<compile_context>
chip_gen: v7x
topology: tpu7x:2x2x1
jax: 0.10.0
libtpu: 0.0.40
codegen_flags: <defaults>
</compile_context>

<pallas_src>
import functools

import numpy as np

import jax
import jax.numpy as jnp
from jax.experimental import pallas as pl
from jax.experimental.pallas import tpu as pltpu


def _round_up(n, m):
    return ((n + m - 1) // m) * m


# ----------------------------------------------------------------------------
# Fused kernel: conv1 -> conv2 -> maxpool -> biLSTM x2 -> fc_latent -> decoder
# ----------------------------------------------------------------------------
def _fused_kernel(*refs, BP, T, HP1, HP2):
    (xpat_ref, sh_ref, pool_ref, w1_ref, b1_ref, w2_ref, b2_ref,
     wih1f_ref, whh1f_ref, bg1f_ref, wih1b_ref, whh1b_ref, bg1b_ref,
     wih2ft_ref, wih2fb_ref, whh2f_ref, bg2f_ref,
     wih2bt_ref, wih2bb_ref, whh2b_ref, bg2b_ref,
     wlatf_ref, wlatb_ref, blat_ref,
     wdec_ref, bdec_ref,
     latent_ref, out_ref,
     g1f_scr, g1b_scr, g2f_scr, g2b_scr, h1f_scr, h1b_scr) = refs

    f32 = jnp.float32

    def leaky(v):                                     # nn.LeakyReLU(0.1)
        return jnp.where(v >= 0.0, v, 0.1 * v)

    def mm(a, b):
        return jnp.dot(a, b, preferred_element_type=f32)

    # ---------------- Encoder: conv1 -> conv2 -> MaxPool2d((1,2)) -------------
    # conv1: im2col patches prebuilt in the wrapper -> single matmul.
    h1 = leaky(mm(xpat_ref[...], w1_ref[...]) + b1_ref[...])        # (W*B, 32)

    # conv2 over width via per-tap shift matmuls (input produced in-kernel).
    n_taps = w2_ref.shape[0]
    acc2 = jnp.zeros((h1.shape[0], w2_ref.shape[2]), f32)
    for k in range(n_taps):
        acc2 = acc2 + mm(mm(sh_ref[k], h1), w2_ref[k])
    h2 = acc2 + b2_ref[...]                                          # pre-activation
    # (1,2) max-pool via 0/1 selection matmuls directly into the batch-padded
    # (t, bp) row layout (pad rows are all-zero); LeakyReLU commutes with max.
    seq = leaky(jnp.maximum(mm(pool_ref[0], h2), mm(pool_ref[1], h2)))   # (T*BP, 64)

    # ---------------- Bidirectional LSTM layers -------------------------------
    def run_bilstm(gxf_ref, gxb_ref, whh_f, whh_b, HP, outf_ref, outb_ref):
        """Both directions, fully unrolled over T.  gx*_ref hold the hoisted
        input projections (+bias) for all timesteps in BP-padded row blocks so
        every per-step slice is sublane-aligned; gate blocks are padded to HP
        (=128) lanes so every gate slice is vreg-aligned."""
        hf = jnp.zeros((BP, HP), f32)
        cf = jnp.zeros((BP, HP), f32)
        hb = jnp.zeros((BP, HP), f32)
        cb = jnp.zeros((BP, HP), f32)
        hb_at_last_time = None
        for s in range(T):
            tf, tb = s, T - 1 - s
            gf = gxf_ref[tf * BP:(tf + 1) * BP, :] + mm(hf, whh_f)
            gb = gxb_ref[tb * BP:(tb + 1) * BP, :] + mm(hb, whh_b)
            i_f = jax.nn.sigmoid(gf[:, 0:HP])
            f_f = jax.nn.sigmoid(gf[:, HP:2 * HP])
            g_f = jnp.tanh(gf[:, 2 * HP:3 * HP])
            o_f = jax.nn.sigmoid(gf[:, 3 * HP:4 * HP])
            cf = f_f * cf + i_f * g_f
            hf = o_f * jnp.tanh(cf)
            i_b = jax.nn.sigmoid(gb[:, 0:HP])
            f_b = jax.nn.sigmoid(gb[:, HP:2 * HP])
            g_b = jnp.tanh(gb[:, 2 * HP:3 * HP])
            o_b = jax.nn.sigmoid(gb[:, 3 * HP:4 * HP])
            cb = f_b * cb + i_b * g_b
            hb = o_b * jnp.tanh(cb)
            if outf_ref is not None:
                outf_ref[tf * BP:(tf + 1) * BP, :] = hf
                outb_ref[tb * BP:(tb + 1) * BP, :] = hb
            if s == 0:
                hb_at_last_time = hb                  # bwd hidden for time T-1
        return hf, hb_at_last_time                    # fwd/bwd hidden at time T-1

    # layer 1 (64 -> 2x64): hoisted input projections over all timesteps.
    g1f_scr[...] = mm(seq, wih1f_ref[...]) + bg1f_ref[...]
    g1b_scr[...] = mm(seq, wih1b_ref[...]) + bg1b_ref[...]
    run_bilstm(g1f_scr, g1b_scr, whh1f_ref[...], whh1b_ref[...], HP1,
               h1f_scr, h1b_scr)

    # layer 2 (2x64 -> 2x32): wih2 is pre-split over the (fwd, bwd) feature
    # halves so the padded layer-1 states are consumed without slicing/concat.
    f_all = h1f_scr[...]
    b_all = h1b_scr[...]
    g2f_scr[...] = mm(f_all, wih2ft_ref[...]) + mm(b_all, wih2fb_ref[...]) + bg2f_ref[...]
    g2b_scr[...] = mm(f_all, wih2bt_ref[...]) + mm(b_all, wih2bb_ref[...]) + bg2b_ref[...]
    h2f_last, h2b_last = run_bilstm(g2f_scr, g2b_scr, whh2f_ref[...], whh2b_ref[...],
                                    HP2, None, None)

    # fc_latent on the last timestep of the bilstm2 output (lane-padded).
    latent = (mm(h2f_last, wlatf_ref[...]) + mm(h2b_last, wlatb_ref[...])
              + blat_ref[...])                        # (BP, LP), valid [:B,:latent_dim]
    latent_ref[...] = latent

    # ---------------- Decoder (purely affine -> pre-folded to one matmul) -----
    out_ref[...] = mm(latent, wdec_ref[...]) + bdec_ref[...]


def _full_spec(shape):
    rank = len(shape)

    def idx(i):
        return (0,) * rank

    return pl.BlockSpec(shape, idx)


def _conv_shift_pool_mats(W, B, T, BP, taps=5):
    """0/1 matrices: width-shift for the conv2 taps (zero padded at the ends)
    and (1,2) max-pool selection that also re-packs rows from (w, b) order into
    batch-padded (t, bp) blocks (bp = BP sublanes, pad rows all-zero)."""
    WB = W * B
    half = taps // 2
    shifts = np.zeros((taps, WB, WB), np.float32)
    for k in range(taps):
        dw = k - half
        for w in range(W):
            ws = w + dw
            if 0 <= ws < W:
                for b in range(B):
                    shifts[k, w * B + b, ws * B + b] = 1.0
    pools = np.zeros((2, T * BP, WB), np.float32)
    for t in range(T):
        for b in range(B):
            pools[0, t * BP + b, (2 * t) * B + b] = 1.0
            pools[1, t * BP + b, (2 * t + 1) * B + b] = 1.0
    return jnp.asarray(shifts), jnp.asarray(pools)


# ----------------------------------------------------------------------------
# Forward pass wrapper (single pallas_call)
# ----------------------------------------------------------------------------
def autoencoder_forward(params, x, *, latent_dim, input_size):
    B, _, _, W = x.shape
    T = W // 2
    BP = _round_up(B, 8)
    HP1 = params["whh1f"].shape[0]
    HP2 = params["whh2f"].shape[0]
    LP = params["wlatf"].shape[1]
    NP2 = params["wdec_tot"].shape[1]      # = 2 * padded input_size
    NP = NP2 // 2

    # conv1 im2col on the tiny input (layout plumbing, done in the wrapper):
    # rows ordered (w, b), columns ordered (channel, tap).
    x2 = x[:, 0].astype(jnp.float32)                                  # (B, 2, W)
    xp = jnp.pad(x2, ((0, 0), (0, 0), (2, 2)))
    pat = jnp.stack([xp[:, :, k:k + W] for k in range(5)], axis=-1)   # (B, 2, W, 5)
    x_pat = jnp.transpose(pat, (2, 0, 1, 3)).reshape(W * B, 10)

    shifts, pools = _conv_shift_pool_mats(W, B, T, BP)

    args = (x_pat, shifts, pools,
            params["w1"], params["b1"], params["w2s"], params["b2"],
            params["wih1f"], params["whh1f"], params["bg1f"],
            params["wih1b"], params["whh1b"], params["bg1b"],
            params["wih2ft"], params["wih2fb"], params["whh2f"], params["bg2f"],
            params["wih2bt"], params["wih2bb"], params["whh2b"], params["bg2b"],
            params["wlatf"], params["wlatb"], params["blat"],
            params["wdec_tot"], params["bdec_tot"])

    kernel = functools.partial(_fused_kernel, BP=BP, T=T, HP1=HP1, HP2=HP2)
    latent_p, out_wide = pl.pallas_call(
        kernel,
        out_shape=(jax.ShapeDtypeStruct((BP, LP), jnp.float32),
                   jax.ShapeDtypeStruct((BP, NP2), jnp.float32)),
        grid=(1,),
        in_specs=[_full_spec(a.shape) for a in args],
        out_specs=(_full_spec((BP, LP)), _full_spec((BP, NP2))),
        scratch_shapes=[
            pltpu.VMEM((T * BP, 4 * HP1), jnp.float32),   # hoisted gates, layer-1 fwd
            pltpu.VMEM((T * BP, 4 * HP1), jnp.float32),   # hoisted gates, layer-1 bwd
            pltpu.VMEM((T * BP, 4 * HP2), jnp.float32),   # hoisted gates, layer-2 fwd
            pltpu.VMEM((T * BP, 4 * HP2), jnp.float32),   # hoisted gates, layer-2 bwd
            pltpu.VMEM((T * BP, HP1), jnp.float32),       # layer-1 fwd hidden states
            pltpu.VMEM((T * BP, HP1), jnp.float32),       # layer-1 bwd hidden states
        ],
        # Single-step grid; with larger batches a leading "parallel" batch axis
        # would let v7x's two TensorCores split the work.
        compiler_params=pltpu.CompilerParams(dimension_semantics=("arbitrary",)),
    )(*args)

    latent = latent_p[:B, :latent_dim]
    output = out_wide[:B].reshape(B, 2, NP)[:, :, :input_size][:, None, :, :]
    return latent, output


# ----------------------------------------------------------------------------
# Parameters: raw (PyTorch-layout) synthetic weights + one-time kernel prep
# ----------------------------------------------------------------------------
def init_raw_params(key, latent_dim, input_size):
    keys = iter(jax.random.split(key, 64))

    def u(shape, fan_in):
        s = 1.0 / float(fan_in) ** 0.5
        return jax.random.uniform(next(keys), shape, jnp.float32, -s, s)

    def lstm_p(din, h):
        # right-multiplication layout; bias = b_ih + b_hh, gate order [i, f, g, o]
        return dict(wih=u((din, 4 * h), h), whh=u((h, 4 * h), h),
                    b=u((4 * h,), h) + u((4 * h,), h))

    return dict(
        conv1_w=u((32, 1, 2, 5), 10), conv1_b=u((32,), 10),
        conv2_w=u((64, 32, 1, 5), 160), conv2_b=u((64,), 160),
        lstm1_f=lstm_p(64, 64), lstm1_b=lstm_p(64, 64),
        lstm2_f=lstm_p(128, 32), lstm2_b=lstm_p(128, 32),
        fc_latent_w=u((64, latent_dim), 64), fc_latent_b=u((latent_dim,), 64),
        fc_dec_w=u((latent_dim, 64), latent_dim), fc_dec_b=u((64,), latent_dim),
        deconv_w=u((64, 32, 1, 5), 64 * 5), deconv_b=u((32,), 64 * 5),
        cf1_w=u((32, 64, 1, 5), 32 * 5), cf1_b=u((64,), 32 * 5),
        cf2_w=u((64, 128, 1, 5), 64 * 5), cf2_b=u((128,), 64 * 5),
        fin_w=u((128, input_size), 128), fin_b=u((input_size,), 128),
    )


def _deconv_w2_matrix(w):
    """ConvTranspose2d(kernel=(1,5), padding=(0,2), stride=1) on a width-2 map
    is exactly a dense map (t, Cin) -> (x, Cout); returns (2*Cin, 2*Cout)."""
    cin, cout = w.shape[0], w.shape[1]
    k = w[:, :, 0, :]
    m = jnp.zeros((2, cin, 2, cout), jnp.float32)
    for t in range(2):
        for xo in range(2):
            kk = xo - t + 2
            if 0 <= kk < 5:
                m = m.at[t, :, xo, :].set(k[:, :, kk])
    return m.reshape(2 * cin, 2 * cout)


def _prep_lstm_dir(wih, whh, b, H, HP):
    """Pad each gate block of a single LSTM direction to HP lanes (zeros)."""
    D = wih.shape[0]
    wih_p = jnp.zeros((D, 4 * HP), jnp.float32)
    whh_p = jnp.zeros((HP, 4 * HP), jnp.float32)
    b_p = jnp.zeros((1, 4 * HP), jnp.float32)
    for g in range(4):
        wih_p = wih_p.at[:, g * HP:g * HP + H].set(wih[:, g * H:(g + 1) * H])
        whh_p = whh_p.at[:H, g * HP:g * HP + H].set(whh[:, g * H:(g + 1) * H])
        b_p = b_p.at[0, g * HP:g * HP + H].set(b[g * H:(g + 1) * H])
    return wih_p, whh_p, b_p


def prepare_params(raw, latent_dim, input_size):
    """One-time weight rearrangement into kernel-ready (padded/dense) form."""
    H1, H2 = 64, 32
    HP1, HP2 = _round_up(H1, 128), _round_up(H2, 128)
    LP = _round_up(latent_dim, 128)
    NP = _round_up(input_size, 128)
    p = {}

    # conv1 flattened for the prebuilt im2col patches (rows ordered (c, k))
    p["w1"] = jnp.transpose(raw["conv1_w"][:, 0], (1, 2, 0)).reshape(10, 32)
    p["b1"] = raw["conv1_b"].reshape(1, -1)
    # conv2 taps stacked per width offset, ready for per-tap matmuls
    p["w2s"] = jnp.transpose(raw["conv2_w"][:, :, 0, :], (2, 1, 0))    # (5, 32, 64)
    p["b2"] = raw["conv2_b"].reshape(1, -1)

    # bilstm1 (input 64, hidden 64)
    p["wih1f"], p["whh1f"], p["bg1f"] = _prep_lstm_dir(**raw["lstm1_f"], H=H1, HP=HP1)
    p["wih1b"], p["whh1b"], p["bg1b"] = _prep_lstm_dir(**raw["lstm1_b"], H=H1, HP=HP1)

    # bilstm2 (input 128 = [fwd|bwd], hidden 32); split wih over feature halves
    def split_wih2(wih, whh, b):
        wih_p, whh_p, b_p = _prep_lstm_dir(wih, whh, b, H2, HP2)
        top = jnp.zeros((HP1, 4 * HP2), jnp.float32).at[:H1].set(wih_p[:H1])
        bot = jnp.zeros((HP1, 4 * HP2), jnp.float32).at[:H1].set(wih_p[H1:2 * H1])
        return top, bot, whh_p, b_p

    p["wih2ft"], p["wih2fb"], p["whh2f"], p["bg2f"] = split_wih2(**raw["lstm2_f"])
    p["wih2bt"], p["wih2bb"], p["whh2b"], p["bg2b"] = split_wih2(**raw["lstm2_b"])

    # fc_latent split over the (fwd, bwd) halves of the bilstm2 output
    wlat = raw["fc_latent_w"]
    p["wlatf"] = jnp.zeros((HP2, LP), jnp.float32).at[:H2, :latent_dim].set(wlat[:H2])
    p["wlatb"] = jnp.zeros((HP2, LP), jnp.float32).at[:H2, :latent_dim].set(wlat[H2:])
    p["blat"] = jnp.zeros((1, LP), jnp.float32).at[0, :latent_dim].set(raw["fc_latent_b"])

    # ---- Decoder: no nonlinearities, so fold the whole chain into one affine
    # map latent(LP) -> output(2*NP).  Upsample((1,2), bilinear) of a 1x1 map
    # just repeats the value; the repeat is folded into the deconv matrix.
    wdec = jnp.zeros((LP, 64), jnp.float32).at[:latent_dim].set(raw["fc_dec_w"])
    bdec = raw["fc_dec_b"]
    dmat = _deconv_w2_matrix(raw["deconv_w"])                          # (2*64, 2*32)
    d1w = dmat[:64, :] + dmat[64:, :]              # fold the 1->2 upsample repeat
    d1b = jnp.tile(raw["deconv_b"], 2)
    d2w = _deconv_w2_matrix(raw["cf1_w"])                              # (64, 128)
    d2b = jnp.tile(raw["cf1_b"], 2)
    d3w = _deconv_w2_matrix(raw["cf2_w"])                              # (128, 256)
    d3b = jnp.tile(raw["cf2_b"], 2)
    # linear_final applied to both width positions via a block-diagonal matrix,
    # output lanes padded to a multiple of 128 for lane-dense stores.
    finw_p = jnp.zeros((128, NP), jnp.float32).at[:, :input_size].set(raw["fin_w"])
    finb_p = jnp.zeros((NP,), jnp.float32).at[:input_size].set(raw["fin_b"])
    finblk = jnp.zeros((2 * 128, 2 * NP), jnp.float32)
    finblk = finblk.at[:128, :NP].set(finw_p).at[128:, NP:].set(finw_p)
    finb2 = jnp.concatenate([finb_p, finb_p])

    w_chain = d1w @ d2w @ d3w @ finblk                                 # (64, 2*NP)
    p["wdec_tot"] = wdec @ w_chain                                     # (LP, 2*NP)
    b_tot = (((bdec @ d1w + d1b) @ d2w + d2b) @ d3w + d3b) @ finblk + finb2
    p["bdec_tot"] = b_tot.reshape(1, -1)
    return p


# ----------------------------------------------------------------------------
# Pure-JAX reference (mirrors the PyTorch module op-for-op), for validation
# ----------------------------------------------------------------------------
def reference_forward(raw, x, latent_dim, input_size):
    B, _, _, W = x.shape
    T = W // 2
    f32 = jnp.float32
    leaky = lambda v: jnp.where(v >= 0, v, 0.1 * v)

    x2 = x[:, 0].astype(f32)
    xp = jnp.pad(x2, ((0, 0), (0, 0), (2, 2)))
    pat1 = jnp.stack([xp[:, :, i:i + W] for i in range(5)], axis=-1)
    pat1 = jnp.transpose(pat1, (0, 2, 1, 3)).reshape(B * W, 10)
    h1 = leaky(pat1 @ raw["conv1_w"].reshape(32, 10).T + raw["conv1_b"]).reshape(B, W, 32)
    hp = jnp.pad(h1, ((0, 0), (2, 2), (0, 0)))
    pat2 = jnp.concatenate([hp[:, i:i + W, :] for i in range(5)], axis=-1)
    w2m = jnp.transpose(raw["conv2_w"][:, :, 0, :], (2, 1, 0)).reshape(160, 64)
    h2 = leaky(pat2.reshape(B * W, 160) @ w2m + raw["conv2_b"]).reshape(B, W, 64)
    seq = jnp.maximum(h2[:, 0:2 * T:2], h2[:, 1:2 * T:2])

    def lstm_dir(xs, wih, whh, bias, H):
        def step(carry, x_t):
            h, c = carry
            g = x_t @ wih + h @ whh + bias
            i = jax.nn.sigmoid(g[:, :H]); f = jax.nn.sigmoid(g[:, H:2 * H])
            gg = jnp.tanh(g[:, 2 * H:3 * H]); o = jax.nn.sigmoid(g[:, 3 * H:])
            c = f * c + i * gg
            h = o * jnp.tanh(c)
            return (h, c), h
        h0 = jnp.zeros((xs.shape[0], H), f32)
        _, hs = jax.lax.scan(step, (h0, h0), jnp.transpose(xs, (1, 0, 2)))
        return jnp.transpose(hs, (1, 0, 2))

    def bilstm(xs, pf, pb, H):
        of = lstm_dir(xs, pf["wih"], pf["whh"], pf["b"], H)
        ob = jnp.flip(lstm_dir(jnp.flip(xs, 1), pb["wih"], pb["whh"], pb["b"], H), 1)
        return jnp.concatenate([of, ob], axis=-1)

    s1 = bilstm(seq, raw["lstm1_f"], raw["lstm1_b"], 64)
    s2 = bilstm(s1, raw["lstm2_f"], raw["lstm2_b"], 32)
    latent = s2[:, -1, :] @ raw["fc_latent_w"] + raw["fc_latent_b"]

    v = latent @ raw["fc_dec_w"] + raw["fc_dec_b"]
    u = jnp.concatenate([v, v], axis=1)
    d = u @ _deconv_w2_matrix(raw["deconv_w"]) + jnp.tile(raw["deconv_b"], 2)
    d = d @ _deconv_w2_matrix(raw["cf1_w"]) + jnp.tile(raw["cf1_b"], 2)
    d = d @ _deconv_w2_matrix(raw["cf2_w"]) + jnp.tile(raw["cf2_b"], 2)
    out = d.reshape(B * 2, 128) @ raw["fin_w"] + raw["fin_b"]
    return latent, out.reshape(B, 2, input_size)[:, None]


# ----------------------------------------------------------------------------
if __name__ == "__main__":
    latent_dim = 32
    input_size = 200           # Autoencoder default
    B, W = 2, 16               # input height must be 2 (conv1 kernel height)

    raw = init_raw_params(jax.random.PRNGKey(12231), latent_dim, input_size)
    params = prepare_params(raw, latent_dim, input_size)
    x = jax.random.normal(jax.random.PRNGKey(0), (B, 1, 2, W), jnp.float32)

    fwd = jax.jit(functools.partial(autoencoder_forward,
                                    latent_dim=latent_dim, input_size=input_size))
    latent, output = fwd(params, x)
    jax.block_until_ready((latent, output))

    assert latent.shape == (B, latent_dim), latent.shape
    assert output.shape == (B, 1, 2, input_size), output.shape
    assert bool(jnp.all(jnp.isfinite(latent))) and bool(jnp.all(jnp.isfinite(output)))

    ref_latent, ref_output = reference_forward(raw, x, latent_dim, input_size)
    assert bool(jnp.allclose(latent, ref_latent, atol=2e-3, rtol=2e-3)), \
        float(jnp.max(jnp.abs(latent - ref_latent)))
    assert bool(jnp.allclose(output, ref_output, atol=2e-3, rtol=2e-3)), \
        float(jnp.max(jnp.abs(output - ref_output)))

    print("KERNEL_OK")
</pallas_src>

<mosaic_0001>
module attributes {stable_mosaic.version = 11 : i64} {
  func.func @_fused_kernel(%arg0: i32, %arg1: memref<32x10xf32, #tpu.memory_space<vmem>>, %arg2: memref<5x32x32xf32, #tpu.memory_space<vmem>>, %arg3: memref<2x64x32xf32, #tpu.memory_space<vmem>>, %arg4: memref<10x32xf32, #tpu.memory_space<vmem>>, %arg5: memref<1x32xf32, #tpu.memory_space<vmem>>, %arg6: memref<5x32x64xf32, #tpu.memory_space<vmem>>, %arg7: memref<1x64xf32, #tpu.memory_space<vmem>>, %arg8: memref<64x512xf32, #tpu.memory_space<vmem>>, %arg9: memref<128x512xf32, #tpu.memory_space<vmem>>, %arg10: memref<1x512xf32, #tpu.memory_space<vmem>>, %arg11: memref<64x512xf32, #tpu.memory_space<vmem>>, %arg12: memref<128x512xf32, #tpu.memory_space<vmem>>, %arg13: memref<1x512xf32, #tpu.memory_space<vmem>>, %arg14: memref<128x512xf32, #tpu.memory_space<vmem>>, %arg15: memref<128x512xf32, #tpu.memory_space<vmem>>, %arg16: memref<128x512xf32, #tpu.memory_space<vmem>>, %arg17: memref<1x512xf32, #tpu.memory_space<vmem>>, %arg18: memref<128x512xf32, #tpu.memory_space<vmem>>, %arg19: memref<128x512xf32, #tpu.memory_space<vmem>>, %arg20: memref<128x512xf32, #tpu.memory_space<vmem>>, %arg21: memref<1x512xf32, #tpu.memory_space<vmem>>, %arg22: memref<128x128xf32, #tpu.memory_space<vmem>>, %arg23: memref<128x128xf32, #tpu.memory_space<vmem>>, %arg24: memref<1x128xf32, #tpu.memory_space<vmem>>, %arg25: memref<128x512xf32, #tpu.memory_space<vmem>>, %arg26: memref<1x512xf32, #tpu.memory_space<vmem>>, %arg27: memref<8x128xf32, #tpu.memory_space<vmem>>, %arg28: memref<8x512xf32, #tpu.memory_space<vmem>>, %arg29: memref<64x512xf32, #tpu.memory_space<vmem>>, %arg30: memref<64x512xf32, #tpu.memory_space<vmem>>, %arg31: memref<64x512xf32, #tpu.memory_space<vmem>>, %arg32: memref<64x512xf32, #tpu.memory_space<vmem>>, %arg33: memref<64x128xf32, #tpu.memory_space<vmem>>, %arg34: memref<64x128xf32, #tpu.memory_space<vmem>>) attributes {dimension_semantics = [#tpu.dimension_semantics<arbitrary>], iteration_bounds = array<i64: 1>, scalar_prefetch = 0 : i64, scratch_operands = 6 : i64, tpu.core_type = #tpu.core_type<tc>, window_params = [{pipeline_mode = #tpu.pipeline_mode<synchronous>, transform_indices = @transform_0, window_bounds = array<i64: 32, 10>}, {pipeline_mode = #tpu.pipeline_mode<synchronous>, transform_indices = @transform_1, window_bounds = array<i64: 5, 32, 32>}, {pipeline_mode = #tpu.pipeline_mode<synchronous>, transform_indices = @transform_2, window_bounds = array<i64: 2, 64, 32>}, {pipeline_mode = #tpu.pipeline_mode<synchronous>, transform_indices = @transform_3, window_bounds = array<i64: 10, 32>}, {pipeline_mode = #tpu.pipeline_mode<synchronous>, transform_indices = @transform_4, window_bounds = array<i64: 1, 32>}, {pipeline_mode = #tpu.pipeline_mode<synchronous>, transform_indices = @transform_5, window_bounds = array<i64: 5, 32, 64>}, {pipeline_mode = #tpu.pipeline_mode<synchronous>, transform_indices = @transform_6, window_bounds = array<i64: 1, 64>}, {pipeline_mode = #tpu.pipeline_mode<synchronous>, transform_indices = @transform_7, window_bounds = array<i64: 64, 512>}, {pipeline_mode = #tpu.pipeline_mode<synchronous>, transform_indices = @transform_8, window_bounds = array<i64: 128, 512>}, {pipeline_mode = #tpu.pipeline_mode<synchronous>, transform_indices = @transform_9, window_bounds = array<i64: 1, 512>}, {pipeline_mode = #tpu.pipeline_mode<synchronous>, transform_indices = @transform_10, window_bounds = array<i64: 64, 512>}, {pipeline_mode = #tpu.pipeline_mode<synchronous>, transform_indices = @transform_11, window_bounds = array<i64: 128, 512>}, {pipeline_mode = #tpu.pipeline_mode<synchronous>, transform_indices = @transform_12, window_bounds = array<i64: 1, 512>}, {pipeline_mode = #tpu.pipeline_mode<synchronous>, transform_indices = @transform_13, window_bounds = array<i64: 128, 512>}, {pipeline_mode = #tpu.pipeline_mode<synchronous>, transform_indices = @transform_14, window_bounds = array<i64: 128, 512>}, {pipeline_mode = #tpu.pipeline_mode<synchronous>, transform_indices = @transform_15, window_bounds = array<i64: 128, 512>}, {pipeline_mode = #tpu.pipeline_mode<synchronous>, transform_indices = @transform_16, window_bounds = array<i64: 1, 512>}, {pipeline_mode = #tpu.pipeline_mode<synchronous>, transform_indices = @transform_17, window_bounds = array<i64: 128, 512>}, {pipeline_mode = #tpu.pipeline_mode<synchronous>, transform_indices = @transform_18, window_bounds = array<i64: 128, 512>}, {pipeline_mode = #tpu.pipeline_mode<synchronous>, transform_indices = @transform_19, window_bounds = array<i64: 128, 512>}, {pipeline_mode = #tpu.pipeline_mode<synchronous>, transform_indices = @transform_20, window_bounds = array<i64: 1, 512>}, {pipeline_mode = #tpu.pipeline_mode<synchronous>, transform_indices = @transform_21, window_bounds = array<i64: 128, 128>}, {pipeline_mode = #tpu.pipeline_mode<synchronous>, transform_indices = @transform_22, window_bounds = array<i64: 128, 128>}, {pipeline_mode = #tpu.pipeline_mode<synchronous>, transform_indices = @transform_23, window_bounds = array<i64: 1, 128>}, {pipeline_mode = #tpu.pipeline_mode<synchronous>, transform_indices = @transform_24, window_bounds = array<i64: 128, 512>}, {pipeline_mode = #tpu.pipeline_mode<synchronous>, transform_indices = @transform_25, window_bounds = array<i64: 1, 512>}, {pipeline_mode = #tpu.pipeline_mode<synchronous>, transform_indices = @transform_26, window_bounds = array<i64: 8, 128>}, {pipeline_mode = #tpu.pipeline_mode<synchronous>, transform_indices = @transform_27, window_bounds = array<i64: 8, 512>}]} {
    %c0 = arith.constant 0 : index
    %c0_0 = arith.constant 0 : index
    %0 = vector.load %arg1[%c0, %c0_0] : memref<32x10xf32, #tpu.memory_space<vmem>>, vector<32x10xf32>
    %c0_1 = arith.constant 0 : index
    %c0_2 = arith.constant 0 : index
    %1 = vector.load %arg4[%c0_1, %c0_2] : memref<10x32xf32, #tpu.memory_space<vmem>>, vector<10x32xf32>
    %cst = arith.constant dense<0.000000e+00> : vector<32x32xf32>
    %2 = tpu.matmul %0, %1, %cst {dimension_numbers = #tpu.dot_dimension_numbers<[1], [0], [0], [1], [0, 0, 1, 1], [], []>} : vector<32x10xf32>, vector<10x32xf32>, vector<32x32xf32> -> vector<32x32xf32>
    %c0_3 = arith.constant 0 : index
    %c0_4 = arith.constant 0 : index
    %3 = vector.load %arg5[%c0_3, %c0_4] : memref<1x32xf32, #tpu.memory_space<vmem>>, vector<1x32xf32>
    %4 = vector.broadcast %3 : vector<1x32xf32> to vector<32x32xf32>
    %5 = arith.addf %2, %4 : vector<32x32xf32>
    %cst_5 = arith.constant 0.000000e+00 : f32
    %6 = vector.broadcast %cst_5 : f32 to vector<32x32xf32>
    %7 = arith.cmpf oge, %5, %6 : vector<32x32xf32>
    %cst_6 = arith.constant 1.000000e-01 : f32
    %8 = vector.broadcast %cst_6 : f32 to vector<32x32xf32>
    %9 = arith.mulf %8, %5 : vector<32x32xf32>
    %10 = arith.select %7, %5, %9 : vector<32x32xi1>, vector<32x32xf32>
    %cst_7 = arith.constant 0.000000e+00 : f32
    %11 = vector.broadcast %cst_7 : f32 to vector<32x64xf32>
    %c0_8 = arith.constant 0 : index
    %c0_9 = arith.constant 0 : index
    %c0_10 = arith.constant 0 : index
    %12 = vector.load %arg2[%c0_8, %c0_9, %c0_10] : memref<5x32x32xf32, #tpu.memory_space<vmem>>, vector<1x32x32xf32>
    %13 = vector.shape_cast %12 : vector<1x32x32xf32> to vector<32x32xf32>
    %cst_11 = arith.constant dense<0.000000e+00> : vector<32x32xf32>
    %14 = tpu.matmul %13, %10, %cst_11 {dimension_numbers = #tpu.dot_dimension_numbers<[1], [0], [0], [1], [0, 0, 1, 1], [], []>} : vector<32x32xf32>, vector<32x32xf32>, vector<32x32xf32> -> vector<32x32xf32>
    %c0_12 = arith.constant 0 : index
    %c0_13 = arith.constant 0 : index
    %c0_14 = arith.constant 0 : index
    %15 = vector.load %arg6[%c0_12, %c0_13, %c0_14] : memref<5x32x64xf32, #tpu.memory_space<vmem>>, vector<1x32x64xf32>
    %16 = vector.shape_cast %15 : vector<1x32x64xf32> to vector<32x64xf32>
    %cst_15 = arith.constant dense<0.000000e+00> : vector<32x64xf32>
    %17 = tpu.matmul %14, %16, %cst_15 {dimension_numbers = #tpu.dot_dimension_numbers<[1], [0], [0], [1], [0, 0, 1, 1], [], []>} : vector<32x32xf32>, vector<32x64xf32>, vector<32x64xf32> -> vector<32x64xf32>
    %18 = arith.addf %11, %17 : vector<32x64xf32>
    %c1 = arith.constant 1 : index
    %c0_16 = arith.constant 0 : index
    %c0_17 = arith.constant 0 : index
    %19 = vector.load %arg2[%c1, %c0_16, %c0_17] : memref<5x32x32xf32, #tpu.memory_space<vmem>>, vector<1x32x32xf32>
    %20 = vector.shape_cast %19 : vector<1x32x32xf32> to vector<32x32xf32>
    %cst_18 = arith.constant dense<0.000000e+00> : vector<32x32xf32>
    %21 = tpu.matmul %20, %10, %cst_18 {dimension_numbers = #tpu.dot_dimension_numbers<[1], [0], [0], [1], [0, 0, 1, 1], [], []>} : vector<32x32xf32>, vector<32x32xf32>, vector<32x32xf32> -> vector<32x32xf32>
    %c1_19 = arith.constant 1 : index
    %c0_20 = arith.constant 0 : index
    %c0_21 = arith.constant 0 : index
    %22 = vector.load %arg6[%c1_19, %c0_20, %c0_21] : memref<5x32x64xf32, #tpu.memory_space<vmem>>, vector<1x32x64xf32>
    %23 = vector.shape_cast %22 : vector<1x32x64xf32> to vector<32x64xf32>
    %cst_22 = arith.constant dense<0.000000e+00> : vector<32x64xf32>
    %24 = tpu.matmul %21, %23, %cst_22 {dimension_numbers = #tpu.dot_dimension_numbers<[1], [0], [0], [1], [0, 0, 1, 1], [], []>} : vector<32x32xf32>, vector<32x64xf32>, vector<32x64xf32> -> vector<32x64xf32>
    %25 = arith.addf %18, %24 : vector<32x64xf32>
    %c2 = arith.constant 2 : index
    %c0_23 = arith.constant 0 : index
    %c0_24 = arith.constant 0 : index
    %26 = vector.load %arg2[%c2, %c0_23, %c0_24] : memref<5x32x32xf32, #tpu.memory_space<vmem>>, vector<1x32x32xf32>
    %27 = vector.shape_cast %26 : vector<1x32x32xf32> to vector<32x32xf32>
    %cst_25 = arith.constant dense<0.000000e+00> : vector<32x32xf32>
    %28 = tpu.matmul %27, %10, %cst_25 {dimension_numbers = #tpu.dot_dimension_numbers<[1], [0], [0], [1], [0, 0, 1, 1], [], []>} : vector<32x32xf32>, vector<32x32xf32>, vector<32x32xf32> -> vector<32x32xf32>
    %c2_26 = arith.constant 2 : index
    %c0_27 = arith.constant 0 : index
    %c0_28 = arith.constant 0 : index
    %29 = vector.load %arg6[%c2_26, %c0_27, %c0_28] : memref<5x32x64xf32, #tpu.memory_space<vmem>>, vector<1x32x64xf32>
    %30 = vector.shape_cast %29 : vector<1x32x64xf32> to vector<32x64xf32>
    %cst_29 = arith.constant dense<0.000000e+00> : vector<32x64xf32>
    %31 = tpu.matmul %28, %30, %cst_29 {dimension_numbers = #tpu.dot_dimension_numbers<[1], [0], [0], [1], [0, 0, 1, 1], [], []>} : vector<32x32xf32>, vector<32x64xf32>, vector<32x64xf32> -> vector<32x64xf32>
    %32 = arith.addf %25, %31 : vector<32x64xf32>
    %c3 = arith.constant 3 : index
    %c0_30 = arith.constant 0 : index
    %c0_31 = arith.constant 0 : index
    %33 = vector.load %arg2[%c3, %c0_30, %c0_31] : memref<5x32x32xf32, #tpu.memory_space<vmem>>, vector<1x32x32xf32>
    %34 = vector.shape_cast %33 : vector<1x32x32xf32> to vector<32x32xf32>
    %cst_32 = arith.constant dense<0.000000e+00> : vector<32x32xf32>
    %35 = tpu.matmul %34, %10, %cst_32 {dimension_numbers = #tpu.dot_dimension_numbers<[1], [0], [0], [1], [0, 0, 1, 1], [], []>} : vector<32x32xf32>, vector<32x32xf32>, vector<32x32xf32> -> vector<32x32xf32>
    %c3_33 = arith.constant 3 : index
    %c0_34 = arith.constant 0 : index
    %c0_35 = arith.constant 0 : index
    %36 = vector.load %arg6[%c3_33, %c0_34, %c0_35] : memref<5x32x64xf32, #tpu.memory_space<vmem>>, vector<1x32x64xf32>
    %37 = vector.shape_cast %36 : vector<1x32x64xf32> to vector<32x64xf32>
    %cst_36 = arith.constant dense<0.000000e+00> : vector<32x64xf32>
    %38 = tpu.matmul %35, %37, %cst_36 {dimension_numbers = #tpu.dot_dimension_numbers<[1], [0], [0], [1], [0, 0, 1, 1], [], []>} : vector<32x32xf32>, vector<32x64xf32>, vector<32x64xf32> -> vector<32x64xf32>
    %39 = arith.addf %32, %38 : vector<32x64xf32>
    %c4 = arith.constant 4 : index
    %c0_37 = arith.constant 0 : index
    %c0_38 = arith.constant 0 : index
    %40 = vector.load %arg2[%c4, %c0_37, %c0_38] : memref<5x32x32xf32, #tpu.memory_space<vmem>>, vector<1x32x32xf32>
    %41 = vector.shape_cast %40 : vector<1x32x32xf32> to vector<32x32xf32>
    %cst_39 = arith.constant dense<0.000000e+00> : vector<32x32xf32>
    %42 = tpu.matmul %41, %10, %cst_39 {dimension_numbers = #tpu.dot_dimension_numbers<[1], [0], [0], [1], [0, 0, 1, 1], [], []>} : vector<32x32xf32>, vector<32x32xf32>, vector<32x32xf32> -> vector<32x32xf32>
    %c4_40 = arith.constant 4 : index
    %c0_41 = arith.constant 0 : index
    %c0_42 = arith.constant 0 : index
    %43 = vector.load %arg6[%c4_40, %c0_41, %c0_42] : memref<5x32x64xf32, #tpu.memory_space<vmem>>, vector<1x32x64xf32>
    %44 = vector.shape_cast %43 : vector<1x32x64xf32> to vector<32x64xf32>
    %cst_43 = arith.constant dense<0.000000e+00> : vector<32x64xf32>
    %45 = tpu.matmul %42, %44, %cst_43 {dimension_numbers = #tpu.dot_dimension_numbers<[1], [0], [0], [1], [0, 0, 1, 1], [], []>} : vector<32x32xf32>, vector<32x64xf32>, vector<32x64xf32> -> vector<32x64xf32>
    %46 = arith.addf %39, %45 : vector<32x64xf32>
    %c0_44 = arith.constant 0 : index
    %c0_45 = arith.constant 0 : index
    %47 = vector.load %arg7[%c0_44, %c0_45] : memref<1x64xf32, #tpu.memory_space<vmem>>, vector<1x64xf32>
    %48 = vector.broadcast %47 : vector<1x64xf32> to vector<32x64xf32>
    %49 = arith.addf %46, %48 : vector<32x64xf32>
    %c0_46 = arith.constant 0 : index
    %c0_47 = arith.constant 0 : index
    %c0_48 = arith.constant 0 : index
    %50 = vector.load %arg3[%c0_46, %c0_47, %c0_48] : memref<2x64x32xf32, #tpu.memory_space<vmem>>, vector<1x64x32xf32>
    %51 = vector.shape_cast %50 : vector<1x64x32xf32> to vector<64x32xf32>
    %cst_49 = arith.constant dense<0.000000e+00> : vector<64x64xf32>
    %52 = tpu.matmul %51, %49, %cst_49 {dimension_numbers = #tpu.dot_dimension_numbers<[1], [0], [0], [1], [0, 0, 1, 1], [], []>} : vector<64x32xf32>, vector<32x64xf32>, vector<64x64xf32> -> vector<64x64xf32>
    %c1_50 = arith.constant 1 : index
    %c0_51 = arith.constant 0 : index
    %c0_52 = arith.constant 0 : index
    %53 = vector.load %arg3[%c1_50, %c0_51, %c0_52] : memref<2x64x32xf32, #tpu.memory_space<vmem>>, vector<1x64x32xf32>
    %54 = vector.shape_cast %53 : vector<1x64x32xf32> to vector<64x32xf32>
    %cst_53 = arith.constant dense<0.000000e+00> : vector<64x64xf32>
    %55 = tpu.matmul %54, %49, %cst_53 {dimension_numbers = #tpu.dot_dimension_numbers<[1], [0], [0], [1], [0, 0, 1, 1], [], []>} : vector<64x32xf32>, vector<32x64xf32>, vector<64x64xf32> -> vector<64x64xf32>
    %56 = arith.maximumf %52, %55 : vector<64x64xf32>
    %cst_54 = arith.constant 0.000000e+00 : f32
    %57 = vector.broadcast %cst_54 : f32 to vector<64x64xf32>
    %58 = arith.cmpf oge, %56, %57 : vector<64x64xf32>
    %cst_55 = arith.constant 1.000000e-01 : f32
    %59 = vector.broadcast %cst_55 : f32 to vector<64x64xf32>
    %60 = arith.mulf %59, %56 : vector<64x64xf32>
    %61 = arith.select %58, %56, %60 : vector<64x64xi1>, vector<64x64xf32>
    %c0_56 = arith.constant 0 : index
    %c0_57 = arith.constant 0 : index
    %62 = vector.load %arg8[%c0_56, %c0_57] : memref<64x512xf32, #tpu.memory_space<vmem>>, vector<64x512xf32>
    %cst_58 = arith.constant dense<0.000000e+00> : vector<64x512xf32>
    %63 = tpu.matmul %61, %62, %cst_58 {dimension_numbers = #tpu.dot_dimension_numbers<[1], [0], [0], [1], [0, 0, 1, 1], [], []>} : vector<64x64xf32>, vector<64x512xf32>, vector<64x512xf32> -> vector<64x512xf32>
    %c0_59 = arith.constant 0 : index
    %c0_60 = arith.constant 0 : index
    %64 = vector.load %arg10[%c0_59, %c0_60] : memref<1x512xf32, #tpu.memory_space<vmem>>, vector<1x512xf32>
    %65 = vector.broadcast %64 : vector<1x512xf32> to vector<64x512xf32>
    %66 = arith.addf %63, %65 : vector<64x512xf32>
    %c0_61 = arith.constant 0 : index
    %c0_62 = arith.constant 0 : index
    %67 = vector.load %arg29[%c0_61, %c0_62] : memref<64x512xf32, #tpu.memory_space<vmem>>, vector<64x512xf32>
    tpu.vector_store %arg29[%c0_61, %c0_62], %66 {strides = array<i32>} : memref<64x512xf32, #tpu.memory_space<vmem>>, vector<64x512xf32>,
    %c0_63 = arith.constant 0 : index
    %c0_64 = arith.constant 0 : index
    %68 = vector.load %arg11[%c0_63, %c0_64] : memref<64x512xf32, #tpu.memory_space<vmem>>, vector<64x512xf32>
    %cst_65 = arith.constant dense<0.000000e+00> : vector<64x512xf32>
    %69 = tpu.matmul %61, %68, %cst_65 {dimension_numbers = #tpu.dot_dimension_numbers<[1], [0], [0], [1], [0, 0, 1, 1], [], []>} : vector<64x64xf32>, vector<64x512xf32>, vector<64x512xf32> -> vector<64x512xf32>
    %c0_66 = arith.constant 0 : index
    %c0_67 = arith.constant 0 : index
    %70 = vector.load %arg13[%c0_66, %c0_67] : memref<1x512xf32, #tpu.memory_space<vmem>>, vector<1x512xf32>
    %71 = vector.broadcast %70 : vector<1x512xf32> to vector<64x512xf32>
    %72 = arith.addf %69, %71 : vector<64x512xf32>
    %c0_68 = arith.constant 0 : index
    %c0_69 = arith.constant 0 : index
    %73 = vector.load %arg30[%c0_68, %c0_69] : memref<64x512xf32, #tpu.memory_space<vmem>>, vector<64x512xf32>
    tpu.vector_store %arg30[%c0_68, %c0_69], %72 {strides = array<i32>} : memref<64x512xf32, #tpu.memory_space<vmem>>, vector<64x512xf32>,
    %c0_70 = arith.constant 0 : index
    %c0_71 = arith.constant 0 : index
    %74 = vector.load %arg9[%c0_70, %c0_71] : memref<128x512xf32, #tpu.memory_space<vmem>>, vector<128x512xf32>
    %c0_72 = arith.constant 0 : index
    %c0_73 = arith.constant 0 : index
    %75 = vector.load %arg12[%c0_72, %c0_73] : memref<128x512xf32, #tpu.memory_space<vmem>>, vector<128x512xf32>
    %cst_74 = arith.constant 0.000000e+00 : f32
    %76 = vector.broadcast %cst_74 : f32 to vector<8x128xf32>
    %cst_75 = arith.constant 0.000000e+00 : f32
    %77 = vector.broadcast %cst_75 : f32 to vector<8x128xf32>
    %cst_76 = arith.constant 0.000000e+00 : f32
    %78 = vector.broadcast %cst_76 : f32 to vector<8x128xf32>
    %cst_77 = arith.constant 0.000000e+00 : f32
    %79 = vector.broadcast %cst_77 : f32 to vector<8x128xf32>
    %c0_78 = arith.constant 0 : index
    %c0_79 = arith.constant 0 : index
    %80 = vector.load %arg29[%c0_78, %c0_79] : memref<64x512xf32, #tpu.memory_space<vmem>>, vector<8x512xf32>
    %cst_80 = arith.constant dense<0.000000e+00> : vector<8x512xf32>
    %81 = tpu.matmul %76, %74, %cst_80 {dimension_numbers = #tpu.dot_dimension_numbers<[1], [0], [0], [1], [0, 0, 1, 1], [], []>} : vector<8x128xf32>, vector<128x512xf32>, vector<8x512xf32> -> vector<8x512xf32>
    %82 = arith.addf %80, %81 : vector<8x512xf32>
    %c56 = arith.constant 56 : index
    %c0_81 = arith.constant 0 : index
    %83 = vector.load %arg30[%c56, %c0_81] : memref<64x512xf32, #tpu.memory_space<vmem>>, vector<8x512xf32>
    %cst_82 = arith.constant dense<0.000000e+00> : vector<8x512xf32>
    %84 = tpu.matmul %78, %75, %cst_82 {dimension_numbers = #tpu.dot_dimension_numbers<[1], [0], [0], [1], [0, 0, 1, 1], [], []>} : vector<8x128xf32>, vector<128x512xf32>, vector<8x512xf32> -> vector<8x512xf32>
    %85 = arith.addf %83, %84 : vector<8x512xf32>
    %86 = vector.extract_strided_slice %82 {offsets = [0, 0], sizes = [8, 128], strides = [1, 1]} : vector<8x512xf32> to vector<8x128xf32>
    %87 = arith.negf %86 : vector<8x128xf32>
    %88 = math.exp %87 : vector<8x128xf32>
    %cst_83 = arith.constant 1.000000e+00 : f32
    %89 = vector.broadcast %cst_83 : f32 to vector<8x128xf32>
    %90 = arith.addf %89, %88 : vector<8x128xf32>
    %91 = arith.divf %89, %90 : vector<8x128xf32>
    %92 = vector.extract_strided_slice %82 {offsets = [0, 128], sizes = [8, 128], strides = [1, 1]} : vector<8x512xf32> to vector<8x128xf32>
    %93 = arith.negf %92 : vector<8x128xf32>
    %94 = math.exp %93 : vector<8x128xf32>
    %cst_84 = arith.constant 1.000000e+00 : f32
    %95 = vector.broadcast %cst_84 : f32 to vector<8x128xf32>
    %96 = arith.addf %95, %94 : vector<8x128xf32>
    %97 = arith.divf %95, %96 : vector<8x128xf32>
    %98 = vector.extract_strided_slice %82 {offsets = [0, 256], sizes = [8, 128], strides = [1, 1]} : vector<8x512xf32> to vector<8x128xf32>
    %99 = math.tanh %98 : vector<8x128xf32>
    %100 = vector.extract_strided_slice %82 {offsets = [0, 384], sizes = [8, 128], strides = [1, 1]} : vector<8x512xf32> to vector<8x128xf32>
    %101 = arith.negf %100 : vector<8x128xf32>
    %102 = math.exp %101 : vector<8x128xf32>
    %cst_85 = arith.constant 1.000000e+00 : f32
    %103 = vector.broadcast %cst_85 : f32 to vector<8x128xf32>
    %104 = arith.addf %103, %102 : vector<8x128xf32>
    %105 = arith.divf %103, %104 : vector<8x128xf32>
    %106 = arith.mulf %97, %77 : vector<8x128xf32>
    %107 = arith.mulf %91, %99 : vector<8x128xf32>
    %108 = arith.addf %106, %107 : vector<8x128xf32>
    %109 = math.tanh %108 : vector<8x128xf32>
    %110 = arith.mulf %105, %109 : vector<8x128xf32>
    %111 = vector.extract_strided_slice %85 {offsets = [0, 0], sizes = [8, 128], strides = [1, 1]} : vector<8x512xf32> to vector<8x128xf32>
    %112 = arith.negf %111 : vector<8x128xf32>
    %113 = math.exp %112 : vector<8x128xf32>
    %cst_86 = arith.constant 1.000000e+00 : f32
    %114 = vector.broadcast %cst_86 : f32 to vector<8x128xf32>
    %115 = arith.addf %114, %113 : vector<8x128xf32>
    %116 = arith.divf %114, %115 : vector<8x128xf32>
    %117 = vector.extract_strided_slice %85 {offsets = [0, 128], sizes = [8, 128], strides = [1, 1]} : vector<8x512xf32> to vector<8x128xf32>
    %118 = arith.negf %117 : vector<8x128xf32>
    %119 = math.exp %118 : vector<8x128xf32>
    %cst_87 = arith.constant 1.000000e+00 : f32
    %120 = vector.broadcast %cst_87 : f32 to vector<8x128xf32>
    %121 = arith.addf %120, %119 : vector<8x128xf32>
    %122 = arith.divf %120, %121 : vector<8x128xf32>
    %123 = vector.extract_strided_slice %85 {offsets = [0, 256], sizes = [8, 128], strides = [1, 1]} : vector<8x512xf32> to vector<8x128xf32>
    %124 = math.tanh %123 : vector<8x128xf32>
    %125 = vector.extract_strided_slice %85 {offsets = [0, 384], sizes = [8, 128], strides = [1, 1]} : vector<8x512xf32> to vector<8x128xf32>
    %126 = arith.negf %125 : vector<8x128xf32>
    %127 = math.exp %126 : vector<8x128xf32>
    %cst_88 = arith.constant 1.000000e+00 : f32
    %128 = vector.broadcast %cst_88 : f32 to vector<8x128xf32>
    %129 = arith.addf %128, %127 : vector<8x128xf32>
    %130 = arith.divf %128, %129 : vector<8x128xf32>
    %131 = arith.mulf %122, %79 : vector<8x128xf32>
    %132 = arith.mulf %116, %124 : vector<8x128xf32>
    %133 = arith.addf %131, %132 : vector<8x128xf32>
    %134 = math.tanh %133 : vector<8x128xf32>
    %135 = arith.mulf %130, %134 : vector<8x128xf32>
    %c0_89 = arith.constant 0 : index
    %c0_90 = arith.constant 0 : index
    %136 = vector.load %arg33[%c0_89, %c0_90] : memref<64x128xf32, #tpu.memory_space<vmem>>, vector<8x128xf32>
    tpu.vector_store %arg33[%c0_89, %c0_90], %110 {strides = array<i32>} : memref<64x128xf32, #tpu.memory_space<vmem>>, vector<8x128xf32>,
    %c56_91 = arith.constant 56 : index
    %c0_92 = arith.constant 0 : index
    %137 = vector.load %arg34[%c56_91, %c0_92] : memref<64x128xf32, #tpu.memory_space<vmem>>, vector<8x128xf32>
    tpu.vector_store %arg34[%c56_91, %c0_92], %135 {strides = array<i32>} : memref<64x128xf32, #tpu.memory_space<vmem>>, vector<8x128xf32>,
    %c8 = arith.constant 8 : index
    %c0_93 = arith.constant 0 : index
    %138 = vector.load %arg29[%c8, %c0_93] : memref<64x512xf32, #tpu.memory_space<vmem>>, vector<8x512xf32>
    %cst_94 = arith.constant dense<0.000000e+00> : vector<8x512xf32>
    %139 = tpu.matmul %110, %74, %cst_94 {dimension_numbers = #tpu.dot_dimension_numbers<[1], [0], [0], [1], [0, 0, 1, 1], [], []>} : vector<8x128xf32>, vector<128x512xf32>, vector<8x512xf32> -> vector<8x512xf32>
    %140 = arith.addf %138, %139 : vector<8x512xf32>
    %c48 = arith.constant 48 : index
    %c0_95 = arith.constant 0 : index
    %141 = vector.load %arg30[%c48, %c0_95] : memref<64x512xf32, #tpu.memory_space<vmem>>, vector<8x512xf32>
    %cst_96 = arith.constant dense<0.000000e+00> : vector<8x512xf32>
    %142 = tpu.matmul %135, %75, %cst_96 {dimension_numbers = #tpu.dot_dimension_numbers<[1], [0], [0], [1], [0, 0, 1, 1], [], []>} : vector<8x128xf32>, vector<128x512xf32>, vector<8x512xf32> -> vector<8x512xf32>
    %143 = arith.addf %141, %142 : vector<8x512xf32>
    %144 = vector.extract_strided_slice %140 {offsets = [0, 0], sizes = [8, 128], strides = [1, 1]} : vector<8x512xf32> to vector<8x128xf32>
    %145 = arith.negf %144 : vector<8x128xf32>
    %146 = math.exp %145 : vector<8x128xf32>
    %cst_97 = arith.constant 1.000000e+00 : f32
    %147 = vector.broadcast %cst_97 : f32 to vector<8x128xf32>
    %148 = arith.addf %147, %146 : vector<8x128xf32>
    %149 = arith.divf %147, %148 : vector<8x128xf32>
    %150 = vector.extract_strided_slice %140 {offsets = [0, 128], sizes = [8, 128], strides = [1, 1]} : vector<8x512xf32> to vector<8x128xf32>
    %151 = arith.negf %150 : vector<8x128xf32>
    %152 = math.exp %151 : vector<8x128xf32>
    %cst_98 = arith.constant 1.000000e+00 : f32
    %153 = vector.broadcast %cst_98 : f32 to vector<8x128xf32>
    %154 = arith.addf %153, %152 : vector<8x128xf32>
    %155 = arith.divf %153, %154 : vector<8x128xf32>
    %156 = vector.extract_strided_slice %140 {offsets = [0, 256], sizes = [8, 128], strides = [1, 1]} : vector<8x512xf32> to vector<8x128xf32>
    %157 = math.tanh %156 : vector<8x128xf32>
    %158 = vector.extract_strided_slice %140 {offsets = [0, 384], sizes = [8, 128], strides = [1, 1]} : vector<8x512xf32> to vector<8x128xf32>
    %159 = arith.negf %158 : vector<8x128xf32>
    %160 = math.exp %159 : vector<8x128xf32>
    %cst_99 = arith.constant 1.000000e+00 : f32
    %161 = vector.broadcast %cst_99 : f32 to vector<8x128xf32>
    %162 = arith.addf %161, %160 : vector<8x128xf32>
    %163 = arith.divf %161, %162 : vector<8x128xf32>
    %164 = arith.mulf %155, %108 : vector<8x128xf32>
    %165 = arith.mulf %149, %157 : vector<8x128xf32>
    %166 = arith.addf %164, %165 : vector<8x128xf32>
    %167 = math.tanh %166 : vector<8x128xf32>
    %168 = arith.mulf %163, %167 : vector<8x128xf32>
    %169 = vector.extract_strided_slice %143 {offsets = [0, 0], sizes = [8, 128], strides = [1, 1]} : vector<8x512xf32> to vector<8x128xf32>
    %170 = arith.negf %169 : vector<8x128xf32>
    %171 = math.exp %170 : vector<8x128xf32>
    %cst_100 = arith.constant 1.000000e+00 : f32
    %172 = vector.broadcast %cst_100 : f32 to vector<8x128xf32>
    %173 = arith.addf %172, %171 : vector<8x128xf32>
    %174 = arith.divf %172, %173 : vector<8x128xf32>
    %175 = vector.extract_strided_slice %143 {offsets = [0, 128], sizes = [8, 128], strides = [1, 1]} : vector<8x512xf32> to vector<8x128xf32>
    %176 = arith.negf %175 : vector<8x128xf32>
    %177 = math.exp %176 : vector<8x128xf32>
    %cst_101 = arith.constant 1.000000e+00 : f32
    %178 = vector.broadcast %cst_101 : f32 to vector<8x128xf32>
    %179 = arith.addf %178, %177 : vector<8x128xf32>
    %180 = arith.divf %178, %179 : vector<8x128xf32>
    %181 = vector.extract_strided_slice %143 {offsets = [0, 256], sizes = [8, 128], strides = [1, 1]} : vector<8x512xf32> to vector<8x128xf32>
    %182 = math.tanh %181 : vector<8x128xf32>
    %183 = vector.extract_strided_slice %143 {offsets = [0, 384], sizes = [8, 128], strides = [1, 1]} : vector<8x512xf32> to vector<8x128xf32>
    %184 = arith.negf %183 : vector<8x128xf32>
    %185 = math.exp %184 : vector<8x128xf32>
    %cst_102 = arith.constant 1.000000e+00 : f32
    %186 = vector.broadcast %cst_102 : f32 to vector<8x128xf32>
    %187 = arith.addf %186, %185 : vector<8x128xf32>
    %188 = arith.divf %186, %187 : vector<8x128xf32>
    %189 = arith.mulf %180, %133 : vector<8x128xf32>
    %190 = arith.mulf %174, %182 : vector<8x128xf32>
    %191 = arith.addf %189, %190 : vector<8x128xf32>
    %192 = math.tanh %191 : vector<8x128xf32>
    %193 = arith.mulf %188, %192 : vector<8x128xf32>
    %c8_103 = arith.constant 8 : index
    %c0_104 = arith.constant 0 : index
    %194 = vector.load %arg33[%c8_103, %c0_104] : memref<64x128xf32, #tpu.memory_space<vmem>>, vector<8x128xf32>
    tpu.vector_store %arg33[%c8_103, %c0_104], %168 {strides = array<i32>} : memref<64x128xf32, #tpu.memory_space<vmem>>, vector<8x128xf32>,
    %c48_105 = arith.constant 48 : index
    %c0_106 = arith.constant 0 : index
    %195 = vector.load %arg34[%c48_105, %c0_106] : memref<64x128xf32, #tpu.memory_space<vmem>>, vector<8x128xf32>
    tpu.vector_store %arg34[%c48_105, %c0_106], %193 {strides = array<i32>} : memref<64x128xf32, #tpu.memory_space<vmem>>, vector<8x128xf32>,
    %c16 = arith.constant 16 : index
    %c0_107 = arith.constant 0 : index
    %196 = vector.load %arg29[%c16, %c0_107] : memref<64x512xf32, #tpu.memory_space<vmem>>, vector<8x512xf32>
    %cst_108 = arith.constant dense<0.000000e+00> : vector<8x512xf32>
    %197 = tpu.matmul %168, %74, %cst_108 {dimension_numbers = #tpu.dot_dimension_numbers<[1], [0], [0], [1], [0, 0, 1, 1], [], []>} : vector<8x128xf32>, vector<128x512xf32>, vector<8x512xf32> -> vector<8x512xf32>
    %198 = arith.addf %196, %197 : vector<8x512xf32>
    %c40 = arith.constant 40 : index
    %c0_109 = arith.constant 0 : index
    %199 = vector.load %arg30[%c40, %c0_109] : memref<64x512xf32, #tpu.memory_space<vmem>>, vector<8x512xf32>
    %cst_110 = arith.constant dense<0.000000e+00> : vector<8x512xf32>
    %200 = tpu.matmul %193, %75, %cst_110 {dimension_numbers = #tpu.dot_dimension_numbers<[1], [0], [0], [1], [0, 0, 1, 1], [], []>} : vector<8x128xf32>, vector<128x512xf32>, vector<8x512xf32> -> vector<8x512xf32>
    %201 = arith.addf %199, %200 : vector<8x512xf32>
    %202 = vector.extract_strided_slice %198 {offsets = [0, 0], sizes = [8, 128], strides = [1, 1]} : vector<8x512xf32> to vector<8x128xf32>
    %203 = arith.negf %202 : vector<8x128xf32>
    %204 = math.exp %203 : vector<8x128xf32>
    %cst_111 = arith.constant 1.000000e+00 : f32
    %205 = vector.broadcast %cst_111 : f32 to vector<8x128xf32>
    %206 = arith.addf %205, %204 : vector<8x128xf32>
    %207 = arith.divf %205, %206 : vector<8x128xf32>
    %208 = vector.extract_strided_slice %198 {offsets = [0, 128], sizes = [8, 128], strides = [1, 1]} : vector<8x512xf32> to vector<8x128xf32>
    %209 = arith.negf %208 : vector<8x128xf32>
    %210 = math.exp %209 : vector<8x128xf32>
    %cst_112 = arith.constant 1.000000e+00 : f32
    %211 = vector.broadcast %cst_112 : f32 to vector<8x128xf32>
    %212 = arith.addf %211, %210 : vector<8x128xf32>
    %213 = arith.divf %211, %212 : vector<8x128xf32>
    %214 = vector.extract_strided_slice %198 {offsets = [0, 256], sizes = [8, 128], strides = [1, 1]} : vector<8x512xf32> to vector<8x128xf32>
    %215 = math.tanh %214 : vector<8x128xf32>
    %216 = vector.extract_strided_slice %198 {offsets = [0, 384], sizes = [8, 128], strides = [1, 1]} : vector<8x512xf32> to vector<8x128xf32>
    %217 = arith.negf %216 : vector<8x128xf32>
    %218 = math.exp %217 : vector<8x128xf32>
    %cst_113 = arith.constant 1.000000e+00 : f32
    %219 = vector.broadcast %cst_113 : f32 to vector<8x128xf32>
    %220 = arith.addf %219, %218 : vector<8x128xf32>
    %221 = arith.divf %219, %220 : vector<8x128xf32>
    %222 = arith.mulf %213, %166 : vector<8x128xf32>
    %223 = arith.mulf %207, %215 : vector<8x128xf32>
    %224 = arith.addf %222, %223 : vector<8x128xf32>
    %225 = math.tanh %224 : vector<8x128xf32>
    %226 = arith.mulf %221, %225 : vector<8x128xf32>
    %227 = vector.extract_strided_slice %201 {offsets = [0, 0], sizes = [8, 128], strides = [1, 1]} : vector<8x512xf32> to vector<8x128xf32>
    %228 = arith.negf %227 : vector<8x128xf32>
    %229 = math.exp %228 : vector<8x128xf32>
    %cst_114 = arith.constant 1.000000e+00 : f32
    %230 = vector.broadcast %cst_114 : f32 to vector<8x128xf32>
    %231 = arith.addf %230, %229 : vector<8x128xf32>
    %232 = arith.divf %230, %231 : vector<8x128xf32>
    %233 = vector.extract_strided_slice %201 {offsets = [0, 128], sizes = [8, 128], strides = [1, 1]} : vector<8x512xf32> to vector<8x128xf32>
    %234 = arith.negf %233 : vector<8x128xf32>
    %235 = math.exp %234 : vector<8x128xf32>
    %cst_115 = arith.constant 1.000000e+00 : f32
    %236 = vector.broadcast %cst_115 : f32 to vector<8x128xf32>
    %237 = arith.addf %236, %235 : vector<8x128xf32>
    %238 = arith.divf %236, %237 : vector<8x128xf32>
    %239 = vector.extract_strided_slice %201 {offsets = [0, 256], sizes = [8, 128], strides = [1, 1]} : vector<8x512xf32> to vector<8x128xf32>
    %240 = math.tanh %239 : vector<8x128xf32>
    %241 = vector.extract_strided_slice %201 {offsets = [0, 384], sizes = [8, 128], strides = [1, 1]} : vector<8x512xf32> to vector<8x128xf32>
    %242 = arith.negf %241 : vector<8x128xf32>
    %243 = math.exp %242 : vector<8x128xf32>
    %cst_116 = arith.constant 1.000000e+00 : f32
    %244 = vector.broadcast %cst_116 : f32 to vector<8x128xf32>
    %245 = arith.addf %244, %243 : vector<8x128xf32>
    %246 = arith.divf %244, %245 : vector<8x128xf32>
    %247 = arith.mulf %238, %191 : vector<8x128xf32>
    %248 = arith.mulf %232, %240 : vector<8x128xf32>
    %249 = arith.addf %247, %248 : vector<8x128xf32>
    %250 = math.tanh %249 : vector<8x128xf32>
    %251 = arith.mulf %246, %250 : vector<8x128xf32>
    %c16_117 = arith.constant 16 : index
    %c0_118 = arith.constant 0 : index
    %252 = vector.load %arg33[%c16_117, %c0_118] : memref<64x128xf32, #tpu.memory_space<vmem>>, vector<8x128xf32>
    tpu.vector_store %arg33[%c16_117, %c0_118], %226 {strides = array<i32>} : memref<64x128xf32, #tpu.memory_space<vmem>>, vector<8x128xf32>,
    %c40_119 = arith.constant 40 : index
    %c0_120 = arith.constant 0 : index
    %253 = vector.load %arg34[%c40_119, %c0_120] : memref<64x128xf32, #tpu.memory_space<vmem>>, vector<8x128xf32>
    tpu.vector_store %arg34[%c40_119, %c0_120], %251 {strides = array<i32>} : memref<64x128xf32, #tpu.memory_space<vmem>>, vector<8x128xf32>,
    %c24 = arith.constant 24 : index
    %c0_121 = arith.constant 0 : index
    %254 = vector.load %arg29[%c24, %c0_121] : memref<64x512xf32, #tpu.memory_space<vmem>>, vector<8x512xf32>
    %cst_122 = arith.constant dense<0.000000e+00> : vector<8x512xf32>
    %255 = tpu.matmul %226, %74, %cst_122 {dimension_numbers = #tpu.dot_dimension_numbers<[1], [0], [0], [1], [0, 0, 1, 1], [], []>} : vector<8x128xf32>, vector<128x512xf32>, vector<8x512xf32> -> vector<8x512xf32>
    %256 = arith.addf %254, %255 : vector<8x512xf32>
    %c32 = arith.constant 32 : index
    %c0_123 = arith.constant 0 : index
    %257 = vector.load %arg30[%c32, %c0_123] : memref<64x512xf32, #tpu.memory_space<vmem>>, vector<8x512xf32>
    %cst_124 = arith.constant dense<0.000000e+00> : vector<8x512xf32>
    %258 = tpu.matmul %251, %75, %cst_124 {dimension_numbers = #tpu.dot_dimension_numbers<[1], [0], [0], [1], [0, 0, 1, 1], [], []>} : vector<8x128xf32>, vector<128x512xf32>, vector<8x512xf32> -> vector<8x512xf32>
    %259 = arith.addf %257, %258 : vector<8x512xf32>
    %260 = vector.extract_strided_slice %256 {offsets = [0, 0], sizes = [8, 128], strides = [1, 1]} : vector<8x512xf32> to vector<8x128xf32>
    %261 = arith.negf %260 : vector<8x128xf32>
    %262 = math.exp %261 : vector<8x128xf32>
    %cst_125 = arith.constant 1.000000e+00 : f32
    %263 = vector.broadcast %cst_125 : f32 to vector<8x128xf32>
    %264 = arith.addf %263, %262 : vector<8x128xf32>
    %265 = arith.divf %263, %264 : vector<8x128xf32>
    %266 = vector.extract_strided_slice %256 {offsets = [0, 128], sizes = [8, 128], strides = [1, 1]} : vector<8x512xf32> to vector<8x128xf32>
    %267 = arith.negf %266 : vector<8x128xf32>
    %268 = math.exp %267 : vector<8x128xf32>
    %cst_126 = arith.constant 1.000000e+00 : f32
    %269 = vector.broadcast %cst_126 : f32 to vector<8x128xf32>
    %270 = arith.addf %269, %268 : vector<8x128xf32>
    %271 = arith.divf %269, %270 : vector<8x128xf32>
    %272 = vector.extract_strided_slice %256 {offsets = [0, 256], sizes = [8, 128], strides = [1, 1]} : vector<8x512xf32> to vector<8x128xf32>
    %273 = math.tanh %272 : vector<8x128xf32>
    %274 = vector.extract_strided_slice %256 {offsets = [0, 384], sizes = [8, 128], strides = [1, 1]} : vector<8x512xf32> to vector<8x128xf32>
    %275 = arith.negf %274 : vector<8x128xf32>
    %276 = math.exp %275 : vector<8x128xf32>
    %cst_127 = arith.constant 1.000000e+00 : f32
    %277 = vector.broadcast %cst_127 : f32 to vector<8x128xf32>
    %278 = arith.addf %277, %276 : vector<8x128xf32>
    %279 = arith.divf %277, %278 : vector<8x128xf32>
    %280 = arith.mulf %271, %224 : vector<8x128xf32>
    %281 = arith.mulf %265, %273 : vector<8x128xf32>
    %282 = arith.addf %280, %281 : vector<8x128xf32>
    %283 = math.tanh %282 : vector<8x128xf32>
    %284 = arith.mulf %279, %283 : vector<8x128xf32>
    %285 = vector.extract_strided_slice %259 {offsets = [0, 0], sizes = [8, 128], strides = [1, 1]} : vector<8x512xf32> to vector<8x128xf32>
    %286 = arith.negf %285 : vector<8x128xf32>
    %287 = math.exp %286 : vector<8x128xf32>
    %cst_128 = arith.constant 1.000000e+00 : f32
    %288 = vector.broadcast %cst_128 : f32 to vector<8x128xf32>
    %289 = arith.addf %288, %287 : vector<8x128xf32>
    %290 = arith.divf %288, %289 : vector<8x128xf32>
    %291 = vector.extract_strided_slice %259 {offsets = [0, 128], sizes = [8, 128], strides = [1, 1]} : vector<8x512xf32> to vector<8x128xf32>
    %292 = arith.negf %291 : vector<8x128xf32>
    %293 = math.exp %292 : vector<8x128xf32>
    %cst_129 = arith.constant 1.000000e+00 : f32
    %294 = vector.broadcast %cst_129 : f32 to vector<8x128xf32>
    %295 = arith.addf %294, %293 : vector<8x128xf32>
    %296 = arith.divf %294, %295 : vector<8x128xf32>
    %297 = vector.extract_strided_slice %259 {offsets = [0, 256], sizes = [8, 128], strides = [1, 1]} : vector<8x512xf32> to vector<8x128xf32>
    %298 = math.tanh %297 : vector<8x128xf32>
    %299 = vector.extract_strided_slice %259 {offsets = [0, 384], sizes = [8, 128], strides = [1, 1]} : vector<8x512xf32> to vector<8x128xf32>
    %300 = arith.negf %299 : vector<8x128xf32>
    %301 = math.exp %300 : vector<8x128xf32>
    %cst_130 = arith.constant 1.000000e+00 : f32
    %302 = vector.broadcast %cst_130 : f32 to vector<8x128xf32>
    %303 = arith.addf %302, %301 : vector<8x128xf32>
    %304 = arith.divf %302, %303 : vector<8x128xf32>
    %305 = arith.mulf %296, %249 : vector<8x128xf32>
    %306 = arith.mulf %290, %298 : vector<8x128xf32>
    %307 = arith.addf %305, %306 : vector<8x128xf32>
    %308 = math.tanh %307 : vector<8x128xf32>
    %309 = arith.mulf %304, %308 : vector<8x128xf32>
    %c24_131 = arith.constant 24 : index
    %c0_132 = arith.constant 0 : index
    %310 = vector.load %arg33[%c24_131, %c0_132] : memref<64x128xf32, #tpu.memory_space<vmem>>, vector<8x128xf32>
    tpu.vector_store %arg33[%c24_131, %c0_132], %284 {strides = array<i32>} : memref<64x128xf32, #tpu.memory_space<vmem>>, vector<8x128xf32>,
    %c32_133 = arith.constant 32 : index
    %c0_134 = arith.constant 0 : index
    %311 = vector.load %arg34[%c32_133, %c0_134] : memref<64x128xf32, #tpu.memory_space<vmem>>, vector<8x128xf32>
    tpu.vector_store %arg34[%c32_133, %c0_134], %309 {strides = array<i32>} : memref<64x128xf32, #tpu.memory_space<vmem>>, vector<8x128xf32>,
    %c32_135 = arith.constant 32 : index
    %c0_136 = arith.constant 0 : index
    %312 = vector.load %arg29[%c32_135, %c0_136] : memref<64x512xf32, #tpu.memory_space<vmem>>, vector<8x512xf32>
    %cst_137 = arith.constant dense<0.000000e+00> : vector<8x512xf32>
    %313 = tpu.matmul %284, %74, %cst_137 {dimension_numbers = #tpu.dot_dimension_numbers<[1], [0], [0], [1], [0, 0, 1, 1], [], []>} : vector<8x128xf32>, vector<128x512xf32>, vector<8x512xf32> -> vector<8x512xf32>
    %314 = arith.addf %312, %313 : vector<8x512xf32>
    %c24_138 = arith.constant 24 : index
    %c0_139 = arith.constant 0 : index
    %315 = vector.load %arg30[%c24_138, %c0_139] : memref<64x512xf32, #tpu.memory_space<vmem>>, vector<8x512xf32>
    %cst_140 = arith.constant dense<0.000000e+00> : vector<8x512xf32>
    %316 = tpu.matmul %309, %75, %cst_140 {dimension_numbers = #tpu.dot_dimension_numbers<[1], [0], [0], [1], [0, 0, 1, 1], [], []>} : vector<8x128xf32>, vector<128x512xf32>, vector<8x512xf32> -> vector<8x512xf32>
    %317 = arith.addf %315, %316 : vector<8x512xf32>
    %318 = vector.extract_strided_slice %314 {offsets = [0, 0], sizes = [8, 128], strides = [1, 1]} : vector<8x512xf32> to vector<8x128xf32>
    %319 = arith.negf %318 : vector<8x128xf32>
    %320 = math.exp %319 : vector<8x128xf32>
    %cst_141 = arith.constant 1.000000e+00 : f32
    %321 = vector.broadcast %cst_141 : f32 to vector<8x128xf32>
    %322 = arith.addf %321, %320 : vector<8x128xf32>
    %323 = arith.divf %321, %322 : vector<8x128xf32>
    %324 = vector.extract_strided_slice %314 {offsets = [0, 128], sizes = [8, 128], strides = [1, 1]} : vector<8x512xf32> to vector<8x128xf32>
    %325 = arith.negf %324 : vector<8x128xf32>
    %326 = math.exp %325 : vector<8x128xf32>
    %cst_142 = arith.constant 1.000000e+00 : f32
    %327 = vector.broadcast %cst_142 : f32 to vector<8x128xf32>
    %328 = arith.addf %327, %326 : vector<8x128xf32>
    %329 = arith.divf %327, %328 : vector<8x128xf32>
    %330 = vector.extract_strided_slice %314 {offsets = [0, 256], sizes = [8, 128], strides = [1, 1]} : vector<8x512xf32> to vector<8x128xf32>
    %331 = math.tanh %330 : vector<8x128xf32>
    %332 = vector.extract_strided_slice %314 {offsets = [0, 384], sizes = [8, 128], strides = [1, 1]} : vector<8x512xf32> to vector<8x128xf32>
    %333 = arith.negf %332 : vector<8x128xf32>
    %334 = math.exp %333 : vector<8x128xf32>
    %cst_143 = arith.constant 1.000000e+00 : f32
    %335 = vector.broadcast %cst_143 : f32 to vector<8x128xf32>
    %336 = arith.addf %335, %334 : vector<8x128xf32>
    %337 = arith.divf %335, %336 : vector<8x128xf32>
    %338 = arith.mulf %329, %282 : vector<8x128xf32>
    %339 = arith.mulf %323, %331 : vector<8x128xf32>
    %340 = arith.addf %338, %339 : vector<8x128xf32>
    %341 = math.tanh %340 : vector<8x128xf32>
    %342 = arith.mulf %337, %341 : vector<8x128xf32>
    %343 = vector.extract_strided_slice %317 {offsets = [0, 0], sizes = [8, 128], strides = [1, 1]} : vector<8x512xf32> to vector<8x128xf32>
    %344 = arith.negf %343 : vector<8x128xf32>
    %345 = math.exp %344 : vector<8x128xf32>
    %cst_144 = arith.constant 1.000000e+00 : f32
    %346 = vector.broadcast %cst_144 : f32 to vector<8x128xf32>
    %347 = arith.addf %346, %345 : vector<8x128xf32>
    %348 = arith.divf %346, %347 : vector<8x128xf32>
    %349 = vector.extract_strided_slice %317 {offsets = [0, 128], sizes = [8, 128], strides = [1, 1]} : vector<8x512xf32> to vector<8x128xf32>
    %350 = arith.negf %349 : vector<8x128xf32>
    %351 = math.exp %350 : vector<8x128xf32>
    %cst_145 = arith.constant 1.000000e+00 : f32
    %352 = vector.broadcast %cst_145 : f32 to vector<8x128xf32>
    %353 = arith.addf %352, %351 : vector<8x128xf32>
    %354 = arith.divf %352, %353 : vector<8x128xf32>
    %355 = vector.extract_strided_slice %317 {offsets = [0, 256], sizes = [8, 128], strides = [1, 1]} : vector<8x512xf32> to vector<8x128xf32>
    %356 = math.tanh %355 : vector<8x128xf32>
    %357 = vector.extract_strided_slice %317 {offsets = [0, 384], sizes = [8, 128], strides = [1, 1]} : vector<8x512xf32> to vector<8x128xf32>
    %358 = arith.negf %357 : vector<8x128xf32>
    %359 = math.exp %358 : vector<8x128xf32>
    %cst_146 = arith.constant 1.000000e+00 : f32
    %360 = vector.broadcast %cst_146 : f32 to vector<8x128xf32>
    %361 = arith.addf %360, %359 : vector<8x128xf32>
    %362 = arith.divf %360, %361 : vector<8x128xf32>
    %363 = arith.mulf %354, %307 : vector<8x128xf32>
    %364 = arith.mulf %348, %356 : vector<8x128xf32>
    %365 = arith.addf %363, %364 : vector<8x128xf32>
    %366 = math.tanh %365 : vector<8x128xf32>
    %367 = arith.mulf %362, %366 : vector<8x128xf32>
    %c32_147 = arith.constant 32 : index
    %c0_148 = arith.constant 0 : index
    %368 = vector.load %arg33[%c32_147, %c0_148] : memref<64x128xf32, #tpu.memory_space<vmem>>, vector<8x128xf32>
    tpu.vector_store %arg33[%c32_147, %c0_148], %342 {strides = array<i32>} : memref<64x128xf32, #tpu.memory_space<vmem>>, vector<8x128xf32>,
    %c24_149 = arith.constant 24 : index
    %c0_150 = arith.constant 0 : index
    %369 = vector.load %arg34[%c24_149, %c0_150] : memref<64x128xf32, #tpu.memory_space<vmem>>, vector<8x128xf32>
    tpu.vector_store %arg34[%c24_149, %c0_150], %367 {strides = array<i32>} : memref<64x128xf32, #tpu.memory_space<vmem>>, vector<8x128xf32>,
    %c40_151 = arith.constant 40 : index
    %c0_152 = arith.constant 0 : index
    %370 = vector.load %arg29[%c40_151, %c0_152] : memref<64x512xf32, #tpu.memory_space<vmem>>, vector<8x512xf32>
    %cst_153 = arith.constant dense<0.000000e+00> : vector<8x512xf32>
    %371 = tpu.matmul %342, %74, %cst_153 {dimension_numbers = #tpu.dot_dimension_numbers<[1], [0], [0], [1], [0, 0, 1, 1], [], []>} : vector<8x128xf32>, vector<128x512xf32>, vector<8x512xf32> -> vector<8x512xf32>
    %372 = arith.addf %370, %371 : vector<8x512xf32>
    %c16_154 = arith.constant 16 : index
    %c0_155 = arith.constant 0 : index
    %373 = vector.load %arg30[%c16_154, %c0_155] : memref<64x512xf32, #tpu.memory_space<vmem>>, vector<8x512xf32>
    %cst_156 = arith.constant dense<0.000000e+00> : vector<8x512xf32>
    %374 = tpu.matmul %367, %75, %cst_156 {dimension_numbers = #tpu.dot_dimension_numbers<[1], [0], [0], [1], [0, 0, 1, 1], [], []>} : vector<8x128xf32>, vector<128x512xf32>, vector<8x512xf32> -> vector<8x512xf32>
    %375 = arith.addf %373, %374 : vector<8x512xf32>
    %376 = vector.extract_strided_slice %372 {offsets = [0, 0], sizes = [8, 128], strides = [1, 1]} : vector<8x512xf32> to vector<8x128xf32>
    %377 = arith.negf %376 : vector<8x128xf32>
    %378 = math.exp %377 : vector<8x128xf32>
    %cst_157 = arith.constant 1.000000e+00 : f32
    %379 = vector.broadcast %cst_157 : f32 to vector<8x128xf32>
    %380 = arith.addf %379, %378 : vector<8x128xf32>
    %381 = arith.divf %379, %380 : vector<8x128xf32>
    %382 = vector.extract_strided_slice %372 {offsets = [0, 128], sizes = [8, 128], strides = [1, 1]} : vector<8x512xf32> to vector<8x128xf32>
    %383 = arith.negf %382 : vector<8x128xf32>
    %384 = math.exp %383 : vector<8x128xf32>
    %cst_158 = arith.constant 1.000000e+00 : f32
    %385 = vector.broadcast %cst_158 : f32 to vector<8x128xf32>
    %386 = arith.addf %385, %384 : vector<8x128xf32>
    %387 = arith.divf %385, %386 : vector<8x128xf32>
    %388 = vector.extract_strided_slice %372 {offsets = [0, 256], sizes = [8, 128], strides = [1, 1]} : vector<8x512xf32> to vector<8x128xf32>
    %389 = math.tanh %388 : vector<8x128xf32>
    %390 = vector.extract_strided_slice %372 {offsets = [0, 384], sizes = [8, 128], strides = [1, 1]} : vector<8x512xf32> to vector<8x128xf32>
    %391 = arith.negf %390 : vector<8x128xf32>
    %392 = math.exp %391 : vector<8x128xf32>
    %cst_159 = arith.constant 1.000000e+00 : f32
    %393 = vector.broadcast %cst_159 : f32 to vector<8x128xf32>
    %394 = arith.addf %393, %392 : vector<8x128xf32>
    %395 = arith.divf %393, %394 : vector<8x128xf32>
    %396 = arith.mulf %387, %340 : vector<8x128xf32>
    %397 = arith.mulf %381, %389 : vector<8x128xf32>
    %398 = arith.addf %396, %397 : vector<8x128xf32>
    %399 = math.tanh %398 : vector<8x128xf32>
    %400 = arith.mulf %395, %399 : vector<8x128xf32>
    %401 = vector.extract_strided_slice %375 {offsets = [0, 0], sizes = [8, 128], strides = [1, 1]} : vector<8x512xf32> to vector<8x128xf32>
    %402 = arith.negf %401 : vector<8x128xf32>
    %403 = math.exp %402 : vector<8x128xf32>
    %cst_160 = arith.constant 1.000000e+00 : f32
    %404 = vector.broadcast %cst_160 : f32 to vector<8x128xf32>
    %405 = arith.addf %404, %403 : vector<8x128xf32>
    %406 = arith.divf %404, %405 : vector<8x128xf32>
    %407 = vector.extract_strided_slice %375 {offsets = [0, 128], sizes = [8, 128], strides = [1, 1]} : vector<8x512xf32> to vector<8x128xf32>
    %408 = arith.negf %407 : vector<8x128xf32>
    %409 = math.exp %408 : vector<8x128xf32>
    %cst_161 = arith.constant 1.000000e+00 : f32
    %410 = vector.broadcast %cst_161 : f32 to vector<8x128xf32>
    %411 = arith.addf %410, %409 : vector<8x128xf32>
    %412 = arith.divf %410, %411 : vector<8x128xf32>
    %413 = vector.extract_strided_slice %375 {offsets = [0, 256], sizes = [8, 128], strides = [1, 1]} : vector<8x512xf32> to vector<8x128xf32>
    %414 = math.tanh %413 : vector<8x128xf32>
    %415 = vector.extract_strided_slice %375 {offsets = [0, 384], sizes = [8, 128], strides = [1, 1]} : vector<8x512xf32> to vector<8x128xf32>
    %416 = arith.negf %415 : vector<8x128xf32>
    %417 = math.exp %416 : vector<8x128xf32>
    %cst_162 = arith.constant 1.000000e+00 : f32
    %418 = vector.broadcast %cst_162 : f32 to vector<8x128xf32>
    %419 = arith.addf %418, %417 : vector<8x128xf32>
    %420 = arith.divf %418, %419 : vector<8x128xf32>
    %421 = arith.mulf %412, %365 : vector<8x128xf32>
    %422 = arith.mulf %406, %414 : vector<8x128xf32>
    %423 = arith.addf %421, %422 : vector<8x128xf32>
    %424 = math.tanh %423 : vector<8x128xf32>
    %425 = arith.mulf %420, %424 : vector<8x128xf32>
    %c40_163 = arith.constant 40 : index
    %c0_164 = arith.constant 0 : index
    %426 = vector.load %arg33[%c40_163, %c0_164] : memref<64x128xf32, #tpu.memory_space<vmem>>, vector<8x128xf32>
    tpu.vector_store %arg33[%c40_163, %c0_164], %400 {strides = array<i32>} : memref<64x128xf32, #tpu.memory_space<vmem>>, vector<8x128xf32>,
    %c16_165 = arith.constant 16 : index
    %c0_166 = arith.constant 0 : index
    %427 = vector.load %arg34[%c16_165, %c0_166] : memref<64x128xf32, #tpu.memory_space<vmem>>, vector<8x128xf32>
    tpu.vector_store %arg34[%c16_165, %c0_166], %425 {strides = array<i32>} : memref<64x128xf32, #tpu.memory_space<vmem>>, vector<8x128xf32>,
    %c48_167 = arith.constant 48 : index
    %c0_168 = arith.constant 0 : index
    %428 = vector.load %arg29[%c48_167, %c0_168] : memref<64x512xf32, #tpu.memory_space<vmem>>, vector<8x512xf32>
    %cst_169 = arith.constant dense<0.000000e+00> : vector<8x512xf32>
    %429 = tpu.matmul %400, %74, %cst_169 {dimension_numbers = #tpu.dot_dimension_numbers<[1], [0], [0], [1], [0, 0, 1, 1], [], []>} : vector<8x128xf32>, vector<128x512xf32>, vector<8x512xf32> -> vector<8x512xf32>
    %430 = arith.addf %428, %429 : vector<8x512xf32>
    %c8_170 = arith.constant 8 : index
    %c0_171 = arith.constant 0 : index
    %431 = vector.load %arg30[%c8_170, %c0_171] : memref<64x512xf32, #tpu.memory_space<vmem>>, vector<8x512xf32>
    %cst_172 = arith.constant dense<0.000000e+00> : vector<8x512xf32>
    %432 = tpu.matmul %425, %75, %cst_172 {dimension_numbers = #tpu.dot_dimension_numbers<[1], [0], [0], [1], [0, 0, 1, 1], [], []>} : vector<8x128xf32>, vector<128x512xf32>, vector<8x512xf32> -> vector<8x512xf32>
    %433 = arith.addf %431, %432 : vector<8x512xf32>
    %434 = vector.extract_strided_slice %430 {offsets = [0, 0], sizes = [8, 128], strides = [1, 1]} : vector<8x512xf32> to vector<8x128xf32>
    %435 = arith.negf %434 : vector<8x128xf32>
    %436 = math.exp %435 : vector<8x128xf32>
    %cst_173 = arith.constant 1.000000e+00 : f32
    %437 = vector.broadcast %cst_173 : f32 to vector<8x128xf32>
    %438 = arith.addf %437, %436 : vector<8x128xf32>
    %439 = arith.divf %437, %438 : vector<8x128xf32>
    %440 = vector.extract_strided_slice %430 {offsets = [0, 128], sizes = [8, 128], strides = [1, 1]} : vector<8x512xf32> to vector<8x128xf32>
    %441 = arith.negf %440 : vector<8x128xf32>
    %442 = math.exp %441 : vector<8x128xf32>
    %cst_174 = arith.constant 1.000000e+00 : f32
    %443 = vector.broadcast %cst_174 : f32 to vector<8x128xf32>
    %444 = arith.addf %443, %442 : vector<8x128xf32>
    %445 = arith.divf %443, %444 : vector<8x128xf32>
    %446 = vector.extract_strided_slice %430 {offsets = [0, 256], sizes = [8, 128], strides = [1, 1]} : vector<8x512xf32> to vector<8x128xf32>
    %447 = math.tanh %446 : vector<8x128xf32>
    %448 = vector.extract_strided_slice %430 {offsets = [0, 384], sizes = [8, 128], strides = [1, 1]} : vector<8x512xf32> to vector<8x128xf32>
    %449 = arith.negf %448 : vector<8x128xf32>
    %450 = math.exp %449 : vector<8x128xf32>
    %cst_175 = arith.constant 1.000000e+00 : f32
    %451 = vector.broadcast %cst_175 : f32 to vector<8x128xf32>
    %452 = arith.addf %451, %450 : vector<8x128xf32>
    %453 = arith.divf %451, %452 : vector<8x128xf32>
    %454 = arith.mulf %445, %398 : vector<8x128xf32>
    %455 = arith.mulf %439, %447 : vector<8x128xf32>
    %456 = arith.addf %454, %455 : vector<8x128xf32>
    %457 = math.tanh %456 : vector<8x128xf32>
    %458 = arith.mulf %453, %457 : vector<8x128xf32>
    %459 = vector.extract_strided_slice %433 {offsets = [0, 0], sizes = [8, 128], strides = [1, 1]} : vector<8x512xf32> to vector<8x128xf32>
    %460 = arith.negf %459 : vector<8x128xf32>
    %461 = math.exp %460 : vector<8x128xf32>
    %cst_176 = arith.constant 1.000000e+00 : f32
    %462 = vector.broadcast %cst_176 : f32 to vector<8x128xf32>
    %463 = arith.addf %462, %461 : vector<8x128xf32>
    %464 = arith.divf %462, %463 : vector<8x128xf32>
    %465 = vector.extract_strided_slice %433 {offsets = [0, 128], sizes = [8, 128], strides = [1, 1]} : vector<8x512xf32> to vector<8x128xf32>
    %466 = arith.negf %465 : vector<8x128xf32>
    %467 = math.exp %466 : vector<8x128xf32>
    %cst_177 = arith.constant 1.000000e+00 : f32
    %468 = vector.broadcast %cst_177 : f32 to vector<8x128xf32>
    %469 = arith.addf %468, %467 : vector<8x128xf32>
    %470 = arith.divf %468, %469 : vector<8x128xf32>
    %471 = vector.extract_strided_slice %433 {offsets = [0, 256], sizes = [8, 128], strides = [1, 1]} : vector<8x512xf32> to vector<8x128xf32>
    %472 = math.tanh %471 : vector<8x128xf32>
    %473 = vector.extract_strided_slice %433 {offsets = [0, 384], sizes = [8, 128], strides = [1, 1]} : vector<8x512xf32> to vector<8x128xf32>
    %474 = arith.negf %473 : vector<8x128xf32>
    %475 = math.exp %474 : vector<8x128xf32>
    %cst_178 = arith.constant 1.000000e+00 : f32
    %476 = vector.broadcast %cst_178 : f32 to vector<8x128xf32>
    %477 = arith.addf %476, %475 : vector<8x128xf32>
    %478 = arith.divf %476, %477 : vector<8x128xf32>
    %479 = arith.mulf %470, %423 : vector<8x128xf32>
    %480 = arith.mulf %464, %472 : vector<8x128xf32>
    %481 = arith.addf %479, %480 : vector<8x128xf32>
    %482 = math.tanh %481 : vector<8x128xf32>
    %483 = arith.mulf %478, %482 : vector<8x128xf32>
    %c48_179 = arith.constant 48 : index
    %c0_180 = arith.constant 0 : index
    %484 = vector.load %arg33[%c48_179, %c0_180] : memref<64x128xf32, #tpu.memory_space<vmem>>, vector<8x128xf32>
    tpu.vector_store %arg33[%c48_179, %c0_180], %458 {strides = array<i32>} : memref<64x128xf32, #tpu.memory_space<vmem>>, vector<8x128xf32>,
    %c8_181 = arith.constant 8 : index
    %c0_182 = arith.constant 0 : index
    %485 = vector.load %arg34[%c8_181, %c0_182] : memref<64x128xf32, #tpu.memory_space<vmem>>, vector<8x128xf32>
    tpu.vector_store %arg34[%c8_181, %c0_182], %483 {strides = array<i32>} : memref<64x128xf32, #tpu.memory_space<vmem>>, vector<8x128xf32>,
    %c56_183 = arith.constant 56 : index
    %c0_184 = arith.constant 0 : index
    %486 = vector.load %arg29[%c56_183, %c0_184] : memref<64x512xf32, #tpu.memory_space<vmem>>, vector<8x512xf32>
    %cst_185 = arith.constant dense<0.000000e+00> : vector<8x512xf32>
    %487 = tpu.matmul %458, %74, %cst_185 {dimension_numbers = #tpu.dot_dimension_numbers<[1], [0], [0], [1], [0, 0, 1, 1], [], []>} : vector<8x128xf32>, vector<128x512xf32>, vector<8x512xf32> -> vector<8x512xf32>
    %488 = arith.addf %486, %487 : vector<8x512xf32>
    %c0_186 = arith.constant 0 : index
    %c0_187 = arith.constant 0 : index
    %489 = vector.load %arg30[%c0_186, %c0_187] : memref<64x512xf32, #tpu.memory_space<vmem>>, vector<8x512xf32>
    %cst_188 = arith.constant dense<0.000000e+00> : vector<8x512xf32>
    %490 = tpu.matmul %483, %75, %cst_188 {dimension_numbers = #tpu.dot_dimension_numbers<[1], [0], [0], [1], [0, 0, 1, 1], [], []>} : vector<8x128xf32>, vector<128x512xf32>, vector<8x512xf32> -> vector<8x512xf32>
    %491 = arith.addf %489, %490 : vector<8x512xf32>
    %492 = vector.extract_strided_slice %488 {offsets = [0, 0], sizes = [8, 128], strides = [1, 1]} : vector<8x512xf32> to vector<8x128xf32>
    %493 = arith.negf %492 : vector<8x128xf32>
    %494 = math.exp %493 : vector<8x128xf32>
    %cst_189 = arith.constant 1.000000e+00 : f32
    %495 = vector.broadcast %cst_189 : f32 to vector<8x128xf32>
    %496 = arith.addf %495, %494 : vector<8x128xf32>
    %497 = arith.divf %495, %496 : vector<8x128xf32>
    %498 = vector.extract_strided_slice %488 {offsets = [0, 128], sizes = [8, 128], strides = [1, 1]} : vector<8x512xf32> to vector<8x128xf32>
    %499 = arith.negf %498 : vector<8x128xf32>
    %500 = math.exp %499 : vector<8x128xf32>
    %cst_190 = arith.constant 1.000000e+00 : f32
    %501 = vector.broadcast %cst_190 : f32 to vector<8x128xf32>
    %502 = arith.addf %501, %500 : vector<8x128xf32>
    %503 = arith.divf %501, %502 : vector<8x128xf32>
    %504 = vector.extract_strided_slice %488 {offsets = [0, 256], sizes = [8, 128], strides = [1, 1]} : vector<8x512xf32> to vector<8x128xf32>
    %505 = math.tanh %504 : vector<8x128xf32>
    %506 = vector.extract_strided_slice %488 {offsets = [0, 384], sizes = [8, 128], strides = [1, 1]} : vector<8x512xf32> to vector<8x128xf32>
    %507 = arith.negf %506 : vector<8x128xf32>
    %508 = math.exp %507 : vector<8x128xf32>
    %cst_191 = arith.constant 1.000000e+00 : f32
    %509 = vector.broadcast %cst_191 : f32 to vector<8x128xf32>
    %510 = arith.addf %509, %508 : vector<8x128xf32>
    %511 = arith.divf %509, %510 : vector<8x128xf32>
    %512 = arith.mulf %503, %456 : vector<8x128xf32>
    %513 = arith.mulf %497, %505 : vector<8x128xf32>
    %514 = arith.addf %512, %513 : vector<8x128xf32>
    %515 = math.tanh %514 : vector<8x128xf32>
    %516 = arith.mulf %511, %515 : vector<8x128xf32>
    %517 = vector.extract_strided_slice %491 {offsets = [0, 0], sizes = [8, 128], strides = [1, 1]} : vector<8x512xf32> to vector<8x128xf32>
    %518 = arith.negf %517 : vector<8x128xf32>
    %519 = math.exp %518 : vector<8x128xf32>
    %cst_192 = arith.constant 1.000000e+00 : f32
    %520 = vector.broadcast %cst_192 : f32 to vector<8x128xf32>
    %521 = arith.addf %520, %519 : vector<8x128xf32>
    %522 = arith.divf %520, %521 : vector<8x128xf32>
    %523 = vector.extract_strided_slice %491 {offsets = [0, 128], sizes = [8, 128], strides = [1, 1]} : vector<8x512xf32> to vector<8x128xf32>
    %524 = arith.negf %523 : vector<8x128xf32>
    %525 = math.exp %524 : vector<8x128xf32>
    %cst_193 = arith.constant 1.000000e+00 : f32
    %526 = vector.broadcast %cst_193 : f32 to vector<8x128xf32>
    %527 = arith.addf %526, %525 : vector<8x128xf32>
    %528 = arith.divf %526, %527 : vector<8x128xf32>
    %529 = vector.extract_strided_slice %491 {offsets = [0, 256], sizes = [8, 128], strides = [1, 1]} : vector<8x512xf32> to vector<8x128xf32>
    %530 = math.tanh %529 : vector<8x128xf32>
    %531 = vector.extract_strided_slice %491 {offsets = [0, 384], sizes = [8, 128], strides = [1, 1]} : vector<8x512xf32> to vector<8x128xf32>
    %532 = arith.negf %531 : vector<8x128xf32>
    %533 = math.exp %532 : vector<8x128xf32>
    %cst_194 = arith.constant 1.000000e+00 : f32
    %534 = vector.broadcast %cst_194 : f32 to vector<8x128xf32>
    %535 = arith.addf %534, %533 : vector<8x128xf32>
    %536 = arith.divf %534, %535 : vector<8x128xf32>
    %537 = arith.mulf %528, %481 : vector<8x128xf32>
    %538 = arith.mulf %522, %530 : vector<8x128xf32>
    %539 = arith.addf %537, %538 : vector<8x128xf32>
    %540 = math.tanh %539 : vector<8x128xf32>
    %541 = arith.mulf %536, %540 : vector<8x128xf32>
    %c56_195 = arith.constant 56 : index
    %c0_196 = arith.constant 0 : index
    %542 = vector.load %arg33[%c56_195, %c0_196] : memref<64x128xf32, #tpu.memory_space<vmem>>, vector<8x128xf32>
    tpu.vector_store %arg33[%c56_195, %c0_196], %516 {strides = array<i32>} : memref<64x128xf32, #tpu.memory_space<vmem>>, vector<8x128xf32>,
    %c0_197 = arith.constant 0 : index
    %c0_198 = arith.constant 0 : index
    %543 = vector.load %arg34[%c0_197, %c0_198] : memref<64x128xf32, #tpu.memory_space<vmem>>, vector<8x128xf32>
    tpu.vector_store %arg34[%c0_197, %c0_198], %541 {strides = array<i32>} : memref<64x128xf32, #tpu.memory_space<vmem>>, vector<8x128xf32>,
    %c0_199 = arith.constant 0 : index
    %c0_200 = arith.constant 0 : index
    %544 = vector.load %arg33[%c0_199, %c0_200] : memref<64x128xf32, #tpu.memory_space<vmem>>, vector<64x128xf32>
    %c0_201 = arith.constant 0 : index
    %c0_202 = arith.constant 0 : index
    %545 = vector.load %arg34[%c0_201, %c0_202] : memref<64x128xf32, #tpu.memory_space<vmem>>, vector<64x128xf32>
    %c0_203 = arith.constant 0 : index
    %c0_204 = arith.constant 0 : index
    %546 = vector.load %arg14[%c0_203, %c0_204] : memref<128x512xf32, #tpu.memory_space<vmem>>, vector<128x512xf32>
    %cst_205 = arith.constant dense<0.000000e+00> : vector<64x512xf32>
    %547 = tpu.matmul %544, %546, %cst_205 {dimension_numbers = #tpu.dot_dimension_numbers<[1], [0], [0], [1], [0, 0, 1, 1], [], []>} : vector<64x128xf32>, vector<128x512xf32>, vector<64x512xf32> -> vector<64x512xf32>
    %c0_206 = arith.constant 0 : index
    %c0_207 = arith.constant 0 : index
    %548 = vector.load %arg15[%c0_206, %c0_207] : memref<128x512xf32, #tpu.memory_space<vmem>>, vector<128x512xf32>
    %cst_208 = arith.constant dense<0.000000e+00> : vector<64x512xf32>
    %549 = tpu.matmul %545, %548, %cst_208 {dimension_numbers = #tpu.dot_dimension_numbers<[1], [0], [0], [1], [0, 0, 1, 1], [], []>} : vector<64x128xf32>, vector<128x512xf32>, vector<64x512xf32> -> vector<64x512xf32>
    %550 = arith.addf %547, %549 : vector<64x512xf32>
    %c0_209 = arith.constant 0 : index
    %c0_210 = arith.constant 0 : index
    %551 = vector.load %arg17[%c0_209, %c0_210] : memref<1x512xf32, #tpu.memory_space<vmem>>, vector<1x512xf32>
    %552 = vector.broadcast %551 : vector<1x512xf32> to vector<64x512xf32>
    %553 = arith.addf %550, %552 : vector<64x512xf32>
    %c0_211 = arith.constant 0 : index
    %c0_212 = arith.constant 0 : index
    %554 = vector.load %arg31[%c0_211, %c0_212] : memref<64x512xf32, #tpu.memory_space<vmem>>, vector<64x512xf32>
    tpu.vector_store %arg31[%c0_211, %c0_212], %553 {strides = array<i32>} : memref<64x512xf32, #tpu.memory_space<vmem>>, vector<64x512xf32>,
    %c0_213 = arith.constant 0 : index
    %c0_214 = arith.constant 0 : index
    %555 = vector.load %arg18[%c0_213, %c0_214] : memref<128x512xf32, #tpu.memory_space<vmem>>, vector<128x512xf32>
    %cst_215 = arith.constant dense<0.000000e+00> : vector<64x512xf32>
    %556 = tpu.matmul %544, %555, %cst_215 {dimension_numbers = #tpu.dot_dimension_numbers<[1], [0], [0], [1], [0, 0, 1, 1], [], []>} : vector<64x128xf32>, vector<128x512xf32>, vector<64x512xf32> -> vector<64x512xf32>
    %c0_216 = arith.constant 0 : index
    %c0_217 = arith.constant 0 : index
    %557 = vector.load %arg19[%c0_216, %c0_217] : memref<128x512xf32, #tpu.memory_space<vmem>>, vector<128x512xf32>
    %cst_218 = arith.constant dense<0.000000e+00> : vector<64x512xf32>
    %558 = tpu.matmul %545, %557, %cst_218 {dimension_numbers = #tpu.dot_dimension_numbers<[1], [0], [0], [1], [0, 0, 1, 1], [], []>} : vector<64x128xf32>, vector<128x512xf32>, vector<64x512xf32> -> vector<64x512xf32>
    %559 = arith.addf %556, %558 : vector<64x512xf32>
    %c0_219 = arith.constant 0 : index
    %c0_220 = arith.constant 0 : index
    %560 = vector.load %arg21[%c0_219, %c0_220] : memref<1x512xf32, #tpu.memory_space<vmem>>, vector<1x512xf32>
    %561 = vector.broadcast %560 : vector<1x512xf32> to vector<64x512xf32>
    %562 = arith.addf %559, %561 : vector<64x512xf32>
    %c0_221 = arith.constant 0 : index
    %c0_222 = arith.constant 0 : index
    %563 = vector.load %arg32[%c0_221, %c0_222] : memref<64x512xf32, #tpu.memory_space<vmem>>, vector<64x512xf32>
    tpu.vector_store %arg32[%c0_221, %c0_222], %562 {strides = array<i32>} : memref<64x512xf32, #tpu.memory_space<vmem>>, vector<64x512xf32>,
    %c0_223 = arith.constant 0 : index
    %c0_224 = arith.constant 0 : index
    %564 = vector.load %arg16[%c0_223, %c0_224] : memref<128x512xf32, #tpu.memory_space<vmem>>, vector<128x512xf32>
    %c0_225 = arith.constant 0 : index
    %c0_226 = arith.constant 0 : index
    %565 = vector.load %arg20[%c0_225, %c0_226] : memref<128x512xf32, #tpu.memory_space<vmem>>, vector<128x512xf32>
    %cst_227 = arith.constant 0.000000e+00 : f32
    %566 = vector.broadcast %cst_227 : f32 to vector<8x128xf32>
    %cst_228 = arith.constant 0.000000e+00 : f32
    %567 = vector.broadcast %cst_228 : f32 to vector<8x128xf32>
    %cst_229 = arith.constant 0.000000e+00 : f32
    %568 = vector.broadcast %cst_229 : f32 to vector<8x128xf32>
    %cst_230 = arith.constant 0.000000e+00 : f32
    %569 = vector.broadcast %cst_230 : f32 to vector<8x128xf32>
    %c0_231 = arith.constant 0 : index
    %c0_232 = arith.constant 0 : index
    %570 = vector.load %arg31[%c0_231, %c0_232] : memref<64x512xf32, #tpu.memory_space<vmem>>, vector<8x512xf32>
    %cst_233 = arith.constant dense<0.000000e+00> : vector<8x512xf32>
    %571 = tpu.matmul %566, %564, %cst_233 {dimension_numbers = #tpu.dot_dimension_numbers<[1], [0], [0], [1], [0, 0, 1, 1], [], []>} : vector<8x128xf32>, vector<128x512xf32>, vector<8x512xf32> -> vector<8x512xf32>
    %572 = arith.addf %570, %571 : vector<8x512xf32>
    %c56_234 = arith.constant 56 : index
    %c0_235 = arith.constant 0 : index
    %573 = vector.load %arg32[%c56_234, %c0_235] : memref<64x512xf32, #tpu.memory_space<vmem>>, vector<8x512xf32>
    %cst_236 = arith.constant dense<0.000000e+00> : vector<8x512xf32>
    %574 = tpu.matmul %568, %565, %cst_236 {dimension_numbers = #tpu.dot_dimension_numbers<[1], [0], [0], [1], [0, 0, 1, 1], [], []>} : vector<8x128xf32>, vector<128x512xf32>, vector<8x512xf32> -> vector<8x512xf32>
    %575 = arith.addf %573, %574 : vector<8x512xf32>
    %576 = vector.extract_strided_slice %572 {offsets = [0, 0], sizes = [8, 128], strides = [1, 1]} : vector<8x512xf32> to vector<8x128xf32>
    %577 = arith.negf %576 : vector<8x128xf32>
    %578 = math.exp %577 : vector<8x128xf32>
    %cst_237 = arith.constant 1.000000e+00 : f32
    %579 = vector.broadcast %cst_237 : f32 to vector<8x128xf32>
    %580 = arith.addf %579, %578 : vector<8x128xf32>
    %581 = arith.divf %579, %580 : vector<8x128xf32>
    %582 = vector.extract_strided_slice %572 {offsets = [0, 128], sizes = [8, 128], strides = [1, 1]} : vector<8x512xf32> to vector<8x128xf32>
    %583 = arith.negf %582 : vector<8x128xf32>
    %584 = math.exp %583 : vector<8x128xf32>
    %cst_238 = arith.constant 1.000000e+00 : f32
    %585 = vector.broadcast %cst_238 : f32 to vector<8x128xf32>
    %586 = arith.addf %585, %584 : vector<8x128xf32>
    %587 = arith.divf %585, %586 : vector<8x128xf32>
    %588 = vector.extract_strided_slice %572 {offsets = [0, 256], sizes = [8, 128], strides = [1, 1]} : vector<8x512xf32> to vector<8x128xf32>
    %589 = math.tanh %588 : vector<8x128xf32>
    %590 = vector.extract_strided_slice %572 {offsets = [0, 384], sizes = [8, 128], strides = [1, 1]} : vector<8x512xf32> to vector<8x128xf32>
    %591 = arith.negf %590 : vector<8x128xf32>
    %592 = math.exp %591 : vector<8x128xf32>
    %cst_239 = arith.constant 1.000000e+00 : f32
    %593 = vector.broadcast %cst_239 : f32 to vector<8x128xf32>
    %594 = arith.addf %593, %592 : vector<8x128xf32>
    %595 = arith.divf %593, %594 : vector<8x128xf32>
    %596 = arith.mulf %587, %567 : vector<8x128xf32>
    %597 = arith.mulf %581, %589 : vector<8x128xf32>
    %598 = arith.addf %596, %597 : vector<8x128xf32>
    %599 = math.tanh %598 : vector<8x128xf32>
    %600 = arith.mulf %595, %599 : vector<8x128xf32>
    %601 = vector.extract_strided_slice %575 {offsets = [0, 0], sizes = [8, 128], strides = [1, 1]} : vector<8x512xf32> to vector<8x128xf32>
    %602 = arith.negf %601 : vector<8x128xf32>
    %603 = math.exp %602 : vector<8x128xf32>
    %cst_240 = arith.constant 1.000000e+00 : f32
    %604 = vector.broadcast %cst_240 : f32 to vector<8x128xf32>
    %605 = arith.addf %604, %603 : vector<8x128xf32>
    %606 = arith.divf %604, %605 : vector<8x128xf32>
    %607 = vector.extract_strided_slice %575 {offsets = [0, 128], sizes = [8, 128], strides = [1, 1]} : vector<8x512xf32> to vector<8x128xf32>
    %608 = arith.negf %607 : vector<8x128xf32>
    %609 = math.exp %608 : vector<8x128xf32>
    %cst_241 = arith.constant 1.000000e+00 : f32
    %610 = vector.broadcast %cst_241 : f32 to vector<8x128xf32>
    %611 = arith.addf %610, %609 : vector<8x128xf32>
    %612 = arith.divf %610, %611 : vector<8x128xf32>
    %613 = vector.extract_strided_slice %575 {offsets = [0, 256], sizes = [8, 128], strides = [1, 1]} : vector<8x512xf32> to vector<8x128xf32>
    %614 = math.tanh %613 : vector<8x128xf32>
    %615 = vector.extract_strided_slice %575 {offsets = [0, 384], sizes = [8, 128], strides = [1, 1]} : vector<8x512xf32> to vector<8x128xf32>
    %616 = arith.negf %615 : vector<8x128xf32>
    %617 = math.exp %616 : vector<8x128xf32>
    %cst_242 = arith.constant 1.000000e+00 : f32
    %618 = vector.broadcast %cst_242 : f32 to vector<8x128xf32>
    %619 = arith.addf %618, %617 : vector<8x128xf32>
    %620 = arith.divf %618, %619 : vector<8x128xf32>
    %621 = arith.mulf %612, %569 : vector<8x128xf32>
    %622 = arith.mulf %606, %614 : vector<8x128xf32>
    %623 = arith.addf %621, %622 : vector<8x128xf32>
    %624 = math.tanh %623 : vector<8x128xf32>
    %625 = arith.mulf %620, %624 : vector<8x128xf32>
    %c8_243 = arith.constant 8 : index
    %c0_244 = arith.constant 0 : index
    %626 = vector.load %arg31[%c8_243, %c0_244] : memref<64x512xf32, #tpu.memory_space<vmem>>, vector<8x512xf32>
    %cst_245 = arith.constant dense<0.000000e+00> : vector<8x512xf32>
    %627 = tpu.matmul %600, %564, %cst_245 {dimension_numbers = #tpu.dot_dimension_numbers<[1], [0], [0], [1], [0, 0, 1, 1], [], []>} : vector<8x128xf32>, vector<128x512xf32>, vector<8x512xf32> -> vector<8x512xf32>
    %628 = arith.addf %626, %627 : vector<8x512xf32>
    %629 = vector.extract_strided_slice %628 {offsets = [0, 0], sizes = [8, 128], strides = [1, 1]} : vector<8x512xf32> to vector<8x128xf32>
    %630 = arith.negf %629 : vector<8x128xf32>
    %631 = math.exp %630 : vector<8x128xf32>
    %cst_246 = arith.constant 1.000000e+00 : f32
    %632 = vector.broadcast %cst_246 : f32 to vector<8x128xf32>
    %633 = arith.addf %632, %631 : vector<8x128xf32>
    %634 = arith.divf %632, %633 : vector<8x128xf32>
    %635 = vector.extract_strided_slice %628 {offsets = [0, 128], sizes = [8, 128], strides = [1, 1]} : vector<8x512xf32> to vector<8x128xf32>
    %636 = arith.negf %635 : vector<8x128xf32>
    %637 = math.exp %636 : vector<8x128xf32>
    %cst_247 = arith.constant 1.000000e+00 : f32
    %638 = vector.broadcast %cst_247 : f32 to vector<8x128xf32>
    %639 = arith.addf %638, %637 : vector<8x128xf32>
    %640 = arith.divf %638, %639 : vector<8x128xf32>
    %641 = vector.extract_strided_slice %628 {offsets = [0, 256], sizes = [8, 128], strides = [1, 1]} : vector<8x512xf32> to vector<8x128xf32>
    %642 = math.tanh %641 : vector<8x128xf32>
    %643 = vector.extract_strided_slice %628 {offsets = [0, 384], sizes = [8, 128], strides = [1, 1]} : vector<8x512xf32> to vector<8x128xf32>
    %644 = arith.negf %643 : vector<8x128xf32>
    %645 = math.exp %644 : vector<8x128xf32>
    %cst_248 = arith.constant 1.000000e+00 : f32
    %646 = vector.broadcast %cst_248 : f32 to vector<8x128xf32>
    %647 = arith.addf %646, %645 : vector<8x128xf32>
    %648 = arith.divf %646, %647 : vector<8x128xf32>
    %649 = arith.mulf %640, %598 : vector<8x128xf32>
    %650 = arith.mulf %634, %642 : vector<8x128xf32>
    %651 = arith.addf %649, %650 : vector<8x128xf32>
    %652 = math.tanh %651 : vector<8x128xf32>
    %653 = arith.mulf %648, %652 : vector<8x128xf32>
    %c16_249 = arith.constant 16 : index
    %c0_250 = arith.constant 0 : index
    %654 = vector.load %arg31[%c16_249, %c0_250] : memref<64x512xf32, #tpu.memory_space<vmem>>, vector<8x512xf32>
    %cst_251 = arith.constant dense<0.000000e+00> : vector<8x512xf32>
    %655 = tpu.matmul %653, %564, %cst_251 {dimension_numbers = #tpu.dot_dimension_numbers<[1], [0], [0], [1], [0, 0, 1, 1], [], []>} : vector<8x128xf32>, vector<128x512xf32>, vector<8x512xf32> -> vector<8x512xf32>
    %656 = arith.addf %654, %655 : vector<8x512xf32>
    %657 = vector.extract_strided_slice %656 {offsets = [0, 0], sizes = [8, 128], strides = [1, 1]} : vector<8x512xf32> to vector<8x128xf32>
    %658 = arith.negf %657 : vector<8x128xf32>
    %659 = math.exp %658 : vector<8x128xf32>
    %cst_252 = arith.constant 1.000000e+00 : f32
    %660 = vector.broadcast %cst_252 : f32 to vector<8x128xf32>
    %661 = arith.addf %660, %659 : vector<8x128xf32>
    %662 = arith.divf %660, %661 : vector<8x128xf32>
    %663 = vector.extract_strided_slice %656 {offsets = [0, 128], sizes = [8, 128], strides = [1, 1]} : vector<8x512xf32> to vector<8x128xf32>
    %664 = arith.negf %663 : vector<8x128xf32>
    %665 = math.exp %664 : vector<8x128xf32>
    %cst_253 = arith.constant 1.000000e+00 : f32
    %666 = vector.broadcast %cst_253 : f32 to vector<8x128xf32>
    %667 = arith.addf %666, %665 : vector<8x128xf32>
    %668 = arith.divf %666, %667 : vector<8x128xf32>
    %669 = vector.extract_strided_slice %656 {offsets = [0, 256], sizes = [8, 128], strides = [1, 1]} : vector<8x512xf32> to vector<8x128xf32>
    %670 = math.tanh %669 : vector<8x128xf32>
    %671 = vector.extract_strided_slice %656 {offsets = [0, 384], sizes = [8, 128], strides = [1, 1]} : vector<8x512xf32> to vector<8x128xf32>
    %672 = arith.negf %671 : vector<8x128xf32>
    %673 = math.exp %672 : vector<8x128xf32>
    %cst_254 = arith.constant 1.000000e+00 : f32
    %674 = vector.broadcast %cst_254 : f32 to vector<8x128xf32>
    %675 = arith.addf %674, %673 : vector<8x128xf32>
    %676 = arith.divf %674, %675 : vector<8x128xf32>
    %677 = arith.mulf %668, %651 : vector<8x128xf32>
    %678 = arith.mulf %662, %670 : vector<8x128xf32>
    %679 = arith.addf %677, %678 : vector<8x128xf32>
    %680 = math.tanh %679 : vector<8x128xf32>
    %681 = arith.mulf %676, %680 : vector<8x128xf32>
    %c24_255 = arith.constant 24 : index
    %c0_256 = arith.constant 0 : index
    %682 = vector.load %arg31[%c24_255, %c0_256] : memref<64x512xf32, #tpu.memory_space<vmem>>, vector<8x512xf32>
    %cst_257 = arith.constant dense<0.000000e+00> : vector<8x512xf32>
    %683 = tpu.matmul %681, %564, %cst_257 {dimension_numbers = #tpu.dot_dimension_numbers<[1], [0], [0], [1], [0, 0, 1, 1], [], []>} : vector<8x128xf32>, vector<128x512xf32>, vector<8x512xf32> -> vector<8x512xf32>
    %684 = arith.addf %682, %683 : vector<8x512xf32>
    %685 = vector.extract_strided_slice %684 {offsets = [0, 0], sizes = [8, 128], strides = [1, 1]} : vector<8x512xf32> to vector<8x128xf32>
    %686 = arith.negf %685 : vector<8x128xf32>
    %687 = math.exp %686 : vector<8x128xf32>
    %cst_258 = arith.constant 1.000000e+00 : f32
    %688 = vector.broadcast %cst_258 : f32 to vector<8x128xf32>
    %689 = arith.addf %688, %687 : vector<8x128xf32>
    %690 = arith.divf %688, %689 : vector<8x128xf32>
    %691 = vector.extract_strided_slice %684 {offsets = [0, 128], sizes = [8, 128], strides = [1, 1]} : vector<8x512xf32> to vector<8x128xf32>
    %692 = arith.negf %691 : vector<8x128xf32>
    %693 = math.exp %692 : vector<8x128xf32>
    %cst_259 = arith.constant 1.000000e+00 : f32
    %694 = vector.broadcast %cst_259 : f32 to vector<8x128xf32>
    %695 = arith.addf %694, %693 : vector<8x128xf32>
    %696 = arith.divf %694, %695 : vector<8x128xf32>
    %697 = vector.extract_strided_slice %684 {offsets = [0, 256], sizes = [8, 128], strides = [1, 1]} : vector<8x512xf32> to vector<8x128xf32>
    %698 = math.tanh %697 : vector<8x128xf32>
    %699 = vector.extract_strided_slice %684 {offsets = [0, 384], sizes = [8, 128], strides = [1, 1]} : vector<8x512xf32> to vector<8x128xf32>
    %700 = arith.negf %699 : vector<8x128xf32>
    %701 = math.exp %700 : vector<8x128xf32>
    %cst_260 = arith.constant 1.000000e+00 : f32
    %702 = vector.broadcast %cst_260 : f32 to vector<8x128xf32>
    %703 = arith.addf %702, %701 : vector<8x128xf32>
    %704 = arith.divf %702, %703 : vector<8x128xf32>
    %705 = arith.mulf %696, %679 : vector<8x128xf32>
    %706 = arith.mulf %690, %698 : vector<8x128xf32>
    %707 = arith.addf %705, %706 : vector<8x128xf32>
    %708 = math.tanh %707 : vector<8x128xf32>
    %709 = arith.mulf %704, %708 : vector<8x128xf32>
    %c32_261 = arith.constant 32 : index
    %c0_262 = arith.constant 0 : index
    %710 = vector.load %arg31[%c32_261, %c0_262] : memref<64x512xf32, #tpu.memory_space<vmem>>, vector<8x512xf32>
    %cst_263 = arith.constant dense<0.000000e+00> : vector<8x512xf32>
    %711 = tpu.matmul %709, %564, %cst_263 {dimension_numbers = #tpu.dot_dimension_numbers<[1], [0], [0], [1], [0, 0, 1, 1], [], []>} : vector<8x128xf32>, vector<128x512xf32>, vector<8x512xf32> -> vector<8x512xf32>
    %712 = arith.addf %710, %711 : vector<8x512xf32>
    %713 = vector.extract_strided_slice %712 {offsets = [0, 0], sizes = [8, 128], strides = [1, 1]} : vector<8x512xf32> to vector<8x128xf32>
    %714 = arith.negf %713 : vector<8x128xf32>
    %715 = math.exp %714 : vector<8x128xf32>
    %cst_264 = arith.constant 1.000000e+00 : f32
    %716 = vector.broadcast %cst_264 : f32 to vector<8x128xf32>
    %717 = arith.addf %716, %715 : vector<8x128xf32>
    %718 = arith.divf %716, %717 : vector<8x128xf32>
    %719 = vector.extract_strided_slice %712 {offsets = [0, 128], sizes = [8, 128], strides = [1, 1]} : vector<8x512xf32> to vector<8x128xf32>
    %720 = arith.negf %719 : vector<8x128xf32>
    %721 = math.exp %720 : vector<8x128xf32>
    %cst_265 = arith.constant 1.000000e+00 : f32
    %722 = vector.broadcast %cst_265 : f32 to vector<8x128xf32>
    %723 = arith.addf %722, %721 : vector<8x128xf32>
    %724 = arith.divf %722, %723 : vector<8x128xf32>
    %725 = vector.extract_strided_slice %712 {offsets = [0, 256], sizes = [8, 128], strides = [1, 1]} : vector<8x512xf32> to vector<8x128xf32>
    %726 = math.tanh %725 : vector<8x128xf32>
    %727 = vector.extract_strided_slice %712 {offsets = [0, 384], sizes = [8, 128], strides = [1, 1]} : vector<8x512xf32> to vector<8x128xf32>
    %728 = arith.negf %727 : vector<8x128xf32>
    %729 = math.exp %728 : vector<8x128xf32>
    %cst_266 = arith.constant 1.000000e+00 : f32
    %730 = vector.broadcast %cst_266 : f32 to vector<8x128xf32>
    %731 = arith.addf %730, %729 : vector<8x128xf32>
    %732 = arith.divf %730, %731 : vector<8x128xf32>
    %733 = arith.mulf %724, %707 : vector<8x128xf32>
    %734 = arith.mulf %718, %726 : vector<8x128xf32>
    %735 = arith.addf %733, %734 : vector<8x128xf32>
    %736 = math.tanh %735 : vector<8x128xf32>
    %737 = arith.mulf %732, %736 : vector<8x128xf32>
    %c40_267 = arith.constant 40 : index
    %c0_268 = arith.constant 0 : index
    %738 = vector.load %arg31[%c40_267, %c0_268] : memref<64x512xf32, #tpu.memory_space<vmem>>, vector<8x512xf32>
    %cst_269 = arith.constant dense<0.000000e+00> : vector<8x512xf32>
    %739 = tpu.matmul %737, %564, %cst_269 {dimension_numbers = #tpu.dot_dimension_numbers<[1], [0], [0], [1], [0, 0, 1, 1], [], []>} : vector<8x128xf32>, vector<128x512xf32>, vector<8x512xf32> -> vector<8x512xf32>
    %740 = arith.addf %738, %739 : vector<8x512xf32>
    %741 = vector.extract_strided_slice %740 {offsets = [0, 0], sizes = [8, 128], strides = [1, 1]} : vector<8x512xf32> to vector<8x128xf32>
    %742 = arith.negf %741 : vector<8x128xf32>
    %743 = math.exp %742 : vector<8x128xf32>
    %cst_270 = arith.constant 1.000000e+00 : f32
    %744 = vector.broadcast %cst_270 : f32 to vector<8x128xf32>
    %745 = arith.addf %744, %743 : vector<8x128xf32>
    %746 = arith.divf %744, %745 : vector<8x128xf32>
    %747 = vector.extract_strided_slice %740 {offsets = [0, 128], sizes = [8, 128], strides = [1, 1]} : vector<8x512xf32> to vector<8x128xf32>
    %748 = arith.negf %747 : vector<8x128xf32>
    %749 = math.exp %748 : vector<8x128xf32>
    %cst_271 = arith.constant 1.000000e+00 : f32
    %750 = vector.broadcast %cst_271 : f32 to vector<8x128xf32>
    %751 = arith.addf %750, %749 : vector<8x128xf32>
    %752 = arith.divf %750, %751 : vector<8x128xf32>
    %753 = vector.extract_strided_slice %740 {offsets = [0, 256], sizes = [8, 128], strides = [1, 1]} : vector<8x512xf32> to vector<8x128xf32>
    %754 = math.tanh %753 : vector<8x128xf32>
    %755 = vector.extract_strided_slice %740 {offsets = [0, 384], sizes = [8, 128], strides = [1, 1]} : vector<8x512xf32> to vector<8x128xf32>
    %756 = arith.negf %755 : vector<8x128xf32>
    %757 = math.exp %756 : vector<8x128xf32>
    %cst_272 = arith.constant 1.000000e+00 : f32
    %758 = vector.broadcast %cst_272 : f32 to vector<8x128xf32>
    %759 = arith.addf %758, %757 : vector<8x128xf32>
    %760 = arith.divf %758, %759 : vector<8x128xf32>
    %761 = arith.mulf %752, %735 : vector<8x128xf32>
    %762 = arith.mulf %746, %754 : vector<8x128xf32>
    %763 = arith.addf %761, %762 : vector<8x128xf32>
    %764 = math.tanh %763 : vector<8x128xf32>
    %765 = arith.mulf %760, %764 : vector<8x128xf32>
    %c48_273 = arith.constant 48 : index
    %c0_274 = arith.constant 0 : index
    %766 = vector.load %arg31[%c48_273, %c0_274] : memref<64x512xf32, #tpu.memory_space<vmem>>, vector<8x512xf32>
    %cst_275 = arith.constant dense<0.000000e+00> : vector<8x512xf32>
    %767 = tpu.matmul %765, %564, %cst_275 {dimension_numbers = #tpu.dot_dimension_numbers<[1], [0], [0], [1], [0, 0, 1, 1], [], []>} : vector<8x128xf32>, vector<128x512xf32>, vector<8x512xf32> -> vector<8x512xf32>
    %768 = arith.addf %766, %767 : vector<8x512xf32>
    %769 = vector.extract_strided_slice %768 {offsets = [0, 0], sizes = [8, 128], strides = [1, 1]} : vector<8x512xf32> to vector<8x128xf32>
    %770 = arith.negf %769 : vector<8x128xf32>
    %771 = math.exp %770 : vector<8x128xf32>
    %cst_276 = arith.constant 1.000000e+00 : f32
    %772 = vector.broadcast %cst_276 : f32 to vector<8x128xf32>
    %773 = arith.addf %772, %771 : vector<8x128xf32>
    %774 = arith.divf %772, %773 : vector<8x128xf32>
    %775 = vector.extract_strided_slice %768 {offsets = [0, 128], sizes = [8, 128], strides = [1, 1]} : vector<8x512xf32> to vector<8x128xf32>
    %776 = arith.negf %775 : vector<8x128xf32>
    %777 = math.exp %776 : vector<8x128xf32>
    %cst_277 = arith.constant 1.000000e+00 : f32
    %778 = vector.broadcast %cst_277 : f32 to vector<8x128xf32>
    %779 = arith.addf %778, %777 : vector<8x128xf32>
    %780 = arith.divf %778, %779 : vector<8x128xf32>
    %781 = vector.extract_strided_slice %768 {offsets = [0, 256], sizes = [8, 128], strides = [1, 1]} : vector<8x512xf32> to vector<8x128xf32>
    %782 = math.tanh %781 : vector<8x128xf32>
    %783 = vector.extract_strided_slice %768 {offsets = [0, 384], sizes = [8, 128], strides = [1, 1]} : vector<8x512xf32> to vector<8x128xf32>
    %784 = arith.negf %783 : vector<8x128xf32>
    %785 = math.exp %784 : vector<8x128xf32>
    %cst_278 = arith.constant 1.000000e+00 : f32
    %786 = vector.broadcast %cst_278 : f32 to vector<8x128xf32>
    %787 = arith.addf %786, %785 : vector<8x128xf32>
    %788 = arith.divf %786, %787 : vector<8x128xf32>
    %789 = arith.mulf %780, %763 : vector<8x128xf32>
    %790 = arith.mulf %774, %782 : vector<8x128xf32>
    %791 = arith.addf %789, %790 : vector<8x128xf32>
    %792 = math.tanh %791 : vector<8x128xf32>
    %793 = arith.mulf %788, %792 : vector<8x128xf32>
    %c56_279 = arith.constant 56 : index
    %c0_280 = arith.constant 0 : index
    %794 = vector.load %arg31[%c56_279, %c0_280] : memref<64x512xf32, #tpu.memory_space<vmem>>, vector<8x512xf32>
    %cst_281 = arith.constant dense<0.000000e+00> : vector<8x512xf32>
    %795 = tpu.matmul %793, %564, %cst_281 {dimension_numbers = #tpu.dot_dimension_numbers<[1], [0], [0], [1], [0, 0, 1, 1], [], []>} : vector<8x128xf32>, vector<128x512xf32>, vector<8x512xf32> -> vector<8x512xf32>
    %796 = arith.addf %794, %795 : vector<8x512xf32>
    %797 = vector.extract_strided_slice %796 {offsets = [0, 0], sizes = [8, 128], strides = [1, 1]} : vector<8x512xf32> to vector<8x128xf32>
    %798 = arith.negf %797 : vector<8x128xf32>
    %799 = math.exp %798 : vector<8x128xf32>
    %cst_282 = arith.constant 1.000000e+00 : f32
    %800 = vector.broadcast %cst_282 : f32 to vector<8x128xf32>
    %801 = arith.addf %800, %799 : vector<8x128xf32>
    %802 = arith.divf %800, %801 : vector<8x128xf32>
    %803 = vector.extract_strided_slice %796 {offsets = [0, 128], sizes = [8, 128], strides = [1, 1]} : vector<8x512xf32> to vector<8x128xf32>
    %804 = arith.negf %803 : vector<8x128xf32>
    %805 = math.exp %804 : vector<8x128xf32>
    %cst_283 = arith.constant 1.000000e+00 : f32
    %806 = vector.broadcast %cst_283 : f32 to vector<8x128xf32>
    %807 = arith.addf %806, %805 : vector<8x128xf32>
    %808 = arith.divf %806, %807 : vector<8x128xf32>
    %809 = vector.extract_strided_slice %796 {offsets = [0, 256], sizes = [8, 128], strides = [1, 1]} : vector<8x512xf32> to vector<8x128xf32>
    %810 = math.tanh %809 : vector<8x128xf32>
    %811 = vector.extract_strided_slice %796 {offsets = [0, 384], sizes = [8, 128], strides = [1, 1]} : vector<8x512xf32> to vector<8x128xf32>
    %812 = arith.negf %811 : vector<8x128xf32>
    %813 = math.exp %812 : vector<8x128xf32>
    %cst_284 = arith.constant 1.000000e+00 : f32
    %814 = vector.broadcast %cst_284 : f32 to vector<8x128xf32>
    %815 = arith.addf %814, %813 : vector<8x128xf32>
    %816 = arith.divf %814, %815 : vector<8x128xf32>
    %817 = arith.mulf %808, %791 : vector<8x128xf32>
    %818 = arith.mulf %802, %810 : vector<8x128xf32>
    %819 = arith.addf %817, %818 : vector<8x128xf32>
    %820 = math.tanh %819 : vector<8x128xf32>
    %821 = arith.mulf %816, %820 : vector<8x128xf32>
    %c0_285 = arith.constant 0 : index
    %c0_286 = arith.constant 0 : index
    %822 = vector.load %arg22[%c0_285, %c0_286] : memref<128x128xf32, #tpu.memory_space<vmem>>, vector<128x128xf32>
    %cst_287 = arith.constant dense<0.000000e+00> : vector<8x128xf32>
    %823 = tpu.matmul %821, %822, %cst_287 {dimension_numbers = #tpu.dot_dimension_numbers<[1], [0], [0], [1], [0, 0, 1, 1], [], []>} : vector<8x128xf32>, vector<128x128xf32>, vector<8x128xf32> -> vector<8x128xf32>
    %c0_288 = arith.constant 0 : index
    %c0_289 = arith.constant 0 : index
    %824 = vector.load %arg23[%c0_288, %c0_289] : memref<128x128xf32, #tpu.memory_space<vmem>>, vector<128x128xf32>
    %cst_290 = arith.constant dense<0.000000e+00> : vector<8x128xf32>
    %825 = tpu.matmul %625, %824, %cst_290 {dimension_numbers = #tpu.dot_dimension_numbers<[1], [0], [0], [1], [0, 0, 1, 1], [], []>} : vector<8x128xf32>, vector<128x128xf32>, vector<8x128xf32> -> vector<8x128xf32>
    %826 = arith.addf %823, %825 : vector<8x128xf32>
    %c0_291 = arith.constant 0 : index
    %c0_292 = arith.constant 0 : index
    %827 = vector.load %arg24[%c0_291, %c0_292] : memref<1x128xf32, #tpu.memory_space<vmem>>, vector<1x128xf32>
    %828 = vector.broadcast %827 : vector<1x128xf32> to vector<8x128xf32>
    %829 = arith.addf %826, %828 : vector<8x128xf32>
    %c0_293 = arith.constant 0 : index
    %c0_294 = arith.constant 0 : index
    %830 = vector.load %arg27[%c0_293, %c0_294] : memref<8x128xf32, #tpu.memory_space<vmem>>, vector<8x128xf32>
    tpu.vector_store %arg27[%c0_293, %c0_294], %829 {strides = array<i32>} : memref<8x128xf32, #tpu.memory_space<vmem>>, vector<8x128xf32>,
    %c0_295 = arith.constant 0 : index
    %c0_296 = arith.constant 0 : index
    %831 = vector.load %arg25[%c0_295, %c0_296] : memref<128x512xf32, #tpu.memory_space<vmem>>, vector<128x512xf32>
    %cst_297 = arith.constant dense<0.000000e+00> : vector<8x512xf32>
    %832 = tpu.matmul %829, %831, %cst_297 {dimension_numbers = #tpu.dot_dimension_numbers<[1], [0], [0], [1], [0, 0, 1, 1], [], []>} : vector<8x128xf32>, vector<128x512xf32>, vector<8x512xf32> -> vector<8x512xf32>
    %c0_298 = arith.constant 0 : index
    %c0_299 = arith.constant 0 : index
    %833 = vector.load %arg26[%c0_298, %c0_299] : memref<1x512xf32, #tpu.memory_space<vmem>>, vector<1x512xf32>
    %834 = vector.broadcast %833 : vector<1x512xf32> to vector<8x512xf32>
    %835 = arith.addf %832, %834 : vector<8x512xf32>
    %c0_300 = arith.constant 0 : index
    %c0_301 = arith.constant 0 : index
    %836 = vector.load %arg28[%c0_300, %c0_301] : memref<8x512xf32, #tpu.memory_space<vmem>>, vector<8x512xf32>
    tpu.vector_store %arg28[%c0_300, %c0_301], %835 {strides = array<i32>} : memref<8x512xf32, #tpu.memory_space<vmem>>, vector<8x512xf32>,
    return
  }
  func.func @transform_0(%arg0: i32) -> (i32, i32) {
    %c0_i32 = arith.constant 0 : i32
    %c0_i32_0 = arith.constant 0 : i32
    %c0_i32_1 = arith.constant 0 : i32
    return %c0_i32, %c0_i32_0 : i32, i32
  }
  func.func @transform_1(%arg0: i32) -> (i32, i32, i32) {
    %c0_i32 = arith.constant 0 : i32
    %c0_i32_0 = arith.constant 0 : i32
    %c0_i32_1 = arith.constant 0 : i32
    %c0_i32_2 = arith.constant 0 : i32
    return %c0_i32, %c0_i32_0, %c0_i32_1 : i32, i32, i32
  }
  func.func @transform_2(%arg0: i32) -> (i32, i32, i32) {
    %c0_i32 = arith.constant 0 : i32
    %c0_i32_0 = arith.constant 0 : i32
    %c0_i32_1 = arith.constant 0 : i32
    %c0_i32_2 = arith.constant 0 : i32
    return %c0_i32, %c0_i32_0, %c0_i32_1 : i32, i32, i32
  }
  func.func @transform_3(%arg0: i32) -> (i32, i32) {
    %c0_i32 = arith.constant 0 : i32
    %c0_i32_0 = arith.constant 0 : i32
    %c0_i32_1 = arith.constant 0 : i32
    return %c0_i32, %c0_i32_0 : i32, i32
  }
  func.func @transform_4(%arg0: i32) -> (i32, i32) {
    %c0_i32 = arith.constant 0 : i32
    %c0_i32_0 = arith.constant 0 : i32
    %c0_i32_1 = arith.constant 0 : i32
    return %c0_i32, %c0_i32_0 : i32, i32
  }
  func.func @transform_5(%arg0: i32) -> (i32, i32, i32) {
    %c0_i32 = arith.constant 0 : i32
    %c0_i32_0 = arith.constant 0 : i32
    %c0_i32_1 = arith.constant 0 : i32
    %c0_i32_2 = arith.constant 0 : i32
    return %c0_i32, %c0_i32_0, %c0_i32_1 : i32, i32, i32
  }
  func.func @transform_6(%arg0: i32) -> (i32, i32) {
    %c0_i32 = arith.constant 0 : i32
    %c0_i32_0 = arith.constant 0 : i32
    %c0_i32_1 = arith.constant 0 : i32
    return %c0_i32, %c0_i32_0 : i32, i32
  }
  func.func @transform_7(%arg0: i32) -> (i32, i32) {
    %c0_i32 = arith.constant 0 : i32
    %c0_i32_0 = arith.constant 0 : i32
    %c0_i32_1 = arith.constant 0 : i32
    return %c0_i32, %c0_i32_0 : i32, i32
  }
  func.func @transform_8(%arg0: i32) -> (i32, i32) {
    %c0_i32 = arith.constant 0 : i32
    %c0_i32_0 = arith.constant 0 : i32
    %c0_i32_1 = arith.constant 0 : i32
    return %c0_i32, %c0_i32_0 : i32, i32
  }
  func.func @transform_9(%arg0: i32) -> (i32, i32) {
    %c0_i32 = arith.constant 0 : i32
    %c0_i32_0 = arith.constant 0 : i32
    %c0_i32_1 = arith.constant 0 : i32
    return %c0_i32, %c0_i32_0 : i32, i32
  }
  func.func @transform_10(%arg0: i32) -> (i32, i32) {
    %c0_i32 = arith.constant 0 : i32
    %c0_i32_0 = arith.constant 0 : i32
    %c0_i32_1 = arith.constant 0 : i32
    return %c0_i32, %c0_i32_0 : i32, i32
  }
  func.func @transform_11(%arg0: i32) -> (i32, i32) {
    %c0_i32 = arith.constant 0 : i32
    %c0_i32_0 = arith.constant 0 : i32
    %c0_i32_1 = arith.constant 0 : i32
    return %c0_i32, %c0_i32_0 : i32, i32
  }
  func.func @transform_12(%arg0: i32) -> (i32, i32) {
    %c0_i32 = arith.constant 0 : i32
    %c0_i32_0 = arith.constant 0 : i32
    %c0_i32_1 = arith.constant 0 : i32
    return %c0_i32, %c0_i32_0 : i32, i32
  }
  func.func @transform_13(%arg0: i32) -> (i32, i32) {
    %c0_i32 = arith.constant 0 : i32
    %c0_i32_0 = arith.constant 0 : i32
    %c0_i32_1 = arith.constant 0 : i32
    return %c0_i32, %c0_i32_0 : i32, i32
  }
  func.func @transform_14(%arg0: i32) -> (i32, i32) {
    %c0_i32 = arith.constant 0 : i32
    %c0_i32_0 = arith.constant 0 : i32
    %c0_i32_1 = arith.constant 0 : i32
    return %c0_i32, %c0_i32_0 : i32, i32
  }
  func.func @transform_15(%arg0: i32) -> (i32, i32) {
    %c0_i32 = arith.constant 0 : i32
    %c0_i32_0 = arith.constant 0 : i32
    %c0_i32_1 = arith.constant 0 : i32
    return %c0_i32, %c0_i32_0 : i32, i32
  }
  func.func @transform_16(%arg0: i32) -> (i32, i32) {
    %c0_i32 = arith.constant 0 : i32
    %c0_i32_0 = arith.constant 0 : i32
    %c0_i32_1 = arith.constant 0 : i32
    return %c0_i32, %c0_i32_0 : i32, i32
  }
  func.func @transform_17(%arg0: i32) -> (i32, i32) {
    %c0_i32 = arith.constant 0 : i32
    %c0_i32_0 = arith.constant 0 : i32
    %c0_i32_1 = arith.constant 0 : i32
    return %c0_i32, %c0_i32_0 : i32, i32
  }
  func.func @transform_18(%arg0: i32) -> (i32, i32) {
    %c0_i32 = arith.constant 0 : i32
    %c0_i32_0 = arith.constant 0 : i32
    %c0_i32_1 = arith.constant 0 : i32
    return %c0_i32, %c0_i32_0 : i32, i32
  }
  func.func @transform_19(%arg0: i32) -> (i32, i32) {
    %c0_i32 = arith.constant 0 : i32
    %c0_i32_0 = arith.constant 0 : i32
    %c0_i32_1 = arith.constant 0 : i32
    return %c0_i32, %c0_i32_0 : i32, i32
  }
  func.func @transform_20(%arg0: i32) -> (i32, i32) {
    %c0_i32 = arith.constant 0 : i32
    %c0_i32_0 = arith.constant 0 : i32
    %c0_i32_1 = arith.constant 0 : i32
    return %c0_i32, %c0_i32_0 : i32, i32
  }
  func.func @transform_21(%arg0: i32) -> (i32, i32) {
    %c0_i32 = arith.constant 0 : i32
    %c0_i32_0 = arith.constant 0 : i32
    %c0_i32_1 = arith.constant 0 : i32
    return %c0_i32, %c0_i32_0 : i32, i32
  }
  func.func @transform_22(%arg0: i32) -> (i32, i32) {
    %c0_i32 = arith.constant 0 : i32
    %c0_i32_0 = arith.constant 0 : i32
    %c0_i32_1 = arith.constant 0 : i32
    return %c0_i32, %c0_i32_0 : i32, i32
  }
  func.func @transform_23(%arg0: i32) -> (i32, i32) {
    %c0_i32 = arith.constant 0 : i32
    %c0_i32_0 = arith.constant 0 : i32
    %c0_i32_1 = arith.constant 0 : i32
    return %c0_i32, %c0_i32_0 : i32, i32
  }
  func.func @transform_24(%arg0: i32) -> (i32, i32) {
    %c0_i32 = arith.constant 0 : i32
    %c0_i32_0 = arith.constant 0 : i32
    %c0_i32_1 = arith.constant 0 : i32
    return %c0_i32, %c0_i32_0 : i32, i32
  }
  func.func @transform_25(%arg0: i32) -> (i32, i32) {
    %c0_i32 = arith.constant 0 : i32
    %c0_i32_0 = arith.constant 0 : i32
    %c0_i32_1 = arith.constant 0 : i32
    return %c0_i32, %c0_i32_0 : i32, i32
  }
  func.func @transform_26(%arg0: i32) -> (i32, i32) {
    %c0_i32 = arith.constant 0 : i32
    %c0_i32_0 = arith.constant 0 : i32
    %c0_i32_1 = arith.constant 0 : i32
    return %c0_i32, %c0_i32_0 : i32, i32
  }
  func.func @transform_27(%arg0: i32) -> (i32, i32) {
    %c0_i32 = arith.constant 0 : i32
    %c0_i32_0 = arith.constant 0 : i32
    %c0_i32_1 = arith.constant 0 : i32
    return %c0_i32, %c0_i32_0 : i32, i32
  }
}

</mosaic_0001>

<bundles_post_ra>
// kernel: autoencoder_forward.1
= control target key start
LH: loop header
LB: loop body
LE: loop exit
PB: predicated region body
PF: predicated region fallthrough
CT: control target
= control target key end

     0   :  { %s14885_s0 = inlined_call_operand.vmem [shape: f32[32,10], index: 0, kind: input, shape index: {}]   ;;  %s14886_s1 = inlined_call_operand.hbm [shape: f32[5,32,32], index: 1, kind: input, shape index: {}]   ;;  %s14887_s2 = inlined_call_operand.hbm [shape: f32[2,64,32], index: 2, kind: input, shape index: {}]   ;;  %s14888_s3 = inlined_call_operand.vmem [shape: f32[10,32], index: 3, kind: input, shape index: {}]   ;;  %s14889_s4 = inlined_call_operand.vmem [shape: f32[1,32], index: 4, kind: input, shape index: {}]   ;;  %s14890_s5 = inlined_call_operand.hbm [shape: f32[5,32,64], index: 5, kind: input, shape index: {}]   ;;  %s14891_s6 = inlined_call_operand.vmem [shape: f32[1,64], index: 6, kind: input, shape index: {}]   ;;  %s14892_s7 = inlined_call_operand.vmem [shape: f32[64,512], index: 7, kind: input, shape index: {}]   ;;  %s14893_s8 = inlined_call_operand.hbm [shape: f32[128,512], index: 8, kind: input, shape index: {}]   ;;  %s14894_s9 = inlined_call_operand.vmem [shape: f32[1,512], index: 9, kind: input, shape index: {}]   ;;  %s14895_s10 = inlined_call_operand.hbm [shape: f32[64,512], index: 10, kind: input, shape index: {}]   ;;  %s14896_s11 = inlined_call_operand.hbm [shape: f32[128,512], index: 11, kind: input, shape index: {}]   ;;  %s14897_s12 = inlined_call_operand.vmem [shape: f32[1,512], index: 12, kind: input, shape index: {}]   ;;  %s14898_s13 = inlined_call_operand.hbm [shape: f32[128,512], index: 13, kind: input, shape index: {}]   ;;  %s14899_s14 = inlined_call_operand.hbm [shape: f32[128,512], index: 14, kind: input, shape index: {}]   ;;  %s14900_s15 = inlined_call_operand.hbm [shape: f32[128,512], index: 15, kind: input, shape index: {}]   ;;  %s14901_s16 = inlined_call_operand.vmem [shape: f32[1,512], index: 16, kind: input, shape index: {}]   ;;  %s14902_s17 = inlined_call_operand.hbm [shape: f32[128,512], index: 17, kind: input, shape index: {}]   ;;  %s14903_s18 = inlined_call_operand.hbm [shape: f32[128,512], index: 18, kind: input, shape index: {}]   ;;  %s14904_s19 = inlined_call_operand.hbm [shape: f32[128,512], index: 19, kind: input, shape index: {}]   ;;  %s14905_s20 = inlined_call_operand.hbm [shape: f32[1,512], index: 20, kind: input, shape index: {}]   ;;  %s14906_s21 = inlined_call_operand.hbm [shape: f32[128,128], index: 21, kind: input, shape index: {}]   ;;  %s14907_s22 = inlined_call_operand.hbm [shape: f32[128,128], index: 22, kind: input, shape index: {}]   ;;  %s14908_s23 = inlined_call_operand.vmem [shape: f32[1,128], index: 23, kind: input, shape index: {}]   ;;  %s14909_s24 = inlined_call_operand.hbm [shape: f32[128,512], index: 24, kind: input, shape index: {}]   ;;  %s14910_s25 = inlined_call_operand.hbm [shape: f32[1,512], index: 25, kind: input, shape index: {}]   ;;  %s14911_s26 = inlined_call_operand.vmem [shape: f32[8,128], index: 26, kind: output, shape index: {0}]   ;;  %s14912_s27 = inlined_call_operand.vmem [shape: f32[8,512], index: 27, kind: output, shape index: {1}]  }
   0x1   :  { %15037 = sst [smem:[#allocation88_spill]] %s14885_s0 }
   0x2   :  { %15038 = sst [smem:[#allocation89_spill]] %s14886_s1 }
   0x3   :  { %15039 = sst [smem:[#allocation90_spill]] %s14887_s2 }
   0x4   :  { %15040 = sst [smem:[#allocation91_spill]] %s14888_s3 }
   0x5   :  { %15041 = sst [smem:[#allocation92_spill]] %s14889_s4 }
   0x6   :  { %15042 = sst [smem:[#allocation93_spill]] %s14890_s5 }
   0x7   :  { %15043 = sst [smem:[#allocation94_spill]] %s14891_s6 }
   0x8   :  { %15044 = sst [smem:[#allocation95_spill]] %s14892_s7 }
   0x9   :  { %15045 = sst [smem:[#allocation96_spill]] %s14893_s8 }
   0xa   :  { %15046 = sst [smem:[#allocation97_spill]] %s14894_s9 }
   0xb   :  { %15047 = sst [smem:[#allocation98_spill]] %s14895_s10 }
   0xc   :  { %15048 = sst [smem:[#allocation99_spill]] %s14896_s11 }
   0xd   :  { %15049 = sst [smem:[#allocation100_spill]] %s14908_s23 }
   0xe   :  { %15050 = sst [smem:[#allocation101_spill]] %s14911_s26 }
   0xf   :  { %15051 = sst [smem:[#allocation102_spill]] %s14912_s27 }
  0x10   :  { %33 = vsyncpa [#allocation9], 0 }
  0x11   :  { %34 = vsyncpa [#allocation11], 0 }
  0x12   :  { %35 = vsyncpa [#allocation14], 0 }
  0x13   :  { %36 = vsyncpa [#allocation17], 0 }
  0x14   :  { %37 = vsyncpa [#allocation20], 0 }
  0x15   :  { %38 = vsyncpa [#allocation23], 0 }
  0x16   :  { %39 = vsyncpa [#allocation26], 0 }
  0x17   :  { %40 = vsyncpa [#allocation29], 0 }
  0x18   :  { %41 = vsyncpa [#allocation32], 0  ;;  %s12614_s7 = smov [#allocation10]   ;;  %s12615_s8 = smov [#allocation13]  }
  0x19   :  { %s61_s4 = sshll.u32 %s12614_s7, 4  ;;  %s93_s30 = sshll.u32 %s12615_s8, 4  ;;  %s62_s4 = int_to_ptr.vmem [resolvable:$true] %s61_s4  ;;  %s12779_s30 = int_to_ptr.vmem [resolvable:$true] %s93_s30 }
  0x1a   :  { %s15052_s28 = sld [smem:[#allocation90_spill]] }
  0x20   :  { %s12222_s0 = scalar_lea.hbm %s15052_s28, 2048 }
  0x21   :  { %p12223_p0 = scmp.ne.s32.totalorder %s15052_s28, %s12222_s0  ;;  %p12226_p1 = scmp.lt.u32.totalorder %s12222_s0, %s15052_s28 }
  0x23   :  { %p12228_p2 = pnand %p12226_p1, %p12223_p0 }
  0x25   :  { %12231 = shalt.err (!%p12228_p2)
}
  0x26   :  { %s12232_s11 = scalar_lea.vmem %s62_s4, 2048  ;;  %p12237_p4 = scmp.lt.s32.totalorder %s62_s4, %s62_s4 }
  0x27   :  { %p12233_p3 = scmp.ne.s32.totalorder %s62_s4, %s12232_s11  ;;  %p12238_p5 = scmp.lt.s32.totalorder %s12232_s11, %s12232_s11 }
  0x29   :  { %p12239_p6 = por %p12238_p5, %p12237_p4 }
  0x2b   :  { %p12240_p7 = pnand %p12239_p6, %p12233_p3 }
  0x2d   :  { %12243 = shalt.err (!%p12240_p7)
}
  0x2e   :  { %s14923_s2 = smov 128   ;;  %s14925_s3 = smov 8  }
  0x2f   :  { %67 = dma.hbm_to_vmem [thread:$0]  %s15052_s28, 2048, %s62_s4, [#allocation11], %s14923_s2, %s14923_s2, %s14925_s3  }
  0x30   :  { %s15053_s0 = sld [smem:[#allocation96_spill]] }
  0x36   :  { %s12244_s10 = scalar_lea.hbm %s15053_s0, 8192 }
  0x37   :  { %p12245_p8 = scmp.ne.s32.totalorder %s15053_s0, %s12244_s10  ;;  %p12248_p9 = scmp.lt.u32.totalorder %s12244_s10, %s15053_s0 }
  0x39   :  { %p12250_p10 = pnand %p12248_p9, %p12245_p8 }
  0x3b   :  { %12253 = shalt.err (!%p12250_p10)
}
  0x3c   :  { %s12254_s27 = scalar_lea.vmem %s12779_s30, 8192  ;;  %p12259_p12 = scmp.lt.s32.totalorder %s12779_s30, %s12779_s30 }
  0x3d   :  { %p12255_p11 = scmp.ne.s32.totalorder %s12779_s30, %s12254_s27  ;;  %p12260_p13 = scmp.lt.s32.totalorder %s12254_s27, %s12254_s27 }
  0x3f   :  { %p12261_p0 = por %p12260_p13, %p12259_p12 }
  0x41   :  { %p12262_p1 = pnand %p12261_p0, %p12255_p11 }
  0x43   :  { %12265 = shalt.err (!%p12262_p1)
}
  0x44   :  { %s12618_s4 = smov 512   ;;  %s12619_s28 = smov 32  }
  0x45   :  { %99 = dma.hbm_to_vmem [thread:$0]  %s15053_s0, 8192, %s12779_s30, [#allocation14], %s12618_s4, %s12618_s4, %s12619_s28  }
  0x46   :  { %s12620_s9 = smov [#allocation16]   ;;  %s12621_s10 = smov [#allocation19]  }
  0x47   :  { %s119_s5 = sshll.u32 %s12620_s9, 4  ;;  %s145_s29 = sshll.u32 %s12621_s10, 4  ;;  %s120_s5 = int_to_ptr.vmem [resolvable:$true] %s119_s5  ;;  %s12816_s29 = int_to_ptr.vmem [resolvable:$true] %s145_s29 }
  0x48   :  { %s15054_s6 = sld [smem:[#allocation99_spill]] }
  0x4e   :  { %s12266_s11 = scalar_lea.hbm %s15054_s6, 8192 }
  0x4f   :  { %p12267_p2 = scmp.ne.s32.totalorder %s15054_s6, %s12266_s11  ;;  %p12270_p3 = scmp.lt.u32.totalorder %s12266_s11, %s15054_s6 }
  0x51   :  { %p12272_p4 = pnand %p12270_p3, %p12267_p2 }
  0x53   :  { %12275 = shalt.err (!%p12272_p4)
}
  0x54   :  { %s12276_s30 = scalar_lea.vmem %s120_s5, 8192  ;;  %p12281_p6 = scmp.lt.s32.totalorder %s120_s5, %s120_s5 }
  0x55   :  { %p12277_p5 = scmp.ne.s32.totalorder %s120_s5, %s12276_s30  ;;  %p12282_p7 = scmp.lt.s32.totalorder %s12276_s30, %s12276_s30 }
  0x57   :  { %p12283_p8 = por %p12282_p7, %p12281_p6 }
  0x59   :  { %p12284_p9 = pnand %p12283_p8, %p12277_p5 }
  0x5b   :  { %12287 = shalt.err (!%p12284_p9)
}
  0x5c   :  { %125 = dma.hbm_to_vmem [thread:$0]  %s15054_s6, 8192, %s120_s5, [#allocation17], %s12618_s4, %s12618_s4, %s12619_s28  }
  0x5d   :  { %s12288_s23 = scalar_lea.hbm %s14899_s14, 8192 }
  0x5e   :  { %p12289_p10 = scmp.ne.s32.totalorder %s14899_s14, %s12288_s23  ;;  %p12292_p11 = scmp.lt.u32.totalorder %s12288_s23, %s14899_s14 }
  0x60   :  { %p12294_p12 = pnand %p12292_p11, %p12289_p10 }
  0x62   :  { %12297 = shalt.err (!%p12294_p12)
}
  0x63   :  { %s12298_s27 = scalar_lea.vmem %s12816_s29, 8192  ;;  %p12303_p0 = scmp.lt.s32.totalorder %s12816_s29, %s12816_s29 }
  0x64   :  { %p12299_p13 = scmp.ne.s32.totalorder %s12816_s29, %s12298_s27  ;;  %p12304_p1 = scmp.lt.s32.totalorder %s12298_s27, %s12298_s27 }
  0x66   :  { %p12305_p2 = por %p12304_p1, %p12303_p0 }
  0x68   :  { %p12306_p3 = pnand %p12305_p2, %p12299_p13 }
  0x6a   :  { %12309 = shalt.err (!%p12306_p3)
}
  0x6b   :  { %151 = dma.hbm_to_vmem [thread:$0]  %s14899_s14, 8192, %s12816_s29, [#allocation20], %s12618_s4, %s12618_s4, %s12619_s28  }
  0x6c   :  { %s12622_s6 = smov [#allocation22]   ;;  %s12623_s30 = smov [#allocation25]  }
  0x6d   :  { %s171_s11 = sshll.u32 %s12622_s6, 4  ;;  %s195_s0 = sshll.u32 %s12623_s30, 4  ;;  %s172_s11 = int_to_ptr.vmem [resolvable:$true] %s171_s11  ;;  %s12853_s0 = int_to_ptr.vmem [resolvable:$true] %s195_s0 }
  0x6e   :  { %s12310_s3 = scalar_lea.hbm %s14902_s17, 8192 }
  0x6f   :  { %p12311_p4 = scmp.ne.s32.totalorder %s14902_s17, %s12310_s3  ;;  %p12314_p5 = scmp.lt.u32.totalorder %s12310_s3, %s14902_s17 }
  0x71   :  { %p12316_p6 = pnand %p12314_p5, %p12311_p4 }
  0x73   :  { %12319 = shalt.err (!%p12316_p6)
}
  0x74   :  { %s12320_s14 = scalar_lea.vmem %s172_s11, 8192  ;;  %p12325_p8 = scmp.lt.s32.totalorder %s172_s11, %s172_s11 }
  0x75   :  { %p12321_p7 = scmp.ne.s32.totalorder %s172_s11, %s12320_s14  ;;  %p12326_p9 = scmp.lt.s32.totalorder %s12320_s14, %s12320_s14 }
  0x77   :  { %p12327_p10 = por %p12326_p9, %p12325_p8 }
  0x79   :  { %p12328_p11 = pnand %p12327_p10, %p12321_p7 }
  0x7b   :  { %12331 = shalt.err (!%p12328_p11)
}
  0x7c   :  { %177 = dma.hbm_to_vmem [thread:$0]  %s14902_s17, 8192, %s172_s11, [#allocation23], %s12618_s4, %s12618_s4, %s12619_s28  }
  0x7d   :  { %s12332_s1 = scalar_lea.hbm %s14904_s19, 8192 }
  0x7e   :  { %p12333_p12 = scmp.ne.s32.totalorder %s14904_s19, %s12332_s1  ;;  %p12336_p13 = scmp.lt.u32.totalorder %s12332_s1, %s14904_s19 }
  0x80   :  { %p12338_p0 = pnand %p12336_p13, %p12333_p12 }
  0x82   :  { %12341 = shalt.err (!%p12338_p0)
}
  0x83   :  { %s12342_s3 = scalar_lea.vmem %s12853_s0, 8192  ;;  %p12347_p2 = scmp.lt.s32.totalorder %s12853_s0, %s12853_s0 }
  0x84   :  { %p12343_p1 = scmp.ne.s32.totalorder %s12853_s0, %s12342_s3  ;;  %p12348_p3 = scmp.lt.s32.totalorder %s12342_s3, %s12342_s3 }
  0x86   :  { %p12349_p4 = por %p12348_p3, %p12347_p2 }
  0x88   :  { %p12350_p5 = pnand %p12349_p4, %p12343_p1 }
  0x8a   :  { %12353 = shalt.err (!%p12350_p5)
}
  0x8b   :  { %201 = dma.hbm_to_vmem [thread:$0]  %s14904_s19, 8192, %s12853_s0, [#allocation26], %s12618_s4, %s12618_s4, %s12619_s28  }
  0x8c   :  { %s12624_s23 = smov [#allocation28]   ;;  %s12625_s8 = smov [#allocation31]  }
  0x8d   :  { %s217_s26 = sshll.u32 %s12624_s23, 4  ;;  %s243_s9 = sshll.u32 %s12625_s8, 4  ;;  %s218_s26 = int_to_ptr.vmem [resolvable:$true] %s217_s26  ;;  %s12890_s9 = int_to_ptr.vmem [resolvable:$true] %s243_s9 }
  0x8e   :  { %s12354_s10 = scalar_lea.hbm %s14906_s21, 2048 }
  0x8f   :  { %p12355_p6 = scmp.ne.s32.totalorder %s14906_s21, %s12354_s10  ;;  %p12358_p7 = scmp.lt.u32.totalorder %s12354_s10, %s14906_s21 }
  0x91   :  { %p12360_p8 = pnand %p12358_p7, %p12355_p6 }
  0x93   :  { %12363 = shalt.err (!%p12360_p8)
}
  0x94   :  { %s12364_s19 = scalar_lea.vmem %s218_s26, 2048  ;;  %p12369_p10 = scmp.lt.s32.totalorder %s218_s26, %s218_s26 }
  0x95   :  { %p12365_p9 = scmp.ne.s32.totalorder %s218_s26, %s12364_s19  ;;  %p12370_p11 = scmp.lt.s32.totalorder %s12364_s19, %s12364_s19 }
  0x97   :  { %p12371_p12 = por %p12370_p11, %p12369_p10 }
  0x99   :  { %p12372_p13 = pnand %p12371_p12, %p12365_p9 }
  0x9b   :  { %12375 = shalt.err (!%p12372_p13)
}
  0x9c   :  { %s15055_s0 = smov 8   ;;  %s15056_s30 = smov 128  }
  0x9d   :  { %223 = dma.hbm_to_vmem [thread:$0]  %s14906_s21, 2048, %s218_s26, [#allocation29], %s15056_s30, %s15056_s30, %s15055_s0  }
  0x9e   :  { %s12376_s11 = scalar_lea.hbm %s14909_s24, 8192 }
  0x9f   :  { %p12377_p0 = scmp.ne.s32.totalorder %s14909_s24, %s12376_s11  ;;  %p12380_p1 = scmp.lt.u32.totalorder %s12376_s11, %s14909_s24 }
  0xa1   :  { %p12382_p2 = pnand %p12380_p1, %p12377_p0 }
  0xa3   :  { %12385 = shalt.err (!%p12382_p2)
}
  0xa4   :  { %s12386_s10 = scalar_lea.vmem %s12890_s9, 8192  ;;  %p12391_p4 = scmp.lt.s32.totalorder %s12890_s9, %s12890_s9 }
  0xa5   :  { %p12387_p3 = scmp.ne.s32.totalorder %s12890_s9, %s12386_s10  ;;  %p12392_p5 = scmp.lt.s32.totalorder %s12386_s10, %s12386_s10 }
  0xa7   :  { %p12393_p6 = por %p12392_p5, %p12391_p4 }
  0xa9   :  { %p12394_p7 = pnand %p12393_p6, %p12387_p3 }
  0xab   :  { %12397 = shalt.err (!%p12394_p7)
}
  0xac   :  { %249 = dma.hbm_to_vmem [thread:$0]  %s14909_s24, 8192, %s12890_s9, [#allocation32], %s12618_s4, %s12618_s4, %s12619_s28  }
  0xad   :  { %s12626_s27 = smov [#allocation8]   ;;  %s12627_s1 = smov [#allocation12]  }
  0xae   :  { %s49_s5 = sshll.u32 %s12626_s27, 4  ;;  %s77_s6 = sshll.u32 %s12627_s1, 4  ;;  %s50_s5 = int_to_ptr.vmem [resolvable:$true] %s49_s5  ;;  %s12927_s6 = int_to_ptr.vmem [resolvable:$true] %s77_s6 }
  0xaf   :  { %s15057_s2 = sld [smem:[#allocation89_spill]] }
  0xb5   :  { %s12398_s3 = scalar_lea.hbm %s15057_s2, 2560 }
  0xb6   :  { %p12399_p8 = scmp.ne.s32.totalorder %s15057_s2, %s12398_s3  ;;  %p12402_p9 = scmp.lt.u32.totalorder %s12398_s3, %s15057_s2 }
  0xb8   :  { %p12404_p10 = pnand %p12402_p9, %p12399_p8 }
  0xba   :  { %12407 = shalt.err (!%p12404_p10)
}
  0xbb   :  { %s12408_s24 = scalar_lea.vmem %s50_s5, 2560  ;;  %p12413_p12 = scmp.lt.s32.totalorder %s50_s5, %s50_s5 }
  0xbc   :  { %p12409_p11 = scmp.ne.s32.totalorder %s50_s5, %s12408_s24  ;;  %p12414_p13 = scmp.lt.s32.totalorder %s12408_s24, %s12408_s24 }
  0xbe   :  { %p12415_p0 = por %p12414_p13, %p12413_p12 }
  0xc0   :  { %p12416_p1 = pnand %p12415_p0, %p12409_p11 }
  0xc2   :  { %12419 = shalt.err (!%p12416_p1)
}
  0xc3   :  { %55 = dma.hbm_to_vmem [thread:$0]  %s15057_s2, 2560, %s50_s5, [#allocation9], %s15056_s30, %s15056_s30, %s15055_s0  }
  0xc4   :  { %s15058_s21 = sld [smem:[#allocation93_spill]] }
  0xca   :  { %s12420_s26 = scalar_lea.hbm %s15058_s21, 2560 }
  0xcb   :  { %p12421_p2 = scmp.ne.s32.totalorder %s15058_s21, %s12420_s26  ;;  %p12424_p3 = scmp.lt.u32.totalorder %s12420_s26, %s15058_s21 }
  0xcd   :  { %p12426_p4 = pnand %p12424_p3, %p12421_p2 }
  0xcf   :  { %12429 = shalt.err (!%p12426_p4)
}
  0xd0   :  { %s12430_s3 = scalar_lea.vmem %s12927_s6, 2560  ;;  %p12435_p6 = scmp.lt.s32.totalorder %s12927_s6, %s12927_s6 }
  0xd1   :  { %p12431_p5 = scmp.ne.s32.totalorder %s12927_s6, %s12430_s3  ;;  %p12436_p7 = scmp.lt.s32.totalorder %s12430_s3, %s12430_s3 }
  0xd3   :  { %p12437_p8 = por %p12436_p7, %p12435_p6 }
  0xd5   :  { %p12438_p9 = pnand %p12437_p8, %p12431_p5 }
  0xd7   :  { %12441 = shalt.err (!%p12438_p9)
}
  0xd8   :  { %83 = dma.hbm_to_vmem [thread:$0]  %s15058_s21, 2560, %s12927_s6, [#allocation11], %s15056_s30, %s15056_s30, %s15055_s0  }
  0xd9   :  { %s12628_s17 = smov [#allocation15]   ;;  %s12629_s23 = smov [#allocation18]  }
  0xda   :  { %s107_s11 = sshll.u32 %s12628_s17, 4  ;;  %s133_s8 = sshll.u32 %s12629_s23, 4  ;;  %s108_s11 = int_to_ptr.vmem [resolvable:$true] %s107_s11  ;;  %s12964_s8 = int_to_ptr.vmem [resolvable:$true] %s133_s8 }
  0xdb   :  { %s15059_s14 = sld [smem:[#allocation98_spill]] }
  0xe1   :  { %s12442_s29 = scalar_lea.hbm %s15059_s14, 4096 }
  0xe2   :  { %p12443_p10 = scmp.ne.s32.totalorder %s15059_s14, %s12442_s29  ;;  %p12446_p11 = scmp.lt.u32.totalorder %s12442_s29, %s15059_s14 }
  0xe4   :  { %p12448_p12 = pnand %p12446_p11, %p12443_p10 }
  0xe6   :  { %12451 = shalt.err (!%p12448_p12)
}
  0xe7   :  { %s12452_s6 = scalar_lea.vmem %s108_s11, 4096  ;;  %p12457_p0 = scmp.lt.s32.totalorder %s108_s11, %s108_s11 }
  0xe8   :  { %p12453_p13 = scmp.ne.s32.totalorder %s108_s11, %s12452_s6  ;;  %p12458_p1 = scmp.lt.s32.totalorder %s12452_s6, %s12452_s6 }
  0xea   :  { %p12459_p2 = por %p12458_p1, %p12457_p0 }
  0xec   :  { %p12460_p3 = pnand %p12459_p2, %p12453_p13 }
  0xee   :  { %12463 = shalt.err (!%p12460_p3)
}
  0xef   :  { %113 = dma.hbm_to_vmem [thread:$0]  %s15059_s14, 4096, %s108_s11, [#allocation14], %s12618_s4, %s12618_s4, %s12619_s28  }
  0xf0   :  { %s12464_s5 = scalar_lea.hbm %s14898_s13, 8192 }
  0xf1   :  { %p12465_p4 = scmp.ne.s32.totalorder %s14898_s13, %s12464_s5  ;;  %p12468_p5 = scmp.lt.u32.totalorder %s12464_s5, %s14898_s13 }
  0xf3   :  { %p12470_p6 = pnand %p12468_p5, %p12465_p4 }
  0xf5   :  { %12473 = shalt.err (!%p12470_p6)
}
  0xf6   :  { %s12474_s9 = scalar_lea.vmem %s12964_s8, 8192  ;;  %p12479_p8 = scmp.lt.s32.totalorder %s12964_s8, %s12964_s8 }
  0xf7   :  { %p12475_p7 = scmp.ne.s32.totalorder %s12964_s8, %s12474_s9  ;;  %p12480_p9 = scmp.lt.s32.totalorder %s12474_s9, %s12474_s9 }
  0xf9   :  { %p12481_p10 = por %p12480_p9, %p12479_p8 }
  0xfb   :  { %p12482_p11 = pnand %p12481_p10, %p12475_p7 }
  0xfd   :  { %12485 = shalt.err (!%p12482_p11)
}
  0xfe   :  { %139 = dma.hbm_to_vmem [thread:$0]  %s14898_s13, 8192, %s12964_s8, [#allocation17], %s12618_s4, %s12618_s4, %s12619_s28  }
  0xff   :  { %s12630_s29 = smov [#allocation21]   ;;  %s12631_s26 = smov [#allocation24]  }
 0x100   :  { %s157_s10 = sshll.u32 %s12630_s29, 4  ;;  %s183_s27 = sshll.u32 %s12631_s26, 4  ;;  %s158_s10 = int_to_ptr.vmem [resolvable:$true] %s157_s10  ;;  %s13001_s27 = int_to_ptr.vmem [resolvable:$true] %s183_s27 }
 0x101   :  { %s12486_s21 = scalar_lea.hbm %s14900_s15, 8192 }
 0x102   :  { %p12487_p12 = scmp.ne.s32.totalorder %s14900_s15, %s12486_s21  ;;  %p12490_p13 = scmp.lt.u32.totalorder %s12486_s21, %s14900_s15 }
 0x104   :  { %p12492_p0 = pnand %p12490_p13, %p12487_p12 }
 0x106   :  { %12495 = shalt.err (!%p12492_p0)
}
 0x107   :  { %s12496_s13 = scalar_lea.vmem %s158_s10, 8192  ;;  %p12501_p2 = scmp.lt.s32.totalorder %s158_s10, %s158_s10 }
 0x108   :  { %p12497_p1 = scmp.ne.s32.totalorder %s158_s10, %s12496_s13  ;;  %p12502_p3 = scmp.lt.s32.totalorder %s12496_s13, %s12496_s13 }
 0x10a   :  { %p12503_p4 = por %p12502_p3, %p12501_p2 }
 0x10c   :  { %p12504_p5 = pnand %p12503_p4, %p12497_p1 }
 0x10e   :  { %12507 = shalt.err (!%p12504_p5)
}
 0x10f   :  { %163 = dma.hbm_to_vmem [thread:$0]  %s14900_s15, 8192, %s158_s10, [#allocation20], %s12618_s4, %s12618_s4, %s12619_s28  }
 0x110   :  { %s12508_s24 = scalar_lea.hbm %s14903_s18, 8192 }
 0x111   :  { %p12509_p6 = scmp.ne.s32.totalorder %s14903_s18, %s12508_s24  ;;  %p12512_p7 = scmp.lt.u32.totalorder %s12508_s24, %s14903_s18 }
 0x113   :  { %p12514_p8 = pnand %p12512_p7, %p12509_p6 }
 0x115   :  { %12517 = shalt.err (!%p12514_p8)
}
 0x116   :  { %s12518_s26 = scalar_lea.vmem %s13001_s27, 8192  ;;  %p12523_p10 = scmp.lt.s32.totalorder %s13001_s27, %s13001_s27 }
 0x117   :  { %p12519_p9 = scmp.ne.s32.totalorder %s13001_s27, %s12518_s26  ;;  %p12524_p11 = scmp.lt.s32.totalorder %s12518_s26, %s12518_s26 }
 0x119   :  { %p12525_p12 = por %p12524_p11, %p12523_p10 }
 0x11b   :  { %p12526_p13 = pnand %p12525_p12, %p12519_p9 }
 0x11d   :  { %12529 = shalt.err (!%p12526_p13)
}
 0x11e   :  { %189 = dma.hbm_to_vmem [thread:$0]  %s14903_s18, 8192, %s13001_s27, [#allocation23], %s12618_s4, %s12618_s4, %s12619_s28  }
 0x11f   :  { %s12632_s1 = smov [#allocation27]   ;;  %s12633_s21 = smov [#allocation30]  }
 0x120   :  { %s208_s6 = sshll.u32 %s12632_s1, 4  ;;  %s229_s19 = sshll.u32 %s12633_s21, 4  ;;  %s209_s6 = int_to_ptr.vmem [resolvable:$true] %s208_s6  ;;  %s13038_s19 = int_to_ptr.vmem [resolvable:$true] %s229_s19 }
 0x121   :  { %s12530_s5 = scalar_lea.hbm %s14905_s20, 64 }
 0x122   :  { %p12531_p0 = scmp.ne.s32.totalorder %s14905_s20, %s12530_s5  ;;  %p12534_p1 = scmp.lt.u32.totalorder %s12530_s5, %s14905_s20 }
 0x124   :  { %p12536_p2 = pnand %p12534_p1, %p12531_p0 }
 0x126   :  { %12539 = shalt.err (!%p12536_p2)
}
 0x127   :  { %s12540_s18 = scalar_lea.vmem %s209_s6, 64  ;;  %p12545_p4 = scmp.lt.s32.totalorder %s209_s6, %s209_s6 }
 0x128   :  { %p12541_p3 = scmp.ne.s32.totalorder %s209_s6, %s12540_s18  ;;  %p12546_p5 = scmp.lt.s32.totalorder %s12540_s18, %s12540_s18 }
 0x12a   :  { %p12547_p6 = por %p12546_p5, %p12545_p4 }
 0x12c   :  { %p12548_p7 = pnand %p12547_p6, %p12541_p3 }
 0x12e   :  { %12551 = shalt.err (!%p12548_p7)
}
 0x12f   :  { %211 = dma.hbm_to_vmem [thread:$0]  %s14905_s20, 64, %s209_s6, [#allocation26]  }
 0x130   :  { %s12552_s24 = scalar_lea.hbm %s14907_s22, 2048 }
 0x131   :  { %p12553_p8 = scmp.ne.s32.totalorder %s14907_s22, %s12552_s24  ;;  %p12556_p9 = scmp.lt.u32.totalorder %s12552_s24, %s14907_s22 }
 0x133   :  { %p12558_p10 = pnand %p12556_p9, %p12553_p8 }
 0x135   :  { %12561 = shalt.err (!%p12558_p10)
}
 0x136   :  { %s12562_s26 = scalar_lea.vmem %s13038_s19, 2048  ;;  %p12567_p12 = scmp.lt.s32.totalorder %s13038_s19, %s13038_s19 }
 0x137   :  { %p12563_p11 = scmp.ne.s32.totalorder %s13038_s19, %s12562_s26  ;;  %p12568_p13 = scmp.lt.s32.totalorder %s12562_s26, %s12562_s26 }
 0x139   :  { %p12569_p0 = por %p12568_p13, %p12567_p12 }
 0x13b   :  { %p12570_p1 = pnand %p12569_p0, %p12563_p11 }
 0x13d   :  { %12573 = shalt.err (!%p12570_p1)
}
 0x13e   :  { %235 = dma.hbm_to_vmem [thread:$0]  %s14907_s22, 2048, %s13038_s19, [#allocation29], %s15056_s30, %s15056_s30, %s15055_s0  }
 0x13f   :  { %s12634_s10 = smov [#allocation33]   ;;  %s12574_s7 = scalar_lea.hbm %s14910_s25, 64 }
 0x140   :  { %s256_s1 = sshll.u32 %s12634_s10, 4  ;;  %p12575_p2 = scmp.ne.s32.totalorder %s14910_s25, %s12574_s7  ;;  %s257_s1 = int_to_ptr.vmem [resolvable:$true] %s256_s1 }
 0x141   :  { %p12578_p3 = scmp.lt.u32.totalorder %s12574_s7, %s14910_s25 }
 0x143   :  { %p12580_p4 = pnand %p12578_p3, %p12575_p2 }
 0x145   :  { %12583 = shalt.err (!%p12580_p4)
}
 0x146   :  { %s12584_s2 = scalar_lea.vmem %s257_s1, 64  ;;  %p12589_p6 = scmp.lt.s32.totalorder %s257_s1, %s257_s1 }
 0x147   :  { %p12585_p5 = scmp.ne.s32.totalorder %s257_s1, %s12584_s2  ;;  %p12590_p7 = scmp.lt.s32.totalorder %s12584_s2, %s12584_s2 }
 0x149   :  { %p12591_p8 = por %p12590_p7, %p12589_p6 }
 0x14b   :  { %p12592_p9 = pnand %p12591_p8, %p12585_p5 }
 0x14d   :  { %12595 = shalt.err (!%p12592_p9)
}
 0x14e   :  { %259 = dma.hbm_to_vmem [thread:$0]  %s14910_s25, 64, %s257_s1, [#allocation32]  }
 0x14f   :  { %12596 = dma.done.wait [#allocation9], 2560  }
 0x150   :  { %12597 = vsyncadd [#allocation9], 4294964736 }
 0x151   :  { %12598 = dma.done.wait [#allocation11], 4608  }
 0x152   :  { %12599 = vsyncadd [#allocation11], 4294962688 }
 0x153   :  { %12600 = dma.done.wait [#allocation14], 12288  }
 0x154   :  { %12601 = vsyncadd [#allocation14], 4294955008 }
 0x155   :  { %12602 = dma.done.wait [#allocation17], 16384  }
 0x156   :  { %12603 = vsyncadd [#allocation17], 4294950912 }
 0x157   :  { %12604 = dma.done.wait [#allocation20], 16384  }
 0x158   :  { %12605 = vsyncadd [#allocation20], 4294950912 }
 0x159   :  { %12606 = dma.done.wait [#allocation23], 16384  }
 0x15a   :  { %12607 = vsyncadd [#allocation23], 4294950912 }
 0x15b   :  { %12608 = dma.done.wait [#allocation26], 8256  }
 0x15c   :  { %12609 = vsyncadd [#allocation26], 4294959040 }
 0x15d   :  { %12610 = dma.done.wait [#allocation29], 4096  }
 0x15e   :  { %12611 = vsyncadd [#allocation29], 4294963200 }
 0x15f   :  { %12612 = dma.done.wait [#allocation32], 8256  }
 0x160   :  { %12613 = vsyncadd [#allocation32], 4294959040  ;;  %vm337_vm0 = vcmask 1041408   ;;  %vm324_vm1 = vcmask 80896   ;;  %vm12635_vm2 = vmmov 1   ;;  %s15060_s19 = sld [smem:[#allocation91_spill]] }
 0x161   :  { %vm9412_vm3 = vmpackc.low %vm337_vm0, %vm12635_vm2  ;;  %s15061_s27 = sld [smem:[#allocation88_spill]]  ;;  %v438_v7 = vld [vmem:[#allocation8] sm:$0xff]  ;;  %vm442_vm4 = vcmask 261120   ;;  %s15062_s15 = sld [smem:[#allocation92_spill]]  ;;  %v439_v27 = vld [vmem:[#allocation8 + $0x8] sm:$0xff]  ;;  %vm1841_vm10 = vcmask 523264  }
 0x162   :  { %v440_v28 = vld [vmem:[#allocation8 + $0x10] sm:$0xff]  ;;  %v441_v29 = vld [vmem:[#allocation8 + $0x18] sm:$0xff]  ;;  %v545_v30 = vld [vmem:[#allocation8 + $0x20] sm:$0xff]  ;;  %s15063_s6 = sld [smem:[#allocation94_spill]]  ;;  %s15064_s3 = sld [smem:[#allocation95_spill]]  ;;  %vm12638_vm2 = vmmov 0  }
 0x163   :  { %v546_v31 = vld [vmem:[#allocation8 + $0x28] sm:$0xff]  ;;  %v547_v32 = vld [vmem:[#allocation8 + $0x30] sm:$0xff]  ;;  %v548_v33 = vld [vmem:[#allocation8 + $0x38] sm:$0xff]  ;;  %s15103_s30 = sld [smem:[#allocation97_spill]]  ;;  %s15296_s28 = sld [smem:[#allocation100_spill]] }
 0x164   :  { %v846_v34 = vld [vmem:[#allocation8 + $0x40] sm:$0xff]  ;;  %v847_v35 = vld [vmem:[#allocation8 + $0x48] sm:$0xff]  ;;  %v848_v36 = vld [vmem:[#allocation8 + $0x50] sm:$0xff]  ;;  %s15297_s24 = sld [smem:[#allocation101_spill]]  ;;  %s15298_s14 = sld [smem:[#allocation102_spill]] }
 0x165   :  { %v849_v37 = vld [vmem:[#allocation8 + $0x58] sm:$0xff]  ;;  %v1054_v38 = vld [vmem:[#allocation8 + $0x60] sm:$0xff]  ;;  %v1055_v39 = vld [vmem:[#allocation8 + $0x68] sm:$0xff] }
 0x166   :  { %v315_v0 = vld [vmem:[%s15060_s19] sm:$0xff]  ;;  %v316_v1 = vld [vmem:[%s15060_s19 + $0x8] sm:$0x3]  ;;  %v1056_v40 = vld [vmem:[#allocation8 + $0x70] sm:$0xff] }
 0x167   :  { %v311_v2 = vld [vmem:[%s15061_s27] sm:$0xff]  ;;  %v9411_v3 = vpack.c.bf16 %v316_v1, %v315_v0  ;;  %v312_v4 = vld [vmem:[%s15061_s27 + $0x8] sm:$0xff]  ;;  %v313_v5 = vld [vmem:[%s15061_s27 + $0x10] sm:$0xff] }
 0x168   :  { %9155 = vmatprep.mubr.msk.f32.mxu0 %vm324_vm1, %v311_v2  ;;  %v314_v6 = vld [vmem:[%s15061_s27 + $0x18] sm:$0xff]  ;;  %v8836_v8 = vld [vmem:[%s15062_s15] ss:$0 sm:$0xff]  ;;  %v1263_v43 = vld [vmem:[#allocation8 + $0x88] sm:$0xff] }
 0x169   :  { %9413 = vmatprep.subr.msk.bf16.mxu0 %vm9412_vm3, %v9411_v3  ;;  %v1057_v41 = vld [vmem:[#allocation8 + $0x78] sm:$0xff]  ;;  %v1262_v42 = vld [vmem:[#allocation8 + $0x80] sm:$0xff]  ;;  %v1264_v44 = vld [vmem:[#allocation8 + $0x90] sm:$0xff] }
 0x16a   :  { %9416 = vmatpush3.bf16.msk.msra.mxu0 %vm9412_vm3, %v9411_v3  ;;  %v1265_v45 = vld [vmem:[#allocation8 + $0x98] sm:$0xff]  ;;  %v647_v46 = vld [vmem:[#allocation12 + $0x20] sm:$0xff]  ;;  %v648_v47 = vld [vmem:[#allocation12 + $0x28] sm:$0xff] }
 0x16b   :  { %v9433_v48 = vpack.c.bf16 %v648_v47, %v647_v46  ;;  %v649_v49 = vld [vmem:[#allocation12 + $0x30] sm:$0xff]  ;;  %v650_v50 = vld [vmem:[#allocation12 + $0x38] sm:$0xff]  ;;  %v540_v52 = vld [vmem:[#allocation12] sm:$0xff] }
 0x16c   :  { %v9437_v51 = vpack.c.bf16 %v650_v50, %v649_v49  ;;  %v541_v53 = vld [vmem:[#allocation12 + $0x8] sm:$0xff]  ;;  %v542_v59 = vld [vmem:[#allocation12 + $0x10] sm:$0xff]  ;;  %v543_v60 = vld [vmem:[#allocation12 + $0x18] sm:$0xff] }
 0x16d   :  { %9156 = vmatmul.mubr.msk.f32.vlgmr.msra.gmra.mrb[0].mxu0 %vm324_vm1, %v312_v4  ;;  %9434 = vmatprep.subr.bf16.mxu1 %v9433_v48  ;;  %v9441_v54 = vpack.c.bf16 %v541_v53, %v540_v52  ;;  %v9445_v63 = vpack.c.bf16 %v543_v60, %v542_v59  ;;  %v948_v0 = vld [vmem:[#allocation12 + $0x40] sm:$0xff]  ;;  %v949_v1 = vld [vmem:[#allocation12 + $0x48] sm:$0xff]  ;;  %v1794_v46 = vld [vmem:[%s15064_s3 + $0x38] sm:$0xff] }
 0x16e   :  { %9158 = vmatprep.mubr.msk.f32.mxu0 %vm324_vm1, %v313_v5  ;;  %9436 = vmatpush3.bf16.msra.mxu1 %v9433_v48  ;;  %v9457_v4 = vpack.c.bf16 %v949_v1, %v948_v0  ;;  %v950_v5 = vld [vmem:[#allocation12 + $0x50] sm:$0xff]  ;;  %v1791_v52 = vld [vmem:[%s15064_s3 + $0x20] sm:$0xff]  ;;  %v1481_v59 = vld [vmem:[#allocation10 + $0x8] sm:$0xff] }
 0x16f   :  { %9438 = vmatprep.subr.bf16.mxu1 %v9437_v51  ;;  %v1789_v53 = vld [vmem:[%s15064_s3 + $0x10] sm:$0xff]  ;;  %v1619_v60 = vld [vmem:[#allocation10 + $0x48] sm:$0xff]  ;;  %v1795_v1 = vld [vmem:[%s15064_s3 + $0x40] sm:$0xff] }
 0x171   :  { %9159 = vmatmul.mubr.msk.f32.gmra.mrb[2].mxu0 %vm324_vm1, %v314_v6  ;;  %v951_v6 = vld [vmem:[#allocation12 + $0x58] sm:$0xff] }
 0x172   :  { %9169 = vmatprep.mubr.msk.f32.mxu0 %vm442_vm4, %v438_v7  ;;  %9440 = vmatpush3.bf16.msra.mxu1 %v9437_v51  ;;  %v1787_v51 = vld [vmem:[%s15064_s3] sm:$0xff] }
 0x173   :  { %9442 = vmatprep.subr.bf16.mxu1 %v9441_v54 }
 0x240   :  { %v9157_v9 = vpop.f32.mrb[0].mxu0 }
 0x241   :  { %v413_v10 = vadd.f32 %v9157_v9, %v8836_v8  ;;  %v407_v11 = vpop.f32.mrb[1].mxu0 }
 0x242   :  { %v408_v12 = vadd.f32 %v8836_v8, %v407_v11  ;;  %v1157_v11 = vld [vmem:[#allocation12 + $0x68] sm:$0xff] }
 0x243   :  { %vm427_vm5 = vcmp.ge.f32.partialorder %v413_v10, 0.0  ;;  %v431_v13 = vmul.f32 0.1, %v413_v10 }
 0x244   :  { %vm426_vm6 = vcmp.ge.f32.partialorder %v408_v12, 0.0  ;;  %v430_v14 = vmul.f32 0.1, %v408_v12  ;;  %v9160_v15 = vpop.f32.mrb[2].mxu0 }
 0x245   :  { %v435_v16 = vsel %vm427_vm5, %v413_v10, %v431_v13  ;;  %v423_v17 = vadd.f32 %v9160_v15, %v8836_v8  ;;  %v417_v18 = vpop.f32.mrb[3].mxu0  ;;  %v1156_v10 = vld [vmem:[#allocation12 + $0x60] sm:$0xff]  ;;  %v1158_v15 = vld [vmem:[#allocation12 + $0x70] sm:$0xff] }
 0x246   :  { %v434_v19 = vsel %vm426_vm6, %v408_v12, %v430_v14  ;;  %v418_v20 = vadd.f32 %v8836_v8, %v417_v18  ;;  %v9461_v8 = vpack.c.bf16 %v951_v6, %v950_v5  ;;  %v9473_v13 = vpack.c.bf16 %v1157_v11, %v1156_v10  ;;  %v1797_v5 = vld [vmem:[%s15064_s3 + $0x50] sm:$0xff]  ;;  %v1810_v10 = vld [vmem:[%s15064_s3 + $0xb8] sm:$0xff] }
 0x247   :  { %v9417_v21 = vpack.c.bf16 %v435_v16, %v434_v19  ;;  %vm429_vm7 = vcmp.ge.f32.partialorder %v423_v17, 0.0  ;;  %v433_v22 = vmul.f32 0.1, %v423_v17  ;;  %v1159_v16 = vld [vmem:[#allocation12 + $0x78] sm:$0xff]  ;;  %v1801_v6 = vld [vmem:[%s15064_s3 + $0x70] sm:$0xff] }
 0x248   :  { %vm428_vm8 = vcmp.ge.f32.partialorder %v418_v20, 0.0  ;;  %v432_v23 = vmul.f32 0.1, %v418_v20  ;;  %v9477_v18 = vpack.c.bf16 %v1159_v16, %v1158_v15  ;;  %v1483_v11 = vld [vmem:[#allocation10 + $0x18] sm:$0xff]  ;;  %v9535_v16 = vpack.c.bf16 %v1801_v6, %v1797_v5  ;;  %v2132_v6 = vld [vmem:[#allocation15 + $0x40] sm:$0xff] }
 0x249   :  { %v437_v24 = vsel %vm429_vm7, %v423_v17, %v433_v22  ;;  %9418 = vmatprep.subr.bf16.mxu0 %v9417_v21 }
 0x24a   :  { %v436_v25 = vsel %vm428_vm8, %v418_v20, %v432_v23  ;;  %9420 = vmatpush3.bf16.msra.mxu0 %v9417_v21  ;;  %v1364_v20 = vld [vmem:[#allocation12 + $0x80] sm:$0xff] }
 0x24b   :  { %v9421_v26 = vpack.c.bf16 %v437_v24, %v436_v25  ;;  %v1366_v25 = vld [vmem:[#allocation12 + $0x90] sm:$0xff] }
 0x24d   :  { %9422 = vmatprep.subr.bf16.mxu0 %v9421_v26 }
 0x24e   :  { %9424 = vmatpush3.bf16.msra.mxu0 %v9421_v26 }
 0x24f   :  { %9426 = vmatprep.subr.bf16.mxu0 %v9417_v21 }
 0x251   :  { %9170 = vmatmul.mubr.msk.f32.vlgmr.msra.gmra.mrb[4].mxu0 %vm442_vm4, %v439_v27 }
 0x252   :  { %9428 = vmatpush3.bf16.msra.mxu0 %v9417_v21  ;;  %9172 = vmatprep.mubr.msk.f32.mxu0 %vm442_vm4, %v440_v28 }
 0x253   :  { %9430 = vmatprep.subr.bf16.mxu0 %v9421_v26 }
 0x255   :  { %9173 = vmatmul.mubr.msk.f32.gmra.mrb[6].mxu0 %vm442_vm4, %v441_v29 }
 0x256   :  { %9432 = vmatpush3.bf16.msra.mxu0 %v9421_v26  ;;  %9183 = vmatprep.mubr.msk.f32.mxu0 %vm442_vm4, %v545_v30 }
 0x257   :  { %9450 = vmatprep.subr.bf16.mxu0 %v9417_v21 }
 0x259   :  { %9184 = vmatmul.mubr.msk.f32.vlgmr.msra.gmra.mrb[8].mxu0 %vm442_vm4, %v546_v31 }
 0x25a   :  { %9452 = vmatpush3.bf16.msra.mxu0 %v9417_v21  ;;  %9186 = vmatprep.mubr.msk.f32.mxu0 %vm442_vm4, %v547_v32  ;;  %v1480_v32 = vld [vmem:[#allocation10] sm:$0xff] }
 0x25b   :  { %9454 = vmatprep.subr.bf16.mxu0 %v9421_v26 }
 0x25d   :  { %9187 = vmatmul.mubr.msk.f32.gmra.mrb[10].mxu0 %vm442_vm4, %v548_v33  ;;  %v1618_v33 = vld [vmem:[#allocation10 + $0x40] sm:$0xff] }
 0x25e   :  { %9456 = vmatpush3.bf16.msra.mxu0 %v9421_v26  ;;  %9225 = vmatprep.mubr.msk.f32.mxu0 %vm442_vm4, %v846_v34  ;;  %v8882_v34 = vld [vmem:[%s15063_s6] ss:$0 sm:$0xff] }
 0x25f   :  { %9466 = vmatprep.subr.bf16.mxu0 %v9417_v21 }
 0x261   :  { %9226 = vmatmul.mubr.msk.f32.vlgmr.msra.gmra.mrb[12].mxu0 %vm442_vm4, %v847_v35 }
 0x262   :  { %9468 = vmatpush3.bf16.msra.mxu0 %v9417_v21  ;;  %9228 = vmatprep.mubr.msk.f32.mxu0 %vm442_vm4, %v848_v36 }
 0x263   :  { %9470 = vmatprep.subr.bf16.mxu0 %v9421_v26 }
 0x265   :  { %9229 = vmatmul.mubr.msk.f32.gmra.mrb[14].mxu0 %vm442_vm4, %v849_v37 }
 0x266   :  { %9472 = vmatpush3.bf16.msra.mxu0 %v9421_v26  ;;  %9253 = vmatprep.mubr.msk.f32.mxu0 %vm442_vm4, %v1054_v38 }
 0x267   :  { %9482 = vmatprep.subr.bf16.mxu0 %v9417_v21 }
 0x269   :  { %9254 = vmatmul.mubr.msk.f32.vlgmr.msra.gmra.mrb[16].mxu0 %vm442_vm4, %v1055_v39 }
 0x26a   :  { %9484 = vmatpush3.bf16.msra.mxu0 %v9417_v21  ;;  %9256 = vmatprep.mubr.msk.f32.mxu0 %vm442_vm4, %v1056_v40  ;;  %v1365_v21 = vld [vmem:[#allocation12 + $0x88] sm:$0xff] }
 0x26b   :  { %9486 = vmatprep.subr.bf16.mxu0 %v9421_v26  ;;  %v9489_v23 = vpack.c.bf16 %v1365_v21, %v1364_v20  ;;  %v1623_v20 = vld [vmem:[#allocation10 + $0x68] sm:$0xff]  ;;  %v1486_v21 = vld [vmem:[#allocation10 + $0x30] sm:$0xff] }
 0x26d   :  { %9257 = vmatmul.mubr.msk.f32.gmra.mrb[18].mxu0 %vm442_vm4, %v1057_v41  ;;  %v1788_v41 = vld [vmem:[%s15064_s3 + $0x8] sm:$0xff] }
 0x26e   :  { %9488 = vmatpush3.bf16.msra.mxu0 %v9421_v26  ;;  %9281 = vmatprep.mubr.msk.f32.mxu0 %vm442_vm4, %v1262_v42  ;;  %v1367_v26 = vld [vmem:[#allocation12 + $0x98] sm:$0xff] }
 0x26f   :  { %v9493_v28 = vpack.c.bf16 %v1367_v26, %v1366_v25  ;;  %v1803_v25 = vld [vmem:[%s15064_s3 + $0x80] sm:$0xff] }
 0x270   :  { %v1807_v26 = vld [vmem:[%s15064_s3 + $0xa0] sm:$0xff] }
 0x271   :  { %9282 = vmatmul.mubr.msk.f32.vlgmr.msra.gmra.mrb[20].mxu0 %vm442_vm4, %v1263_v43 }
 0x272   :  { %9284 = vmatprep.mubr.msk.f32.mxu0 %vm442_vm4, %v1264_v44  ;;  %v1792_v44 = vld [vmem:[%s15064_s3 + $0x28] sm:$0xff] }
 0x273   :  { %v9513_v49 = vpack.c.bf16 %v1792_v44, %v1788_v41  ;;  %v1817_v41 = vld [vmem:[%s15064_s3 + $0xf0] sm:$0xff]  ;;  %v2125_v44 = vld [vmem:[#allocation15 + $0x8] sm:$0xff] }
 0x275   :  { %9285 = vmatmul.mubr.msk.f32.gmra.mrb[22].mxu0 %vm442_vm4, %v1265_v45  ;;  %v1790_v45 = vld [vmem:[%s15064_s3 + $0x18] sm:$0xff] }
 0x276   :  { %9309 = vmatprep.mubr.msk.f32.mxu0 %vm442_vm4, %v1480_v32  ;;  %v9529_v50 = vpack.c.bf16 %v1794_v46, %v1790_v45  ;;  %v1816_v32 = vld [vmem:[%s15064_s3 + $0xe8] sm:$0xff] }
 0x277   :  { %v2129_v45 = vld [vmem:[#allocation15 + $0x28] sm:$0xff] }
 0x278   :  { %v9545_v46 = vpack.c.bf16 %v2129_v45, %v2125_v44 }
 0x324   :  { %v9171_v55 = vpop.f32.mrb[4].mxu0 }
 0x325   :  { %v521_v56 = vpop.f32.mrb[5].mxu0 }
 0x328   :  { %v9174_v57 = vpop.f32.mrb[6].mxu0 }
 0x329   :  { %v531_v58 = vpop.f32.mrb[7].mxu0 }
 0x32c   :  { %v9185_v61 = vpop.f32.mrb[8].mxu0 }
 0x32d   :  { %v627_v62 = vpop.f32.mrb[9].mxu0 }
 0x32e   :  { %9197 = vmatprep.mubr.msk.f32.mxu1 %vm442_vm4, %v627_v62  ;;  %v1620_v62 = vld [vmem:[#allocation10 + $0x50] sm:$0xff] }
 0x32f   :  { %9198 = vmatmul.mubr.msk.f32.vlgmr.msra.gmra.mrb[0].mxu1 %vm442_vm4, %v9185_v61  ;;  %v1482_v61 = vld [vmem:[#allocation10 + $0x10] sm:$0xff] }
 0x330   :  { %v9188_v2 = vpop.f32.mrb[10].mxu0  ;;  %9444 = vmatpush3.bf16.msra.mxu1 %v9441_v54  ;;  %v1793_v54 = vld [vmem:[%s15064_s3 + $0x30] sm:$0xff] }
 0x331   :  { %v637_v3 = vpop.f32.mrb[11].mxu0  ;;  %9446 = vmatprep.subr.bf16.mxu1 %v9445_v63  ;;  %v9531_v0 = vpack.c.bf16 %v1793_v54, %v1789_v53 }
 0x332   :  { %9200 = vmatprep.mubr.msk.f32.mxu1 %vm442_vm4, %v637_v3 }
 0x333   :  { %9201 = vmatmul.mubr.msk.f32.gmra.mrb[2].mxu1 %vm442_vm4, %v9188_v2  ;;  %v1799_v2 = vld [vmem:[%s15064_s3 + $0x60] sm:$0xff] }
 0x334   :  { %9448 = vmatpush3.bf16.msra.mxu1 %v9445_v63  ;;  %9211 = vmatprep.mubr.msk.f32.mxu1 %vm442_vm4, %v521_v56  ;;  %v9227_v7 = vpop.f32.mrb[12].mxu0  ;;  %v1800_v56 = vld [vmem:[%s15064_s3 + $0x68] sm:$0xff]  ;;  %v9515_v63 = vpack.c.bf16 %v1791_v52, %v1787_v51  ;;  %v9519_v15 = vpack.c.bf16 %v1799_v2, %v1795_v1 }
 0x335   :  { %9458 = vmatprep.subr.bf16.mxu1 %v9457_v4  ;;  %v928_v9 = vpop.f32.mrb[13].mxu0 }
 0x337   :  { %9212 = vmatmul.mubr.msk.f32.vlgmr.msra.gmra.mrb[0].mxu1 %vm442_vm4, %v9171_v55  ;;  %v1796_v55 = vld [vmem:[%s15064_s3 + $0x48] sm:$0xff] }
 0x338   :  { %9214 = vmatprep.mubr.msk.f32.mxu1 %vm442_vm4, %v531_v58  ;;  %9460 = vmatpush3.bf16.msra.mxu1 %v9457_v4  ;;  %v9230_v12 = vpop.f32.mrb[14].mxu0  ;;  %v1802_v58 = vld [vmem:[%s15064_s3 + $0x78] sm:$0xff]  ;;  %v9517_v3 = vpack.c.bf16 %v1800_v56, %v1796_v55  ;;  %v2124_v55 = vld [vmem:[#allocation15] sm:$0xff] }
 0x339   :  { %9462 = vmatprep.subr.bf16.mxu1 %v9461_v8  ;;  %v938_v14 = vpop.f32.mrb[15].mxu0  ;;  %v2128_v56 = vld [vmem:[#allocation15 + $0x20] sm:$0xff] }
 0x33a   :  { %v9547_v1 = vpack.c.bf16 %v2128_v56, %v2124_v55  ;;  %v2150_v55 = vld [vmem:[#allocation15 + $0xd0] sm:$0xff] }
 0x33b   :  { %9215 = vmatmul.mubr.msk.f32.gmra.mrb[2].mxu1 %vm442_vm4, %v9174_v57  ;;  %v1798_v57 = vld [vmem:[%s15064_s3 + $0x58] sm:$0xff]  ;;  %v2154_v56 = vld [vmem:[#allocation15 + $0xf0] sm:$0xff] }
 0x33c   :  { %9464 = vmatpush3.bf16.msra.mxu1 %v9461_v8  ;;  %9239 = vmatprep.mubr.msk.f32.mxu1 %vm442_vm4, %v928_v9  ;;  %v9255_v17 = vpop.f32.mrb[16].mxu0  ;;  %v9533_v4 = vpack.c.bf16 %v1802_v58, %v1798_v57  ;;  %v1808_v8 = vld [vmem:[%s15064_s3 + $0xa8] sm:$0xff]  ;;  %v1806_v9 = vld [vmem:[%s15064_s3 + $0x98] sm:$0xff] }
 0x33d   :  { %9474 = vmatprep.subr.bf16.mxu1 %v9473_v13  ;;  %v1136_v19 = vpop.f32.mrb[17].mxu0  ;;  %v2133_v58 = vld [vmem:[#allocation15 + $0x48] sm:$0xff] }
 0x33f   :  { %9240 = vmatmul.mubr.msk.f32.vlgmr.msra.gmra.mrb[0].mxu1 %vm442_vm4, %v9227_v7  ;;  %v1804_v7 = vld [vmem:[%s15064_s3 + $0x88] sm:$0xff] }
 0x340   :  { %9476 = vmatpush3.bf16.msra.mxu1 %v9473_v13  ;;  %9242 = vmatprep.mubr.msk.f32.mxu1 %vm442_vm4, %v938_v14  ;;  %v9258_v22 = vpop.f32.mrb[18].mxu0  ;;  %v1484_v13 = vld [vmem:[#allocation10 + $0x20] sm:$0xff] }
 0x341   :  { %9478 = vmatprep.subr.bf16.mxu1 %v9477_v18  ;;  %v1146_v24 = vpop.f32.mrb[19].mxu0  ;;  %v1622_v14 = vld [vmem:[#allocation10 + $0x60] sm:$0xff] }
 0x343   :  { %9243 = vmatmul.mubr.msk.f32.gmra.mrb[2].mxu1 %vm442_vm4, %v9230_v12  ;;  %v1621_v12 = vld [vmem:[#allocation10 + $0x58] sm:$0xff] }
 0x344   :  { %9480 = vmatpush3.bf16.msra.mxu1 %v9477_v18  ;;  %9267 = vmatprep.mubr.msk.f32.mxu1 %vm442_vm4, %v1136_v19  ;;  %v9283_v27 = vpop.f32.mrb[20].mxu0  ;;  %v9537_v18 = vpack.c.bf16 %v1810_v10, %v1806_v9  ;;  %v1485_v19 = vld [vmem:[#allocation10 + $0x28] sm:$0xff] }
 0x345   :  { %9490 = vmatprep.subr.bf16.mxu1 %v9489_v23  ;;  %v1344_v29 = vpop.f32.mrb[21].mxu0 }
 0x347   :  { %9268 = vmatmul.mubr.msk.f32.vlgmr.msra.gmra.mrb[0].mxu1 %vm442_vm4, %v9255_v17  ;;  %v9521_v17 = vpack.c.bf16 %v1808_v8, %v1804_v7  ;;  %v2136_v7 = vld [vmem:[#allocation15 + $0x60] sm:$0xff]  ;;  %v2141_v8 = vld [vmem:[#allocation15 + $0x88] sm:$0xff] }
 0x348   :  { %9492 = vmatpush3.bf16.msra.mxu1 %v9489_v23  ;;  %9270 = vmatprep.mubr.msk.f32.mxu1 %vm442_vm4, %v1146_v24  ;;  %v9286_v30 = vpop.f32.mrb[22].mxu0  ;;  %v1487_v23 = vld [vmem:[#allocation10 + $0x38] sm:$0xff] }
 0x349   :  { %9494 = vmatprep.subr.bf16.mxu1 %v9493_v28  ;;  %v1354_v31 = vpop.f32.mrb[23].mxu0  ;;  %v1625_v24 = vld [vmem:[#allocation10 + $0x78] sm:$0xff] }
 0x34b   :  { %9271 = vmatmul.mubr.msk.f32.gmra.mrb[2].mxu1 %vm442_vm4, %v9258_v22  ;;  %v1624_v22 = vld [vmem:[#allocation10 + $0x70] sm:$0xff] }
 0x34c   :  { %9496 = vmatpush3.bf16.msra.mxu1 %v9493_v28  ;;  %9295 = vmatprep.mubr.msk.f32.mxu1 %vm442_vm4, %v1344_v29  ;;  %v9523_v28 = vpack.c.bf16 %v1807_v26, %v1803_v25  ;;  %v1809_v29 = vld [vmem:[%s15064_s3 + $0xb0] sm:$0xff]  ;;  %v2140_v25 = vld [vmem:[#allocation15 + $0x80] sm:$0xff] }
 0x34d   :  { %v2144_v26 = vld [vmem:[#allocation15 + $0xa0] sm:$0xff] }
 0x34f   :  { %9296 = vmatmul.mubr.msk.f32.vlgmr.msra.gmra.mrb[0].mxu1 %vm442_vm4, %v9283_v27  ;;  %v1805_v27 = vld [vmem:[%s15064_s3 + $0x90] sm:$0xff] }
 0x350   :  { %9298 = vmatprep.mubr.msk.f32.mxu1 %vm442_vm4, %v1354_v31  ;;  %v1812_v31 = vld [vmem:[%s15064_s3 + $0xc8] sm:$0xff] }
 0x353   :  { %9299 = vmatmul.mubr.msk.f32.gmra.mrb[2].mxu1 %vm442_vm4, %v9286_v30  ;;  %v9539_v30 = vpack.c.bf16 %v1809_v29, %v1805_v27 }
 0x354   :  { %9329 = vmatprep.mubr.msk.f32.mxu1 %vm442_vm4, %v1618_v33  ;;  %v1814_v33 = vld [vmem:[%s15064_s3 + $0xd8] sm:$0xff] }
 0x422   :  { %v9297_v35 = vpop.f32.mrb[0].mxu1 }
 0x423   :  { %v1477_v36 = vadd.f32 %v9297_v35, %v8882_v34  ;;  %v1446_v37 = vpop.f32.mrb[1].mxu1  ;;  %v1818_v35 = vld [vmem:[%s15064_s3 + $0xf8] sm:$0xff] }
 0x424   :  { %v1476_v38 = vadd.f32 %v8882_v34, %v1446_v37  ;;  %v1815_v37 = vld [vmem:[%s15064_s3 + $0xe0] sm:$0xff] }
 0x426   :  { %v9497_v39 = vpack.c.bf16 %v1477_v36, %v1476_v38  ;;  %v9300_v40 = vpop.f32.mrb[2].mxu1  ;;  %v1811_v36 = vld [vmem:[%s15064_s3 + $0xc0] sm:$0xff]  ;;  %v9541_v38 = vpack.c.bf16 %v1818_v35, %v1814_v33  ;;  %v2147_v33 = vld [vmem:[#allocation15 + $0xb8] sm:$0xff]  ;;  %v2146_v35 = vld [vmem:[#allocation15 + $0xb0] sm:$0xff] }
 0x427   :  { %v1479_v42 = vadd.f32 %v9300_v40, %v8882_v34  ;;  %v1456_v43 = vpop.f32.mrb[3].mxu1  ;;  %v1813_v40 = vld [vmem:[%s15064_s3 + $0xd0] sm:$0xff] }
 0x428   :  { %v1478_v47 = vadd.f32 %v8882_v34, %v1456_v43  ;;  %9498 = vmatprep.subr.bf16.mxu0 %v9497_v39  ;;  %9506 = vmatprep.subr.bf16.mxu1 %v9497_v39  ;;  %v9525_v34 = vpack.c.bf16 %v1816_v32, %v1812_v31  ;;  %v14927_v43 = vmov 0.0  }
 0x429   :  { %9500 = vmatpush3.bf16.msra.mxu0 %v9497_v39  ;;  %9508 = vmatpush3.bf16.msra.mxu1 %v9497_v39  ;;  %v9527_v39 = vpack.c.bf16 %v1815_v37, %v1811_v36  ;;  %v2149_v36 = vld [vmem:[#allocation15 + $0xc8] sm:$0xff] }
 0x42a   :  { %v9501_v48 = vpack.c.bf16 %v1479_v42, %v1478_v47  ;;  %v9543_v42 = vpack.c.bf16 %v1817_v41, %v1813_v40  ;;  %v2127_v47 = vld [vmem:[#allocation15 + $0x18] sm:$0xff]  ;;  %v2153_v37 = vld [vmem:[#allocation15 + $0xe8] sm:$0xff]  ;;  %v9555_v40 = vpack.c.bf16 %v2144_v26, %v2140_v25  ;;  %v2450_v25 = vld [vmem:[#allocation13 + $0x70] sm:$0xff] }
 0x42c   :  { %9502 = vmatprep.subr.bf16.mxu0 %v9501_v48  ;;  %9510 = vmatprep.subr.bf16.mxu1 %v9501_v48 }
 0x42d   :  { %9504 = vmatpush3.bf16.msra.mxu0 %v9501_v48  ;;  %9512 = vmatpush3.bf16.msra.mxu1 %v9501_v48  ;;  %v2131_v48 = vld [vmem:[#allocation15 + $0x38] sm:$0xff] }
 0x42e   :  { %9514 = vmatprep.subr.bf16.mxu0 %v9513_v49  ;;  %9530 = vmatprep.subr.bf16.mxu1 %v9529_v50  ;;  %v9561_v49 = vpack.c.bf16 %v2131_v48, %v2127_v47  ;;  %v2148_v47 = vld [vmem:[#allocation15 + $0xc0] sm:$0xff] }
 0x42f   :  { %v2152_v48 = vld [vmem:[#allocation15 + $0xe0] sm:$0xff] }
 0x430   :  { %9310 = vmatmul.mubr.msk.f32.vlgmr.msra.gmra.mrb[24].mxu0 %vm442_vm4, %v1481_v59  ;;  %9330 = vmatmul.mubr.msk.f32.vlgmr.msra.gmra.mrb[4].mxu1 %vm442_vm4, %v1619_v60  ;;  %v2137_v59 = vld [vmem:[#allocation15 + $0x68] sm:$0xff]  ;;  %v2126_v60 = vld [vmem:[#allocation15 + $0x10] sm:$0xff] }
 0x431   :  { %9312 = vmatprep.mubr.msk.f32.mxu0 %vm442_vm4, %v1482_v61  ;;  %9332 = vmatprep.mubr.msk.f32.mxu1 %vm442_vm4, %v1620_v62  ;;  %v2130_v61 = vld [vmem:[#allocation15 + $0x30] sm:$0xff]  ;;  %v9549_v5 = vpack.c.bf16 %v2137_v59, %v2133_v58  ;;  %v2441_v58 = vld [vmem:[#allocation13 + $0x28] sm:$0xff]  ;;  %v9559_v59 = vpack.c.bf16 %v2152_v48, %v2148_v47  ;;  %v2460_v47 = vld [vmem:[#allocation13 + $0xc0] sm:$0xff] }
 0x432   :  { %9516 = vmatpush1.bf16.msra.mxu0 %v9515_v63  ;;  %9532 = vmatpush1.bf16.msra.mxu1 %v9531_v0  ;;  %v2464_v48 = vld [vmem:[#allocation13 + $0xe0] sm:$0xff] }
 0x433   :  { %9518 = vmatprep.subr.bf16.mxu0 %v9517_v3  ;;  %9534 = vmatprep.subr.bf16.mxu1 %v9533_v4 }
 0x434   :  { %9313 = vmatmul.mubr.msk.f32.gmra.mrb[26].mxu0 %vm442_vm4, %v1483_v11  ;;  %9333 = vmatmul.mubr.msk.f32.gmra.mrb[6].mxu1 %vm442_vm4, %v1621_v12  ;;  %v2145_v12 = vld [vmem:[#allocation15 + $0xa8] sm:$0xff] }
 0x435   :  { %9315 = vmatprep.mubr.msk.f32.mxu0 %vm442_vm4, %v1484_v13  ;;  %9335 = vmatprep.mubr.msk.f32.mxu1 %vm442_vm4, %v1622_v14  ;;  %v9563_v13 = vpack.c.bf16 %v2130_v61, %v2126_v60  ;;  %v2135_v14 = vld [vmem:[#allocation15 + $0x58] sm:$0xff] }
 0x436   :  { %9520 = vmatpush1.bf16.msra.mxu0 %v9519_v15  ;;  %9536 = vmatpush1.bf16.msra.mxu1 %v9535_v16  ;;  %v2139_v15 = vld [vmem:[#allocation15 + $0x78] sm:$0xff]  ;;  %v2134_v16 = vld [vmem:[#allocation15 + $0x50] sm:$0xff] }
 0x437   :  { %9522 = vmatprep.subr.bf16.mxu0 %v9521_v17  ;;  %9538 = vmatprep.subr.bf16.mxu1 %v9537_v18  ;;  %v2138_v17 = vld [vmem:[#allocation15 + $0x70] sm:$0xff]  ;;  %v9565_v27 = vpack.c.bf16 %v2139_v15, %v2135_v14 }
 0x438   :  { %9316 = vmatmul.mubr.msk.f32.gmra.mrb[28].mxu0 %vm442_vm4, %v1485_v19  ;;  %9336 = vmatmul.mubr.msk.f32.gmra.mrb[8].mxu1 %vm442_vm4, %v1623_v20  ;;  %v9551_v20 = vpack.c.bf16 %v2136_v7, %v2132_v6  ;;  %v9567_v32 = vpack.c.bf16 %v2138_v17, %v2134_v16  ;;  %v2442_v14 = vld [vmem:[#allocation13 + $0x30] sm:$0xff]  ;;  %v2445_v16 = vld [vmem:[#allocation13 + $0x48] sm:$0xff] }
 0x439   :  { %9318 = vmatprep.mubr.msk.f32.mxu0 %vm442_vm4, %v1486_v21  ;;  %9338 = vmatprep.mubr.msk.f32.mxu1 %vm442_vm4, %v1624_v22  ;;  %v2449_v17 = vld [vmem:[#allocation13 + $0x68] sm:$0xff] }
 0x43a   :  { %9524 = vmatpush1.bf16.msra.mxu0 %v9523_v28  ;;  %9540 = vmatpush1.bf16.msra.mxu1 %v9539_v30  ;;  %v2143_v28 = vld [vmem:[#allocation15 + $0x98] sm:$0xff]  ;;  %v13358_v26 = vpack.c.bf16 %v2449_v17, %v2445_v16  ;;  %v2478_v16 = vld [vmem:[#allocation13 + $0x150] sm:$0xff] }
 0x43b   :  { %9526 = vmatprep.subr.bf16.mxu0 %v9525_v34  ;;  %9542 = vmatprep.subr.bf16.mxu1 %v9541_v38  ;;  %v2142_v34 = vld [vmem:[#allocation15 + $0x90] sm:$0xff]  ;;  %v9569_v45 = vpack.c.bf16 %v2147_v33, %v2143_v28  ;;  %v2453_v28 = vld [vmem:[#allocation13 + $0x88] sm:$0xff] }
 0x43c   :  { %9319 = vmatmul.mubr.msk.f32.gmra.mrb[30].mxu0 %vm442_vm4, %v1487_v23  ;;  %9339 = vmatmul.mubr.msk.f32.gmra.mrb[10].mxu1 %vm442_vm4, %v1625_v24  ;;  %v9553_v24 = vpack.c.bf16 %v2145_v12, %v2141_v8  ;;  %v2440_v12 = vld [vmem:[#allocation13 + $0x20] sm:$0xff]  ;;  %v2482_v17 = vld [vmem:[#allocation13 + $0x170] sm:$0xff] }
 0x43d   :  { %1930 = vmatprep.mubr.f32.mxu0 %v14927_v43  ;;  %2043 = vmatprep.mubr.f32.mxu1 %v14927_v43 }
 0x43e   :  { %9528 = vmatpush1.bf16.msra.mxu0 %v9527_v39  ;;  %9544 = vmatpush1.bf16.msra.mxu1 %v9543_v42 }
 0x43f   :  { %9546 = vmatprep.subr.bf16.mxu0 %v9545_v46  ;;  %9562 = vmatprep.subr.bf16.mxu1 %v9561_v49  ;;  %v9571_v46 = vpack.c.bf16 %v2146_v35, %v2142_v34  ;;  %v2452_v35 = vld [vmem:[#allocation13 + $0x80] sm:$0xff] }
 0x503   :  { %v9311_v50 = vpop.f32.mrb[24].mxu0  ;;  %v9331_v51 = vpop.f32.mrb[4].mxu1 }
 0x504   :  { %v1756_v52 = vmax.f32 %v9311_v50, %v9331_v51  ;;  %v1578_v53 = vpop.f32.mrb[25].mxu0  ;;  %v1716_v54 = vpop.f32.mrb[5].mxu1 }
 0x505   :  { %v1755_v57 = vmax.f32 %v1578_v53, %v1716_v54  ;;  %v2151_v53 = vld [vmem:[#allocation15 + $0xd8] sm:$0xff] }
 0x506   :  { %v1772_v9 = vmul.f32 0.1, %v1756_v52  ;;  %vm1764_vm11 = vcmp.ge.f32.partialorder %v1756_v52, 0.0  ;;  %v2155_v54 = vld [vmem:[#allocation15 + $0xf8] sm:$0xff] }
 0x507   :  { %vm1763_vm9 = vcmp.ge.f32.partialorder %v1755_v57, 0.0  ;;  %v1771_v62 = vmul.f32 0.1, %v1755_v57  ;;  %v9314_v63 = vpop.f32.mrb[26].mxu0  ;;  %v9334_v0 = vpop.f32.mrb[6].mxu1  ;;  %v9573_v60 = vpack.c.bf16 %v2155_v54, %v2151_v53  ;;  %v2469_v53 = vld [vmem:[#allocation13 + $0x108] sm:$0xff] }
 0x508   :  { %v13262_v2 = vmax.f32 %v9314_v63, %v9334_v0  ;;  %v1588_v3 = vpop.f32.mrb[27].mxu0  ;;  %v1726_v4 = vpop.f32.mrb[7].mxu1  ;;  %v13275_v30 = vsel %vm1764_vm11, %v1756_v52, %v1772_v9  ;;  %v9557_v52 = vpack.c.bf16 %v2153_v37, %v2149_v36  ;;  %v9575_v63 = vpack.c.bf16 %v2154_v56, %v2150_v55  ;;  %v2456_v36 = vld [vmem:[#allocation13 + $0xa0] sm:$0xff]  ;;  %v2454_v37 = vld [vmem:[#allocation13 + $0x90] sm:$0xff]  ;;  %v2473_v54 = vld [vmem:[#allocation13 + $0x128] sm:$0xff] }
 0x509   :  { %v13264_v10 = vsel %vm1763_vm9, %v1755_v57, %v1771_v62  ;;  %v1757_v11 = vmax.f32 %v1588_v3, %v1726_v4  ;;  %v2437_v57 = vld [vmem:[#allocation13 + $0x8] sm:$0xff]  ;;  %v2443_v3 = vld [vmem:[#allocation13 + $0x38] sm:$0xff] }
 0x50a   :  { %8899 = vmatmul.mubr.msk.f32.vlgmr.msra.gmra.mrb[32].mxu0 %vm1841_vm10, %v13264_v10  ;;  %8907 = vmatmul.mubr.msk.f32.vlgmr.msra.gmra.mrb[12].mxu1 %vm1841_vm10, %v13264_v10  ;;  %v1774_v49 = vmul.f32 0.1, %v13262_v2  ;;  %vm1766_vm13 = vcmp.ge.f32.partialorder %v13262_v2, 0.0  ;;  %v13302_v0 = vpack.c.bf16 %v2441_v58, %v2437_v57  ;;  %v2471_v55 = vld [vmem:[#allocation13 + $0x118] sm:$0xff]  ;;  %v13404_v57 = vpack.c.bf16 %v2464_v48, %v2460_v47  ;;  %v2492_v47 = vld [vmem:[#allocation13 + $0x1c0] sm:$0xff] }
 0x50b   :  { %9548 = vmatpush1.bf16.msra.mxu0 %v9547_v1  ;;  %1936 = vmatprep.mubr.f32.mxu0 %v14927_v43  ;;  %v9317_v18 = vpop.f32.mrb[28].mxu0  ;;  %v9337_v19 = vpop.f32.mrb[8].mxu1  ;;  %v1773_v29 = vmul.f32 0.1, %v1757_v11  ;;  %vm1765_vm12 = vcmp.ge.f32.partialorder %v1757_v11, 0.0  ;;  %v2439_v1 = vld [vmem:[#allocation13 + $0x18] sm:$0xff] }
 0x50c   :  { %2049 = vmatprep.mubr.f32.mxu1 %v14927_v43  ;;  %v13272_v21 = vmax.f32 %v9317_v18, %v9337_v19  ;;  %v1598_v22 = vpop.f32.mrb[29].mxu0  ;;  %v1736_v23 = vpop.f32.mrb[9].mxu1  ;;  %9550 = vmatprep.subr.bf16.mxu0 %v9549_v5  ;;  %v13300_v62 = vsel %vm1766_vm13, %v13262_v2, %v1774_v49  ;;  %v13311_v2 = vpack.c.bf16 %v2443_v3, %v2439_v1  ;;  %v2447_v18 = vld [vmem:[#allocation13 + $0x58] sm:$0xff]  ;;  %v2462_v49 = vld [vmem:[#allocation13 + $0xd0] sm:$0xff]  ;;  %v2477_v3 = vld [vmem:[#allocation13 + $0x148] sm:$0xff] }
 0x50d   :  { %v13277_v31 = vmax.f32 %v1598_v22, %v1736_v23  ;;  %9564 = vmatpush1.bf16.msra.mxu1 %v9563_v13  ;;  %v13289_v50 = vsel %vm1765_vm12, %v1757_v11, %v1773_v29  ;;  %v2436_v11 = vld [vmem:[#allocation13] sm:$0xff]  ;;  %v2438_v13 = vld [vmem:[#allocation13 + $0x10] sm:$0xff]  ;;  %v2451_v19 = vld [vmem:[#allocation13 + $0x78] sm:$0xff]  ;;  %15071 = vst [vmem:[#allocation49_spill] sm:$0xff] %v13404_v57 }
 0x50e   :  { %8900 = vmatmul.mubr.msk.f32.gmra.mrb[34].mxu0 %vm1841_vm10, %v13275_v30  ;;  %8908 = vmatmul.mubr.msk.f32.gmra.mrb[14].mxu1 %vm1841_vm10, %v13275_v30  ;;  %v1776_v4 = vmul.f32 0.1, %v13272_v21  ;;  %vm1768_vm15 = vcmp.ge.f32.partialorder %v13272_v21, 0.0  ;;  %v2444_v22 = vld [vmem:[#allocation13 + $0x40] sm:$0xff]  ;;  %v2457_v29 = vld [vmem:[#allocation13 + $0xa8] sm:$0xff]  ;;  %v2475_v56 = vld [vmem:[#allocation13 + $0x138] sm:$0xff] }
 0x50f   :  { %1942 = vmatprep.mubr.f32.mxu0 %v14927_v43  ;;  %2055 = vmatprep.mubr.f32.mxu1 %v14927_v43  ;;  %v9320_v38 = vpop.f32.mrb[30].mxu0  ;;  %v9340_v39 = vpop.f32.mrb[10].mxu1  ;;  %v1775_v61 = vmul.f32 0.1, %v13277_v31  ;;  %vm1767_vm14 = vcmp.ge.f32.partialorder %v13277_v31, 0.0  ;;  %v2448_v23 = vld [vmem:[#allocation13 + $0x60] sm:$0xff]  ;;  %v13414_v1 = vpack.c.bf16 %v2475_v56, %v2471_v55 }
 0x510   :  { %9552 = vmatpush1.bf16.msra.mxu0 %v9551_v20  ;;  %v13285_v41 = vmax.f32 %v9320_v38, %v9340_v39  ;;  %v1608_v42 = vpop.f32.mrb[31].mxu0  ;;  %v1746_v44 = vpop.f32.mrb[11].mxu1  ;;  %9566 = vmatprep.subr.bf16.mxu1 %v9565_v27  ;;  %v13327_v7 = vsel %vm1768_vm15, %v13272_v21, %v1776_v4  ;;  %v13354_v20 = vpack.c.bf16 %v2440_v12, %v2436_v11  ;;  %v2458_v38 = vld [vmem:[#allocation13 + $0xb0] sm:$0xff]  ;;  %v2481_v4 = vld [vmem:[#allocation13 + $0x168] sm:$0xff]  ;;  %v2496_v48 = vld [vmem:[#allocation13 + $0x1e0] sm:$0xff] }
 0x511   :  { %v1761_v51 = vmax.f32 %v1608_v42, %v1746_v44  ;;  %9554 = vmatprep.subr.bf16.mxu0 %v9553_v24  ;;  %9568 = vmatpush1.bf16.msra.mxu1 %v9567_v32  ;;  %v13315_v5 = vsel %vm1767_vm14, %v13277_v31, %v1775_v61  ;;  %v13356_v21 = vpack.c.bf16 %v2442_v14, %v2438_v13  ;;  %v2446_v24 = vld [vmem:[#allocation13 + $0x50] sm:$0xff]  ;;  %v2455_v31 = vld [vmem:[#allocation13 + $0x98] sm:$0xff]  ;;  %v2476_v13 = vld [vmem:[#allocation13 + $0x140] sm:$0xff] }
 0x512   :  { %8901 = vmatmul.mubr.msk.f32.gmra.mrb[36].mxu0 %vm1841_vm10, %v13289_v50  ;;  %8909 = vmatmul.mubr.msk.f32.gmra.mrb[16].mxu1 %vm1841_vm10, %v13289_v50  ;;  %v1778_v8 = vmul.f32 0.1, %v13285_v41  ;;  %vm1770_vm1 = vcmp.ge.f32.partialorder %v13285_v41, 0.0  ;;  %v13360_v27 = vpack.c.bf16 %v2451_v19, %v2447_v18  ;;  %v2459_v32 = vld [vmem:[#allocation13 + $0xb8] sm:$0xff]  ;;  %v13368_v33 = vpack.c.bf16 %v2448_v23, %v2444_v22  ;;  %v2470_v61 = vld [vmem:[#allocation13 + $0x110] sm:$0xff]  ;;  %15074 = vst [vmem:[#allocation52_spill] sm:$0xff] %v13414_v1 }
 0x513   :  { %1948 = vmatprep.mubr.f32.mxu0 %v14927_v43  ;;  %2061 = vmatprep.mubr.f32.mxu1 %v14927_v43  ;;  %v1777_v6 = vmul.f32 0.1, %v1761_v51  ;;  %vm1769_vm0 = vcmp.ge.f32.partialorder %v1761_v51, 0.0  ;;  %v13370_v34 = vpack.c.bf16 %v2450_v25, %v2446_v24  ;;  %v13378_v39 = vpack.c.bf16 %v2459_v32, %v2455_v31  ;;  %v2463_v42 = vld [vmem:[#allocation13 + $0xd8] sm:$0xff]  ;;  %v2480_v14 = vld [vmem:[#allocation13 + $0x160] sm:$0xff]  ;;  %v2485_v19 = vld [vmem:[#allocation13 + $0x188] sm:$0xff] }
 0x514   :  { %9556 = vmatpush1.bf16.msra.mxu0 %v9555_v40  ;;  %9570 = vmatprep.subr.bf16.mxu1 %v9569_v45  ;;  %v13346_v15 = vsel %vm1770_vm1, %v13285_v41, %v1778_v8  ;;  %v2461_v40 = vld [vmem:[#allocation13 + $0xc8] sm:$0xff]  ;;  %v2467_v44 = vld [vmem:[#allocation13 + $0xf8] sm:$0xff]  ;;  %v13386_v45 = vpack.c.bf16 %v2456_v36, %v2452_v35  ;;  %v13440_v25 = vpack.c.bf16 %v2480_v14, %v2476_v13  ;;  %v2488_v31 = vld [vmem:[#allocation13 + $0x1a0] sm:$0xff] }
 0x515   :  { %9558 = vmatprep.subr.bf16.mxu0 %v9557_v52  ;;  %9572 = vmatpush1.bf16.msra.mxu1 %v9571_v46  ;;  %v13336_v9 = vsel %vm1769_vm0, %v1761_v51, %v1777_v6  ;;  %15066 = vst [vmem:[#allocation44_spill] sm:$0xff] %v13378_v39  ;;  %v2465_v41 = vld [vmem:[#allocation13 + $0xe8] sm:$0xff]  ;;  %v13388_v46 = vpack.c.bf16 %v2458_v38, %v2454_v37  ;;  %v2466_v51 = vld [vmem:[#allocation13 + $0xf0] sm:$0xff]  ;;  %v2479_v6 = vld [vmem:[#allocation13 + $0x158] sm:$0xff] }
 0x516   :  { %8902 = vmatmul.mubr.msk.f32.gmra.mrb[38].mxu0 %vm1841_vm10, %v13300_v62  ;;  %8910 = vmatmul.mubr.msk.f32.gmra.mrb[18].mxu1 %vm1841_vm10, %v13300_v62  ;;  %15067 = vst [vmem:[#allocation45_spill] sm:$0xff] %v13386_v45  ;;  %v13396_v52 = vpack.c.bf16 %v2467_v44, %v2463_v42  ;;  %v13406_v58 = vpack.c.bf16 %v2466_v51, %v2462_v49  ;;  %v2483_v8 = vld [vmem:[#allocation13 + $0x178] sm:$0xff]  ;;  %v2489_v22 = vld [vmem:[#allocation13 + $0x1a8] sm:$0xff]  ;;  %15079 = vst [vmem:[#allocation57_spill] sm:$0xff] %v13440_v25 }
 0x517   :  { %1954 = vmatprep.mubr.f32.mxu0 %v14927_v43  ;;  %2067 = vmatprep.mubr.f32.mxu1 %v14927_v43  ;;  %15068 = vst [vmem:[#allocation46_spill] sm:$0xff] %v13388_v46  ;;  %v13432_v18 = vpack.c.bf16 %v2483_v8, %v2479_v6  ;;  %v2487_v23 = vld [vmem:[#allocation13 + $0x198] sm:$0xff]  ;;  %v2486_v32 = vld [vmem:[#allocation13 + $0x190] sm:$0xff]  ;;  %v2493_v37 = vld [vmem:[#allocation13 + $0x1c8] sm:$0xff] }
 0x518   :  { %9560 = vmatpush1.bf16.msra.mxu0 %v9559_v59  ;;  %9574 = vmatprep.subr.bf16.mxu1 %v9573_v60  ;;  %15070 = vst [vmem:[#allocation48_spill] sm:$0xff] %v13396_v52  ;;  %15072 = vst [vmem:[#allocation50_spill] sm:$0xff] %v13406_v58  ;;  %v2468_v59 = vld [vmem:[#allocation13 + $0x100] sm:$0xff]  ;;  %v2491_v24 = vld [vmem:[#allocation13 + $0x1b8] sm:$0xff] }
 0x519   :  { %9576 = vmatpush1.bf16.msra.mxu1 %v9575_v63  ;;  %9578 = vmatprep.subr.bf16.mxu0 %v13302_v0  ;;  %v2472_v60 = vld [vmem:[#allocation13 + $0x120] sm:$0xff]  ;;  %v2474_v63 = vld [vmem:[#allocation13 + $0x130] sm:$0xff]  ;;  %15078 = vst [vmem:[#allocation56_spill] sm:$0xff] %v13432_v18  ;;  %v13450_v36 = vpack.c.bf16 %v2491_v24, %v2487_v23  ;;  %v2497_v38 = vld [vmem:[#allocation13 + $0x1e8] sm:$0xff] }
 0x51a   :  { %8903 = vmatmul.mubr.msk.f32.gmra.mrb[40].mxu0 %vm1841_vm10, %v13315_v5  ;;  %8911 = vmatmul.mubr.msk.f32.gmra.mrb[20].mxu1 %vm1841_vm10, %v13315_v5  ;;  %v13422_v11 = vpack.c.bf16 %v2472_v60, %v2468_v59  ;;  %v13424_v12 = vpack.c.bf16 %v2474_v63, %v2470_v61  ;;  %v2490_v35 = vld [vmem:[#allocation13 + $0x1b0] sm:$0xff]  ;;  %v2505_v55 = vld [vmem:[#allocation16 + $0x28] sm:$0xff]  ;;  %v2503_v56 = vld [vmem:[#allocation16 + $0x18] sm:$0xff]  ;;  %v13476_v60 = vpack.c.bf16 %v2496_v48, %v2492_v47 }
 0x51b   :  { %1960 = vmatprep.mubr.f32.mxu0 %v14927_v43  ;;  %2073 = vmatprep.mubr.f32.mxu1 %v14927_v43  ;;  %15082 = vst [vmem:[#allocation60_spill] sm:$0xff] %v13450_v36  ;;  %v13460_v44 = vpack.c.bf16 %v2490_v35, %v2486_v32  ;;  %v2494_v49 = vld [vmem:[#allocation13 + $0x1d0] sm:$0xff]  ;;  %v2507_v59 = vld [vmem:[#allocation16 + $0x38] sm:$0xff]  ;;  %v2500_v63 = vld [vmem:[#allocation16] sm:$0xff] }
 0x51c   :  { %9610 = vmatprep.subr.bf16.mxu1 %v13311_v2  ;;  %15075 = vst [vmem:[#allocation53_spill] sm:$0xff] %v13422_v11  ;;  %15076 = vst [vmem:[#allocation54_spill] sm:$0xff] %v13424_v12  ;;  %v2498_v51 = vld [vmem:[#allocation13 + $0x1f0] sm:$0xff]  ;;  %v13486_v13 = vpack.c.bf16 %v2507_v59, %v2503_v56  ;;  %v2513_v14 = vld [vmem:[#allocation16 + $0x68] sm:$0xff] }
 0x51d   :  { %15084 = vst [vmem:[#allocation62_spill] sm:$0xff] %v13460_v44  ;;  %15087 = vst [vmem:[#allocation65_spill] sm:$0xff] %v13476_v60  ;;  %v13478_v61 = vpack.c.bf16 %v2498_v51, %v2494_v49  ;;  %v2506_v6 = vld [vmem:[#allocation16 + $0x30] sm:$0xff]  ;;  %v2508_v23 = vld [vmem:[#allocation16 + $0x40] sm:$0xff] }
 0x51e   :  { %8904 = vmatmul.mubr.msk.f32.gmra.mrb[42].mxu0 %vm1841_vm10, %v13327_v7  ;;  %8912 = vmatmul.mubr.msk.f32.gmra.mrb[22].mxu1 %vm1841_vm10, %v13327_v7  ;;  %15090 = vst [vmem:[#allocation68_spill] sm:$0xff] %v13486_v13  ;;  %v2512_v24 = vld [vmem:[#allocation16 + $0x60] sm:$0xff]  ;;  %v2510_v32 = vld [vmem:[#allocation16 + $0x50] sm:$0xff]  ;;  %v2517_v35 = vld [vmem:[#allocation16 + $0x88] sm:$0xff] }
 0x51f   :  { %1966 = vmatprep.mubr.f32.mxu0 %v14927_v43  ;;  %2079 = vmatprep.mubr.f32.mxu1 %v14927_v43  ;;  %15088 = vst [vmem:[#allocation66_spill] sm:$0xff] %v13478_v61  ;;  %v2516_v48 = vld [vmem:[#allocation16 + $0x80] sm:$0xff]  ;;  %v2522_v56 = vld [vmem:[#allocation16 + $0xb0] sm:$0xff]  ;;  %v2525_v59 = vld [vmem:[#allocation16 + $0xc8] sm:$0xff] }
 0x520   :  { %v2520_v49 = vld [vmem:[#allocation16 + $0xa0] sm:$0xff] }
 0x522   :  { %8905 = vmatmul.mubr.msk.f32.gmra.mrb[44].mxu0 %vm1841_vm10, %v13336_v9  ;;  %8913 = vmatmul.mubr.msk.f32.gmra.mrb[24].mxu1 %vm1841_vm10, %v13336_v9 }
 0x523   :  { %1972 = vmatprep.mubr.f32.mxu0 %v14927_v43  ;;  %2085 = vmatprep.mubr.f32.mxu1 %v14927_v43 }
 0x526   :  { %8906 = vmatmul.mubr.msk.f32.gmra.mrb[46].mxu0 %vm1841_vm10, %v13346_v15  ;;  %8914 = vmatmul.mubr.msk.f32.gmra.mrb[26].mxu1 %vm1841_vm10, %v13346_v15 }
 0x527   :  { %2242 = vmatprep.mubr.f32.mxu0 %v14927_v43  ;;  %2355 = vmatprep.mubr.f32.mxu1 %v14927_v43 }
 0x52a   :  { %8915 = vmatmul.mubr.msk.f32.vlgmr.msra.gmra.mrb[48].mxu0 %vm1841_vm10, %v13264_v10  ;;  %8923 = vmatmul.mubr.msk.f32.vlgmr.msra.gmra.mrb[28].mxu1 %vm1841_vm10, %v13264_v10  ;;  %v13376_v10 = vpack.c.bf16 %v2457_v29, %v2453_v28  ;;  %v13442_v28 = vpack.c.bf16 %v2482_v17, %v2478_v16  ;;  %v2484_v29 = vld [vmem:[#allocation13 + $0x180] sm:$0xff]  ;;  %v2511_v16 = vld [vmem:[#allocation16 + $0x58] sm:$0xff] }
 0x52b   :  { %9580 = vmatpush1.bf16.msra.mxu0 %v13354_v20  ;;  %9612 = vmatpush1.bf16.msra.mxu1 %v13356_v21  ;;  %v13458_v42 = vpack.c.bf16 %v2488_v31, %v2484_v29  ;;  %v2515_v17 = vld [vmem:[#allocation16 + $0x78] sm:$0xff] }
 0x52c   :  { %2248 = vmatprep.mubr.f32.mxu0 %v14927_v43  ;;  %2361 = vmatprep.mubr.f32.mxu1 %v14927_v43  ;;  %15065 = vst [vmem:[#allocation43_spill] sm:$0xff] %v13376_v10  ;;  %15080 = vst [vmem:[#allocation58_spill] sm:$0xff] %v13442_v28  ;;  %v13502_v31 = vpack.c.bf16 %v2515_v17, %v2511_v16  ;;  %v2528_v16 = vld [vmem:[#allocation16 + $0xe0] sm:$0xff] }
 0x52d   :  { %9582 = vmatprep.subr.bf16.mxu0 %v13358_v26  ;;  %9614 = vmatprep.subr.bf16.mxu1 %v13360_v27  ;;  %15083 = vst [vmem:[#allocation61_spill] sm:$0xff] %v13458_v42 }
 0x52e   :  { %8916 = vmatmul.mubr.msk.f32.gmra.mrb[50].mxu0 %vm1841_vm10, %v13275_v30  ;;  %8924 = vmatmul.mubr.msk.f32.gmra.mrb[30].mxu1 %vm1841_vm10, %v13275_v30  ;;  %v13394_v30 = vpack.c.bf16 %v2465_v41, %v2461_v40  ;;  %v2495_v40 = vld [vmem:[#allocation13 + $0x1d8] sm:$0xff] }
 0x52f   :  { %9584 = vmatpush1.bf16.msra.mxu0 %v13368_v33  ;;  %9616 = vmatpush1.bf16.msra.mxu1 %v13370_v34  ;;  %v2499_v41 = vld [vmem:[#allocation13 + $0x1f8] sm:$0xff] }
 0x530   :  { %2254 = vmatprep.mubr.f32.mxu0 %v14927_v43  ;;  %2367 = vmatprep.mubr.f32.mxu1 %v14927_v43  ;;  %15069 = vst [vmem:[#allocation47_spill] sm:$0xff] %v13394_v30 }
 0x531   :  { %9586 = vmatprep.subr.bf16.mxu0 %v13376_v10  ;;  %9618 = vmatprep.subr.bf16.mxu1 %v13378_v39 }
 0x532   :  { %8917 = vmatmul.mubr.msk.f32.gmra.mrb[52].mxu0 %vm1841_vm10, %v13289_v50  ;;  %8925 = vmatmul.mubr.msk.f32.gmra.mrb[32].mxu1 %vm1841_vm10, %v13289_v50  ;;  %v13412_v50 = vpack.c.bf16 %v2473_v54, %v2469_v53  ;;  %v13468_v53 = vpack.c.bf16 %v2499_v41, %v2495_v40  ;;  %v2501_v54 = vld [vmem:[#allocation16 + $0x8] sm:$0xff]  ;;  %v2523_v40 = vld [vmem:[#allocation16 + $0xb8] sm:$0xff]  ;;  %v13510_v41 = vpack.c.bf16 %v2512_v24, %v2508_v23  ;;  %v2526_v24 = vld [vmem:[#allocation16 + $0xd0] sm:$0xff] }
 0x533   :  { %9588 = vmatpush1.bf16.msra.mxu0 %v13386_v45  ;;  %9620 = vmatpush1.bf16.msra.mxu1 %v13388_v46  ;;  %v13484_v8 = vpack.c.bf16 %v2505_v55, %v2501_v54  ;;  %v2518_v55 = vld [vmem:[#allocation16 + $0x90] sm:$0xff] }
 0x534   :  { %2260 = vmatprep.mubr.f32.mxu0 %v14927_v43  ;;  %2373 = vmatprep.mubr.f32.mxu1 %v14927_v43  ;;  %15073 = vst [vmem:[#allocation51_spill] sm:$0xff] %v13412_v50  ;;  %15086 = vst [vmem:[#allocation64_spill] sm:$0xff] %v13468_v53 }
 0x535   :  { %9590 = vmatprep.subr.bf16.mxu0 %v13394_v30  ;;  %9622 = vmatprep.subr.bf16.mxu1 %v13396_v52  ;;  %15089 = vst [vmem:[#allocation67_spill] sm:$0xff] %v13484_v8 }
 0x536   :  { %8918 = vmatmul.mubr.msk.f32.gmra.mrb[54].mxu0 %vm1841_vm10, %v13300_v62  ;;  %8926 = vmatmul.mubr.msk.f32.gmra.mrb[34].mxu1 %vm1841_vm10, %v13300_v62  ;;  %v13430_v62 = vpack.c.bf16 %v2481_v4, %v2477_v3  ;;  %v2504_v3 = vld [vmem:[#allocation16 + $0x20] sm:$0xff]  ;;  %v2502_v4 = vld [vmem:[#allocation16 + $0x10] sm:$0xff] }
 0x537   :  { %9592 = vmatpush1.bf16.msra.mxu0 %v13404_v57  ;;  %9624 = vmatpush1.bf16.msra.mxu1 %v13406_v58 }
 0x538   :  { %2266 = vmatprep.mubr.f32.mxu0 %v14927_v43  ;;  %2379 = vmatprep.mubr.f32.mxu1 %v14927_v43  ;;  %15077 = vst [vmem:[#allocation55_spill] sm:$0xff] %v13430_v62 }
 0x539   :  { %9594 = vmatprep.subr.bf16.mxu0 %v13412_v50  ;;  %9626 = vmatprep.subr.bf16.mxu1 %v13414_v1 }
 0x53a   :  { %8919 = vmatmul.mubr.msk.f32.gmra.mrb[56].mxu0 %vm1841_vm10, %v13315_v5  ;;  %8927 = vmatmul.mubr.msk.f32.gmra.mrb[36].mxu1 %vm1841_vm10, %v13315_v5  ;;  %v13448_v5 = vpack.c.bf16 %v2489_v22, %v2485_v19  ;;  %v13494_v19 = vpack.c.bf16 %v2504_v3, %v2500_v63  ;;  %v13496_v22 = vpack.c.bf16 %v2506_v6, %v2502_v4  ;;  %v2529_v63 = vld [vmem:[#allocation16 + $0xe8] sm:$0xff]  ;;  %v2527_v3 = vld [vmem:[#allocation16 + $0xd8] sm:$0xff] }
 0x53b   :  { %9596 = vmatpush1.bf16.msra.mxu0 %v13422_v11  ;;  %9628 = vmatpush1.bf16.msra.mxu1 %v13424_v12  ;;  %v2531_v4 = vld [vmem:[#allocation16 + $0xf8] sm:$0xff]  ;;  %v13524_v6 = vpack.c.bf16 %v2520_v49, %v2516_v48  ;;  %v13530_v17 = vpack.c.bf16 %v2529_v63, %v2525_v59  ;;  %v2532_v49 = vld [vmem:[#allocation16 + $0x100] sm:$0xff]  ;;  %v2534_v63 = vld [vmem:[#allocation16 + $0x110] sm:$0xff] }
 0x53c   :  { %2272 = vmatprep.mubr.f32.mxu0 %v14927_v43  ;;  %2385 = vmatprep.mubr.f32.mxu1 %v14927_v43  ;;  %15081 = vst [vmem:[#allocation59_spill] sm:$0xff] %v13448_v5  ;;  %v13532_v23 = vpack.c.bf16 %v2531_v4, %v2527_v3  ;;  %v2538_v3 = vld [vmem:[#allocation16 + $0x130] sm:$0xff]  ;;  %v2541_v4 = vld [vmem:[#allocation16 + $0x148] sm:$0xff] }
 0x53d   :  { %9598 = vmatprep.subr.bf16.mxu0 %v13430_v62  ;;  %9630 = vmatprep.subr.bf16.mxu1 %v13432_v18  ;;  %15091 = vst [vmem:[#allocation69_spill] sm:$0xff] %v13524_v6  ;;  %15093 = vst [vmem:[#allocation71_spill] sm:$0xff] %v13530_v17 }
 0x53e   :  { %8920 = vmatmul.mubr.msk.f32.gmra.mrb[58].mxu0 %vm1841_vm10, %v13327_v7  ;;  %8928 = vmatmul.mubr.msk.f32.gmra.mrb[38].mxu1 %vm1841_vm10, %v13327_v7  ;;  %v13466_v7 = vpack.c.bf16 %v2497_v38, %v2493_v37  ;;  %v2521_v37 = vld [vmem:[#allocation16 + $0xa8] sm:$0xff]  ;;  %v2519_v38 = vld [vmem:[#allocation16 + $0x98] sm:$0xff]  ;;  %15094 = vst [vmem:[#allocation72_spill] sm:$0xff] %v13532_v23 }
 0x53f   :  { %9600 = vmatpush1.bf16.msra.mxu0 %v13440_v25  ;;  %9632 = vmatpush1.bf16.msra.mxu1 %v13442_v28  ;;  %v13516_v51 = vpack.c.bf16 %v2521_v37, %v2517_v35  ;;  %v13518_v54 = vpack.c.bf16 %v2523_v40, %v2519_v38  ;;  %v2537_v35 = vld [vmem:[#allocation16 + $0x128] sm:$0xff]  ;;  %v2535_v37 = vld [vmem:[#allocation16 + $0x118] sm:$0xff] }
 0x540   :  { %2278 = vmatprep.mubr.f32.mxu0 %v14927_v43  ;;  %2391 = vmatprep.mubr.f32.mxu1 %v14927_v43  ;;  %15085 = vst [vmem:[#allocation63_spill] sm:$0xff] %v13466_v7  ;;  %v2539_v38 = vld [vmem:[#allocation16 + $0x138] sm:$0xff] }
 0x541   :  { %9602 = vmatprep.subr.bf16.mxu0 %v13448_v5  ;;  %9634 = vmatprep.subr.bf16.mxu1 %v13450_v36  ;;  %v13544_v59 = vpack.c.bf16 %v2539_v38, %v2535_v37  ;;  %v2542_v37 = vld [vmem:[#allocation16 + $0x150] sm:$0xff] }
 0x542   :  { %8921 = vmatmul.mubr.msk.f32.gmra.mrb[60].mxu0 %vm1841_vm10, %v13336_v9  ;;  %8929 = vmatmul.mubr.msk.f32.gmra.mrb[40].mxu1 %vm1841_vm10, %v13336_v9  ;;  %v2509_v9 = vld [vmem:[#allocation16 + $0x48] sm:$0xff]  ;;  %v2546_v38 = vld [vmem:[#allocation16 + $0x170] sm:$0xff] }
 0x543   :  { %9604 = vmatpush1.bf16.msra.mxu0 %v13458_v42  ;;  %9636 = vmatpush1.bf16.msra.mxu1 %v13460_v44  ;;  %v13500_v29 = vpack.c.bf16 %v2513_v14, %v2509_v9  ;;  %v13526_v9 = vpack.c.bf16 %v2522_v56, %v2518_v55  ;;  %v2524_v14 = vld [vmem:[#allocation16 + $0xc0] sm:$0xff]  ;;  %15098 = vst [vmem:[#allocation76_spill] sm:$0xff] %v13544_v59 }
 0x544   :  { %2284 = vmatprep.mubr.f32.mxu0 %v14927_v43  ;;  %2397 = vmatprep.mubr.f32.mxu1 %v14927_v43  ;;  %v13536_v40 = vpack.c.bf16 %v2528_v16, %v2524_v14  ;;  %v2536_v55 = vld [vmem:[#allocation16 + $0x120] sm:$0xff]  ;;  %v13550_v16 = vpack.c.bf16 %v2538_v3, %v2534_v63 }
 0x545   :  { %9606 = vmatprep.subr.bf16.mxu0 %v13466_v7  ;;  %9638 = vmatprep.subr.bf16.mxu1 %v13468_v53  ;;  %15092 = vst [vmem:[#allocation70_spill] sm:$0xff] %v13526_v9  ;;  %v13548_v14 = vpack.c.bf16 %v2536_v55, %v2532_v49  ;;  %v13562_v55 = vpack.c.bf16 %v2546_v38, %v2542_v37  ;;  %v2548_v63 = vld [vmem:[#allocation16 + $0x180] sm:$0xff]  ;;  %v2562_v38 = vld [vmem:[#allocation16 + $0x1f0] sm:$0xff] }
 0x546   :  { %8922 = vmatmul.mubr.msk.f32.gmra.mrb[62].mxu0 %vm1841_vm10, %v13346_v15  ;;  %8930 = vmatmul.mubr.msk.f32.gmra.mrb[42].mxu1 %vm1841_vm10, %v13346_v15  ;;  %v2514_v15 = vld [vmem:[#allocation16 + $0x70] sm:$0xff]  ;;  %15095 = vst [vmem:[#allocation73_spill] sm:$0xff] %v13536_v40  ;;  %15100 = vst [vmem:[#allocation78_spill] sm:$0xff] %v13550_v16  ;;  %v2552_v3 = vld [vmem:[#allocation16 + $0x1a0] sm:$0xff] }
 0x547   :  { %9608 = vmatpush1.bf16.msra.mxu0 %v13476_v60  ;;  %9640 = vmatpush1.bf16.msra.mxu1 %v13478_v61  ;;  %v13512_v47 = vpack.c.bf16 %v2514_v15, %v2510_v32  ;;  %v2530_v32 = vld [vmem:[#allocation16 + $0xf0] sm:$0xff]  ;;  %v2533_v15 = vld [vmem:[#allocation16 + $0x108] sm:$0xff]  ;;  %15099 = vst [vmem:[#allocation77_spill] sm:$0xff] %v13548_v14  ;;  %v2556_v37 = vld [vmem:[#allocation16 + $0x1c0] sm:$0xff] }
 0x548   :  { %2632 = vmatprep.mubr.f32.mxu0 %v14927_v43  ;;  %2703 = vmatprep.mubr.f32.mxu1 %v14927_v43  ;;  %v13538_v48 = vpack.c.bf16 %v2530_v32, %v2526_v24  ;;  %v13542_v56 = vpack.c.bf16 %v2537_v35, %v2533_v15  ;;  %v2540_v24 = vld [vmem:[#allocation16 + $0x140] sm:$0xff] }
 0x549   :  { %9642 = vmatprep.subr.bf16.mxu0 %v13484_v8  ;;  %9674 = vmatprep.subr.bf16.mxu1 %v13486_v13  ;;  %v2544_v32 = vld [vmem:[#allocation16 + $0x160] sm:$0xff] }
 0x54a   :  { %2633 = vmatmul.mubr.f32.vlgmr.msra.gmra.mrb[32].mxu0 %v14927_v43  ;;  %2704 = vmatmul.mubr.f32.vlgmr.msra.gmra.mrb[12].mxu1 %v14927_v43  ;;  %15096 = vst [vmem:[#allocation74_spill] sm:$0xff] %v13538_v48  ;;  %15097 = vst [vmem:[#allocation75_spill] sm:$0xff] %v13542_v56  ;;  %v13560_v49 = vpack.c.bf16 %v2544_v32, %v2540_v24  ;;  %v13572_v24 = vpack.c.bf16 %v2552_v3, %v2548_v63 }
 0x54b   :  { %9644 = vmatpush1.bf16.msra.mxu0 %v13494_v19  ;;  %9676 = vmatpush1.bf16.msra.mxu1 %v13496_v22 }
 0x54c   :  { %9646 = vmatprep.subr.bf16.mxu0 %v13500_v29  ;;  %9678 = vmatprep.subr.bf16.mxu1 %v13502_v31 }
 0x54d   :  { %2782 = vmatprep.mubr.f32.mxu0 %v14927_v43  ;;  %2853 = vmatprep.mubr.f32.mxu1 %v14927_v43  ;;  %v2545_v43 = vld [vmem:[#allocation16 + $0x168] sm:$0xff] }
 0x54e   :  { %v13554_v15 = vpack.c.bf16 %v2545_v43, %v2541_v4  ;;  %v2554_v4 = vld [vmem:[#allocation16 + $0x1b0] sm:$0xff] }
 0x54f   :  { %9648 = vmatpush1.bf16.msra.mxu0 %v13510_v41  ;;  %9680 = vmatpush1.bf16.msra.mxu1 %v13512_v47 }
 0x550   :  { %9650 = vmatprep.subr.bf16.mxu0 %v13516_v51  ;;  %9682 = vmatprep.subr.bf16.mxu1 %v13518_v54 }
 0x553   :  { %9652 = vmatpush1.bf16.msra.mxu0 %v13524_v6  ;;  %9684 = vmatpush1.bf16.msra.mxu1 %v13526_v9  ;;  %v2543_v6 = vld [vmem:[#allocation16 + $0x158] sm:$0xff] }
 0x554   :  { %9654 = vmatprep.subr.bf16.mxu0 %v13530_v17  ;;  %9686 = vmatprep.subr.bf16.mxu1 %v13532_v23  ;;  %v2547_v9 = vld [vmem:[#allocation16 + $0x178] sm:$0xff]  ;;  %v2549_v23 = vld [vmem:[#allocation16 + $0x188] sm:$0xff] }
 0x555   :  { %v13556_v35 = vpack.c.bf16 %v2547_v9, %v2543_v6  ;;  %v2551_v17 = vld [vmem:[#allocation16 + $0x198] sm:$0xff]  ;;  %v2550_v9 = vld [vmem:[#allocation16 + $0x190] sm:$0xff] }
 0x556   :  { %v13574_v32 = vpack.c.bf16 %v2554_v4, %v2550_v9  ;;  %v1819_v9 = vld [vmem:[%s15103_s30] sm:$0xf] }
 0x557   :  { %9656 = vmatpush1.bf16.msra.mxu0 %v13536_v40  ;;  %9688 = vmatpush1.bf16.msra.mxu1 %v13538_v48  ;;  %v2553_v40 = vld [vmem:[#allocation16 + $0x1a8] sm:$0xff]  ;;  %v2555_v48 = vld [vmem:[#allocation16 + $0x1b8] sm:$0xff] }
 0x558   :  { %9658 = vmatprep.subr.bf16.mxu0 %v13542_v56  ;;  %9690 = vmatprep.subr.bf16.mxu1 %v13544_v59  ;;  %v13566_v43 = vpack.c.bf16 %v2553_v40, %v2549_v23  ;;  %v13568_v6 = vpack.c.bf16 %v2555_v48, %v2551_v17  ;;  %v2557_v59 = vld [vmem:[#allocation16 + $0x1c8] sm:$0xff]  ;;  %v2559_v56 = vld [vmem:[#allocation16 + $0x1d8] sm:$0xff]  ;;  %v2560_v40 = vld [vmem:[#allocation16 + $0x1e0] sm:$0xff] }
 0x559   :  { %v2558_v48 = vld [vmem:[#allocation16 + $0x1d0] sm:$0xff]  ;;  %v13584_v63 = vpack.c.bf16 %v2560_v40, %v2556_v37 }
 0x55a   :  { %v13586_v3 = vpack.c.bf16 %v2562_v38, %v2558_v48 }
 0x55b   :  { %9660 = vmatpush1.bf16.msra.mxu0 %v13548_v14  ;;  %9692 = vmatpush1.bf16.msra.mxu1 %v13550_v16  ;;  %v2561_v14 = vld [vmem:[#allocation16 + $0x1e8] sm:$0xff]  ;;  %v2563_v16 = vld [vmem:[#allocation16 + $0x1f8] sm:$0xff] }
 0x55c   :  { %9662 = vmatprep.subr.bf16.mxu0 %v13554_v15  ;;  %9694 = vmatprep.subr.bf16.mxu1 %v13556_v35  ;;  %v13578_v17 = vpack.c.bf16 %v2561_v14, %v2557_v59  ;;  %v13580_v23 = vpack.c.bf16 %v2563_v16, %v2559_v56  ;;  %v15101_v56 = vmov 0.0   ;;  %v1821_v59 = vlaneseq }
 0x55e   :  { %v1822_v14 = vshrl.u32 %v1821_v59, 7 }
 0x55f   :  { %9664 = vmatpush1.bf16.msra.mxu0 %v13560_v49  ;;  %9696 = vmatpush1.bf16.msra.mxu1 %v13562_v55 }
 0x560   :  { %9666 = vmatprep.subr.bf16.mxu0 %v13566_v43  ;;  %9698 = vmatprep.subr.bf16.mxu1 %v13568_v6  ;;  %v13630_v16 = vsub.s32 0, %v1822_v14  ;;  %v13635_v4 = vsub.s32 1, %v1822_v14 }
 0x562   :  { %15102 = vst [vmem:[#allocation79_spill] sm:$0xff] %v13630_v16  ;;  %15104 = vst [vmem:[#allocation80_spill] sm:$0xff] %v13635_v4  ;;  %v13638_v37 = vrot.slane %v1819_v9, %v13630_v16  ;;  %v13641_v40 = vrot.slane %v1819_v9, %v13635_v4 }
 0x563   :  { %9668 = vmatpush1.bf16.msra.mxu0 %v13572_v24  ;;  %9700 = vmatpush1.bf16.msra.mxu1 %v13574_v32 }
 0x564   :  { %9670 = vmatprep.subr.bf16.mxu0 %v13578_v17  ;;  %9702 = vmatprep.subr.bf16.mxu1 %v13580_v23  ;;  %15105 = vst [vmem:[#allocation81_spill] sm:$0xff] %v13638_v37 }
 0x567   :  { %9672 = vmatpush1.bf16.msra.mxu0 %v13584_v63  ;;  %9704 = vmatpush1.bf16.msra.mxu1 %v13586_v3 }
 0x568   :  { %9706 = vmatprep.subr.bf16.mxu0 %v13302_v0  ;;  %9738 = vmatprep.subr.bf16.mxu1 %v13311_v2 }
 0x56a   :  { %2783 = vmatmul.mubr.f32.vlgmr.msra.gmra.mrb[62].mxu0 %v15101_v56  ;;  %2854 = vmatmul.mubr.f32.vlgmr.msra.gmra.mrb[42].mxu1 %v15101_v56 }
 0x56b   :  { %9708 = vmatpush1.bf16.msra.mxu0 %v13354_v20  ;;  %9740 = vmatpush1.bf16.msra.mxu1 %v13356_v21 }
 0x56c   :  { %9710 = vmatprep.subr.bf16.mxu0 %v13358_v26  ;;  %9742 = vmatprep.subr.bf16.mxu1 %v13360_v27 }
 0x56d   :  { %2982 = vmatprep.mubr.f32.mxu0 %v15101_v56  ;;  %3053 = vmatprep.mubr.f32.mxu1 %v15101_v56 }
 0x56f   :  { %9712 = vmatpush1.bf16.msra.mxu0 %v13368_v33  ;;  %9744 = vmatpush1.bf16.msra.mxu1 %v13370_v34 }
 0x570   :  { %9714 = vmatprep.subr.bf16.mxu0 %v13376_v10  ;;  %9746 = vmatprep.subr.bf16.mxu1 %v13378_v39 }
 0x573   :  { %9716 = vmatpush1.bf16.msra.mxu0 %v13386_v45  ;;  %9748 = vmatpush1.bf16.msra.mxu1 %v13388_v46 }
 0x574   :  { %9718 = vmatprep.subr.bf16.mxu0 %v13394_v30  ;;  %9750 = vmatprep.subr.bf16.mxu1 %v13396_v52 }
 0x577   :  { %9720 = vmatpush1.bf16.msra.mxu0 %v13404_v57  ;;  %9752 = vmatpush1.bf16.msra.mxu1 %v13406_v58 }
 0x578   :  { %9722 = vmatprep.subr.bf16.mxu0 %v13412_v50  ;;  %9754 = vmatprep.subr.bf16.mxu1 %v13414_v1 }
 0x57b   :  { %9724 = vmatpush1.bf16.msra.mxu0 %v13422_v11  ;;  %9756 = vmatpush1.bf16.msra.mxu1 %v13424_v12 }
 0x57c   :  { %9726 = vmatprep.subr.bf16.mxu0 %v13430_v62  ;;  %9758 = vmatprep.subr.bf16.mxu1 %v13432_v18 }
 0x57f   :  { %9728 = vmatpush1.bf16.msra.mxu0 %v13440_v25  ;;  %9760 = vmatpush1.bf16.msra.mxu1 %v13442_v28 }
 0x580   :  { %9730 = vmatprep.subr.bf16.mxu0 %v13448_v5  ;;  %9762 = vmatprep.subr.bf16.mxu1 %v13450_v36 }
 0x583   :  { %9732 = vmatpush1.bf16.msra.mxu0 %v13458_v42  ;;  %9764 = vmatpush1.bf16.msra.mxu1 %v13460_v44  ;;  %v13650_v42 = vsub.s32 2, %v1822_v14 }
 0x584   :  { %9734 = vmatprep.subr.bf16.mxu0 %v13466_v7  ;;  %9766 = vmatprep.subr.bf16.mxu1 %v13468_v53 }
 0x585   :  { %15108 = vst [vmem:[#allocation84_spill] sm:$0xff] %v13650_v42  ;;  %v13654_v5 = vrot.slane %v1819_v9, %v13650_v42 }
 0x587   :  { %9736 = vmatpush1.bf16.msra.mxu0 %v13476_v60  ;;  %9768 = vmatpush1.bf16.msra.mxu1 %v13478_v61  ;;  %15109 = vst [vmem:[#allocation85_spill] sm:$0xff] %v13654_v5 }
 0x588   :  { %9770 = vmatprep.subr.bf16.mxu0 %v13484_v8  ;;  %9802 = vmatprep.subr.bf16.mxu1 %v13486_v13  ;;  %v13643_v8 = vsub.s32 3, %v1822_v14 }
 0x58a   :  { %15106 = vst [vmem:[#allocation82_spill] sm:$0xff] %v13643_v8  ;;  %v13648_v44 = vrot.slane %v1819_v9, %v13643_v8 }
 0x58c   :  { %15107 = vst [vmem:[#allocation83_spill] sm:$0xff] %v13648_v44 }
 0x61d   :  { %v2634_v48 = vpop.f32.mrb[32].mxu0  ;;  %v2705_v38 = vpop.f32.mrb[12].mxu1 }
 0x61e   :  { %v11545_v59 = vadd.f32 %v2634_v48, %v13638_v37  ;;  %v2636_v13 = vpop.f32.mrb[33].mxu0  ;;  %v2707_v61 = vpop.f32.mrb[13].mxu1  ;;  %v11561_v48 = vadd.f32 %v2705_v38, %v13654_v5 }
 0x61f   :  { %v11546_v60 = vadd.f32 %v2636_v13, %v13641_v40  ;;  %v11562_v36 = vadd.f32 %v2707_v61, %v13648_v44 }
 0x620   :  { %v8931_v53 = vmul.f32 -1.442695, %v11545_v59 }
 0x621   :  { %v8932_v7 = vmul.f32 -1.442695, %v11546_v60  ;;  %v8933_v28 = vmul.f32 -1.442695, %v11562_v36 }
 0x622   :  { %11822 = vpow2.f32 %v8931_v53 }
 0x623   :  { %11824 = vpow2.f32 %v8932_v7  ;;  %v2156_v7 = vld [vmem:[%s14897_s12] sm:$0xf] }
 0x624   :  { %11826 = vpow2.f32 %v8933_v28  ;;  %v13661_v38 = vrot.slane %v2156_v7, %v13630_v16  ;;  %v13664_v28 = vrot.slane %v2156_v7, %v13635_v4 }
 0x625   :  { %11828 = vtanh.f32 %v11561_v48 }
 0x626   :  { %15110 = vst [vmem:[#allocation86_spill] sm:$0xff] %v13661_v38 }
 0x62c   :  { %v11823_v37 = vpop.eup %11822 }
 0x62d   :  { %v11825_v25 = vpop.eup %11824  ;;  %v2867_v13 = vadd.f32 1.0, %v11823_v37 }
 0x62e   :  { %v2873_v60 = vadd.f32 1.0, %v11825_v25  ;;  %v11827_v53 = vpop.eup %11826 }
 0x62f   :  { %11830 = vrcp.f32 %v2867_v13  ;;  %v11829_v61 = vpop.eup %11828  ;;  %v2880_v36 = vadd.f32 1.0, %v11827_v53 }
 0x630   :  { %11832 = vrcp.f32 %v2873_v60 }
 0x631   :  { %11834 = vrcp.f32 %v2880_v36 }
 0x639   :  { %v11831_v14 = vpop.eup %11830 }
 0x63a   :  { %v11833_v9 = vpop.eup %11832  ;;  %v2884_v59 = vmul.f32 %v11831_v14, %v11829_v61 }
 0x63b   :  { %v2883_v5 = vmul.f32 0.0, %v11833_v9  ;;  %v13672_v9 = vrot.slane %v2156_v7, %v13643_v8  ;;  %v11835_v36 = vpop.eup %11834 }
 0x63d   :  { %v13666_v25 = vadd.f32 %v2884_v59, %v2883_v5  ;;  %v2784_v37 = vpop.f32.mrb[62].mxu0  ;;  %v2855_v48 = vpop.f32.mrb[42].mxu1  ;;  %v13676_v59 = vrot.slane %v2156_v7, %v13650_v42  ;;  %v15113_v7 = vld [vmem:[#allocation70_spill] sm:$0xff]  ;;  %v15119_v42 = vld [vmem:[#allocation76_spill] sm:$0xff] }
 0x63e   :  { %v11591_v13 = vadd.f32 %v2784_v37, %v13661_v38  ;;  %v2786_v60 = vpop.f32.mrb[63].mxu0  ;;  %v2857_v44 = vpop.f32.mrb[43].mxu1 }
 0x63f   :  { %11836 = vtanh.f32 %v13666_v25  ;;  %v11592_v53 = vadd.f32 %v2786_v60, %v13664_v28  ;;  %v11608_v5 = vadd.f32 %v2857_v44, %v13672_v9  ;;  %v11607_v38 = vadd.f32 %v2855_v48, %v13676_v59  ;;  %v15115_v48 = vld [vmem:[#allocation72_spill] sm:$0xff] }
 0x640   :  { %v8934_v61 = vmul.f32 -1.442695, %v11591_v13 }
 0x641   :  { %v8935_v14 = vmul.f32 -1.442695, %v11592_v53  ;;  %v8936_v4 = vmul.f32 -1.442695, %v11608_v5 }
 0x642   :  { %11838 = vpow2.f32 %v8934_v61 }
 0x643   :  { %11840 = vpow2.f32 %v8935_v14 }
 0x644   :  { %11842 = vpow2.f32 %v8936_v4  ;;  %v15112_v4 = vld [vmem:[#allocation69_spill] sm:$0xff] }
 0x645   :  { %11844 = vtanh.f32 %v11607_v38  ;;  %v15114_v38 = vld [vmem:[#allocation71_spill] sm:$0xff] }
 0x649   :  { %v11837_v37 = vpop.eup %11836 }
 0x64a   :  { %v13678_v16 = vmul.f32 %v11837_v37, %v11835_v36  ;;  %v15116_v36 = vld [vmem:[#allocation73_spill] sm:$0xff]  ;;  %v15117_v37 = vld [vmem:[#allocation74_spill] sm:$0xff] }
 0x64c   :  { %15111 = vst [vmem:[#allocation87_spill] sm:$0xff] %v13678_v16  ;;  %v11839_v60 = vpop.eup %11838  ;;  %2983 = vmatmul.mubr.f32.vlgmr.msra.gmra.mrb[34].mxu0 %v13678_v16  ;;  %3054 = vmatmul.mubr.f32.vlgmr.msra.gmra.mrb[14].mxu1 %v13678_v16 }
 0x64d   :  { %v11841_v13 = vpop.eup %11840  ;;  %v2891_v53 = vadd.f32 1.0, %v11839_v60  ;;  %9772 = vmatpush1.bf16.msra.mxu0 %v13494_v19  ;;  %9804 = vmatpush1.bf16.msra.mxu1 %v13496_v22 }
 0x64e   :  { %v2897_v44 = vadd.f32 1.0, %v11841_v13  ;;  %9774 = vmatprep.subr.bf16.mxu0 %v13500_v29  ;;  %9806 = vmatprep.subr.bf16.mxu1 %v13502_v31  ;;  %v11843_v61 = vpop.eup %11842 }
 0x64f   :  { %11846 = vrcp.f32 %v2891_v53  ;;  %3132 = vmatprep.mubr.f32.mxu0 %v15101_v56  ;;  %3203 = vmatprep.mubr.f32.mxu1 %v15101_v56  ;;  %v11845_v14 = vpop.eup %11844  ;;  %v2904_v53 = vadd.f32 1.0, %v11843_v61 }
 0x650   :  { %11848 = vrcp.f32 %v2897_v44  ;;  %v15118_v44 = vld [vmem:[#allocation75_spill] sm:$0xff] }
 0x651   :  { %9776 = vmatpush1.bf16.msra.mxu0 %v13510_v41  ;;  %9808 = vmatpush1.bf16.msra.mxu1 %v13512_v47  ;;  %11850 = vrcp.f32 %v2904_v53  ;;  %v15126_v53 = vld [vmem:[#allocation60_spill] sm:$0xff] }
 0x652   :  { %9778 = vmatprep.subr.bf16.mxu0 %v13516_v51  ;;  %9810 = vmatprep.subr.bf16.mxu1 %v13518_v54 }
 0x655   :  { %9780 = vmatpush1.bf16.msra.mxu0 %v15112_v4  ;;  %9812 = vmatpush1.bf16.msra.mxu1 %v15113_v7 }
 0x656   :  { %9782 = vmatprep.subr.bf16.mxu0 %v15114_v38  ;;  %9814 = vmatprep.subr.bf16.mxu1 %v15115_v48  ;;  %v15120_v38 = vld [vmem:[#allocation77_spill] sm:$0xff]  ;;  %v15121_v48 = vld [vmem:[#allocation78_spill] sm:$0xff] }
 0x659   :  { %v11847_v5 = vpop.eup %11846  ;;  %9784 = vmatpush1.bf16.msra.mxu0 %v15116_v36  ;;  %9816 = vmatpush1.bf16.msra.mxu1 %v15117_v37 }
 0x65a   :  { %v11849_v60 = vpop.eup %11848  ;;  %v2908_v13 = vmul.f32 %v11847_v5, %v11845_v14  ;;  %9786 = vmatprep.subr.bf16.mxu0 %v15118_v44  ;;  %9818 = vmatprep.subr.bf16.mxu1 %v15119_v42  ;;  %v15123_v5 = vld [vmem:[#allocation57_spill] sm:$0xff] }
 0x65b   :  { %v2907_v8 = vmul.f32 0.0, %v11849_v60  ;;  %v15124_v60 = vld [vmem:[#allocation58_spill] sm:$0xff] }
 0x65d   :  { %v13701_v16 = vadd.f32 %v2908_v13, %v2907_v8  ;;  %9788 = vmatpush1.bf16.msra.mxu0 %v15120_v38  ;;  %9820 = vmatpush1.bf16.msra.mxu1 %v15121_v48  ;;  %v11851_v8 = vpop.eup %11850  ;;  %v15125_v13 = vld [vmem:[#allocation59_spill] sm:$0xff] }
 0x65e   :  { %9790 = vmatprep.subr.bf16.mxu0 %v13554_v15  ;;  %9822 = vmatprep.subr.bf16.mxu1 %v13556_v35 }
 0x65f   :  { %11852 = vtanh.f32 %v13701_v16 }
 0x661   :  { %9792 = vmatpush1.bf16.msra.mxu0 %v13560_v49  ;;  %9824 = vmatpush1.bf16.msra.mxu1 %v13562_v55 }
 0x662   :  { %9794 = vmatprep.subr.bf16.mxu0 %v13566_v43  ;;  %9826 = vmatprep.subr.bf16.mxu1 %v13568_v6 }
 0x665   :  { %9796 = vmatpush1.bf16.msra.mxu0 %v13572_v24  ;;  %9828 = vmatpush1.bf16.msra.mxu1 %v13574_v32 }
 0x666   :  { %9798 = vmatprep.subr.bf16.mxu0 %v13578_v17  ;;  %9830 = vmatprep.subr.bf16.mxu1 %v13580_v23 }
 0x669   :  { %v11853_v61 = vpop.eup %11852  ;;  %9800 = vmatpush1.bf16.msra.mxu0 %v13584_v63  ;;  %9832 = vmatpush1.bf16.msra.mxu1 %v13586_v3 }
 0x66a   :  { %v13718_v14 = vmul.f32 %v11853_v61, %v11851_v8  ;;  %9834 = vmatprep.subr.bf16.mxu0 %v13302_v0  ;;  %9866 = vmatprep.subr.bf16.mxu1 %v13311_v2  ;;  %v15127_v8 = vld [vmem:[#allocation61_spill] sm:$0xff]  ;;  %v15128_v61 = vld [vmem:[#allocation62_spill] sm:$0xff] }
 0x66c   :  { %15122 = vst [vmem:[#allocation69_spill] sm:$0xff] %v13718_v14  ;;  %3133 = vmatmul.mubr.f32.vlgmr.msra.gmra.mrb[60].mxu0 %v13718_v14  ;;  %3204 = vmatmul.mubr.f32.vlgmr.msra.gmra.mrb[40].mxu1 %v13718_v14  ;;  %v15129_v14 = vld [vmem:[#allocation63_spill] sm:$0xff] }
 0x66d   :  { %9836 = vmatpush1.bf16.msra.mxu0 %v13354_v20  ;;  %9868 = vmatpush1.bf16.msra.mxu1 %v13356_v21 }
 0x66e   :  { %9838 = vmatprep.subr.bf16.mxu0 %v13358_v26  ;;  %9870 = vmatprep.subr.bf16.mxu1 %v13360_v27 }
 0x66f   :  { %3332 = vmatprep.mubr.f32.mxu0 %v15101_v56  ;;  %3403 = vmatprep.mubr.f32.mxu1 %v15101_v56 }
 0x671   :  { %9840 = vmatpush1.bf16.msra.mxu0 %v13368_v33  ;;  %9872 = vmatpush1.bf16.msra.mxu1 %v13370_v34 }
 0x672   :  { %9842 = vmatprep.subr.bf16.mxu0 %v13376_v10  ;;  %9874 = vmatprep.subr.bf16.mxu1 %v13378_v39 }
 0x675   :  { %9844 = vmatpush1.bf16.msra.mxu0 %v13386_v45  ;;  %9876 = vmatpush1.bf16.msra.mxu1 %v13388_v46 }
 0x676   :  { %9846 = vmatprep.subr.bf16.mxu0 %v13394_v30  ;;  %9878 = vmatprep.subr.bf16.mxu1 %v13396_v52 }
 0x679   :  { %9848 = vmatpush1.bf16.msra.mxu0 %v13404_v57  ;;  %9880 = vmatpush1.bf16.msra.mxu1 %v13406_v58 }
 0x67a   :  { %9850 = vmatprep.subr.bf16.mxu0 %v13412_v50  ;;  %9882 = vmatprep.subr.bf16.mxu1 %v13414_v1  ;;  %v15135_v1 = vld [vmem:[#allocation81_spill] sm:$0xff] }
 0x67d   :  { %9852 = vmatpush1.bf16.msra.mxu0 %v13422_v11  ;;  %9884 = vmatpush1.bf16.msra.mxu1 %v13424_v12  ;;  %v15130_v11 = vld [vmem:[#allocation64_spill] sm:$0xff]  ;;  %v15131_v12 = vld [vmem:[#allocation65_spill] sm:$0xff] }
 0x67e   :  { %9854 = vmatprep.subr.bf16.mxu0 %v13430_v62  ;;  %9886 = vmatprep.subr.bf16.mxu1 %v13432_v18  ;;  %v15132_v62 = vld [vmem:[#allocation66_spill] sm:$0xff]  ;;  %v15133_v18 = vld [vmem:[#allocation67_spill] sm:$0xff] }
 0x681   :  { %9856 = vmatpush1.bf16.msra.mxu0 %v15123_v5  ;;  %9888 = vmatpush1.bf16.msra.mxu1 %v15124_v60  ;;  %v15134_v5 = vld [vmem:[#allocation68_spill] sm:$0xff] }
 0x682   :  { %9858 = vmatprep.subr.bf16.mxu0 %v15125_v13  ;;  %9890 = vmatprep.subr.bf16.mxu1 %v15126_v53 }
 0x685   :  { %9860 = vmatpush1.bf16.msra.mxu0 %v15127_v8  ;;  %9892 = vmatpush1.bf16.msra.mxu1 %v15128_v61 }
 0x686   :  { %9862 = vmatprep.subr.bf16.mxu0 %v15129_v14  ;;  %9894 = vmatprep.subr.bf16.mxu1 %v15130_v11  ;;  %v15136_v11 = vld [vmem:[#allocation83_spill] sm:$0xff] }
 0x689   :  { %9864 = vmatpush1.bf16.msra.mxu0 %v15131_v12  ;;  %9896 = vmatpush1.bf16.msra.mxu1 %v15132_v62  ;;  %v15137_v62 = vld [vmem:[#allocation85_spill] sm:$0xff] }
 0x68a   :  { %9898 = vmatprep.subr.bf16.mxu0 %v15133_v18  ;;  %9930 = vmatprep.subr.bf16.mxu1 %v15134_v5 }
 0x71f   :  { %v2984_v60 = vpop.f32.mrb[34].mxu0  ;;  %v3055_v13 = vpop.f32.mrb[14].mxu1 }
 0x720   :  { %v11547_v53 = vadd.f32 %v2984_v60, %v15135_v1  ;;  %v2986_v50 = vpop.f32.mrb[35].mxu0  ;;  %v3057_v8 = vpop.f32.mrb[15].mxu1  ;;  %v11563_v52 = vadd.f32 %v3055_v13, %v15137_v62  ;;  %v15138_v62 = vld [vmem:[#allocation86_spill] sm:$0xff] }
 0x721   :  { %v11548_v61 = vadd.f32 %v2986_v50, %v13641_v40  ;;  %v11564_v12 = vadd.f32 %v3057_v8, %v15136_v11 }
 0x722   :  { %v8937_v58 = vmul.f32 -1.442695, %v11547_v53 }
 0x723   :  { %v8938_v14 = vmul.f32 -1.442695, %v11548_v61  ;;  %v8939_v57 = vmul.f32 -1.442695, %v11564_v12 }
 0x724   :  { %11854 = vpow2.f32 %v8937_v58 }
 0x725   :  { %11856 = vpow2.f32 %v8938_v14 }
 0x726   :  { %11858 = vpow2.f32 %v8939_v57 }
 0x727   :  { %11860 = vtanh.f32 %v11563_v52 }
 0x72e   :  { %v11855_v18 = vpop.eup %11854 }
 0x72f   :  { %v11857_v30 = vpop.eup %11856  ;;  %v3217_v5 = vadd.f32 1.0, %v11855_v18 }
 0x730   :  { %v3223_v46 = vadd.f32 1.0, %v11857_v30  ;;  %v11859_v60 = vpop.eup %11858 }
 0x731   :  { %11862 = vrcp.f32 %v3217_v5  ;;  %v11861_v1 = vpop.eup %11860  ;;  %v3230_v58 = vadd.f32 1.0, %v11859_v60 }
 0x732   :  { %11864 = vrcp.f32 %v3223_v46 }
 0x733   :  { %11866 = vrcp.f32 %v3230_v58 }
 0x73b   :  { %v11863_v50 = vpop.eup %11862 }
 0x73c   :  { %v11865_v53 = vpop.eup %11864  ;;  %v3234_v61 = vmul.f32 %v11863_v50, %v11861_v1 }
 0x73d   :  { %v3233_v14 = vmul.f32 %v11865_v53, %v13666_v25  ;;  %v11867_v25 = vpop.eup %11866 }
 0x73f   :  { %v13763_v8 = vadd.f32 %v3234_v61, %v3233_v14  ;;  %v3134_v12 = vpop.f32.mrb[60].mxu0  ;;  %v3205_v13 = vpop.f32.mrb[40].mxu1 }
 0x740   :  { %v11589_v18 = vadd.f32 %v3134_v12, %v15138_v62  ;;  %v3136_v57 = vpop.f32.mrb[61].mxu0  ;;  %v3207_v52 = vpop.f32.mrb[41].mxu1  ;;  %v11605_v61 = vadd.f32 %v3205_v13, %v13676_v59  ;;  %v15140_v13 = vld [vmem:[#allocation71_spill] sm:$0xff] }
 0x741   :  { %11868 = vtanh.f32 %v13763_v8  ;;  %v11590_v46 = vadd.f32 %v3136_v57, %v13664_v28  ;;  %v11606_v1 = vadd.f32 %v3207_v52, %v13672_v9  ;;  %v15141_v57 = vld [vmem:[#allocation72_spill] sm:$0xff] }
 0x742   :  { %v8940_v30 = vmul.f32 -1.442695, %v11589_v18 }
 0x743   :  { %v8941_v5 = vmul.f32 -1.442695, %v11590_v46  ;;  %v8942_v50 = vmul.f32 -1.442695, %v11606_v1 }
 0x744   :  { %11870 = vpow2.f32 %v8940_v30 }
 0x745   :  { %11872 = vpow2.f32 %v8941_v5 }
 0x746   :  { %11874 = vpow2.f32 %v8942_v50 }
 0x747   :  { %11876 = vtanh.f32 %v11605_v61 }
 0x74b   :  { %v11869_v60 = vpop.eup %11868 }
 0x74c   :  { %v13769_v53 = vmul.f32 %v11869_v60, %v11867_v25 }
 0x74e   :  { %15139 = vst [vmem:[#allocation70_spill] sm:$0xff] %v13769_v53  ;;  %v11871_v58 = vpop.eup %11870  ;;  %3333 = vmatmul.mubr.f32.vlgmr.msra.gmra.mrb[36].mxu0 %v13769_v53  ;;  %3404 = vmatmul.mubr.f32.vlgmr.msra.gmra.mrb[16].mxu1 %v13769_v53  ;;  %v15155_v53 = vld [vmem:[#allocation58_spill] sm:$0xff] }
 0x74f   :  { %v11873_v14 = vpop.eup %11872  ;;  %v3241_v12 = vadd.f32 1.0, %v11871_v58  ;;  %9900 = vmatpush1.bf16.msra.mxu0 %v13494_v19  ;;  %9932 = vmatpush1.bf16.msra.mxu1 %v13496_v22 }
 0x750   :  { %v3247_v18 = vadd.f32 1.0, %v11873_v14  ;;  %9902 = vmatprep.subr.bf16.mxu0 %v13500_v29  ;;  %9934 = vmatprep.subr.bf16.mxu1 %v13502_v31  ;;  %v11875_v52 = vpop.eup %11874  ;;  %v15143_v14 = vld [vmem:[#allocation46_spill] sm:$0xff] }
 0x751   :  { %11878 = vrcp.f32 %v3241_v12  ;;  %3482 = vmatprep.mubr.f32.mxu0 %v15101_v56  ;;  %3553 = vmatprep.mubr.f32.mxu1 %v15101_v56  ;;  %v11877_v46 = vpop.eup %11876  ;;  %v3254_v25 = vadd.f32 1.0, %v11875_v52  ;;  %v15144_v12 = vld [vmem:[#allocation47_spill] sm:$0xff]  ;;  %v15146_v52 = vld [vmem:[#allocation49_spill] sm:$0xff] }
 0x752   :  { %11880 = vrcp.f32 %v3247_v18  ;;  %v15145_v18 = vld [vmem:[#allocation48_spill] sm:$0xff] }
 0x753   :  { %9904 = vmatpush1.bf16.msra.mxu0 %v13510_v41  ;;  %9936 = vmatpush1.bf16.msra.mxu1 %v13512_v47  ;;  %11882 = vrcp.f32 %v3254_v25  ;;  %v15151_v25 = vld [vmem:[#allocation54_spill] sm:$0xff] }
 0x754   :  { %9906 = vmatprep.subr.bf16.mxu0 %v13516_v51  ;;  %9938 = vmatprep.subr.bf16.mxu1 %v13518_v54 }
 0x757   :  { %9908 = vmatpush1.bf16.msra.mxu0 %v15112_v4  ;;  %9940 = vmatpush1.bf16.msra.mxu1 %v15113_v7 }
 0x758   :  { %9910 = vmatprep.subr.bf16.mxu0 %v15140_v13  ;;  %9942 = vmatprep.subr.bf16.mxu1 %v15141_v57 }
 0x75b   :  { %v11879_v30 = vpop.eup %11878  ;;  %9912 = vmatpush1.bf16.msra.mxu0 %v15116_v36  ;;  %9944 = vmatpush1.bf16.msra.mxu1 %v15117_v37 }
 0x75c   :  { %v11881_v5 = vpop.eup %11880  ;;  %v3258_v1 = vmul.f32 %v11879_v30, %v11877_v46  ;;  %9914 = vmatprep.subr.bf16.mxu0 %v15118_v44  ;;  %9946 = vmatprep.subr.bf16.mxu1 %v15119_v42  ;;  %v15147_v46 = vld [vmem:[#allocation50_spill] sm:$0xff]  ;;  %v15148_v30 = vld [vmem:[#allocation51_spill] sm:$0xff] }
 0x75d   :  { %v3257_v60 = vmul.f32 %v11881_v5, %v13701_v16  ;;  %v11883_v16 = vpop.eup %11882  ;;  %v15149_v5 = vld [vmem:[#allocation52_spill] sm:$0xff] }
 0x75f   :  { %v13793_v50 = vadd.f32 %v3258_v1, %v3257_v60  ;;  %9916 = vmatpush1.bf16.msra.mxu0 %v15120_v38  ;;  %9948 = vmatpush1.bf16.msra.mxu1 %v15121_v48  ;;  %v15150_v1 = vld [vmem:[#allocation53_spill] sm:$0xff]  ;;  %v15152_v60 = vld [vmem:[#allocation55_spill] sm:$0xff] }
 0x760   :  { %9918 = vmatprep.subr.bf16.mxu0 %v13554_v15  ;;  %9950 = vmatprep.subr.bf16.mxu1 %v13556_v35 }
 0x761   :  { %11884 = vtanh.f32 %v13793_v50 }
 0x763   :  { %9920 = vmatpush1.bf16.msra.mxu0 %v13560_v49  ;;  %9952 = vmatpush1.bf16.msra.mxu1 %v13562_v55 }
 0x764   :  { %9922 = vmatprep.subr.bf16.mxu0 %v13566_v43  ;;  %9954 = vmatprep.subr.bf16.mxu1 %v13568_v6 }
 0x767   :  { %9924 = vmatpush1.bf16.msra.mxu0 %v13572_v24  ;;  %9956 = vmatpush1.bf16.msra.mxu1 %v13574_v32 }
 0x768   :  { %9926 = vmatprep.subr.bf16.mxu0 %v13578_v17  ;;  %9958 = vmatprep.subr.bf16.mxu1 %v13580_v23 }
 0x76b   :  { %v11885_v61 = vpop.eup %11884  ;;  %9928 = vmatpush1.bf16.msra.mxu0 %v13584_v63  ;;  %9960 = vmatpush1.bf16.msra.mxu1 %v13586_v3 }
 0x76c   :  { %v13810_v58 = vmul.f32 %v11885_v61, %v11883_v16  ;;  %9962 = vmatprep.subr.bf16.mxu0 %v13302_v0  ;;  %9994 = vmatprep.subr.bf16.mxu1 %v13311_v2  ;;  %v15153_v16 = vld [vmem:[#allocation56_spill] sm:$0xff]  ;;  %v15154_v61 = vld [vmem:[#allocation57_spill] sm:$0xff] }
 0x76e   :  { %15142 = vst [vmem:[#allocation73_spill] sm:$0xff] %v13810_v58  ;;  %3483 = vmatmul.mubr.f32.vlgmr.msra.gmra.mrb[58].mxu0 %v13810_v58  ;;  %3554 = vmatmul.mubr.f32.vlgmr.msra.gmra.mrb[38].mxu1 %v13810_v58  ;;  %v15156_v58 = vld [vmem:[#allocation59_spill] sm:$0xff] }
 0x76f   :  { %9964 = vmatpush1.bf16.msra.mxu0 %v13354_v20  ;;  %9996 = vmatpush1.bf16.msra.mxu1 %v13356_v21 }
 0x770   :  { %9966 = vmatprep.subr.bf16.mxu0 %v13358_v26  ;;  %9998 = vmatprep.subr.bf16.mxu1 %v13360_v27 }
 0x771   :  { %3682 = vmatprep.mubr.f32.mxu0 %v15101_v56  ;;  %3753 = vmatprep.mubr.f32.mxu1 %v15101_v56 }
 0x773   :  { %9968 = vmatpush1.bf16.msra.mxu0 %v13368_v33  ;;  %10000 = vmatpush1.bf16.msra.mxu1 %v13370_v34 }
 0x774   :  { %9970 = vmatprep.subr.bf16.mxu0 %v13376_v10  ;;  %10002 = vmatprep.subr.bf16.mxu1 %v13378_v39 }
 0x777   :  { %9972 = vmatpush1.bf16.msra.mxu0 %v13386_v45  ;;  %10004 = vmatpush1.bf16.msra.mxu1 %v15143_v14 }
 0x778   :  { %9974 = vmatprep.subr.bf16.mxu0 %v15144_v12  ;;  %10006 = vmatprep.subr.bf16.mxu1 %v15145_v18  ;;  %v15166_v18 = vld [vmem:[#allocation81_spill] sm:$0xff] }
 0x77b   :  { %9976 = vmatpush1.bf16.msra.mxu0 %v15146_v52  ;;  %10008 = vmatpush1.bf16.msra.mxu1 %v15147_v46  ;;  %v15157_v52 = vld [vmem:[#allocation60_spill] sm:$0xff]  ;;  %v15158_v46 = vld [vmem:[#allocation61_spill] sm:$0xff] }
 0x77c   :  { %9978 = vmatprep.subr.bf16.mxu0 %v15148_v30  ;;  %10010 = vmatprep.subr.bf16.mxu1 %v15149_v5  ;;  %v15159_v30 = vld [vmem:[#allocation62_spill] sm:$0xff]  ;;  %v15160_v5 = vld [vmem:[#allocation63_spill] sm:$0xff] }
 0x77f   :  { %9980 = vmatpush1.bf16.msra.mxu0 %v15150_v1  ;;  %10012 = vmatpush1.bf16.msra.mxu1 %v15151_v25  ;;  %v15161_v1 = vld [vmem:[#allocation64_spill] sm:$0xff]  ;;  %v15162_v25 = vld [vmem:[#allocation65_spill] sm:$0xff] }
 0x780   :  { %9982 = vmatprep.subr.bf16.mxu0 %v15152_v60  ;;  %10014 = vmatprep.subr.bf16.mxu1 %v15153_v16  ;;  %v15163_v60 = vld [vmem:[#allocation66_spill] sm:$0xff]  ;;  %v15164_v16 = vld [vmem:[#allocation67_spill] sm:$0xff] }
 0x783   :  { %9984 = vmatpush1.bf16.msra.mxu0 %v15154_v61  ;;  %10016 = vmatpush1.bf16.msra.mxu1 %v15155_v53  ;;  %v15165_v61 = vld [vmem:[#allocation68_spill] sm:$0xff] }
 0x784   :  { %9986 = vmatprep.subr.bf16.mxu0 %v15156_v58  ;;  %10018 = vmatprep.subr.bf16.mxu1 %v15157_v52 }
 0x787   :  { %9988 = vmatpush1.bf16.msra.mxu0 %v15158_v46  ;;  %10020 = vmatpush1.bf16.msra.mxu1 %v15159_v30 }
 0x788   :  { %9990 = vmatprep.subr.bf16.mxu0 %v15160_v5  ;;  %10022 = vmatprep.subr.bf16.mxu1 %v15161_v1 }
 0x78b   :  { %9992 = vmatpush1.bf16.msra.mxu0 %v15162_v25  ;;  %10024 = vmatpush1.bf16.msra.mxu1 %v15163_v60  ;;  %v15167_v60 = vld [vmem:[#allocation85_spill] sm:$0xff] }
 0x78c   :  { %10026 = vmatprep.subr.bf16.mxu0 %v15164_v16  ;;  %10058 = vmatprep.subr.bf16.mxu1 %v15165_v61 }
 0x821   :  { %v3334_v53 = vpop.f32.mrb[36].mxu0  ;;  %v3405_v58 = vpop.f32.mrb[16].mxu1 }
 0x822   :  { %v11549_v52 = vadd.f32 %v3334_v53, %v15166_v18  ;;  %v3336_v12 = vpop.f32.mrb[37].mxu0  ;;  %v3407_v46 = vpop.f32.mrb[17].mxu1  ;;  %v11565_v45 = vadd.f32 %v3405_v58, %v15167_v60 }
 0x823   :  { %v11550_v30 = vadd.f32 %v3336_v12, %v13641_v40  ;;  %v11566_v25 = vadd.f32 %v3407_v46, %v15136_v11 }
 0x824   :  { %v8943_v14 = vmul.f32 -1.442695, %v11549_v52 }
 0x825   :  { %v8944_v5 = vmul.f32 -1.442695, %v11550_v30  ;;  %v8945_v1 = vmul.f32 -1.442695, %v11566_v25 }
 0x826   :  { %11886 = vpow2.f32 %v8943_v14 }
 0x827   :  { %11888 = vpow2.f32 %v8944_v5 }
 0x828   :  { %11890 = vpow2.f32 %v8945_v1 }
 0x829   :  { %11892 = vtanh.f32 %v11565_v45 }
 0x830   :  { %v11887_v16 = vpop.eup %11886 }
 0x831   :  { %v11889_v39 = vpop.eup %11888  ;;  %v3567_v61 = vadd.f32 1.0, %v11887_v16 }
 0x832   :  { %v3573_v10 = vadd.f32 1.0, %v11889_v39  ;;  %v11891_v53 = vpop.eup %11890 }
 0x833   :  { %11894 = vrcp.f32 %v3567_v61  ;;  %v11893_v18 = vpop.eup %11892  ;;  %v3580_v14 = vadd.f32 1.0, %v11891_v53 }
 0x834   :  { %11896 = vrcp.f32 %v3573_v10 }
 0x835   :  { %11898 = vrcp.f32 %v3580_v14 }
 0x83d   :  { %v11895_v12 = vpop.eup %11894 }
 0x83e   :  { %v11897_v52 = vpop.eup %11896  ;;  %v3584_v30 = vmul.f32 %v11895_v12, %v11893_v18 }
 0x83f   :  { %v3583_v5 = vmul.f32 %v11897_v52, %v13763_v8  ;;  %v11899_v8 = vpop.eup %11898 }
 0x841   :  { %v13855_v46 = vadd.f32 %v3584_v30, %v3583_v5  ;;  %v3484_v25 = vpop.f32.mrb[58].mxu0  ;;  %v3555_v58 = vpop.f32.mrb[38].mxu1 }
 0x842   :  { %v11587_v16 = vadd.f32 %v3484_v25, %v15138_v62  ;;  %v3486_v1 = vpop.f32.mrb[59].mxu0  ;;  %v3557_v45 = vpop.f32.mrb[39].mxu1  ;;  %v11603_v30 = vadd.f32 %v3555_v58, %v13676_v59 }
 0x843   :  { %11900 = vtanh.f32 %v13855_v46  ;;  %v11588_v10 = vadd.f32 %v3486_v1, %v13664_v28  ;;  %v11604_v18 = vadd.f32 %v3557_v45, %v13672_v9 }
 0x844   :  { %v8946_v39 = vmul.f32 -1.442695, %v11587_v16 }
 0x845   :  { %v8947_v61 = vmul.f32 -1.442695, %v11588_v10  ;;  %v8948_v12 = vmul.f32 -1.442695, %v11604_v18 }
 0x846   :  { %11902 = vpow2.f32 %v8946_v39 }
 0x847   :  { %11904 = vpow2.f32 %v8947_v61 }
 0x848   :  { %11906 = vpow2.f32 %v8948_v12 }
 0x849   :  { %11908 = vtanh.f32 %v11603_v30  ;;  %v15170_v30 = vld [vmem:[#allocation43_spill] sm:$0xff] }
 0x84d   :  { %v11901_v53 = vpop.eup %11900 }
 0x84e   :  { %v13861_v52 = vmul.f32 %v11901_v53, %v11899_v8 }
 0x850   :  { %15168 = vst [vmem:[#allocation74_spill] sm:$0xff] %v13861_v52  ;;  %v11903_v14 = vpop.eup %11902  ;;  %3683 = vmatmul.mubr.f32.vlgmr.msra.gmra.mrb[38].mxu0 %v13861_v52  ;;  %3754 = vmatmul.mubr.f32.vlgmr.msra.gmra.mrb[18].mxu1 %v13861_v52  ;;  %v15184_v52 = vld [vmem:[#allocation57_spill] sm:$0xff] }
 0x851   :  { %v11905_v5 = vpop.eup %11904  ;;  %v3591_v25 = vadd.f32 1.0, %v11903_v14  ;;  %10028 = vmatpush1.bf16.msra.mxu0 %v13494_v19  ;;  %10060 = vmatpush1.bf16.msra.mxu1 %v13496_v22  ;;  %v15171_v14 = vld [vmem:[#allocation44_spill] sm:$0xff] }
 0x852   :  { %v3597_v16 = vadd.f32 1.0, %v11905_v5  ;;  %10030 = vmatprep.subr.bf16.mxu0 %v13500_v29  ;;  %10062 = vmatprep.subr.bf16.mxu1 %v13502_v31  ;;  %v11907_v58 = vpop.eup %11906  ;;  %v15172_v5 = vld [vmem:[#allocation45_spill] sm:$0xff] }
 0x853   :  { %11910 = vrcp.f32 %v3591_v25  ;;  %3832 = vmatprep.mubr.f32.mxu0 %v15101_v56  ;;  %3903 = vmatprep.mubr.f32.mxu1 %v15101_v56  ;;  %v11909_v1 = vpop.eup %11908  ;;  %v3604_v61 = vadd.f32 1.0, %v11907_v58  ;;  %v15173_v25 = vld [vmem:[#allocation46_spill] sm:$0xff]  ;;  %v15175_v58 = vld [vmem:[#allocation48_spill] sm:$0xff] }
 0x854   :  { %11912 = vrcp.f32 %v3597_v16  ;;  %v15174_v16 = vld [vmem:[#allocation47_spill] sm:$0xff] }
 0x855   :  { %10032 = vmatpush1.bf16.msra.mxu0 %v13510_v41  ;;  %10064 = vmatpush1.bf16.msra.mxu1 %v13512_v47  ;;  %11914 = vrcp.f32 %v3604_v61  ;;  %v15180_v61 = vld [vmem:[#allocation53_spill] sm:$0xff] }
 0x856   :  { %10034 = vmatprep.subr.bf16.mxu0 %v13516_v51  ;;  %10066 = vmatprep.subr.bf16.mxu1 %v13518_v54 }
 0x859   :  { %10036 = vmatpush1.bf16.msra.mxu0 %v15112_v4  ;;  %10068 = vmatpush1.bf16.msra.mxu1 %v15113_v7 }
 0x85a   :  { %10038 = vmatprep.subr.bf16.mxu0 %v15140_v13  ;;  %10070 = vmatprep.subr.bf16.mxu1 %v15141_v57 }
 0x85d   :  { %v11911_v45 = vpop.eup %11910  ;;  %10040 = vmatpush1.bf16.msra.mxu0 %v15116_v36  ;;  %10072 = vmatpush1.bf16.msra.mxu1 %v15117_v37 }
 0x85e   :  { %v11913_v10 = vpop.eup %11912  ;;  %v3608_v39 = vmul.f32 %v11911_v45, %v11909_v1  ;;  %10042 = vmatprep.subr.bf16.mxu0 %v15118_v44  ;;  %10074 = vmatprep.subr.bf16.mxu1 %v15119_v42  ;;  %v15176_v1 = vld [vmem:[#allocation49_spill] sm:$0xff]  ;;  %v15177_v45 = vld [vmem:[#allocation50_spill] sm:$0xff] }
 0x85f   :  { %v3607_v18 = vmul.f32 %v11913_v10, %v13793_v50  ;;  %v11915_v50 = vpop.eup %11914  ;;  %v15178_v10 = vld [vmem:[#allocation51_spill] sm:$0xff] }
 0x861   :  { %v13885_v8 = vadd.f32 %v3608_v39, %v3607_v18  ;;  %10044 = vmatpush1.bf16.msra.mxu0 %v15120_v38  ;;  %10076 = vmatpush1.bf16.msra.mxu1 %v15121_v48  ;;  %v15179_v39 = vld [vmem:[#allocation52_spill] sm:$0xff]  ;;  %v15181_v18 = vld [vmem:[#allocation54_spill] sm:$0xff] }
 0x862   :  { %10046 = vmatprep.subr.bf16.mxu0 %v13554_v15  ;;  %10078 = vmatprep.subr.bf16.mxu1 %v13556_v35 }
 0x863   :  { %11916 = vtanh.f32 %v13885_v8 }
 0x865   :  { %10048 = vmatpush1.bf16.msra.mxu0 %v13560_v49  ;;  %10080 = vmatpush1.bf16.msra.mxu1 %v13562_v55 }
 0x866   :  { %10050 = vmatprep.subr.bf16.mxu0 %v13566_v43  ;;  %10082 = vmatprep.subr.bf16.mxu1 %v13568_v6 }
 0x869   :  { %10052 = vmatpush1.bf16.msra.mxu0 %v13572_v24  ;;  %10084 = vmatpush1.bf16.msra.mxu1 %v13574_v32 }
 0x86a   :  { %10054 = vmatprep.subr.bf16.mxu0 %v13578_v17  ;;  %10086 = vmatprep.subr.bf16.mxu1 %v13580_v23 }
 0x86d   :  { %v11917_v53 = vpop.eup %11916  ;;  %10056 = vmatpush1.bf16.msra.mxu0 %v13584_v63  ;;  %10088 = vmatpush1.bf16.msra.mxu1 %v13586_v3 }
 0x86e   :  { %v13902_v12 = vmul.f32 %v11917_v53, %v11915_v50  ;;  %10090 = vmatprep.subr.bf16.mxu0 %v13302_v0  ;;  %10122 = vmatprep.subr.bf16.mxu1 %v13311_v2  ;;  %v15182_v50 = vld [vmem:[#allocation55_spill] sm:$0xff]  ;;  %v15183_v53 = vld [vmem:[#allocation56_spill] sm:$0xff] }
 0x870   :  { %15169 = vst [vmem:[#allocation75_spill] sm:$0xff] %v13902_v12  ;;  %3833 = vmatmul.mubr.f32.vlgmr.msra.gmra.mrb[56].mxu0 %v13902_v12  ;;  %3904 = vmatmul.mubr.f32.vlgmr.msra.gmra.mrb[36].mxu1 %v13902_v12  ;;  %v15185_v12 = vld [vmem:[#allocation58_spill] sm:$0xff] }
 0x871   :  { %10092 = vmatpush1.bf16.msra.mxu0 %v13354_v20  ;;  %10124 = vmatpush1.bf16.msra.mxu1 %v13356_v21 }
 0x872   :  { %10094 = vmatprep.subr.bf16.mxu0 %v13358_v26  ;;  %10126 = vmatprep.subr.bf16.mxu1 %v13360_v27 }
 0x873   :  { %4032 = vmatprep.mubr.f32.mxu0 %v15101_v56  ;;  %4103 = vmatprep.mubr.f32.mxu1 %v15101_v56 }
 0x875   :  { %10096 = vmatpush1.bf16.msra.mxu0 %v13368_v33  ;;  %10128 = vmatpush1.bf16.msra.mxu1 %v13370_v34 }
 0x876   :  { %10098 = vmatprep.subr.bf16.mxu0 %v15170_v30  ;;  %10130 = vmatprep.subr.bf16.mxu1 %v15171_v14 }
 0x879   :  { %10100 = vmatpush1.bf16.msra.mxu0 %v15172_v5  ;;  %10132 = vmatpush1.bf16.msra.mxu1 %v15173_v25 }
 0x87a   :  { %10102 = vmatprep.subr.bf16.mxu0 %v15174_v16  ;;  %10134 = vmatprep.subr.bf16.mxu1 %v15175_v58  ;;  %v15186_v58 = vld [vmem:[#allocation59_spill] sm:$0xff]  ;;  %v15196_v16 = vld [vmem:[#allocation81_spill] sm:$0xff] }
 0x87d   :  { %10104 = vmatpush1.bf16.msra.mxu0 %v15176_v1  ;;  %10136 = vmatpush1.bf16.msra.mxu1 %v15177_v45  ;;  %v15187_v1 = vld [vmem:[#allocation60_spill] sm:$0xff]  ;;  %v15188_v45 = vld [vmem:[#allocation61_spill] sm:$0xff] }
 0x87e   :  { %10106 = vmatprep.subr.bf16.mxu0 %v15178_v10  ;;  %10138 = vmatprep.subr.bf16.mxu1 %v15179_v39  ;;  %v15189_v10 = vld [vmem:[#allocation62_spill] sm:$0xff]  ;;  %v15190_v39 = vld [vmem:[#allocation63_spill] sm:$0xff] }
 0x881   :  { %10108 = vmatpush1.bf16.msra.mxu0 %v15180_v61  ;;  %10140 = vmatpush1.bf16.msra.mxu1 %v15181_v18  ;;  %v15191_v61 = vld [vmem:[#allocation64_spill] sm:$0xff]  ;;  %v15192_v18 = vld [vmem:[#allocation65_spill] sm:$0xff] }
 0x882   :  { %10110 = vmatprep.subr.bf16.mxu0 %v15182_v50  ;;  %10142 = vmatprep.subr.bf16.mxu1 %v15183_v53  ;;  %v15193_v50 = vld [vmem:[#allocation66_spill] sm:$0xff]  ;;  %v15194_v53 = vld [vmem:[#allocation67_spill] sm:$0xff] }
 0x885   :  { %10112 = vmatpush1.bf16.msra.mxu0 %v15184_v52  ;;  %10144 = vmatpush1.bf16.msra.mxu1 %v15185_v12  ;;  %v15195_v52 = vld [vmem:[#allocation68_spill] sm:$0xff] }
 0x886   :  { %10114 = vmatprep.subr.bf16.mxu0 %v15186_v58  ;;  %10146 = vmatprep.subr.bf16.mxu1 %v15187_v1 }
 0x889   :  { %10116 = vmatpush1.bf16.msra.mxu0 %v15188_v45  ;;  %10148 = vmatpush1.bf16.msra.mxu1 %v15189_v10 }
 0x88a   :  { %10118 = vmatprep.subr.bf16.mxu0 %v15190_v39  ;;  %10150 = vmatprep.subr.bf16.mxu1 %v15191_v61 }
 0x88d   :  { %10120 = vmatpush1.bf16.msra.mxu0 %v15192_v18  ;;  %10152 = vmatpush1.bf16.msra.mxu1 %v15193_v50 }
 0x88e   :  { %10154 = vmatprep.subr.bf16.mxu0 %v15194_v53  ;;  %10186 = vmatprep.subr.bf16.mxu1 %v15195_v52 }
 0x923   :  { %v3684_v12 = vpop.f32.mrb[38].mxu0  ;;  %v3755_v58 = vpop.f32.mrb[18].mxu1 }
 0x924   :  { %v11551_v1 = vadd.f32 %v3684_v12, %v15196_v16  ;;  %v3686_v25 = vpop.f32.mrb[39].mxu0  ;;  %v3757_v45 = vpop.f32.mrb[19].mxu1  ;;  %v11567_v50 = vadd.f32 %v3755_v58, %v15167_v60 }
 0x925   :  { %v11552_v10 = vadd.f32 %v3686_v25, %v13641_v40  ;;  %v11568_v18 = vadd.f32 %v3757_v45, %v15136_v11 }
 0x926   :  { %v8949_v5 = vmul.f32 -1.442695, %v11551_v1 }
 0x927   :  { %v8950_v39 = vmul.f32 -1.442695, %v11552_v10  ;;  %v8951_v61 = vmul.f32 -1.442695, %v11568_v18 }
 0x928   :  { %11918 = vpow2.f32 %v8949_v5 }
 0x929   :  { %11920 = vpow2.f32 %v8950_v39 }
 0x92a   :  { %11922 = vpow2.f32 %v8951_v61 }
 0x92b   :  { %11924 = vtanh.f32 %v11567_v50 }
 0x932   :  { %v11919_v53 = vpop.eup %11918 }
 0x933   :  { %v11921_v14 = vpop.eup %11920  ;;  %v3917_v52 = vadd.f32 1.0, %v11919_v53 }
 0x934   :  { %v3923_v30 = vadd.f32 1.0, %v11921_v14  ;;  %v11923_v12 = vpop.eup %11922 }
 0x935   :  { %11926 = vrcp.f32 %v3917_v52  ;;  %v11925_v16 = vpop.eup %11924  ;;  %v3930_v5 = vadd.f32 1.0, %v11923_v12 }
 0x936   :  { %11928 = vrcp.f32 %v3923_v30 }
 0x937   :  { %11930 = vrcp.f32 %v3930_v5 }
 0x93f   :  { %v11927_v25 = vpop.eup %11926 }
 0x940   :  { %v11929_v1 = vpop.eup %11928  ;;  %v3934_v10 = vmul.f32 %v11927_v25, %v11925_v16 }
 0x941   :  { %v3933_v39 = vmul.f32 %v11929_v1, %v13855_v46  ;;  %v11931_v46 = vpop.eup %11930 }
 0x943   :  { %v13947_v45 = vadd.f32 %v3934_v10, %v3933_v39  ;;  %v3834_v18 = vpop.f32.mrb[56].mxu0  ;;  %v3905_v58 = vpop.f32.mrb[36].mxu1 }
 0x944   :  { %v11585_v53 = vadd.f32 %v3834_v18, %v15138_v62  ;;  %v3836_v61 = vpop.f32.mrb[57].mxu0  ;;  %v3907_v50 = vpop.f32.mrb[37].mxu1  ;;  %v11601_v10 = vadd.f32 %v3905_v58, %v13676_v59 }
 0x945   :  { %11932 = vtanh.f32 %v13947_v45  ;;  %v11586_v52 = vadd.f32 %v3836_v61, %v13664_v28  ;;  %v11602_v16 = vadd.f32 %v3907_v50, %v13672_v9 }
 0x946   :  { %v8952_v30 = vmul.f32 -1.442695, %v11585_v53 }
 0x947   :  { %v8953_v14 = vmul.f32 -1.442695, %v11586_v52  ;;  %v8954_v25 = vmul.f32 -1.442695, %v11602_v16 }
 0x948   :  { %11934 = vpow2.f32 %v8952_v30 }
 0x949   :  { %11936 = vpow2.f32 %v8953_v14 }
 0x94a   :  { %11938 = vpow2.f32 %v8954_v25 }
 0x94b   :  { %11940 = vtanh.f32 %v11601_v10  ;;  %v15199_v10 = vld [vmem:[#allocation43_spill] sm:$0xff] }
 0x94f   :  { %v11933_v12 = vpop.eup %11932 }
 0x950   :  { %v13953_v1 = vmul.f32 %v11933_v12, %v11931_v46 }
 0x952   :  { %15197 = vst [vmem:[#allocation76_spill] sm:$0xff] %v13953_v1  ;;  %v11935_v5 = vpop.eup %11934  ;;  %4033 = vmatmul.mubr.f32.vlgmr.msra.gmra.mrb[40].mxu0 %v13953_v1  ;;  %4104 = vmatmul.mubr.f32.vlgmr.msra.gmra.mrb[20].mxu1 %v13953_v1  ;;  %v15213_v1 = vld [vmem:[#allocation57_spill] sm:$0xff] }
 0x953   :  { %v11937_v39 = vpop.eup %11936  ;;  %v3941_v18 = vadd.f32 1.0, %v11935_v5  ;;  %10156 = vmatpush1.bf16.msra.mxu0 %v13494_v19  ;;  %10188 = vmatpush1.bf16.msra.mxu1 %v13496_v22  ;;  %v15200_v5 = vld [vmem:[#allocation44_spill] sm:$0xff] }
 0x954   :  { %v3947_v53 = vadd.f32 1.0, %v11937_v39  ;;  %10158 = vmatprep.subr.bf16.mxu0 %v13500_v29  ;;  %10190 = vmatprep.subr.bf16.mxu1 %v13502_v31  ;;  %v11939_v58 = vpop.eup %11938  ;;  %v15201_v39 = vld [vmem:[#allocation45_spill] sm:$0xff] }
 0x955   :  { %11942 = vrcp.f32 %v3941_v18  ;;  %4182 = vmatprep.mubr.f32.mxu0 %v15101_v56  ;;  %4253 = vmatprep.mubr.f32.mxu1 %v15101_v56  ;;  %v11941_v61 = vpop.eup %11940  ;;  %v3954_v14 = vadd.f32 1.0, %v11939_v58  ;;  %v15202_v18 = vld [vmem:[#allocation46_spill] sm:$0xff]  ;;  %v15204_v58 = vld [vmem:[#allocation48_spill] sm:$0xff] }
 0x956   :  { %11944 = vrcp.f32 %v3947_v53  ;;  %v15203_v53 = vld [vmem:[#allocation47_spill] sm:$0xff] }
 0x957   :  { %10160 = vmatpush1.bf16.msra.mxu0 %v13510_v41  ;;  %10192 = vmatpush1.bf16.msra.mxu1 %v13512_v47  ;;  %11946 = vrcp.f32 %v3954_v14  ;;  %v15209_v14 = vld [vmem:[#allocation53_spill] sm:$0xff] }
 0x958   :  { %10162 = vmatprep.subr.bf16.mxu0 %v13516_v51  ;;  %10194 = vmatprep.subr.bf16.mxu1 %v13518_v54 }
 0x95b   :  { %10164 = vmatpush1.bf16.msra.mxu0 %v15112_v4  ;;  %10196 = vmatpush1.bf16.msra.mxu1 %v15113_v7 }
 0x95c   :  { %10166 = vmatprep.subr.bf16.mxu0 %v15140_v13  ;;  %10198 = vmatprep.subr.bf16.mxu1 %v15141_v57 }
 0x95f   :  { %v11943_v50 = vpop.eup %11942  ;;  %10168 = vmatpush1.bf16.msra.mxu0 %v15116_v36  ;;  %10200 = vmatpush1.bf16.msra.mxu1 %v15117_v37 }
 0x960   :  { %v11945_v52 = vpop.eup %11944  ;;  %v3958_v30 = vmul.f32 %v11943_v50, %v11941_v61  ;;  %10170 = vmatprep.subr.bf16.mxu0 %v15118_v44  ;;  %10202 = vmatprep.subr.bf16.mxu1 %v15119_v42  ;;  %v15205_v61 = vld [vmem:[#allocation49_spill] sm:$0xff]  ;;  %v15206_v50 = vld [vmem:[#allocation50_spill] sm:$0xff] }
 0x961   :  { %v3957_v16 = vmul.f32 %v11945_v52, %v13885_v8  ;;  %v11947_v8 = vpop.eup %11946  ;;  %v15207_v52 = vld [vmem:[#allocation51_spill] sm:$0xff] }
 0x963   :  { %v13977_v46 = vadd.f32 %v3958_v30, %v3957_v16  ;;  %10172 = vmatpush1.bf16.msra.mxu0 %v15120_v38  ;;  %10204 = vmatpush1.bf16.msra.mxu1 %v15121_v48  ;;  %v15208_v30 = vld [vmem:[#allocation52_spill] sm:$0xff]  ;;  %v15210_v16 = vld [vmem:[#allocation54_spill] sm:$0xff] }
 0x964   :  { %10174 = vmatprep.subr.bf16.mxu0 %v13554_v15  ;;  %10206 = vmatprep.subr.bf16.mxu1 %v13556_v35 }
 0x965   :  { %11948 = vtanh.f32 %v13977_v46 }
 0x967   :  { %10176 = vmatpush1.bf16.msra.mxu0 %v13560_v49  ;;  %10208 = vmatpush1.bf16.msra.mxu1 %v13562_v55 }
 0x968   :  { %10178 = vmatprep.subr.bf16.mxu0 %v13566_v43  ;;  %10210 = vmatprep.subr.bf16.mxu1 %v13568_v6 }
 0x96b   :  { %10180 = vmatpush1.bf16.msra.mxu0 %v13572_v24  ;;  %10212 = vmatpush1.bf16.msra.mxu1 %v13574_v32 }
 0x96c   :  { %10182 = vmatprep.subr.bf16.mxu0 %v13578_v17  ;;  %10214 = vmatprep.subr.bf16.mxu1 %v13580_v23 }
 0x96f   :  { %v11949_v12 = vpop.eup %11948  ;;  %10184 = vmatpush1.bf16.msra.mxu0 %v13584_v63  ;;  %10216 = vmatpush1.bf16.msra.mxu1 %v13586_v3 }
 0x970   :  { %v13994_v25 = vmul.f32 %v11949_v12, %v11947_v8  ;;  %10218 = vmatprep.subr.bf16.mxu0 %v13302_v0  ;;  %10250 = vmatprep.subr.bf16.mxu1 %v13311_v2  ;;  %v15211_v8 = vld [vmem:[#allocation55_spill] sm:$0xff]  ;;  %v15212_v12 = vld [vmem:[#allocation56_spill] sm:$0xff] }
 0x972   :  { %15198 = vst [vmem:[#allocation77_spill] sm:$0xff] %v13994_v25  ;;  %4183 = vmatmul.mubr.f32.vlgmr.msra.gmra.mrb[54].mxu0 %v13994_v25  ;;  %4254 = vmatmul.mubr.f32.vlgmr.msra.gmra.mrb[34].mxu1 %v13994_v25  ;;  %v15214_v25 = vld [vmem:[#allocation58_spill] sm:$0xff] }
 0x973   :  { %10220 = vmatpush1.bf16.msra.mxu0 %v13354_v20  ;;  %10252 = vmatpush1.bf16.msra.mxu1 %v13356_v21 }
 0x974   :  { %10222 = vmatprep.subr.bf16.mxu0 %v13358_v26  ;;  %10254 = vmatprep.subr.bf16.mxu1 %v13360_v27 }
 0x975   :  { %4382 = vmatprep.mubr.f32.mxu0 %v15101_v56  ;;  %4453 = vmatprep.mubr.f32.mxu1 %v15101_v56 }
 0x977   :  { %10224 = vmatpush1.bf16.msra.mxu0 %v13368_v33  ;;  %10256 = vmatpush1.bf16.msra.mxu1 %v13370_v34 }
 0x978   :  { %10226 = vmatprep.subr.bf16.mxu0 %v15199_v10  ;;  %10258 = vmatprep.subr.bf16.mxu1 %v15200_v5 }
 0x97b   :  { %10228 = vmatpush1.bf16.msra.mxu0 %v15201_v39  ;;  %10260 = vmatpush1.bf16.msra.mxu1 %v15202_v18 }
 0x97c   :  { %10230 = vmatprep.subr.bf16.mxu0 %v15203_v53  ;;  %10262 = vmatprep.subr.bf16.mxu1 %v15204_v58  ;;  %v15215_v58 = vld [vmem:[#allocation59_spill] sm:$0xff]  ;;  %v15225_v53 = vld [vmem:[#allocation81_spill] sm:$0xff] }
 0x97f   :  { %10232 = vmatpush1.bf16.msra.mxu0 %v15205_v61  ;;  %10264 = vmatpush1.bf16.msra.mxu1 %v15206_v50  ;;  %v15216_v61 = vld [vmem:[#allocation60_spill] sm:$0xff]  ;;  %v15217_v50 = vld [vmem:[#allocation61_spill] sm:$0xff] }
 0x980   :  { %10234 = vmatprep.subr.bf16.mxu0 %v15207_v52  ;;  %10266 = vmatprep.subr.bf16.mxu1 %v15208_v30  ;;  %v15218_v52 = vld [vmem:[#allocation62_spill] sm:$0xff]  ;;  %v15219_v30 = vld [vmem:[#allocation63_spill] sm:$0xff] }
 0x983   :  { %10236 = vmatpush1.bf16.msra.mxu0 %v15209_v14  ;;  %10268 = vmatpush1.bf16.msra.mxu1 %v15210_v16  ;;  %v15220_v14 = vld [vmem:[#allocation64_spill] sm:$0xff]  ;;  %v15221_v16 = vld [vmem:[#allocation65_spill] sm:$0xff] }
 0x984   :  { %10238 = vmatprep.subr.bf16.mxu0 %v15211_v8  ;;  %10270 = vmatprep.subr.bf16.mxu1 %v15212_v12  ;;  %v15222_v8 = vld [vmem:[#allocation66_spill] sm:$0xff]  ;;  %v15223_v12 = vld [vmem:[#allocation67_spill] sm:$0xff] }
 0x987   :  { %10240 = vmatpush1.bf16.msra.mxu0 %v15213_v1  ;;  %10272 = vmatpush1.bf16.msra.mxu1 %v15214_v25  ;;  %v15224_v1 = vld [vmem:[#allocation68_spill] sm:$0xff] }
 0x988   :  { %10242 = vmatprep.subr.bf16.mxu0 %v15215_v58  ;;  %10274 = vmatprep.subr.bf16.mxu1 %v15216_v61 }
 0x98b   :  { %10244 = vmatpush1.bf16.msra.mxu0 %v15217_v50  ;;  %10276 = vmatpush1.bf16.msra.mxu1 %v15218_v52 }
 0x98c   :  { %10246 = vmatprep.subr.bf16.mxu0 %v15219_v30  ;;  %10278 = vmatprep.subr.bf16.mxu1 %v15220_v14 }
 0x98f   :  { %10248 = vmatpush1.bf16.msra.mxu0 %v15221_v16  ;;  %10280 = vmatpush1.bf16.msra.mxu1 %v15222_v8 }
 0x990   :  { %10282 = vmatprep.subr.bf16.mxu0 %v15223_v12  ;;  %10314 = vmatprep.subr.bf16.mxu1 %v15224_v1 }
 0xa25   :  { %v4034_v25 = vpop.f32.mrb[40].mxu0  ;;  %v4105_v58 = vpop.f32.mrb[20].mxu1 }
 0xa26   :  { %v11553_v61 = vadd.f32 %v4034_v25, %v15225_v53  ;;  %v4036_v18 = vpop.f32.mrb[41].mxu0  ;;  %v4107_v50 = vpop.f32.mrb[21].mxu1  ;;  %v11569_v8 = vadd.f32 %v4105_v58, %v15167_v60 }
 0xa27   :  { %v11554_v52 = vadd.f32 %v4036_v18, %v13641_v40  ;;  %v11570_v16 = vadd.f32 %v4107_v50, %v15136_v11 }
 0xa28   :  { %v8955_v39 = vmul.f32 -1.442695, %v11553_v61 }
 0xa29   :  { %v8956_v30 = vmul.f32 -1.442695, %v11554_v52  ;;  %v8957_v14 = vmul.f32 -1.442695, %v11570_v16 }
 0xa2a   :  { %11950 = vpow2.f32 %v8955_v39 }
 0xa2b   :  { %11952 = vpow2.f32 %v8956_v30 }
 0xa2c   :  { %11954 = vpow2.f32 %v8957_v14 }
 0xa2d   :  { %11956 = vtanh.f32 %v11569_v8 }
 0xa34   :  { %v11951_v12 = vpop.eup %11950 }
 0xa35   :  { %v11953_v5 = vpop.eup %11952  ;;  %v4267_v1 = vadd.f32 1.0, %v11951_v12 }
 0xa36   :  { %v4273_v10 = vadd.f32 1.0, %v11953_v5  ;;  %v11955_v25 = vpop.eup %11954 }
 0xa37   :  { %11958 = vrcp.f32 %v4267_v1  ;;  %v11957_v53 = vpop.eup %11956  ;;  %v4280_v39 = vadd.f32 1.0, %v11955_v25 }
 0xa38   :  { %11960 = vrcp.f32 %v4273_v10 }
 0xa39   :  { %11962 = vrcp.f32 %v4280_v39 }
 0xa41   :  { %v11959_v18 = vpop.eup %11958 }
 0xa42   :  { %v11961_v61 = vpop.eup %11960  ;;  %v4284_v52 = vmul.f32 %v11959_v18, %v11957_v53 }
 0xa43   :  { %v4283_v30 = vmul.f32 %v11961_v61, %v13947_v45  ;;  %v11963_v45 = vpop.eup %11962 }
 0xa45   :  { %v14039_v50 = vadd.f32 %v4284_v52, %v4283_v30  ;;  %v4184_v16 = vpop.f32.mrb[54].mxu0  ;;  %v4255_v58 = vpop.f32.mrb[34].mxu1 }
 0xa46   :  { %v11583_v12 = vadd.f32 %v4184_v16, %v15138_v62  ;;  %v4186_v14 = vpop.f32.mrb[55].mxu0  ;;  %v4257_v8 = vpop.f32.mrb[35].mxu1  ;;  %v11599_v52 = vadd.f32 %v4255_v58, %v13676_v59 }
 0xa47   :  { %11964 = vtanh.f32 %v14039_v50  ;;  %v11584_v1 = vadd.f32 %v4186_v14, %v13664_v28  ;;  %v11600_v53 = vadd.f32 %v4257_v8, %v13672_v9 }
 0xa48   :  { %v8958_v10 = vmul.f32 -1.442695, %v11583_v12 }
 0xa49   :  { %v8959_v5 = vmul.f32 -1.442695, %v11584_v1  ;;  %v8960_v18 = vmul.f32 -1.442695, %v11600_v53 }
 0xa4a   :  { %11966 = vpow2.f32 %v8958_v10 }
 0xa4b   :  { %11968 = vpow2.f32 %v8959_v5 }
 0xa4c   :  { %11970 = vpow2.f32 %v8960_v18 }
 0xa4d   :  { %11972 = vtanh.f32 %v11599_v52  ;;  %v15228_v52 = vld [vmem:[#allocation43_spill] sm:$0xff] }
 0xa51   :  { %v11965_v25 = vpop.eup %11964 }
 0xa52   :  { %v14045_v61 = vmul.f32 %v11965_v25, %v11963_v45 }
 0xa54   :  { %15226 = vst [vmem:[#allocation78_spill] sm:$0xff] %v14045_v61  ;;  %v11967_v39 = vpop.eup %11966  ;;  %4383 = vmatmul.mubr.f32.vlgmr.msra.gmra.mrb[42].mxu0 %v14045_v61  ;;  %4454 = vmatmul.mubr.f32.vlgmr.msra.gmra.mrb[22].mxu1 %v14045_v61  ;;  %v15242_v61 = vld [vmem:[#allocation57_spill] sm:$0xff] }
 0xa55   :  { %v11969_v30 = vpop.eup %11968  ;;  %v4291_v16 = vadd.f32 1.0, %v11967_v39  ;;  %10284 = vmatpush1.bf16.msra.mxu0 %v13494_v19  ;;  %10316 = vmatpush1.bf16.msra.mxu1 %v13496_v22  ;;  %v15229_v39 = vld [vmem:[#allocation44_spill] sm:$0xff] }
 0xa56   :  { %v4297_v12 = vadd.f32 1.0, %v11969_v30  ;;  %10286 = vmatprep.subr.bf16.mxu0 %v13500_v29  ;;  %10318 = vmatprep.subr.bf16.mxu1 %v13502_v31  ;;  %v11971_v58 = vpop.eup %11970  ;;  %v15230_v30 = vld [vmem:[#allocation45_spill] sm:$0xff] }
 0xa57   :  { %11974 = vrcp.f32 %v4291_v16  ;;  %4532 = vmatprep.mubr.f32.mxu0 %v15101_v56  ;;  %4603 = vmatprep.mubr.f32.mxu1 %v15101_v56  ;;  %v11973_v14 = vpop.eup %11972  ;;  %v4304_v5 = vadd.f32 1.0, %v11971_v58  ;;  %v15231_v16 = vld [vmem:[#allocation46_spill] sm:$0xff]  ;;  %v15233_v58 = vld [vmem:[#allocation48_spill] sm:$0xff] }
 0xa58   :  { %11976 = vrcp.f32 %v4297_v12  ;;  %v15232_v12 = vld [vmem:[#allocation47_spill] sm:$0xff] }
 0xa59   :  { %10288 = vmatpush1.bf16.msra.mxu0 %v13510_v41  ;;  %10320 = vmatpush1.bf16.msra.mxu1 %v13512_v47  ;;  %11978 = vrcp.f32 %v4304_v5  ;;  %v15238_v5 = vld [vmem:[#allocation53_spill] sm:$0xff] }
 0xa5a   :  { %10290 = vmatprep.subr.bf16.mxu0 %v13516_v51  ;;  %10322 = vmatprep.subr.bf16.mxu1 %v13518_v54 }
 0xa5d   :  { %10292 = vmatpush1.bf16.msra.mxu0 %v15112_v4  ;;  %10324 = vmatpush1.bf16.msra.mxu1 %v15113_v7 }
 0xa5e   :  { %10294 = vmatprep.subr.bf16.mxu0 %v15140_v13  ;;  %10326 = vmatprep.subr.bf16.mxu1 %v15141_v57 }
 0xa61   :  { %v11975_v8 = vpop.eup %11974  ;;  %10296 = vmatpush1.bf16.msra.mxu0 %v15116_v36  ;;  %10328 = vmatpush1.bf16.msra.mxu1 %v15117_v37 }
 0xa62   :  { %v11977_v1 = vpop.eup %11976  ;;  %v4308_v10 = vmul.f32 %v11975_v8, %v11973_v14  ;;  %10298 = vmatprep.subr.bf16.mxu0 %v15118_v44  ;;  %10330 = vmatprep.subr.bf16.mxu1 %v15119_v42  ;;  %v15234_v14 = vld [vmem:[#allocation49_spill] sm:$0xff]  ;;  %v15235_v8 = vld [vmem:[#allocation50_spill] sm:$0xff] }
 0xa63   :  { %v4307_v53 = vmul.f32 %v11977_v1, %v13977_v46  ;;  %v11979_v46 = vpop.eup %11978  ;;  %v15236_v1 = vld [vmem:[#allocation51_spill] sm:$0xff] }
 0xa65   :  { %v14069_v45 = vadd.f32 %v4308_v10, %v4307_v53  ;;  %10300 = vmatpush1.bf16.msra.mxu0 %v15120_v38  ;;  %10332 = vmatpush1.bf16.msra.mxu1 %v15121_v48  ;;  %v15237_v10 = vld [vmem:[#allocation52_spill] sm:$0xff]  ;;  %v15239_v53 = vld [vmem:[#allocation54_spill] sm:$0xff] }
 0xa66   :  { %10302 = vmatprep.subr.bf16.mxu0 %v13554_v15  ;;  %10334 = vmatprep.subr.bf16.mxu1 %v13556_v35 }
 0xa67   :  { %11980 = vtanh.f32 %v14069_v45 }
 0xa69   :  { %10304 = vmatpush1.bf16.msra.mxu0 %v13560_v49  ;;  %10336 = vmatpush1.bf16.msra.mxu1 %v13562_v55 }
 0xa6a   :  { %10306 = vmatprep.subr.bf16.mxu0 %v13566_v43  ;;  %10338 = vmatprep.subr.bf16.mxu1 %v13568_v6 }
 0xa6d   :  { %10308 = vmatpush1.bf16.msra.mxu0 %v13572_v24  ;;  %10340 = vmatpush1.bf16.msra.mxu1 %v13574_v32 }
 0xa6e   :  { %10310 = vmatprep.subr.bf16.mxu0 %v13578_v17  ;;  %10342 = vmatprep.subr.bf16.mxu1 %v13580_v23 }
 0xa71   :  { %v11981_v25 = vpop.eup %11980  ;;  %10312 = vmatpush1.bf16.msra.mxu0 %v13584_v63  ;;  %10344 = vmatpush1.bf16.msra.mxu1 %v13586_v3 }
 0xa72   :  { %v14086_v18 = vmul.f32 %v11981_v25, %v11979_v46  ;;  %10346 = vmatprep.subr.bf16.mxu0 %v13302_v0  ;;  %10378 = vmatprep.subr.bf16.mxu1 %v13311_v2  ;;  %v15240_v46 = vld [vmem:[#allocation55_spill] sm:$0xff]  ;;  %v15241_v25 = vld [vmem:[#allocation56_spill] sm:$0xff] }
 0xa74   :  { %15227 = vst [vmem:[#allocation83_spill] sm:$0xff] %v14086_v18  ;;  %4533 = vmatmul.mubr.f32.vlgmr.msra.gmra.mrb[52].mxu0 %v14086_v18  ;;  %4604 = vmatmul.mubr.f32.vlgmr.msra.gmra.mrb[32].mxu1 %v14086_v18  ;;  %v15243_v18 = vld [vmem:[#allocation58_spill] sm:$0xff] }
 0xa75   :  { %10348 = vmatpush1.bf16.msra.mxu0 %v13354_v20  ;;  %10380 = vmatpush1.bf16.msra.mxu1 %v13356_v21 }
 0xa76   :  { %10350 = vmatprep.subr.bf16.mxu0 %v13358_v26  ;;  %10382 = vmatprep.subr.bf16.mxu1 %v13360_v27 }
 0xa77   :  { %4732 = vmatprep.mubr.f32.mxu0 %v15101_v56  ;;  %4803 = vmatprep.mubr.f32.mxu1 %v15101_v56 }
 0xa79   :  { %10352 = vmatpush1.bf16.msra.mxu0 %v13368_v33  ;;  %10384 = vmatpush1.bf16.msra.mxu1 %v13370_v34 }
 0xa7a   :  { %10354 = vmatprep.subr.bf16.mxu0 %v15228_v52  ;;  %10386 = vmatprep.subr.bf16.mxu1 %v15229_v39 }
 0xa7d   :  { %10356 = vmatpush1.bf16.msra.mxu0 %v15230_v30  ;;  %10388 = vmatpush1.bf16.msra.mxu1 %v15231_v16 }
 0xa7e   :  { %10358 = vmatprep.subr.bf16.mxu0 %v15232_v12  ;;  %10390 = vmatprep.subr.bf16.mxu1 %v15233_v58  ;;  %v15244_v58 = vld [vmem:[#allocation59_spill] sm:$0xff]  ;;  %v15254_v12 = vld [vmem:[#allocation81_spill] sm:$0xff] }
 0xa81   :  { %10360 = vmatpush1.bf16.msra.mxu0 %v15234_v14  ;;  %10392 = vmatpush1.bf16.msra.mxu1 %v15235_v8  ;;  %v15245_v14 = vld [vmem:[#allocation60_spill] sm:$0xff]  ;;  %v15246_v8 = vld [vmem:[#allocation61_spill] sm:$0xff] }
 0xa82   :  { %10362 = vmatprep.subr.bf16.mxu0 %v15236_v1  ;;  %10394 = vmatprep.subr.bf16.mxu1 %v15237_v10  ;;  %v15247_v1 = vld [vmem:[#allocation62_spill] sm:$0xff]  ;;  %v15248_v10 = vld [vmem:[#allocation63_spill] sm:$0xff] }
 0xa85   :  { %10364 = vmatpush1.bf16.msra.mxu0 %v15238_v5  ;;  %10396 = vmatpush1.bf16.msra.mxu1 %v15239_v53  ;;  %v15249_v5 = vld [vmem:[#allocation64_spill] sm:$0xff]  ;;  %v15250_v53 = vld [vmem:[#allocation65_spill] sm:$0xff] }
 0xa86   :  { %10366 = vmatprep.subr.bf16.mxu0 %v15240_v46  ;;  %10398 = vmatprep.subr.bf16.mxu1 %v15241_v25  ;;  %v15251_v46 = vld [vmem:[#allocation66_spill] sm:$0xff]  ;;  %v15252_v25 = vld [vmem:[#allocation67_spill] sm:$0xff] }
 0xa89   :  { %10368 = vmatpush1.bf16.msra.mxu0 %v15242_v61  ;;  %10400 = vmatpush1.bf16.msra.mxu1 %v15243_v18  ;;  %v15253_v61 = vld [vmem:[#allocation68_spill] sm:$0xff] }
 0xa8a   :  { %10370 = vmatprep.subr.bf16.mxu0 %v15244_v58  ;;  %10402 = vmatprep.subr.bf16.mxu1 %v15245_v14 }
 0xa8d   :  { %10372 = vmatpush1.bf16.msra.mxu0 %v15246_v8  ;;  %10404 = vmatpush1.bf16.msra.mxu1 %v15247_v1 }
 0xa8e   :  { %10374 = vmatprep.subr.bf16.mxu0 %v15248_v10  ;;  %10406 = vmatprep.subr.bf16.mxu1 %v15249_v5 }
 0xa91   :  { %10376 = vmatpush1.bf16.msra.mxu0 %v15250_v53  ;;  %10408 = vmatpush1.bf16.msra.mxu1 %v15251_v46 }
 0xa92   :  { %10410 = vmatprep.subr.bf16.mxu0 %v15252_v25  ;;  %10442 = vmatprep.subr.bf16.mxu1 %v15253_v61 }
 0xb27   :  { %v4384_v18 = vpop.f32.mrb[42].mxu0  ;;  %v4455_v58 = vpop.f32.mrb[22].mxu1 }
 0xb28   :  { %v11555_v14 = vadd.f32 %v4384_v18, %v15254_v12  ;;  %v4386_v16 = vpop.f32.mrb[43].mxu0  ;;  %v4457_v8 = vpop.f32.mrb[23].mxu1  ;;  %v11571_v46 = vadd.f32 %v4455_v58, %v15167_v60 }
 0xb29   :  { %v11556_v1 = vadd.f32 %v4386_v16, %v13641_v40  ;;  %v11572_v53 = vadd.f32 %v4457_v8, %v15136_v11 }
 0xb2a   :  { %v8961_v30 = vmul.f32 -1.442695, %v11555_v14 }
 0xb2b   :  { %v8962_v10 = vmul.f32 -1.442695, %v11556_v1  ;;  %v8963_v5 = vmul.f32 -1.442695, %v11572_v53 }
 0xb2c   :  { %11982 = vpow2.f32 %v8961_v30 }
 0xb2d   :  { %11984 = vpow2.f32 %v8962_v10 }
 0xb2e   :  { %11986 = vpow2.f32 %v8963_v5 }
 0xb2f   :  { %11988 = vtanh.f32 %v11571_v46 }
 0xb36   :  { %v11983_v25 = vpop.eup %11982 }
 0xb37   :  { %v11985_v39 = vpop.eup %11984  ;;  %v4617_v61 = vadd.f32 1.0, %v11983_v25 }
 0xb38   :  { %v4623_v52 = vadd.f32 1.0, %v11985_v39  ;;  %v11987_v18 = vpop.eup %11986 }
 0xb39   :  { %11990 = vrcp.f32 %v4617_v61  ;;  %v11989_v12 = vpop.eup %11988  ;;  %v4630_v30 = vadd.f32 1.0, %v11987_v18 }
 0xb3a   :  { %11992 = vrcp.f32 %v4623_v52 }
 0xb3b   :  { %11994 = vrcp.f32 %v4630_v30 }
 0xb43   :  { %v11991_v16 = vpop.eup %11990 }
 0xb44   :  { %v11993_v14 = vpop.eup %11992  ;;  %v4634_v1 = vmul.f32 %v11991_v16, %v11989_v12 }
 0xb45   :  { %v4633_v10 = vmul.f32 %v11993_v14, %v14039_v50  ;;  %v11995_v50 = vpop.eup %11994 }
 0xb47   :  { %v14131_v8 = vadd.f32 %v4634_v1, %v4633_v10  ;;  %v4534_v53 = vpop.f32.mrb[52].mxu0  ;;  %v4605_v58 = vpop.f32.mrb[32].mxu1 }
 0xb48   :  { %v11581_v25 = vadd.f32 %v4534_v53, %v15138_v62  ;;  %v4536_v5 = vpop.f32.mrb[53].mxu0  ;;  %v4607_v46 = vpop.f32.mrb[33].mxu1  ;;  %v11597_v1 = vadd.f32 %v4605_v58, %v13676_v59 }
 0xb49   :  { %11996 = vtanh.f32 %v14131_v8  ;;  %v11582_v61 = vadd.f32 %v4536_v5, %v13664_v28  ;;  %v11598_v12 = vadd.f32 %v4607_v46, %v13672_v9 }
 0xb4a   :  { %v8964_v52 = vmul.f32 -1.442695, %v11581_v25 }
 0xb4b   :  { %v8965_v39 = vmul.f32 -1.442695, %v11582_v61  ;;  %v8966_v16 = vmul.f32 -1.442695, %v11598_v12 }
 0xb4c   :  { %11998 = vpow2.f32 %v8964_v52 }
 0xb4d   :  { %12000 = vpow2.f32 %v8965_v39 }
 0xb4e   :  { %12002 = vpow2.f32 %v8966_v16 }
 0xb4f   :  { %12004 = vtanh.f32 %v11597_v1  ;;  %v15257_v1 = vld [vmem:[#allocation45_spill] sm:$0xff] }
 0xb53   :  { %v11997_v18 = vpop.eup %11996 }
 0xb54   :  { %v14137_v14 = vmul.f32 %v11997_v18, %v11995_v50 }
 0xb56   :  { %v11999_v30 = vpop.eup %11998  ;;  %4733 = vmatmul.mubr.f32.vlgmr.msra.gmra.mrb[44].mxu0 %v14137_v14  ;;  %4804 = vmatmul.mubr.f32.vlgmr.msra.gmra.mrb[24].mxu1 %v14137_v14 }
 0xb57   :  { %v12001_v10 = vpop.eup %12000  ;;  %v4641_v53 = vadd.f32 1.0, %v11999_v30  ;;  %10412 = vmatpush1.bf16.msra.mxu0 %v13494_v19  ;;  %10444 = vmatpush1.bf16.msra.mxu1 %v13496_v22  ;;  %v15262_v30 = vld [vmem:[#allocation50_spill] sm:$0xff] }
 0xb58   :  { %v4647_v25 = vadd.f32 1.0, %v12001_v10  ;;  %10414 = vmatprep.subr.bf16.mxu0 %v13500_v29  ;;  %10446 = vmatprep.subr.bf16.mxu1 %v13502_v31  ;;  %v12003_v58 = vpop.eup %12002  ;;  %v15263_v10 = vld [vmem:[#allocation51_spill] sm:$0xff] }
 0xb59   :  { %12006 = vrcp.f32 %v4641_v53  ;;  %4882 = vmatprep.mubr.f32.mxu0 %v15101_v56  ;;  %4953 = vmatprep.mubr.f32.mxu1 %v15101_v56  ;;  %v12005_v5 = vpop.eup %12004  ;;  %v4654_v39 = vadd.f32 1.0, %v12003_v58  ;;  %v15266_v53 = vld [vmem:[#allocation54_spill] sm:$0xff]  ;;  %v15268_v58 = vld [vmem:[#allocation56_spill] sm:$0xff] }
 0xb5a   :  { %12008 = vrcp.f32 %v4647_v25  ;;  %v15267_v25 = vld [vmem:[#allocation55_spill] sm:$0xff] }
 0xb5b   :  { %10416 = vmatpush1.bf16.msra.mxu0 %v13510_v41  ;;  %10448 = vmatpush1.bf16.msra.mxu1 %v13512_v47  ;;  %12010 = vrcp.f32 %v4654_v39  ;;  %v15273_v39 = vld [vmem:[#allocation61_spill] sm:$0xff] }
 0xb5c   :  { %10418 = vmatprep.subr.bf16.mxu0 %v13516_v51  ;;  %10450 = vmatprep.subr.bf16.mxu1 %v13518_v54 }
 0xb5f   :  { %10420 = vmatpush1.bf16.msra.mxu0 %v15112_v4  ;;  %10452 = vmatpush1.bf16.msra.mxu1 %v15113_v7 }
 0xb60   :  { %10422 = vmatprep.subr.bf16.mxu0 %v15140_v13  ;;  %10454 = vmatprep.subr.bf16.mxu1 %v15141_v57 }
 0xb63   :  { %v12007_v46 = vpop.eup %12006  ;;  %10424 = vmatpush1.bf16.msra.mxu0 %v15116_v36  ;;  %10456 = vmatpush1.bf16.msra.mxu1 %v15117_v37 }
 0xb64   :  { %v12009_v61 = vpop.eup %12008  ;;  %v4658_v52 = vmul.f32 %v12007_v46, %v12005_v5  ;;  %10426 = vmatprep.subr.bf16.mxu0 %v15118_v44  ;;  %10458 = vmatprep.subr.bf16.mxu1 %v15119_v42  ;;  %v15269_v5 = vld [vmem:[#allocation57_spill] sm:$0xff]  ;;  %v15270_v46 = vld [vmem:[#allocation58_spill] sm:$0xff] }
 0xb65   :  { %v4657_v12 = vmul.f32 %v12009_v61, %v14069_v45  ;;  %v12011_v45 = vpop.eup %12010  ;;  %v15271_v61 = vld [vmem:[#allocation59_spill] sm:$0xff] }
 0xb67   :  { %v14161_v50 = vadd.f32 %v4658_v52, %v4657_v12  ;;  %10428 = vmatpush1.bf16.msra.mxu0 %v15120_v38  ;;  %10460 = vmatpush1.bf16.msra.mxu1 %v15121_v48  ;;  %v15272_v52 = vld [vmem:[#allocation60_spill] sm:$0xff]  ;;  %v15274_v12 = vld [vmem:[#allocation62_spill] sm:$0xff] }
 0xb68   :  { %10430 = vmatprep.subr.bf16.mxu0 %v13554_v15  ;;  %10462 = vmatprep.subr.bf16.mxu1 %v13556_v35 }
 0xb69   :  { %12012 = vtanh.f32 %v14161_v50 }
 0xb6b   :  { %10432 = vmatpush1.bf16.msra.mxu0 %v13560_v49  ;;  %10464 = vmatpush1.bf16.msra.mxu1 %v13562_v55 }
 0xb6c   :  { %10434 = vmatprep.subr.bf16.mxu0 %v13566_v43  ;;  %10466 = vmatprep.subr.bf16.mxu1 %v13568_v6 }
 0xb6f   :  { %10436 = vmatpush1.bf16.msra.mxu0 %v13572_v24  ;;  %10468 = vmatpush1.bf16.msra.mxu1 %v13574_v32 }
 0xb70   :  { %10438 = vmatprep.subr.bf16.mxu0 %v13578_v17  ;;  %10470 = vmatprep.subr.bf16.mxu1 %v13580_v23 }
 0xb73   :  { %v12013_v18 = vpop.eup %12012  ;;  %10440 = vmatpush1.bf16.msra.mxu0 %v13584_v63  ;;  %10472 = vmatpush1.bf16.msra.mxu1 %v13586_v3 }
 0xb74   :  { %v14178_v16 = vmul.f32 %v12013_v18, %v12011_v45  ;;  %10474 = vmatprep.subr.bf16.mxu0 %v13302_v0  ;;  %10506 = vmatprep.subr.bf16.mxu1 %v13311_v2  ;;  %v15255_v0 = vld [vmem:[#allocation43_spill] sm:$0xff]  ;;  %v15256_v2 = vld [vmem:[#allocation44_spill] sm:$0xff] }
 0xb75   :  { %v15275_v45 = vld [vmem:[#allocation63_spill] sm:$0xff]  ;;  %v15276_v18 = vld [vmem:[#allocation64_spill] sm:$0xff] }
 0xb76   :  { %4883 = vmatmul.mubr.f32.vlgmr.msra.gmra.mrb[50].mxu0 %v14178_v16  ;;  %4954 = vmatmul.mubr.f32.vlgmr.msra.gmra.mrb[30].mxu1 %v14178_v16 }
 0xb77   :  { %10476 = vmatpush1.bf16.msra.mxu0 %v13354_v20  ;;  %10508 = vmatpush1.bf16.msra.mxu1 %v13356_v21  ;;  %v15258_v20 = vld [vmem:[#allocation46_spill] sm:$0xff]  ;;  %v15259_v21 = vld [vmem:[#allocation47_spill] sm:$0xff] }
 0xb78   :  { %10478 = vmatprep.subr.bf16.mxu0 %v13358_v26  ;;  %10510 = vmatprep.subr.bf16.mxu1 %v13360_v27  ;;  %v15260_v26 = vld [vmem:[#allocation48_spill] sm:$0xff]  ;;  %v15261_v27 = vld [vmem:[#allocation49_spill] sm:$0xff] }
 0xb79   :  { %5082 = vmatprep.mubr.f32.mxu0 %v15101_v56  ;;  %5153 = vmatprep.mubr.f32.mxu1 %v15101_v56 }
 0xb7b   :  { %10480 = vmatpush1.bf16.msra.mxu0 %v13368_v33  ;;  %10512 = vmatpush1.bf16.msra.mxu1 %v13370_v34  ;;  %v15264_v33 = vld [vmem:[#allocation52_spill] sm:$0xff]  ;;  %v15265_v34 = vld [vmem:[#allocation53_spill] sm:$0xff] }
 0xb7c   :  { %10482 = vmatprep.subr.bf16.mxu0 %v15255_v0  ;;  %10514 = vmatprep.subr.bf16.mxu1 %v15256_v2  ;;  %v15277_v0 = vld [vmem:[#allocation65_spill] sm:$0xff]  ;;  %v15278_v2 = vld [vmem:[#allocation66_spill] sm:$0xff] }
 0xb7f   :  { %10484 = vmatpush1.bf16.msra.mxu0 %v15257_v1  ;;  %10516 = vmatpush1.bf16.msra.mxu1 %v15258_v20  ;;  %v15279_v1 = vld [vmem:[#allocation67_spill] sm:$0xff]  ;;  %v15280_v20 = vld [vmem:[#allocation68_spill] sm:$0xff] }
 0xb80   :  { %10486 = vmatprep.subr.bf16.mxu0 %v15259_v21  ;;  %10518 = vmatprep.subr.bf16.mxu1 %v15260_v26 }
 0xb83   :  { %10488 = vmatpush1.bf16.msra.mxu0 %v15261_v27  ;;  %10520 = vmatpush1.bf16.msra.mxu1 %v15262_v30  ;;  %v15281_v27 = vld [vmem:[#allocation81_spill] sm:$0xff] }
 0xb84   :  { %10490 = vmatprep.subr.bf16.mxu0 %v15263_v10  ;;  %10522 = vmatprep.subr.bf16.mxu1 %v15264_v33 }
 0xb87   :  { %10492 = vmatpush1.bf16.msra.mxu0 %v15265_v34  ;;  %10524 = vmatpush1.bf16.msra.mxu1 %v15266_v53 }
 0xb88   :  { %10494 = vmatprep.subr.bf16.mxu0 %v15267_v25  ;;  %10526 = vmatprep.subr.bf16.mxu1 %v15268_v58 }
 0xb8b   :  { %10496 = vmatpush1.bf16.msra.mxu0 %v15269_v5  ;;  %10528 = vmatpush1.bf16.msra.mxu1 %v15270_v46 }
 0xb8c   :  { %10498 = vmatprep.subr.bf16.mxu0 %v15271_v61  ;;  %10530 = vmatprep.subr.bf16.mxu1 %v15272_v52 }
 0xb8f   :  { %10500 = vmatpush1.bf16.msra.mxu0 %v15273_v39  ;;  %10532 = vmatpush1.bf16.msra.mxu1 %v15274_v12 }
 0xb90   :  { %10502 = vmatprep.subr.bf16.mxu0 %v15275_v45  ;;  %10534 = vmatprep.subr.bf16.mxu1 %v15276_v18 }
 0xb93   :  { %10504 = vmatpush1.bf16.msra.mxu0 %v15277_v0  ;;  %10536 = vmatpush1.bf16.msra.mxu1 %v15278_v2 }
 0xb94   :  { %10538 = vmatprep.subr.bf16.mxu0 %v15279_v1  ;;  %10570 = vmatprep.subr.bf16.mxu1 %v15280_v20 }
 0xc29   :  { %v4734_v21 = vpop.f32.mrb[44].mxu0  ;;  %v4805_v26 = vpop.f32.mrb[24].mxu1 }
 0xc2a   :  { %v11557_v30 = vadd.f32 %v4734_v21, %v15281_v27  ;;  %v4736_v10 = vpop.f32.mrb[45].mxu0  ;;  %v4807_v33 = vpop.f32.mrb[25].mxu1  ;;  %v11573_v46 = vadd.f32 %v4805_v26, %v15167_v60 }
 0xc2b   :  { %v11558_v34 = vadd.f32 %v4736_v10, %v13641_v40  ;;  %v11574_v58 = vadd.f32 %v4807_v33, %v15136_v11 }
 0xc2c   :  { %v8967_v53 = vmul.f32 -1.442695, %v11557_v30 }
 0xc2d   :  { %v8968_v25 = vmul.f32 -1.442695, %v11558_v34  ;;  %v8969_v5 = vmul.f32 -1.442695, %v11574_v58 }
 0xc2e   :  { %12014 = vpow2.f32 %v8967_v53 }
 0xc2f   :  { %12016 = vpow2.f32 %v8968_v25 }
 0xc30   :  { %12018 = vpow2.f32 %v8969_v5 }
 0xc31   :  { %12020 = vtanh.f32 %v11573_v46 }
 0xc38   :  { %v12015_v61 = vpop.eup %12014 }
 0xc39   :  { %v12017_v52 = vpop.eup %12016  ;;  %v4967_v39 = vadd.f32 1.0, %v12015_v61 }
 0xc3a   :  { %v4973_v12 = vadd.f32 1.0, %v12017_v52  ;;  %v12019_v45 = vpop.eup %12018 }
 0xc3b   :  { %12022 = vrcp.f32 %v4967_v39  ;;  %v12021_v18 = vpop.eup %12020  ;;  %v4980_v20 = vadd.f32 1.0, %v12019_v45 }
 0xc3c   :  { %12024 = vrcp.f32 %v4973_v12 }
 0xc3d   :  { %12026 = vrcp.f32 %v4980_v20  ;;  %v5454_v20 = vld [vmem:[#allocation19 + $0x50] sm:$0xff] }
 0xc45   :  { %v12023_v0 = vpop.eup %12022 }
 0xc46   :  { %v12025_v2 = vpop.eup %12024  ;;  %v4984_v1 = vmul.f32 %v12023_v0, %v12021_v18 }
 0xc47   :  { %v4983_v21 = vmul.f32 %v12025_v2, %v14131_v8  ;;  %v12027_v8 = vpop.eup %12026 }
 0xc49   :  { %v14223_v30 = vadd.f32 %v4984_v1, %v4983_v21  ;;  %v4884_v10 = vpop.f32.mrb[50].mxu0  ;;  %v4955_v26 = vpop.f32.mrb[30].mxu1  ;;  %v5458_v21 = vld [vmem:[#allocation19 + $0x70] sm:$0xff] }
 0xc4a   :  { %v11579_v33 = vadd.f32 %v4884_v10, %v15138_v62  ;;  %v4886_v34 = vpop.f32.mrb[51].mxu0  ;;  %v4957_v53 = vpop.f32.mrb[31].mxu1  ;;  %v11595_v12 = vadd.f32 %v4955_v26, %v13676_v59  ;;  %v10639_v10 = vpack.c.bf16 %v5458_v21, %v5454_v20  ;;  %v5461_v26 = vld [vmem:[#allocation19 + $0x88] sm:$0xff]  ;;  %v5490_v20 = vld [vmem:[#allocation19 + $0x170] sm:$0xff] }
 0xc4b   :  { %12028 = vtanh.f32 %v14223_v30  ;;  %v11580_v25 = vadd.f32 %v4886_v34, %v13664_v28  ;;  %v11596_v46 = vadd.f32 %v4957_v53, %v13672_v9  ;;  %v5463_v34 = vld [vmem:[#allocation19 + $0x98] sm:$0xff]  ;;  %v5493_v21 = vld [vmem:[#allocation19 + $0x188] sm:$0xff] }
 0xc4c   :  { %v8970_v58 = vmul.f32 -1.442695, %v11579_v33  ;;  %v5465_v33 = vld [vmem:[#allocation19 + $0xa8] sm:$0xff] }
 0xc4d   :  { %v8971_v5 = vmul.f32 -1.442695, %v11580_v25  ;;  %v8972_v52 = vmul.f32 -1.442695, %v11596_v46  ;;  %v10609_v53 = vpack.c.bf16 %v5465_v33, %v5461_v26  ;;  %v5467_v25 = vld [vmem:[#allocation19 + $0xb8] sm:$0xff]  ;;  %v5497_v26 = vld [vmem:[#allocation19 + $0x1a8] sm:$0xff] }
 0xc4e   :  { %12030 = vpow2.f32 %v8970_v58  ;;  %v5460_v58 = vld [vmem:[#allocation19 + $0x80] sm:$0xff]  ;;  %v10641_v46 = vpack.c.bf16 %v5467_v25, %v5463_v34  ;;  %v5495_v33 = vld [vmem:[#allocation19 + $0x198] sm:$0xff] }
 0xc4f   :  { %12032 = vpow2.f32 %v8971_v5  ;;  %v5464_v5 = vld [vmem:[#allocation19 + $0xa0] sm:$0xff]  ;;  %v5499_v34 = vld [vmem:[#allocation19 + $0x1b8] sm:$0xff] }
 0xc50   :  { %12034 = vpow2.f32 %v8972_v52  ;;  %v5466_v52 = vld [vmem:[#allocation19 + $0xb0] sm:$0xff]  ;;  %v10657_v25 = vpack.c.bf16 %v5499_v34, %v5495_v33 }
 0xc51   :  { %12036 = vtanh.f32 %v11595_v12 }
 0xc55   :  { %v12029_v61 = vpop.eup %12028 }
 0xc56   :  { %v14229_v39 = vmul.f32 %v12029_v61, %v12027_v8  ;;  %v10611_v8 = vpack.c.bf16 %v5464_v5, %v5460_v58  ;;  %v5462_v61 = vld [vmem:[#allocation19 + $0x90] sm:$0xff]  ;;  %v5492_v58 = vld [vmem:[#allocation19 + $0x180] sm:$0xff] }
 0xc57   :  { %v10643_v12 = vpack.c.bf16 %v5466_v52, %v5462_v61  ;;  %v5496_v5 = vld [vmem:[#allocation19 + $0x1a0] sm:$0xff]  ;;  %v5498_v61 = vld [vmem:[#allocation19 + $0x1b0] sm:$0xff]  ;;  %v5501_v52 = vld [vmem:[#allocation19 + $0x1c8] sm:$0xff] }
 0xc58   :  { %v12031_v45 = vpop.eup %12030  ;;  %5083 = vmatmul.mubr.f32.vlgmr.msra.gmra.mrb[46].mxu0 %v14229_v39  ;;  %5154 = vmatmul.mubr.f32.vlgmr.msra.gmra.mrb[26].mxu1 %v14229_v39 }
 0xc59   :  { %v12033_v18 = vpop.eup %12032  ;;  %v4991_v0 = vadd.f32 1.0, %v12031_v45  ;;  %10540 = vmatpush1.bf16.msra.mxu0 %v13494_v19  ;;  %10572 = vmatpush1.bf16.msra.mxu1 %v13496_v22  ;;  %v5469_v45 = vld [vmem:[#allocation19 + $0xc8] sm:$0xff] }
 0xc5a   :  { %v4997_v2 = vadd.f32 1.0, %v12033_v18  ;;  %10542 = vmatprep.subr.bf16.mxu0 %v13500_v29  ;;  %10574 = vmatprep.subr.bf16.mxu1 %v13502_v31  ;;  %v12035_v19 = vpop.eup %12034  ;;  %v5473_v18 = vld [vmem:[#allocation19 + $0xe8] sm:$0xff] }
 0xc5b   :  { %12038 = vrcp.f32 %v4991_v0  ;;  %5232 = vmatprep.mubr.f32.mxu0 %v15101_v56  ;;  %5303 = vmatprep.mubr.f32.mxu1 %v15101_v56  ;;  %v12037_v22 = vpop.eup %12036  ;;  %v5471_v0 = vld [vmem:[#allocation19 + $0xd8] sm:$0xff] }
 0xc5c   :  { %12040 = vrcp.f32 %v4997_v2  ;;  %v10613_v2 = vpack.c.bf16 %v5473_v18, %v5469_v45 }
 0xc5d   :  { %10544 = vmatpush1.bf16.msra.mxu0 %v13510_v41  ;;  %10576 = vmatpush1.bf16.msra.mxu1 %v13512_v47  ;;  %v5004_v47 = vadd.f32 1.0, %v12035_v19  ;;  %v5475_v19 = vld [vmem:[#allocation19 + $0xf8] sm:$0xff] }
 0xc5e   :  { %10546 = vmatprep.subr.bf16.mxu0 %v13516_v51  ;;  %10578 = vmatprep.subr.bf16.mxu1 %v13518_v54 }
 0xc5f   :  { %12042 = vrcp.f32 %v5004_v47  ;;  %v5470_v47 = vld [vmem:[#allocation19 + $0xd0] sm:$0xff] }
 0xc61   :  { %10548 = vmatpush1.bf16.msra.mxu0 %v15112_v4  ;;  %10580 = vmatpush1.bf16.msra.mxu1 %v15113_v7  ;;  %v5450_v4 = vld [vmem:[#allocation19 + $0x30] sm:$0xff] }
 0xc62   :  { %10550 = vmatprep.subr.bf16.mxu0 %v15140_v13  ;;  %10582 = vmatprep.subr.bf16.mxu1 %v15141_v57  ;;  %v5452_v13 = vld [vmem:[#allocation19 + $0x40] sm:$0xff] }
 0xc63   :  { %v5456_v57 = vld [vmem:[#allocation19 + $0x60] sm:$0xff] }
 0xc64   :  { %v10607_v1 = vpack.c.bf16 %v5456_v57, %v5452_v13  ;;  %v5488_v13 = vld [vmem:[#allocation19 + $0x160] sm:$0xff] }
 0xc65   :  { %v12039_v29 = vpop.eup %12038  ;;  %10552 = vmatpush1.bf16.msra.mxu0 %v15116_v36  ;;  %10584 = vmatpush1.bf16.msra.mxu1 %v15117_v37  ;;  %v5455_v36 = vld [vmem:[#allocation19 + $0x58] sm:$0xff] }
 0xc66   :  { %v12041_v31 = vpop.eup %12040  ;;  %v5008_v41 = vmul.f32 %v12039_v29, %v12037_v22  ;;  %10554 = vmatprep.subr.bf16.mxu0 %v15118_v44  ;;  %10586 = vmatprep.subr.bf16.mxu1 %v15119_v42  ;;  %v5459_v44 = vld [vmem:[#allocation19 + $0x78] sm:$0xff]  ;;  %v5468_v22 = vld [vmem:[#allocation19 + $0xc0] sm:$0xff] }
 0xc67   :  { %v5007_v51 = vmul.f32 %v12041_v31, %v14161_v50  ;;  %v10637_v50 = vpack.c.bf16 %v5459_v44, %v5455_v36  ;;  %v5472_v29 = vld [vmem:[#allocation19 + $0xe0] sm:$0xff]  ;;  %v10645_v31 = vpack.c.bf16 %v5475_v19, %v5471_v0  ;;  %v5503_v0 = vld [vmem:[#allocation19 + $0x1d8] sm:$0xff] }
 0xc68   :  { %v5484_v44 = vld [vmem:[#allocation19 + $0x140] sm:$0xff] }
 0xc69   :  { %v14253_v54 = vadd.f32 %v5008_v41, %v5007_v51  ;;  %10556 = vmatpush1.bf16.msra.mxu0 %v15120_v38  ;;  %10588 = vmatpush1.bf16.msra.mxu1 %v15121_v48  ;;  %v12043_v42 = vpop.eup %12042  ;;  %v5453_v38 = vld [vmem:[#allocation19 + $0x48] sm:$0xff]  ;;  %v10615_v41 = vpack.c.bf16 %v5472_v29, %v5468_v22  ;;  %v5474_v51 = vld [vmem:[#allocation19 + $0xf0] sm:$0xff]  ;;  %v5500_v19 = vld [vmem:[#allocation19 + $0x1c0] sm:$0xff] }
 0xc6a   :  { %10558 = vmatprep.subr.bf16.mxu0 %v13554_v15  ;;  %10590 = vmatprep.subr.bf16.mxu1 %v13556_v35  ;;  %v5457_v48 = vld [vmem:[#allocation19 + $0x68] sm:$0xff]  ;;  %v5504_v29 = vld [vmem:[#allocation19 + $0x1e0] sm:$0xff] }
 0xc6b   :  { %12044 = vtanh.f32 %v14253_v54  ;;  %v10605_v37 = vpack.c.bf16 %v5457_v48, %v5453_v38  ;;  %v5489_v38 = vld [vmem:[#allocation19 + $0x168] sm:$0xff]  ;;  %v5487_v48 = vld [vmem:[#allocation19 + $0x158] sm:$0xff] }
 0xc6d   :  { %10560 = vmatpush1.bf16.msra.mxu0 %v13560_v49  ;;  %10592 = vmatpush1.bf16.msra.mxu1 %v13562_v55  ;;  %v5445_v49 = vld [vmem:[#allocation19 + $0x8] sm:$0xff] }
 0xc6e   :  { %10562 = vmatprep.subr.bf16.mxu0 %v13566_v43  ;;  %10594 = vmatprep.subr.bf16.mxu1 %v13568_v6  ;;  %v5449_v55 = vld [vmem:[#allocation19 + $0x28] sm:$0xff]  ;;  %v5447_v43 = vld [vmem:[#allocation19 + $0x18] sm:$0xff] }
 0xc6f   :  { %v10601_v6 = vpack.c.bf16 %v5449_v55, %v5445_v49  ;;  %v5481_v49 = vld [vmem:[#allocation19 + $0x128] sm:$0xff]  ;;  %v5479_v55 = vld [vmem:[#allocation19 + $0x118] sm:$0xff] }
 0xc71   :  { %10564 = vmatpush1.bf16.msra.mxu0 %v13572_v24  ;;  %10596 = vmatpush1.bf16.msra.mxu1 %v13574_v32  ;;  %v5451_v24 = vld [vmem:[#allocation19 + $0x38] sm:$0xff]  ;;  %v5444_v32 = vld [vmem:[#allocation19] sm:$0xff] }
 0xc72   :  { %10566 = vmatprep.subr.bf16.mxu0 %v13578_v17  ;;  %10598 = vmatprep.subr.bf16.mxu1 %v13580_v23  ;;  %v5448_v17 = vld [vmem:[#allocation19 + $0x20] sm:$0xff]  ;;  %v10633_v23 = vpack.c.bf16 %v5451_v24, %v5447_v43 }
 0xc73   :  { %v5476_v24 = vld [vmem:[#allocation19 + $0x100] sm:$0xff] }
 0xc75   :  { %v12045_v15 = vpop.eup %12044  ;;  %10568 = vmatpush1.bf16.msra.mxu0 %v13584_v63  ;;  %10600 = vmatpush1.bf16.msra.mxu1 %v13586_v3  ;;  %v10603_v63 = vpack.c.bf16 %v5448_v17, %v5444_v32  ;;  %v5446_v3 = vld [vmem:[#allocation19 + $0x10] sm:$0xff]  ;;  %v5480_v32 = vld [vmem:[#allocation19 + $0x120] sm:$0xff] }
 0xc76   :  { %v14270_v35 = vmul.f32 %v12045_v15, %v12043_v42  ;;  %10602 = vmatprep.subr.bf16.mxu0 %v10601_v6  ;;  %v10635_v7 = vpack.c.bf16 %v5450_v4, %v5446_v3  ;;  %10634 = vmatprep.subr.bf16.mxu1 %v10633_v23  ;;  %v10647_v42 = vpack.c.bf16 %v5474_v51, %v5470_v47  ;;  %v5477_v15 = vld [vmem:[#allocation19 + $0x108] sm:$0xff]  ;;  %v5483_v6 = vld [vmem:[#allocation19 + $0x138] sm:$0xff]  ;;  %v5482_v3 = vld [vmem:[#allocation19 + $0x130] sm:$0xff] }
 0xc77   :  { %v10617_v43 = vpack.c.bf16 %v5481_v49, %v5477_v15  ;;  %v10649_v17 = vpack.c.bf16 %v5483_v6, %v5479_v55  ;;  %v10619_v23 = vpack.c.bf16 %v5480_v32, %v5476_v24  ;;  %v10631_v47 = vpack.c.bf16 %v5504_v29, %v5500_v19  ;;  %v5381_v51 = vld [vmem:[#allocation18 + $0x8] sm:$0xff]  ;;  %v5383_v15 = vld [vmem:[#allocation18 + $0x18] sm:$0xff] }
 0xc78   :  { %5233 = vmatmul.mubr.f32.vlgmr.msra.gmra.mrb[48].mxu0 %v14270_v35  ;;  %5304 = vmatmul.mubr.f32.vlgmr.msra.gmra.mrb[28].mxu1 %v14270_v35 }
 0xc79   :  { %5572 = vmatprep.mubr.f32.mxu0 %v15101_v56  ;;  %5685 = vmatprep.mubr.f32.mxu1 %v15101_v56 }
 0xc7a   :  { %10604 = vmatpush1.bf16.msra.mxu0 %v10603_v63  ;;  %10636 = vmatpush1.bf16.msra.mxu1 %v10635_v7  ;;  %v5478_v63 = vld [vmem:[#allocation19 + $0x110] sm:$0xff]  ;;  %v5485_v7 = vld [vmem:[#allocation19 + $0x148] sm:$0xff] }
 0xc7b   :  { %10606 = vmatprep.subr.bf16.mxu0 %v10605_v37  ;;  %10638 = vmatprep.subr.bf16.mxu1 %v10637_v50  ;;  %v10651_v4 = vpack.c.bf16 %v5482_v3, %v5478_v63  ;;  %v10621_v36 = vpack.c.bf16 %v5489_v38, %v5485_v7  ;;  %v5491_v37 = vld [vmem:[#allocation19 + $0x178] sm:$0xff]  ;;  %v10623_v50 = vpack.c.bf16 %v5488_v13, %v5484_v44 }
 0xc7c   :  { %v10653_v57 = vpack.c.bf16 %v5491_v37, %v5487_v48 }
 0xc7e   :  { %10608 = vmatpush1.bf16.msra.mxu0 %v10607_v1  ;;  %10640 = vmatpush1.bf16.msra.mxu1 %v10639_v10  ;;  %v5486_v1 = vld [vmem:[#allocation19 + $0x150] sm:$0xff] }
 0xc7f   :  { %10610 = vmatprep.subr.bf16.mxu0 %v10609_v53  ;;  %10642 = vmatprep.subr.bf16.mxu1 %v10641_v46  ;;  %v10655_v10 = vpack.c.bf16 %v5490_v20, %v5486_v1  ;;  %v10625_v53 = vpack.c.bf16 %v5497_v26, %v5493_v21  ;;  %v5494_v46 = vld [vmem:[#allocation19 + $0x190] sm:$0xff] }
 0xc80   :  { %v10659_v45 = vpack.c.bf16 %v5498_v61, %v5494_v46 }
 0xc82   :  { %10612 = vmatpush1.bf16.msra.mxu0 %v10611_v8  ;;  %10644 = vmatpush1.bf16.msra.mxu1 %v10643_v12  ;;  %v10627_v8 = vpack.c.bf16 %v5496_v5, %v5492_v58  ;;  %v5505_v12 = vld [vmem:[#allocation19 + $0x1e8] sm:$0xff] }
 0xc83   :  { %10614 = vmatprep.subr.bf16.mxu0 %v10613_v2  ;;  %10646 = vmatprep.subr.bf16.mxu1 %v10645_v31  ;;  %v10629_v18 = vpack.c.bf16 %v5505_v12, %v5501_v52  ;;  %v5507_v2 = vld [vmem:[#allocation19 + $0x1f8] sm:$0xff]  ;;  %v5502_v31 = vld [vmem:[#allocation19 + $0x1d0] sm:$0xff] }
 0xc84   :  { %v10661_v22 = vpack.c.bf16 %v5507_v2, %v5503_v0 }
 0xc86   :  { %10616 = vmatpush1.bf16.msra.mxu0 %v10615_v41  ;;  %10648 = vmatpush1.bf16.msra.mxu1 %v10647_v42  ;;  %v5506_v41 = vld [vmem:[#allocation19 + $0x1f0] sm:$0xff]  ;;  %v5385_v42 = vld [vmem:[#allocation18 + $0x28] sm:$0xff] }
 0xc87   :  { %10618 = vmatprep.subr.bf16.mxu0 %v10617_v43  ;;  %10650 = vmatprep.subr.bf16.mxu1 %v10649_v17  ;;  %v10663_v49 = vpack.c.bf16 %v5506_v41, %v5502_v31  ;;  %v10665_v55 = vpack.c.bf16 %v5385_v42, %v5381_v51  ;;  %v5387_v43 = vld [vmem:[#allocation18 + $0x38] sm:$0xff]  ;;  %v5382_v51 = vld [vmem:[#allocation18 + $0x10] sm:$0xff] }
 0xc88   :  { %v10697_v6 = vpack.c.bf16 %v5387_v43, %v5383_v15  ;;  %v5386_v42 = vld [vmem:[#allocation18 + $0x30] sm:$0xff]  ;;  %v5389_v15 = vld [vmem:[#allocation18 + $0x48] sm:$0xff]  ;;  %v5391_v43 = vld [vmem:[#allocation18 + $0x58] sm:$0xff] }
 0xc8a   :  { %10620 = vmatpush1.bf16.msra.mxu0 %v10619_v23  ;;  %10652 = vmatpush1.bf16.msra.mxu1 %v10651_v4 }
 0xc8b   :  { %10622 = vmatprep.subr.bf16.mxu0 %v10621_v36  ;;  %10654 = vmatprep.subr.bf16.mxu1 %v10653_v57 }
 0xc8e   :  { %10624 = vmatpush1.bf16.msra.mxu0 %v10623_v50  ;;  %10656 = vmatpush1.bf16.msra.mxu1 %v10655_v10 }
 0xc8f   :  { %10626 = vmatprep.subr.bf16.mxu0 %v10625_v53  ;;  %10658 = vmatprep.subr.bf16.mxu1 %v10657_v25 }
 0xc92   :  { %10628 = vmatpush1.bf16.msra.mxu0 %v10627_v8  ;;  %10660 = vmatpush1.bf16.msra.mxu1 %v10659_v45 }
 0xc93   :  { %10630 = vmatprep.subr.bf16.mxu0 %v10629_v18  ;;  %10662 = vmatprep.subr.bf16.mxu1 %v10661_v22 }
 0xc96   :  { %10632 = vmatpush1.bf16.msra.mxu0 %v10631_v47  ;;  %10664 = vmatpush1.bf16.msra.mxu1 %v10663_v49  ;;  %v5384_v47 = vld [vmem:[#allocation18 + $0x20] sm:$0xff] }
 0xc97   :  { %10666 = vmatprep.subr.bf16.mxu0 %v10665_v55  ;;  %10698 = vmatprep.subr.bf16.mxu1 %v10697_v6  ;;  %v5393_v55 = vld [vmem:[#allocation18 + $0x68] sm:$0xff]  ;;  %v5395_v6 = vld [vmem:[#allocation18 + $0x78] sm:$0xff] }
 0xd2b   :  { %v5084_v24 = vpop.f32.mrb[46].mxu0  ;;  %v5155_v32 = vpop.f32.mrb[26].mxu1 }
 0xd2c   :  { %v11559_v17 = vadd.f32 %v5084_v24, %v15281_v27  ;;  %v5086_v23 = vpop.f32.mrb[47].mxu0  ;;  %v5157_v63 = vpop.f32.mrb[27].mxu1  ;;  %v11575_v36 = vadd.f32 %v5155_v32, %v15167_v60 }
 0xd2d   :  { %v11560_v3 = vadd.f32 %v5086_v23, %v13641_v40  ;;  %v11576_v38 = vadd.f32 %v5157_v63, %v15136_v11  ;;  %v5388_v23 = vld [vmem:[#allocation18 + $0x40] sm:$0xff] }
 0xd2e   :  { %v8973_v4 = vmul.f32 -1.442695, %v11559_v17  ;;  %v10699_v17 = vpack.c.bf16 %v5386_v42, %v5382_v51 }
 0xd2f   :  { %v8974_v7 = vmul.f32 -1.442695, %v11560_v3  ;;  %v8975_v48 = vmul.f32 -1.442695, %v11576_v38  ;;  %v5392_v3 = vld [vmem:[#allocation18 + $0x60] sm:$0xff]  ;;  %v10701_v38 = vpack.c.bf16 %v5395_v6, %v5391_v43  ;;  %v5426_v43 = vld [vmem:[#allocation18 + $0x170] sm:$0xff] }
 0xd30   :  { %12046 = vpow2.f32 %v8973_v4  ;;  %v5394_v4 = vld [vmem:[#allocation18 + $0x70] sm:$0xff] }
 0xd31   :  { %12048 = vpow2.f32 %v8974_v7  ;;  %v10669_v7 = vpack.c.bf16 %v5393_v55, %v5389_v15  ;;  %v5420_v15 = vld [vmem:[#allocation18 + $0x140] sm:$0xff]  ;;  %v5422_v55 = vld [vmem:[#allocation18 + $0x150] sm:$0xff] }
 0xd32   :  { %12050 = vpow2.f32 %v8975_v48  ;;  %v5397_v48 = vld [vmem:[#allocation18 + $0x88] sm:$0xff] }
 0xd33   :  { %12052 = vtanh.f32 %v11575_v36  ;;  %v5401_v36 = vld [vmem:[#allocation18 + $0xa8] sm:$0xff] }
 0xd3a   :  { %v12047_v37 = vpop.eup %12046 }
 0xd3b   :  { %v12049_v44 = vpop.eup %12048  ;;  %v5317_v13 = vadd.f32 1.0, %v12047_v37  ;;  %v5399_v37 = vld [vmem:[#allocation18 + $0x98] sm:$0xff] }
 0xd3c   :  { %v5323_v57 = vadd.f32 1.0, %v12049_v44  ;;  %v12051_v27 = vpop.eup %12050  ;;  %v5403_v44 = vld [vmem:[#allocation18 + $0xb8] sm:$0xff] }
 0xd3d   :  { %12054 = vrcp.f32 %v5317_v13  ;;  %v12053_v50 = vpop.eup %12052  ;;  %v5330_v21 = vadd.f32 1.0, %v12051_v27  ;;  %v10671_v13 = vpack.c.bf16 %v5392_v3, %v5388_v23  ;;  %v5396_v27 = vld [vmem:[#allocation18 + $0x80] sm:$0xff]  ;;  %v5433_v23 = vld [vmem:[#allocation18 + $0x1a8] sm:$0xff]  ;;  %v5431_v3 = vld [vmem:[#allocation18 + $0x198] sm:$0xff] }
 0xd3e   :  { %12056 = vrcp.f32 %v5323_v57 }
 0xd3f   :  { %12058 = vrcp.f32 %v5330_v21  ;;  %v10705_v21 = vpack.c.bf16 %v5403_v44, %v5399_v37  ;;  %v5434_v37 = vld [vmem:[#allocation18 + $0x1b0] sm:$0xff] }
 0xd47   :  { %v12055_v40 = vpop.eup %12054 }
 0xd48   :  { %v12057_v1 = vpop.eup %12056  ;;  %v5334_v20 = vmul.f32 %v12055_v40, %v12053_v50  ;;  %v5400_v50 = vld [vmem:[#allocation18 + $0xa0] sm:$0xff]  ;;  %v5398_v40 = vld [vmem:[#allocation18 + $0x90] sm:$0xff] }
 0xd49   :  { %v5333_v10 = vmul.f32 %v12057_v1, %v14223_v30  ;;  %v12059_v8 = vpop.eup %12058  ;;  %v5402_v1 = vld [vmem:[#allocation18 + $0xb0] sm:$0xff] }
 0xd4b   :  { %v5335_v11 = vadd.f32 %v5334_v20, %v5333_v10  ;;  %v5234_v26 = vpop.f32.mrb[48].mxu0  ;;  %v5305_v33 = vpop.f32.mrb[28].mxu1  ;;  %v10673_v20 = vpack.c.bf16 %v5401_v36, %v5397_v48  ;;  %v5405_v10 = vld [vmem:[#allocation18 + $0xc8] sm:$0xff]  ;;  %v5432_v48 = vld [vmem:[#allocation18 + $0x1a0] sm:$0xff]  ;;  %v5430_v36 = vld [vmem:[#allocation18 + $0x190] sm:$0xff] }
 0xd4c   :  { %v11577_v60 = vadd.f32 %v5234_v26, %v15138_v62  ;;  %v5236_v34 = vpop.f32.mrb[49].mxu0  ;;  %v5307_v53 = vpop.f32.mrb[29].mxu1  ;;  %v11593_v52 = vadd.f32 %v5305_v33, %v13676_v59  ;;  %v5380_v59 = vld [vmem:[#allocation18] sm:$0xff]  ;;  %v5407_v26 = vld [vmem:[#allocation18 + $0xd8] sm:$0xff] }
 0xd4d   :  { %12060 = vtanh.f32 %v5335_v11  ;;  %v11578_v25 = vadd.f32 %v5236_v34, %v13664_v28  ;;  %v11594_v46 = vadd.f32 %v5307_v53, %v13672_v9  ;;  %v10667_v32 = vpack.c.bf16 %v5384_v47, %v5380_v59  ;;  %v5409_v11 = vld [vmem:[#allocation18 + $0xe8] sm:$0xff]  ;;  %v5411_v33 = vld [vmem:[#allocation18 + $0xf8] sm:$0xff]  ;;  %v5404_v53 = vld [vmem:[#allocation18 + $0xc0] sm:$0xff] }
 0xd4e   :  { %v8976_v58 = vmul.f32 -1.442695, %v11577_v60  ;;  %v10675_v60 = vpack.c.bf16 %v5400_v50, %v5396_v27  ;;  %v10707_v34 = vpack.c.bf16 %v5402_v1, %v5398_v40  ;;  %v5423_v59 = vld [vmem:[#allocation18 + $0x158] sm:$0xff]  ;;  %v15284_v27 = vld [vmem:[#allocation75_spill] sm:$0xff] }
 0xd4f   :  { %v8977_v5 = vmul.f32 -1.442695, %v11578_v25  ;;  %v8978_v30 = vmul.f32 -1.442695, %v11594_v46  ;;  %v5408_v25 = vld [vmem:[#allocation18 + $0xe0] sm:$0xff]  ;;  %v10677_v46 = vpack.c.bf16 %v5409_v11, %v5405_v10  ;;  %v5427_v47 = vld [vmem:[#allocation18 + $0x178] sm:$0xff] }
 0xd50   :  { %12062 = vpow2.f32 %v8976_v58  ;;  %v5406_v58 = vld [vmem:[#allocation18 + $0xd0] sm:$0xff]  ;;  %v5441_v50 = vld [vmem:[#allocation18 + $0x1e8] sm:$0xff]  ;;  %v5439_v40 = vld [vmem:[#allocation18 + $0x1d8] sm:$0xff] }
 0xd51   :  { %12064 = vpow2.f32 %v8977_v5  ;;  %v5410_v5 = vld [vmem:[#allocation18 + $0xf0] sm:$0xff]  ;;  %v5443_v1 = vld [vmem:[#allocation18 + $0x1f8] sm:$0xff]  ;;  %v5436_v10 = vld [vmem:[#allocation18 + $0x1c0] sm:$0xff] }
 0xd52   :  { %12066 = vpow2.f32 %v8978_v30  ;;  %v5417_v30 = vld [vmem:[#allocation18 + $0x128] sm:$0xff]  ;;  %v5440_v11 = vld [vmem:[#allocation18 + $0x1e0] sm:$0xff] }
 0xd53   :  { %12068 = vtanh.f32 %v11593_v52  ;;  %v5415_v52 = vld [vmem:[#allocation18 + $0x118] sm:$0xff] }
 0xd57   :  { %v12061_v61 = vpop.eup %12060 }
 0xd58   :  { %v14285_v12 = vmul.f32 %v12061_v61, %v12059_v8  ;;  %v10709_v8 = vpack.c.bf16 %v5411_v33, %v5407_v26  ;;  %v5413_v61 = vld [vmem:[#allocation18 + $0x108] sm:$0xff]  ;;  %v5438_v26 = vld [vmem:[#allocation18 + $0x1d0] sm:$0xff] }
 0xd59   :  { %v5442_v33 = vld [vmem:[#allocation18 + $0x1f0] sm:$0xff] }
 0xd5a   :  { %v12063_v45 = vpop.eup %12062 }
 0xd5b   :  { %v12065_v62 = vpop.eup %12064  ;;  %v5341_v18 = vadd.f32 1.0, %v12063_v45  ;;  %v5419_v45 = vld [vmem:[#allocation18 + $0x138] sm:$0xff] }
 0xd5c   :  { %v5347_v0 = vadd.f32 1.0, %v12065_v62  ;;  %v12067_v28 = vpop.eup %12066  ;;  %v10679_v62 = vpack.c.bf16 %v5408_v25, %v5404_v53  ;;  %v6111_v53 = vld [vmem:[#allocation24 + $0x8] sm:$0xff]  ;;  %v15285_v25 = vld [vmem:[#allocation73_spill] sm:$0xff] }
 0xd5d   :  { %12070 = vrcp.f32 %v5341_v18  ;;  %v12069_v2 = vpop.eup %12068  ;;  %v5354_v29 = vadd.f32 1.0, %v12067_v28  ;;  %v10711_v18 = vpack.c.bf16 %v5410_v5, %v5406_v58  ;;  %v5416_v28 = vld [vmem:[#allocation18 + $0x120] sm:$0xff]  ;;  %v6115_v58 = vld [vmem:[#allocation24 + $0x28] sm:$0xff]  ;;  %v6113_v5 = vld [vmem:[#allocation24 + $0x18] sm:$0xff] }
 0xd5e   :  { %12072 = vrcp.f32 %v5347_v0  ;;  %v5412_v0 = vld [vmem:[#allocation18 + $0x100] sm:$0xff] }
 0xd5f   :  { %12074 = vrcp.f32 %v5354_v29  ;;  %v5421_v29 = vld [vmem:[#allocation18 + $0x148] sm:$0xff]  ;;  %v10683_v51 = vpack.c.bf16 %v5416_v28, %v5412_v0 }
 0xd60   :  { %v6119_v28 = vld [vmem:[#allocation24 + $0x48] sm:$0xff] }
 0xd67   :  { %v12071_v19 = vpop.eup %12070 }
 0xd68   :  { %v12073_v22 = vpop.eup %12072  ;;  %v5358_v9 = vmul.f32 %v12071_v19, %v12069_v2  ;;  %v5414_v2 = vld [vmem:[#allocation18 + $0x110] sm:$0xff] }
 0xd69   :  { %v5357_v31 = vmul.f32 %v12073_v22, %v14253_v54  ;;  %v12075_v49 = vpop.eup %12074  ;;  %v5390_v54 = vld [vmem:[#allocation18 + $0x50] sm:$0xff]  ;;  %v10681_v22 = vpack.c.bf16 %v5417_v30, %v5413_v61  ;;  %v10727_v61 = vpack.c.bf16 %v5442_v33, %v5438_v26  ;;  %v6110_v30 = vld [vmem:[#allocation24] sm:$0xff] }
 0xd6a   :  { %v10703_v57 = vpack.c.bf16 %v5394_v4, %v5390_v54  ;;  %v5418_v19 = vld [vmem:[#allocation18 + $0x130] sm:$0xff]  ;;  %v5435_v54 = vld [vmem:[#allocation18 + $0x1b8] sm:$0xff] }
 0xd6b   :  { %v5359_v41 = vadd.f32 %v5358_v9, %v5357_v31  ;;  %v10713_v9 = vpack.c.bf16 %v5419_v45, %v5415_v52  ;;  %v15282_v31 = vld [vmem:[#allocation83_spill] sm:$0xff]  ;;  %v10715_v42 = vpack.c.bf16 %v5418_v19, %v5414_v2  ;;  %v6114_v52 = vld [vmem:[#allocation24 + $0x20] sm:$0xff]  ;;  %v6112_v45 = vld [vmem:[#allocation24 + $0x10] sm:$0xff] }
 0xd6c   :  { %v15286_v2 = vld [vmem:[#allocation69_spill] sm:$0xff]  ;;  %v6123_v19 = vld [vmem:[#allocation24 + $0x68] sm:$0xff] }
 0xd6d   :  { %12076 = vtanh.f32 %v5359_v41  ;;  %v5425_v41 = vld [vmem:[#allocation18 + $0x168] sm:$0xff] }
 0xd6e   :  { %v10685_v6 = vpack.c.bf16 %v5425_v41, %v5421_v29  ;;  %v10731_v29 = vpack.c.bf16 %v6114_v52, %v6110_v30  ;;  %v6146_v30 = vld [vmem:[#allocation24 + $0x120] sm:$0xff]  ;;  %v6144_v52 = vld [vmem:[#allocation24 + $0x110] sm:$0xff] }
 0xd77   :  { %v12077_v24 = vpop.eup %12076 }
 0xd78   :  { %v14288_v63 = vmul.f32 %v12077_v24, %v12075_v49  ;;  %v5424_v49 = vld [vmem:[#allocation18 + $0x160] sm:$0xff]  ;;  %v10717_v24 = vpack.c.bf16 %v5427_v47, %v5423_v59 }
 0xd79   :  { %v10687_v4 = vpack.c.bf16 %v5424_v49, %v5420_v15  ;;  %v6118_v59 = vld [vmem:[#allocation24 + $0x40] sm:$0xff]  ;;  %v10733_v15 = vpack.c.bf16 %v6123_v19, %v6119_v28  ;;  %v15290_v28 = vld [vmem:[#allocation76_spill] sm:$0xff]  ;;  %v6155_v19 = vld [vmem:[#allocation24 + $0x168] sm:$0xff] }
 0xd7a   :  { %5573 = vmatmul.mubr.f32.vlgmr.msra.gmra.mrb[64].mxu0 %v14288_v63  ;;  %5686 = vmatmul.mubr.f32.vlgmr.msra.gmra.mrb[44].mxu1 %v14288_v63  ;;  %v6122_v47 = vld [vmem:[#allocation24 + $0x60] sm:$0xff] }
 0xd7b   :  { %10668 = vmatpush1.bf16.msra.mxu0 %v10667_v32  ;;  %10700 = vmatpush1.bf16.msra.mxu1 %v10699_v17  ;;  %v5429_v32 = vld [vmem:[#allocation18 + $0x188] sm:$0xff]  ;;  %v15283_v17 = vld [vmem:[#allocation77_spill] sm:$0xff] }
 0xd7c   :  { %5578 = vmatprep.mubr.f32.mxu0 %v15101_v56  ;;  %5691 = vmatprep.mubr.f32.mxu1 %v15101_v56  ;;  %v10689_v44 = vpack.c.bf16 %v5433_v23, %v5429_v32  ;;  %v6133_v32 = vld [vmem:[#allocation24 + $0xb8] sm:$0xff]  ;;  %v10735_v23 = vpack.c.bf16 %v6122_v47, %v6118_v59  ;;  %v6150_v59 = vld [vmem:[#allocation24 + $0x140] sm:$0xff] }
 0xd7d   :  { %10670 = vmatprep.subr.bf16.mxu0 %v10669_v7  ;;  %10702 = vmatprep.subr.bf16.mxu1 %v10701_v38  ;;  %v10719_v7 = vpack.c.bf16 %v5426_v43, %v5422_v55  ;;  %v5428_v38 = vld [vmem:[#allocation18 + $0x180] sm:$0xff]  ;;  %v6127_v55 = vld [vmem:[#allocation24 + $0x88] sm:$0xff] }
 0xd7e   :  { %5579 = vmatmul.mubr.f32.gmra.mrb[66].mxu0 %v14270_v35  ;;  %5692 = vmatmul.mubr.f32.gmra.mrb[46].mxu1 %v14270_v35  ;;  %v15287_v43 = vld [vmem:[#allocation87_spill] sm:$0xff]  ;;  %v6154_v47 = vld [vmem:[#allocation24 + $0x160] sm:$0xff] }
 0xd7f   :  { %10672 = vmatpush1.bf16.msra.mxu0 %v10671_v13  ;;  %10704 = vmatpush1.bf16.msra.mxu1 %v10703_v57  ;;  %v10721_v13 = vpack.c.bf16 %v5435_v54, %v5431_v3  ;;  %v5437_v57 = vld [vmem:[#allocation18 + $0x1c8] sm:$0xff]  ;;  %v6126_v54 = vld [vmem:[#allocation24 + $0x80] sm:$0xff] }
 0xd80   :  { %5584 = vmatprep.mubr.f32.mxu0 %v15101_v56  ;;  %5697 = vmatprep.mubr.f32.mxu1 %v15101_v56 }
 0xd81   :  { %10674 = vmatprep.subr.bf16.mxu0 %v10673_v20  ;;  %10706 = vmatprep.subr.bf16.mxu1 %v10705_v21  ;;  %v10691_v20 = vpack.c.bf16 %v5432_v48, %v5428_v38  ;;  %v10723_v21 = vpack.c.bf16 %v5434_v37, %v5430_v36  ;;  %v6132_v38 = vld [vmem:[#allocation24 + $0xb0] sm:$0xff]  ;;  %v6135_v37 = vld [vmem:[#allocation24 + $0xc8] sm:$0xff] }
 0xd82   :  { %5585 = vmatmul.mubr.f32.gmra.mrb[68].mxu0 %v14178_v16  ;;  %5698 = vmatmul.mubr.f32.gmra.mrb[48].mxu1 %v14178_v16 }
 0xd83   :  { %10676 = vmatpush1.bf16.msra.mxu0 %v10675_v60  ;;  %10708 = vmatpush1.bf16.msra.mxu1 %v10707_v34  ;;  %v10693_v60 = vpack.c.bf16 %v5441_v50, %v5437_v57  ;;  %v10725_v34 = vpack.c.bf16 %v5443_v1, %v5439_v40  ;;  %v6137_v57 = vld [vmem:[#allocation24 + $0xd8] sm:$0xff] }
 0xd84   :  { %5590 = vmatprep.mubr.f32.mxu0 %v15101_v56  ;;  %5703 = vmatprep.mubr.f32.mxu1 %v15101_v56  ;;  %v6141_v50 = vld [vmem:[#allocation24 + $0xf8] sm:$0xff] }
 0xd85   :  { %10678 = vmatprep.subr.bf16.mxu0 %v10677_v46  ;;  %10710 = vmatprep.subr.bf16.mxu1 %v10709_v8  ;;  %v6117_v46 = vld [vmem:[#allocation24 + $0x38] sm:$0xff]  ;;  %v10695_v8 = vpack.c.bf16 %v5440_v11, %v5436_v10  ;;  %v6136_v10 = vld [vmem:[#allocation24 + $0xd0] sm:$0xff]  ;;  %v10773_v33 = vpack.c.bf16 %v6141_v50, %v6137_v57  ;;  %v6171_v57 = vld [vmem:[#allocation24 + $0x1e8] sm:$0xff] }
 0xd86   :  { %5591 = vmatmul.mubr.f32.gmra.mrb[70].mxu0 %v15282_v31  ;;  %5704 = vmatmul.mubr.f32.gmra.mrb[50].mxu1 %v15282_v31  ;;  %v10761_v0 = vpack.c.bf16 %v6117_v46, %v6113_v5  ;;  %v6140_v11 = vld [vmem:[#allocation24 + $0xf0] sm:$0xff]  ;;  %v6149_v5 = vld [vmem:[#allocation24 + $0x138] sm:$0xff] }
 0xd87   :  { %10680 = vmatpush1.bf16.msra.mxu0 %v10679_v62  ;;  %10712 = vmatpush1.bf16.msra.mxu1 %v10711_v18  ;;  %v6116_v62 = vld [vmem:[#allocation24 + $0x30] sm:$0xff]  ;;  %v10729_v18 = vpack.c.bf16 %v6115_v58, %v6111_v53  ;;  %v6147_v53 = vld [vmem:[#allocation24 + $0x128] sm:$0xff]  ;;  %v6145_v58 = vld [vmem:[#allocation24 + $0x118] sm:$0xff] }
 0xd88   :  { %5596 = vmatprep.mubr.f32.mxu0 %v15101_v56  ;;  %5709 = vmatprep.mubr.f32.mxu1 %v15101_v56  ;;  %v10763_v41 = vpack.c.bf16 %v6116_v62, %v6112_v45  ;;  %v6148_v45 = vld [vmem:[#allocation24 + $0x130] sm:$0xff]  ;;  %v6169_v50 = vld [vmem:[#allocation24 + $0x1d8] sm:$0xff] }
 0xd89   :  { %10682 = vmatprep.subr.bf16.mxu0 %v10681_v22  ;;  %10714 = vmatprep.subr.bf16.mxu1 %v10713_v9  ;;  %v6121_v22 = vld [vmem:[#allocation24 + $0x58] sm:$0xff] }
 0xd8a   :  { %5597 = vmatmul.mubr.f32.gmra.mrb[72].mxu0 %v15283_v17  ;;  %5710 = vmatmul.mubr.f32.gmra.mrb[52].mxu1 %v15283_v17  ;;  %v6125_v9 = vld [vmem:[#allocation24 + $0x78] sm:$0xff] }
 0xd8b   :  { %10684 = vmatpush1.bf16.msra.mxu0 %v10683_v51  ;;  %10716 = vmatpush1.bf16.msra.mxu1 %v10715_v42  ;;  %v6120_v51 = vld [vmem:[#allocation24 + $0x50] sm:$0xff]  ;;  %v10765_v49 = vpack.c.bf16 %v6125_v9, %v6121_v22  ;;  %v6153_v22 = vld [vmem:[#allocation24 + $0x158] sm:$0xff] }
 0xd8c   :  { %5602 = vmatprep.mubr.f32.mxu0 %v15101_v56  ;;  %5715 = vmatprep.mubr.f32.mxu1 %v15101_v56  ;;  %v6124_v42 = vld [vmem:[#allocation24 + $0x70] sm:$0xff]  ;;  %v6157_v9 = vld [vmem:[#allocation24 + $0x178] sm:$0xff] }
 0xd8d   :  { %10686 = vmatprep.subr.bf16.mxu0 %v10685_v6  ;;  %10718 = vmatprep.subr.bf16.mxu1 %v10717_v24  ;;  %v6131_v6 = vld [vmem:[#allocation24 + $0xa8] sm:$0xff]  ;;  %v6129_v24 = vld [vmem:[#allocation24 + $0x98] sm:$0xff]  ;;  %v10767_v3 = vpack.c.bf16 %v6124_v42, %v6120_v51  ;;  %v6152_v51 = vld [vmem:[#allocation24 + $0x150] sm:$0xff] }
 0xd8e   :  { %5603 = vmatmul.mubr.f32.gmra.mrb[74].mxu0 %v15284_v27  ;;  %5716 = vmatmul.mubr.f32.gmra.mrb[54].mxu1 %v15284_v27  ;;  %v10737_v48 = vpack.c.bf16 %v6131_v6, %v6127_v55  ;;  %v10769_v36 = vpack.c.bf16 %v6133_v32, %v6129_v24  ;;  %v6156_v42 = vld [vmem:[#allocation24 + $0x170] sm:$0xff]  ;;  %v6159_v55 = vld [vmem:[#allocation24 + $0x188] sm:$0xff]  ;;  %v15291_v6 = vld [vmem:[#allocation78_spill] sm:$0xff] }
 0xd8f   :  { %10688 = vmatpush1.bf16.msra.mxu0 %v10687_v4  ;;  %10720 = vmatpush1.bf16.msra.mxu1 %v10719_v7  ;;  %v6130_v4 = vld [vmem:[#allocation24 + $0xa0] sm:$0xff]  ;;  %v6128_v7 = vld [vmem:[#allocation24 + $0x90] sm:$0xff]  ;;  %v6163_v24 = vld [vmem:[#allocation24 + $0x1a8] sm:$0xff] }
 0xd90   :  { %5608 = vmatprep.mubr.f32.mxu0 %v15101_v56  ;;  %5721 = vmatprep.mubr.f32.mxu1 %v15101_v56  ;;  %v10739_v40 = vpack.c.bf16 %v6130_v4, %v6126_v54  ;;  %v10771_v1 = vpack.c.bf16 %v6132_v38, %v6128_v7  ;;  %v6161_v32 = vld [vmem:[#allocation24 + $0x198] sm:$0xff]  ;;  %v10783_v54 = vpack.c.bf16 %v6156_v42, %v6152_v51  ;;  %v6158_v4 = vld [vmem:[#allocation24 + $0x180] sm:$0xff]  ;;  %v6160_v38 = vld [vmem:[#allocation24 + $0x190] sm:$0xff] }
 0xd91   :  { %10690 = vmatprep.subr.bf16.mxu0 %v10689_v44  ;;  %10722 = vmatprep.subr.bf16.mxu1 %v10721_v13  ;;  %v15288_v44 = vld [vmem:[#allocation70_spill] sm:$0xff]  ;;  %v6139_v13 = vld [vmem:[#allocation24 + $0xe8] sm:$0xff]  ;;  %v6056_v42 = vld [vmem:[#allocation22 + $0x50] sm:$0xff] }
 0xd92   :  { %5609 = vmatmul.mubr.f32.gmra.mrb[76].mxu0 %v15285_v25  ;;  %5722 = vmatmul.mubr.f32.gmra.mrb[56].mxu1 %v15285_v25  ;;  %v10741_v26 = vpack.c.bf16 %v6139_v13, %v6135_v37  ;;  %v6162_v7 = vld [vmem:[#allocation24 + $0x1a0] sm:$0xff]  ;;  %v6167_v13 = vld [vmem:[#allocation24 + $0x1c8] sm:$0xff] }
 0xd93   :  { %10692 = vmatpush1.bf16.msra.mxu0 %v10691_v20  ;;  %10724 = vmatpush1.bf16.msra.mxu1 %v10723_v21  ;;  %v6134_v20 = vld [vmem:[#allocation24 + $0xc0] sm:$0xff] }
 0xd94   :  { %5614 = vmatprep.mubr.f32.mxu0 %v15101_v56  ;;  %5727 = vmatprep.mubr.f32.mxu1 %v15101_v56  ;;  %v6138_v21 = vld [vmem:[#allocation24 + $0xe0] sm:$0xff] }
 0xd95   :  { %10694 = vmatprep.subr.bf16.mxu0 %v10693_v60  ;;  %10726 = vmatprep.subr.bf16.mxu1 %v10725_v34  ;;  %v6143_v60 = vld [vmem:[#allocation24 + $0x108] sm:$0xff]  ;;  %v15289_v34 = vld [vmem:[#allocation74_spill] sm:$0xff]  ;;  %v10743_v46 = vpack.c.bf16 %v6138_v21, %v6134_v20 }
 0xd96   :  { %5615 = vmatmul.mubr.f32.gmra.mrb[78].mxu0 %v15286_v2  ;;  %5728 = vmatmul.mubr.f32.gmra.mrb[58].mxu1 %v15286_v2  ;;  %v10745_v62 = vpack.c.bf16 %v6147_v53, %v6143_v60  ;;  %v6166_v21 = vld [vmem:[#allocation24 + $0x1c0] sm:$0xff]  ;;  %v6047_v53 = vld [vmem:[#allocation22 + $0x8] sm:$0xff] }
 0xd97   :  { %10696 = vmatpush1.bf16.msra.mxu0 %v10695_v8  ;;  %10728 = vmatpush1.bf16.msra.mxu1 %v10727_v61  ;;  %v10775_v8 = vpack.c.bf16 %v6140_v11, %v6136_v10  ;;  %v6142_v61 = vld [vmem:[#allocation24 + $0x100] sm:$0xff]  ;;  %v6168_v11 = vld [vmem:[#allocation24 + $0x1d0] sm:$0xff] }
 0xd98   :  { %5798 = vmatprep.mubr.f32.mxu0 %v15101_v56  ;;  %5911 = vmatprep.mubr.f32.mxu1 %v15101_v56  ;;  %v6170_v10 = vld [vmem:[#allocation24 + $0x1e0] sm:$0xff] }
 0xd99   :  { %10730 = vmatprep.subr.bf16.mxu0 %v10729_v18  ;;  %10762 = vmatprep.subr.bf16.mxu1 %v10761_v0  ;;  %v10777_v18 = vpack.c.bf16 %v6149_v5, %v6145_v58  ;;  %v6151_v0 = vld [vmem:[#allocation24 + $0x148] sm:$0xff]  ;;  %v6049_v5 = vld [vmem:[#allocation22 + $0x18] sm:$0xff]  ;;  %v6058_v51 = vld [vmem:[#allocation22 + $0x60] sm:$0xff] }
 0xd9a   :  { %5799 = vmatmul.mubr.f32.vlgmr.msra.gmra.mrb[64].mxu0 %v15287_v43  ;;  %5912 = vmatmul.mubr.f32.vlgmr.msra.gmra.mrb[44].mxu1 %v15287_v43  ;;  %v6051_v58 = vld [vmem:[#allocation22 + $0x28] sm:$0xff] }
 0xd9b   :  { %10732 = vmatpush1.bf16.msra.mxu0 %v10731_v29  ;;  %10764 = vmatpush1.bf16.msra.mxu1 %v10763_v41  ;;  %v10747_v29 = vpack.c.bf16 %v6146_v30, %v6142_v61  ;;  %v10779_v41 = vpack.c.bf16 %v6148_v45, %v6144_v52  ;;  %v6046_v30 = vld [vmem:[#allocation22] sm:$0xff]  ;;  %v6048_v45 = vld [vmem:[#allocation22 + $0x10] sm:$0xff] }
 0xd9c   :  { %5804 = vmatprep.mubr.f32.mxu0 %v15101_v56  ;;  %5917 = vmatprep.mubr.f32.mxu1 %v15101_v56  ;;  %v6050_v52 = vld [vmem:[#allocation22 + $0x20] sm:$0xff] }
 0xd9d   :  { %10734 = vmatprep.subr.bf16.mxu0 %v10733_v15  ;;  %10766 = vmatprep.subr.bf16.mxu1 %v10765_v49  ;;  %v10749_v15 = vpack.c.bf16 %v6155_v19, %v6151_v0  ;;  %v10781_v49 = vpack.c.bf16 %v6157_v9, %v6153_v22  ;;  %v6055_v19 = vld [vmem:[#allocation22 + $0x48] sm:$0xff]  ;;  %v6057_v9 = vld [vmem:[#allocation22 + $0x58] sm:$0xff] }
 0xd9e   :  { %5805 = vmatmul.mubr.f32.gmra.mrb[66].mxu0 %v15288_v44  ;;  %5918 = vmatmul.mubr.f32.gmra.mrb[46].mxu1 %v15288_v44  ;;  %v6059_v22 = vld [vmem:[#allocation22 + $0x68] sm:$0xff] }
 0xd9f   :  { %10736 = vmatpush1.bf16.msra.mxu0 %v10735_v23  ;;  %10768 = vmatpush1.bf16.msra.mxu1 %v10767_v3  ;;  %v6165_v23 = vld [vmem:[#allocation24 + $0x1b8] sm:$0xff]  ;;  %v10751_v3 = vpack.c.bf16 %v6154_v47, %v6150_v59  ;;  %v6054_v47 = vld [vmem:[#allocation22 + $0x40] sm:$0xff] }
 0xda0   :  { %5810 = vmatprep.mubr.f32.mxu0 %v15101_v56  ;;  %5923 = vmatprep.mubr.f32.mxu1 %v15101_v56  ;;  %v10785_v37 = vpack.c.bf16 %v6165_v23, %v6161_v32  ;;  %v6067_v32 = vld [vmem:[#allocation22 + $0xa8] sm:$0xff]  ;;  %v6065_v23 = vld [vmem:[#allocation22 + $0x98] sm:$0xff] }
 0xda1   :  { %10738 = vmatprep.subr.bf16.mxu0 %v10737_v48  ;;  %10770 = vmatprep.subr.bf16.mxu1 %v10769_v36  ;;  %v6164_v48 = vld [vmem:[#allocation24 + $0x1b0] sm:$0xff]  ;;  %v10753_v36 = vpack.c.bf16 %v6163_v24, %v6159_v55  ;;  %v6063_v24 = vld [vmem:[#allocation22 + $0x88] sm:$0xff] }
 0xda2   :  { %5811 = vmatmul.mubr.f32.gmra.mrb[68].mxu0 %v15289_v34  ;;  %5924 = vmatmul.mubr.f32.gmra.mrb[48].mxu1 %v15289_v34  ;;  %v10787_v20 = vpack.c.bf16 %v6164_v48, %v6160_v38  ;;  %v6066_v38 = vld [vmem:[#allocation22 + $0xa0] sm:$0xff]  ;;  %v6064_v48 = vld [vmem:[#allocation22 + $0x90] sm:$0xff] }
 0xda3   :  { %10740 = vmatpush1.bf16.msra.mxu0 %v10739_v40  ;;  %10772 = vmatpush1.bf16.msra.mxu1 %v10771_v1  ;;  %v6173_v40 = vld [vmem:[#allocation24 + $0x1f8] sm:$0xff]  ;;  %v10755_v1 = vpack.c.bf16 %v6162_v7, %v6158_v4  ;;  %v6062_v7 = vld [vmem:[#allocation22 + $0x80] sm:$0xff] }
 0xda4   :  { %5816 = vmatprep.mubr.f32.mxu0 %v15101_v56  ;;  %5929 = vmatprep.mubr.f32.mxu1 %v15101_v56  ;;  %v10789_v60 = vpack.c.bf16 %v6173_v40, %v6169_v50  ;;  %v6073_v50 = vld [vmem:[#allocation22 + $0xd8] sm:$0xff] }
 0xda5   :  { %10742 = vmatprep.subr.bf16.mxu0 %v10741_v26  ;;  %10774 = vmatprep.subr.bf16.mxu1 %v10773_v33  ;;  %v6172_v26 = vld [vmem:[#allocation24 + $0x1f0] sm:$0xff]  ;;  %v10757_v33 = vpack.c.bf16 %v6171_v57, %v6167_v13  ;;  %v6075_v57 = vld [vmem:[#allocation22 + $0xe8] sm:$0xff]  ;;  %v6077_v40 = vld [vmem:[#allocation22 + $0xf8] sm:$0xff] }
 0xda6   :  { %5817 = vmatmul.mubr.f32.gmra.mrb[70].mxu0 %v15290_v28  ;;  %5930 = vmatmul.mubr.f32.gmra.mrb[50].mxu1 %v15290_v28  ;;  %v10791_v61 = vpack.c.bf16 %v6172_v26, %v6168_v11  ;;  %v6072_v11 = vld [vmem:[#allocation22 + $0xd0] sm:$0xff] }
 0xda7   :  { %10744 = vmatpush1.bf16.msra.mxu0 %v10743_v46  ;;  %10776 = vmatpush1.bf16.msra.mxu1 %v10775_v8  ;;  %v6053_v46 = vld [vmem:[#allocation22 + $0x38] sm:$0xff]  ;;  %v10759_v8 = vpack.c.bf16 %v6170_v10, %v6166_v21  ;;  %v6070_v21 = vld [vmem:[#allocation22 + $0xc0] sm:$0xff]  ;;  %v6076_v26 = vld [vmem:[#allocation22 + $0xf0] sm:$0xff] }
 0xda8   :  { %5822 = vmatprep.mubr.f32.mxu0 %v15101_v56  ;;  %5935 = vmatprep.mubr.f32.mxu1 %v15101_v56  ;;  %v10825_v0 = vpack.c.bf16 %v6053_v46, %v6049_v5  ;;  %v6074_v10 = vld [vmem:[#allocation22 + $0xe0] sm:$0xff]  ;;  %v6085_v5 = vld [vmem:[#allocation22 + $0x138] sm:$0xff] }
 0xda9   :  { %10746 = vmatprep.subr.bf16.mxu0 %v10745_v62  ;;  %10778 = vmatprep.subr.bf16.mxu1 %v10777_v18  ;;  %v6052_v62 = vld [vmem:[#allocation22 + $0x30] sm:$0xff]  ;;  %v10793_v18 = vpack.c.bf16 %v6051_v58, %v6047_v53  ;;  %v6083_v53 = vld [vmem:[#allocation22 + $0x128] sm:$0xff]  ;;  %v6081_v58 = vld [vmem:[#allocation22 + $0x118] sm:$0xff]  ;;  %v10807_v46 = vpack.c.bf16 %v6074_v10, %v6070_v21 }
 0xdaa   :  { %5823 = vmatmul.mubr.f32.gmra.mrb[72].mxu0 %v15291_v6  ;;  %5936 = vmatmul.mubr.f32.gmra.mrb[52].mxu1 %v15291_v6  ;;  %v10827_v59 = vpack.c.bf16 %v6052_v62, %v6048_v45  ;;  %v6084_v45 = vld [vmem:[#allocation22 + $0x130] sm:$0xff] }
 0xdab   :  { %10748 = vmatpush1.bf16.msra.mxu0 %v10747_v29  ;;  %10780 = vmatpush1.bf16.msra.mxu1 %v10779_v41  ;;  %v6061_v29 = vld [vmem:[#allocation22 + $0x78] sm:$0xff]  ;;  %v10795_v41 = vpack.c.bf16 %v6050_v52, %v6046_v30  ;;  %v6082_v30 = vld [vmem:[#allocation22 + $0x120] sm:$0xff]  ;;  %v6080_v52 = vld [vmem:[#allocation22 + $0x110] sm:$0xff] }
 0xdac   :  { %5828 = vmatprep.mubr.f32.mxu0 %v15101_v56  ;;  %5941 = vmatprep.mubr.f32.mxu1 %v15101_v56  ;;  %v10829_v55 = vpack.c.bf16 %v6061_v29, %v6057_v9  ;;  %v10843_v29 = vpack.c.bf16 %v6084_v45, %v6080_v52  ;;  %v6723_v52 = vld [vmem:[#allocation21 + $0x58] sm:$0xff] }
 0xdad   :  { %10750 = vmatprep.subr.bf16.mxu0 %v10749_v15  ;;  %10782 = vmatprep.subr.bf16.mxu1 %v10781_v49  ;;  %v6060_v15 = vld [vmem:[#allocation22 + $0x70] sm:$0xff]  ;;  %v10797_v49 = vpack.c.bf16 %v6059_v22, %v6055_v19  ;;  %v6089_v19 = vld [vmem:[#allocation22 + $0x158] sm:$0xff] }
 0xdae   :  { %5829 = vmatmul.mubr.f32.gmra.mrb[74].mxu0 %v14137_v14  ;;  %5942 = vmatmul.mubr.f32.gmra.mrb[54].mxu1 %v14137_v14  ;;  %v10831_v4 = vpack.c.bf16 %v6060_v15, %v6056_v42  ;;  %v6093_v22 = vld [vmem:[#allocation22 + $0x178] sm:$0xff] }
 0xdaf   :  { %10752 = vmatpush1.bf16.msra.mxu0 %v10751_v3  ;;  %10784 = vmatpush1.bf16.msra.mxu1 %v10783_v54  ;;  %v6069_v3 = vld [vmem:[#allocation22 + $0xb8] sm:$0xff]  ;;  %v10799_v54 = vpack.c.bf16 %v6058_v51, %v6054_v47  ;;  %v6088_v47 = vld [vmem:[#allocation22 + $0x150] sm:$0xff]  ;;  %v10845_v15 = vpack.c.bf16 %v6093_v22, %v6089_v19 }
 0xdb0   :  { %5834 = vmatprep.mubr.f32.mxu0 %v15101_v56  ;;  %5947 = vmatprep.mubr.f32.mxu1 %v15101_v56  ;;  %v10833_v13 = vpack.c.bf16 %v6069_v3, %v6065_v23  ;;  %v6092_v51 = vld [vmem:[#allocation22 + $0x170] sm:$0xff]  ;;  %v6094_v3 = vld [vmem:[#allocation22 + $0x180] sm:$0xff]  ;;  %v6727_v45 = vld [vmem:[#allocation21 + $0x78] sm:$0xff] }
 0xdb1   :  { %10754 = vmatprep.subr.bf16.mxu0 %v10753_v36  ;;  %10786 = vmatprep.subr.bf16.mxu1 %v10785_v37  ;;  %v6068_v36 = vld [vmem:[#allocation22 + $0xb0] sm:$0xff]  ;;  %v10801_v37 = vpack.c.bf16 %v6067_v32, %v6063_v24  ;;  %v6101_v24 = vld [vmem:[#allocation22 + $0x1b8] sm:$0xff]  ;;  %v10847_v23 = vpack.c.bf16 %v6092_v51, %v6088_v47 }
 0xdb2   :  { %5835 = vmatmul.mubr.f32.gmra.mrb[76].mxu0 %v14229_v39  ;;  %5948 = vmatmul.mubr.f32.gmra.mrb[56].mxu1 %v14229_v39  ;;  %v6722_v19 = vld [vmem:[#allocation21 + $0x50] sm:$0xff]  ;;  %v6735_v47 = vld [vmem:[#allocation21 + $0xb8] sm:$0xff] }
 0xdb3   :  { %10756 = vmatpush1.bf16.msra.mxu0 %v10755_v1  ;;  %10788 = vmatpush1.bf16.msra.mxu1 %v10787_v20  ;;  %v10803_v1 = vpack.c.bf16 %v6066_v38, %v6062_v7  ;;  %v10835_v20 = vpack.c.bf16 %v6068_v36, %v6064_v48  ;;  %v6100_v7 = vld [vmem:[#allocation22 + $0x1b0] sm:$0xff]  ;;  %v6107_v36 = vld [vmem:[#allocation22 + $0x1e8] sm:$0xff] }
 0xdb4   :  { %5840 = vmatprep.mubr.f32.mxu0 %v15101_v56  ;;  %5953 = vmatprep.mubr.f32.mxu1 %v15101_v56  ;;  %v6726_v22 = vld [vmem:[#allocation21 + $0x70] sm:$0xff] }
 0xdb5   :  { %10758 = vmatprep.subr.bf16.mxu0 %v10757_v33  ;;  %10790 = vmatprep.subr.bf16.mxu1 %v10789_v60  ;;  %v10837_v60 = vpack.c.bf16 %v6077_v40, %v6073_v50  ;;  %v6102_v50 = vld [vmem:[#allocation22 + $0x1c0] sm:$0xff] }
 0xdb6   :  { %5841 = vmatmul.mubr.f32.gmra.mrb[78].mxu0 %v14285_v12  ;;  %5954 = vmatmul.mubr.f32.gmra.mrb[58].mxu1 %v14285_v12  ;;  %v6106_v40 = vld [vmem:[#allocation22 + $0x1e0] sm:$0xff] }
 0xdb7   :  { %10760 = vmatpush1.bf16.msra.mxu0 %v10759_v8  ;;  %10792 = vmatpush1.bf16.msra.mxu1 %v10791_v61  ;;  %v10839_v8 = vpack.c.bf16 %v6076_v26, %v6072_v11  ;;  %v6078_v61 = vld [vmem:[#allocation22 + $0x100] sm:$0xff]  ;;  %v6717_v11 = vld [vmem:[#allocation21 + $0x28] sm:$0xff]  ;;  %v6715_v26 = vld [vmem:[#allocation21 + $0x18] sm:$0xff] }
 0xdb8   :  { %6238 = vmatprep.mubr.f32.mxu0 %v15101_v56  ;;  %6351 = vmatprep.mubr.f32.mxu1 %v15101_v56  ;;  %v10811_v9 = vpack.c.bf16 %v6082_v30, %v6078_v61  ;;  %v6721_v61 = vld [vmem:[#allocation21 + $0x48] sm:$0xff] }
 0xdb9   :  { %10794 = vmatprep.subr.bf16.mxu0 %v10793_v18  ;;  %10826 = vmatprep.subr.bf16.mxu1 %v10825_v0  ;;  %v10841_v18 = vpack.c.bf16 %v6085_v5, %v6081_v58  ;;  %v6091_v0 = vld [vmem:[#allocation22 + $0x168] sm:$0xff]  ;;  %v6716_v58 = vld [vmem:[#allocation21 + $0x20] sm:$0xff]  ;;  %v6714_v5 = vld [vmem:[#allocation21 + $0x10] sm:$0xff] }
 0xdba   :  { %6239 = vmatmul.mubr.f32.vlgmr.msra.gmra.mrb[80].mxu0 %v14288_v63  ;;  %6352 = vmatmul.mubr.f32.vlgmr.msra.gmra.mrb[60].mxu1 %v14288_v63  ;;  %v6071_v63 = vld [vmem:[#allocation22 + $0xc8] sm:$0xff] }
 0xdbb   :  { %10796 = vmatpush1.bf16.msra.mxu0 %v10795_v41  ;;  %10828 = vmatpush1.bf16.msra.mxu1 %v10827_v59  ;;  %v10805_v33 = vpack.c.bf16 %v6075_v57, %v6071_v63  ;;  %v6086_v41 = vld [vmem:[#allocation22 + $0x140] sm:$0xff]  ;;  %v6725_v30 = vld [vmem:[#allocation21 + $0x68] sm:$0xff] }
 0xdbc   :  { %6244 = vmatprep.mubr.f32.mxu0 %v15101_v56  ;;  %6357 = vmatprep.mubr.f32.mxu1 %v15101_v56  ;;  %v6090_v59 = vld [vmem:[#allocation22 + $0x160] sm:$0xff] }
 0xdbd   :  { %10798 = vmatprep.subr.bf16.mxu0 %v10797_v49  ;;  %10830 = vmatprep.subr.bf16.mxu1 %v10829_v55  ;;  %v6099_v49 = vld [vmem:[#allocation22 + $0x1a8] sm:$0xff]  ;;  %v6097_v55 = vld [vmem:[#allocation22 + $0x198] sm:$0xff]  ;;  %v10815_v32 = vpack.c.bf16 %v6090_v59, %v6086_v41 }
 0xdbe   :  { %6245 = vmatmul.mubr.f32.gmra.mrb[82].mxu0 %v14270_v35  ;;  %6358 = vmatmul.mubr.f32.gmra.mrb[62].mxu1 %v14270_v35  ;;  %v6079_v35 = vld [vmem:[#allocation22 + $0x108] sm:$0xff]  ;;  %v10849_v48 = vpack.c.bf16 %v6101_v24, %v6097_v55  ;;  %v6731_v59 = vld [vmem:[#allocation21 + $0x98] sm:$0xff]  ;;  %v6734_v55 = vld [vmem:[#allocation21 + $0xb0] sm:$0xff] }
 0xdbf   :  { %10800 = vmatpush1.bf16.msra.mxu0 %v10799_v54  ;;  %10832 = vmatpush1.bf16.msra.mxu1 %v10831_v4  ;;  %v10809_v62 = vpack.c.bf16 %v6083_v53, %v6079_v35  ;;  %v6098_v54 = vld [vmem:[#allocation22 + $0x1a0] sm:$0xff]  ;;  %v6096_v4 = vld [vmem:[#allocation22 + $0x190] sm:$0xff]  ;;  %v6733_v41 = vld [vmem:[#allocation21 + $0xa8] sm:$0xff]  ;;  %v14414_v24 = vpack.c.bf16 %v6735_v47, %v6731_v59 }
 0xdc0   :  { %6250 = vmatprep.mubr.f32.mxu0 %v15101_v56  ;;  %6363 = vmatprep.mubr.f32.mxu1 %v15101_v56  ;;  %v10819_v63 = vpack.c.bf16 %v6098_v54, %v6094_v3  ;;  %v10851_v57 = vpack.c.bf16 %v6100_v7, %v6096_v4  ;;  %v6712_v53 = vld [vmem:[#allocation21] sm:$0xff]  ;;  %v6739_v3 = vld [vmem:[#allocation21 + $0xd8] sm:$0xff]  ;;  %v6762_v47 = vld [vmem:[#allocation21 + $0x190] sm:$0xff] }
 0xdc1   :  { %10802 = vmatprep.subr.bf16.mxu0 %v10801_v37  ;;  %10834 = vmatprep.subr.bf16.mxu1 %v10833_v13  ;;  %v6105_v37 = vld [vmem:[#allocation22 + $0x1d8] sm:$0xff]  ;;  %v6764_v59 = vld [vmem:[#allocation21 + $0x1a0] sm:$0xff] }
 0xdc2   :  { %6251 = vmatmul.mubr.f32.gmra.mrb[84].mxu0 %v14178_v16  ;;  %6364 = vmatmul.mubr.f32.gmra.mrb[64].mxu1 %v14178_v16  ;;  %v6087_v16 = vld [vmem:[#allocation22 + $0x148] sm:$0xff]  ;;  %v6109_v13 = vld [vmem:[#allocation22 + $0x1f8] sm:$0xff] }
 0xdc3   :  { %10804 = vmatpush1.bf16.msra.mxu0 %v10803_v1  ;;  %10836 = vmatpush1.bf16.msra.mxu1 %v10835_v20  ;;  %v10813_v42 = vpack.c.bf16 %v6091_v0, %v6087_v16  ;;  %v6104_v1 = vld [vmem:[#allocation22 + $0x1d0] sm:$0xff]  ;;  %v10853_v10 = vpack.c.bf16 %v6109_v13, %v6105_v37  ;;  %v6720_v16 = vld [vmem:[#allocation21 + $0x40] sm:$0xff]  ;;  %v6743_v54 = vld [vmem:[#allocation21 + $0xf8] sm:$0xff] }
 0xdc4   :  { %6256 = vmatprep.mubr.f32.mxu0 %v15101_v56  ;;  %6369 = vmatprep.mubr.f32.mxu1 %v15101_v56  ;;  %v6108_v20 = vld [vmem:[#allocation22 + $0x1f0] sm:$0xff]  ;;  %v6724_v0 = vld [vmem:[#allocation21 + $0x60] sm:$0xff]  ;;  %v14430_v37 = vpack.c.bf16 %v6743_v54, %v6739_v3  ;;  %v6745_v13 = vld [vmem:[#allocation21 + $0x108] sm:$0xff] }
 0xdc5   :  { %10806 = vmatprep.subr.bf16.mxu0 %v10805_v33  ;;  %10838 = vmatprep.subr.bf16.mxu1 %v10837_v60  ;;  %v6719_v33 = vld [vmem:[#allocation21 + $0x38] sm:$0xff]  ;;  %v10823_v60 = vpack.c.bf16 %v6106_v40, %v6102_v50  ;;  %v10855_v35 = vpack.c.bf16 %v6108_v20, %v6104_v1  ;;  %v14404_v51 = vpack.c.bf16 %v6724_v0, %v6720_v16  ;;  %v6744_v20 = vld [vmem:[#allocation21 + $0x100] sm:$0xff]  ;;  %v6765_v16 = vld [vmem:[#allocation21 + $0x1a8] sm:$0xff] }
 0xdc6   :  { %6257 = vmatmul.mubr.f32.gmra.mrb[86].mxu0 %v15282_v31  ;;  %6370 = vmatmul.mubr.f32.gmra.mrb[66].mxu1 %v15282_v31  ;;  %v6095_v31 = vld [vmem:[#allocation22 + $0x188] sm:$0xff]  ;;  %v6751_v50 = vld [vmem:[#allocation21 + $0x138] sm:$0xff] }
 0xdc7   :  { %10808 = vmatpush1.bf16.msra.mxu0 %v10807_v46  ;;  %10840 = vmatpush1.bf16.msra.mxu1 %v10839_v8  ;;  %v10817_v38 = vpack.c.bf16 %v6099_v49, %v6095_v31  ;;  %v6718_v46 = vld [vmem:[#allocation21 + $0x30] sm:$0xff]  ;;  %v6732_v31 = vld [vmem:[#allocation21 + $0xa0] sm:$0xff]  ;;  %v6763_v0 = vld [vmem:[#allocation21 + $0x198] sm:$0xff] }
 0xdc8   :  { %6262 = vmatprep.mubr.f32.mxu0 %v15101_v56  ;;  %6375 = vmatprep.mubr.f32.mxu1 %v15101_v56  ;;  %v6730_v49 = vld [vmem:[#allocation21 + $0x90] sm:$0xff] }
 0xdc9   :  { %10810 = vmatprep.subr.bf16.mxu0 %v10809_v62  ;;  %10842 = vmatprep.subr.bf16.mxu1 %v10841_v18  ;;  %v14388_v62 = vpack.c.bf16 %v6716_v58, %v6712_v53  ;;  %v14390_v18 = vpack.c.bf16 %v6718_v46, %v6714_v5  ;;  %v14422_v7 = vpack.c.bf16 %v6734_v55, %v6730_v49  ;;  %v6752_v5 = vld [vmem:[#allocation21 + $0x140] sm:$0xff]  ;;  %v6769_v49 = vld [vmem:[#allocation21 + $0x1c8] sm:$0xff] }
 0xdca   :  { %6263 = vmatmul.mubr.f32.gmra.mrb[88].mxu0 %v15283_v17  ;;  %6376 = vmatmul.mubr.f32.gmra.mrb[68].mxu1 %v15283_v17  ;;  %v6103_v17 = vld [vmem:[#allocation22 + $0x1c8] sm:$0xff]  ;;  %v6756_v46 = vld [vmem:[#allocation21 + $0x160] sm:$0xff] }
 0xdcb   :  { %10812 = vmatpush1.bf16.msra.mxu0 %v10811_v9  ;;  %10844 = vmatpush1.bf16.msra.mxu1 %v10843_v29  ;;  %v10821_v21 = vpack.c.bf16 %v6107_v36, %v6103_v17  ;;  %v14398_v9 = vpack.c.bf16 %v6727_v45, %v6723_v52  ;;  %v6729_v29 = vld [vmem:[#allocation21 + $0x88] sm:$0xff]  ;;  %v6738_v17 = vld [vmem:[#allocation21 + $0xd0] sm:$0xff] }
 0xdcc   :  { %6268 = vmatprep.mubr.f32.mxu0 %v15101_v56  ;;  %6381 = vmatprep.mubr.f32.mxu1 %v15101_v56  ;;  %v6742_v36 = vld [vmem:[#allocation21 + $0xf0] sm:$0xff]  ;;  %v6761_v45 = vld [vmem:[#allocation21 + $0x188] sm:$0xff] }
 0xdcd   :  { %10814 = vmatprep.subr.bf16.mxu0 %v10813_v42  ;;  %10846 = vmatprep.subr.bf16.mxu1 %v10845_v15  ;;  %v14406_v42 = vpack.c.bf16 %v6726_v22, %v6722_v19  ;;  %v6728_v15 = vld [vmem:[#allocation21 + $0x80] sm:$0xff]  ;;  %v14438_v1 = vpack.c.bf16 %v6742_v36, %v6738_v17  ;;  %v6767_v19 = vld [vmem:[#allocation21 + $0x1b8] sm:$0xff]  ;;  %v14468_v22 = vpack.c.bf16 %v6756_v46, %v6752_v5  ;;  %v6773_v55 = vld [vmem:[#allocation21 + $0x1e8] sm:$0xff] }
 0xdce   :  { %6269 = vmatmul.mubr.f32.gmra.mrb[90].mxu0 %v15284_v27  ;;  %6382 = vmatmul.mubr.f32.gmra.mrb[70].mxu1 %v15284_v27  ;;  %v6713_v27 = vld [vmem:[#allocation21 + $0x8] sm:$0xff]  ;;  %v14420_v4 = vpack.c.bf16 %v6732_v31, %v6728_v15  ;;  %v6766_v15 = vld [vmem:[#allocation21 + $0x1b0] sm:$0xff]  ;;  %v14478_v31 = vpack.c.bf16 %v6767_v19, %v6763_v0  ;;  %v6784_v0 = vld [vmem:[#allocation25 + $0x40] sm:$0xff] }
 0xdcf   :  { %10816 = vmatpush1.bf16.msra.mxu0 %v10815_v32  ;;  %10848 = vmatpush1.bf16.msra.mxu1 %v10847_v23  ;;  %v14382_v8 = vpack.c.bf16 %v6717_v11, %v6713_v27  ;;  %v6737_v32 = vld [vmem:[#allocation21 + $0xc8] sm:$0xff]  ;;  %v6750_v27 = vld [vmem:[#allocation21 + $0x130] sm:$0xff]  ;;  %v14486_v54 = vpack.c.bf16 %v6766_v15, %v6762_v47  ;;  %v6788_v19 = vld [vmem:[#allocation25 + $0x60] sm:$0xff] }
 0xdd0   :  { %6274 = vmatprep.mubr.f32.mxu0 %v15101_v56  ;;  %6387 = vmatprep.mubr.f32.mxu1 %v15101_v56  ;;  %v6741_v23 = vld [vmem:[#allocation21 + $0xe8] sm:$0xff]  ;;  %v6770_v17 = vld [vmem:[#allocation21 + $0x1d0] sm:$0xff] }
 0xdd1   :  { %10818 = vmatprep.subr.bf16.mxu0 %v10817_v38  ;;  %10850 = vmatprep.subr.bf16.mxu1 %v10849_v48  ;;  %v6736_v38 = vld [vmem:[#allocation21 + $0xc0] sm:$0xff]  ;;  %v6774_v36 = vld [vmem:[#allocation21 + $0x1f0] sm:$0xff]  ;;  %v6789_v46 = vld [vmem:[#allocation25 + $0x68] sm:$0xff] }
 0xdd2   :  { %6275 = vmatmul.mubr.f32.gmra.mrb[92].mxu0 %v15285_v25  ;;  %6388 = vmatmul.mubr.f32.gmra.mrb[72].mxu1 %v15285_v25  ;;  %v14384_v25 = vpack.c.bf16 %v6719_v33, %v6715_v26  ;;  %v6740_v48 = vld [vmem:[#allocation21 + $0xe0] sm:$0xff]  ;;  %v6753_v26 = vld [vmem:[#allocation21 + $0x148] sm:$0xff]  ;;  %v6786_v47 = vld [vmem:[#allocation25 + $0x50] sm:$0xff] }
 0xdd3   :  { %10820 = vmatpush1.bf16.msra.mxu0 %v10819_v63  ;;  %10852 = vmatpush1.bf16.msra.mxu1 %v10851_v57  ;;  %v6749_v63 = vld [vmem:[#allocation21 + $0x128] sm:$0xff]  ;;  %v6747_v57 = vld [vmem:[#allocation21 + $0x118] sm:$0xff]  ;;  %v14436_v40 = vpack.c.bf16 %v6740_v48, %v6736_v38  ;;  %v6768_v38 = vld [vmem:[#allocation21 + $0x1c0] sm:$0xff] }
 0xdd4   :  { %6280 = vmatprep.mubr.f32.mxu0 %v15101_v56  ;;  %6393 = vmatprep.mubr.f32.mxu1 %v15101_v56  ;;  %v14446_v11 = vpack.c.bf16 %v6751_v50, %v6747_v57  ;;  %v6757_v33 = vld [vmem:[#allocation21 + $0x168] sm:$0xff]  ;;  %v6772_v48 = vld [vmem:[#allocation21 + $0x1e0] sm:$0xff]  ;;  %v6779_v50 = vld [vmem:[#allocation25 + $0x18] sm:$0xff] }
 0xdd5   :  { %10822 = vmatprep.subr.bf16.mxu0 %v10821_v21  ;;  %10854 = vmatprep.subr.bf16.mxu1 %v10853_v10  ;;  %v6748_v21 = vld [vmem:[#allocation21 + $0x120] sm:$0xff]  ;;  %v6746_v10 = vld [vmem:[#allocation21 + $0x110] sm:$0xff]  ;;  %v6781_v57 = vld [vmem:[#allocation25 + $0x28] sm:$0xff] }
 0xdd6   :  { %6281 = vmatmul.mubr.f32.gmra.mrb[94].mxu0 %v15286_v2  ;;  %6394 = vmatmul.mubr.f32.gmra.mrb[74].mxu1 %v15286_v2  ;;  %v14396_v2 = vpack.c.bf16 %v6725_v30, %v6721_v61  ;;  %v14452_v53 = vpack.c.bf16 %v6748_v21, %v6744_v20  ;;  %v14454_v58 = vpack.c.bf16 %v6750_v27, %v6746_v10  ;;  %v6754_v61 = vld [vmem:[#allocation21 + $0x150] sm:$0xff]  ;;  %v6783_v20 = vld [vmem:[#allocation25 + $0x38] sm:$0xff]  ;;  %v6776_v27 = vld [vmem:[#allocation25] sm:$0xff] }
 0xdd7   :  { %10824 = vmatpush1.bf16.msra.mxu0 %v10823_v60  ;;  %10856 = vmatpush1.bf16.msra.mxu1 %v10855_v35  ;;  %v6755_v60 = vld [vmem:[#allocation21 + $0x158] sm:$0xff]  ;;  %v6758_v30 = vld [vmem:[#allocation21 + $0x170] sm:$0xff]  ;;  %v14500_v21 = vpack.c.bf16 %v6772_v48, %v6768_v38  ;;  %v14502_v10 = vpack.c.bf16 %v6774_v36, %v6770_v17  ;;  %v10953_v5 = vpack.c.bf16 %v6783_v20, %v6779_v50  ;;  %v6792_v48 = vld [vmem:[#allocation25 + $0x80] sm:$0xff] }
 0xdd8   :  { %6464 = vmatprep.mubr.f32.mxu0 %v15101_v56  ;;  %6577 = vmatprep.mubr.f32.mxu1 %v15101_v56  ;;  %v6759_v35 = vld [vmem:[#allocation21 + $0x178] sm:$0xff]  ;;  %v6790_v15 = vld [vmem:[#allocation25 + $0x70] sm:$0xff]  ;;  %v6796_v17 = vld [vmem:[#allocation25 + $0xa0] sm:$0xff] }
 0xdd9   :  { %10858 = vmatprep.subr.bf16.mxu0 %v14382_v8  ;;  %10890 = vmatprep.subr.bf16.mxu1 %v14384_v25  ;;  %v14462_v52 = vpack.c.bf16 %v6759_v35, %v6755_v60  ;;  %v6782_v60 = vld [vmem:[#allocation25 + $0x30] sm:$0xff]  ;;  %v10959_v38 = vpack.c.bf16 %v6790_v15, %v6786_v47  ;;  %v6801_v20 = vld [vmem:[#allocation25 + $0xc8] sm:$0xff]  ;;  %v6808_v15 = vld [vmem:[#allocation25 + $0x100] sm:$0xff] }
 0xdda   :  { %6465 = vmatmul.mubr.f32.vlgmr.msra.gmra.mrb[96].mxu0 %v15287_v43  ;;  %6578 = vmatmul.mubr.f32.vlgmr.msra.gmra.mrb[76].mxu1 %v15287_v43  ;;  %v14412_v43 = vpack.c.bf16 %v6733_v41, %v6729_v29  ;;  %v14470_v29 = vpack.c.bf16 %v6758_v30, %v6754_v61  ;;  %v6760_v41 = vld [vmem:[#allocation21 + $0x180] sm:$0xff]  ;;  %v6787_v61 = vld [vmem:[#allocation25 + $0x58] sm:$0xff]  ;;  %v6798_v50 = vld [vmem:[#allocation25 + $0xb0] sm:$0xff] }
 0xddb   :  { %10860 = vmatpush1.bf16.msra.mxu0 %v14388_v62  ;;  %10892 = vmatpush1.bf16.msra.mxu1 %v14390_v18  ;;  %v14484_v3 = vpack.c.bf16 %v6764_v59, %v6760_v41  ;;  %v6791_v30 = vld [vmem:[#allocation25 + $0x78] sm:$0xff] }
 0xddc   :  { %6470 = vmatprep.mubr.f32.mxu0 %v15101_v56  ;;  %6583 = vmatprep.mubr.f32.mxu1 %v15101_v56  ;;  %v10957_v59 = vpack.c.bf16 %v6791_v30, %v6787_v61  ;;  %v6802_v30 = vld [vmem:[#allocation25 + $0xd0] sm:$0xff] }
 0xddd   :  { %10862 = vmatprep.subr.bf16.mxu0 %v14396_v2  ;;  %10894 = vmatprep.subr.bf16.mxu1 %v14398_v9 }
 0xdde   :  { %6471 = vmatmul.mubr.f32.gmra.mrb[98].mxu0 %v15288_v44  ;;  %6584 = vmatmul.mubr.f32.gmra.mrb[78].mxu1 %v15288_v44  ;;  %v14428_v44 = vpack.c.bf16 %v6741_v23, %v6737_v32  ;;  %v6771_v32 = vld [vmem:[#allocation21 + $0x1d8] sm:$0xff] }
 0xddf   :  { %10864 = vmatpush1.bf16.msra.mxu0 %v14404_v51  ;;  %10896 = vmatpush1.bf16.msra.mxu1 %v14406_v42  ;;  %v6775_v23 = vld [vmem:[#allocation21 + $0x1f8] sm:$0xff] }
 0xde0   :  { %6476 = vmatprep.mubr.f32.mxu0 %v15101_v56  ;;  %6589 = vmatprep.mubr.f32.mxu1 %v15101_v56 }
 0xde1   :  { %10866 = vmatprep.subr.bf16.mxu0 %v14412_v43  ;;  %10898 = vmatprep.subr.bf16.mxu1 %v14414_v24 }
 0xde2   :  { %6477 = vmatmul.mubr.f32.gmra.mrb[100].mxu0 %v15289_v34  ;;  %6590 = vmatmul.mubr.f32.gmra.mrb[80].mxu1 %v15289_v34  ;;  %v14444_v34 = vpack.c.bf16 %v6749_v63, %v6745_v13  ;;  %v14494_v13 = vpack.c.bf16 %v6775_v23, %v6771_v32  ;;  %v6777_v63 = vld [vmem:[#allocation25 + $0x8] sm:$0xff]  ;;  %v6799_v32 = vld [vmem:[#allocation25 + $0xb8] sm:$0xff]  ;;  %v10927_v23 = vpack.c.bf16 %v6788_v19, %v6784_v0 }
 0xde3   :  { %10868 = vmatpush1.bf16.msra.mxu0 %v14420_v4  ;;  %10900 = vmatpush1.bf16.msra.mxu1 %v14422_v7  ;;  %v10921_v35 = vpack.c.bf16 %v6781_v57, %v6777_v63  ;;  %v6794_v57 = vld [vmem:[#allocation25 + $0x90] sm:$0xff]  ;;  %v6813_v0 = vld [vmem:[#allocation25 + $0x128] sm:$0xff]  ;;  %v6811_v19 = vld [vmem:[#allocation25 + $0x118] sm:$0xff] }
 0xde4   :  { %6482 = vmatprep.mubr.f32.mxu0 %v15101_v56  ;;  %6595 = vmatprep.mubr.f32.mxu1 %v15101_v56 }
 0xde5   :  { %10870 = vmatprep.subr.bf16.mxu0 %v14428_v44  ;;  %10902 = vmatprep.subr.bf16.mxu1 %v14430_v37 }
 0xde6   :  { %6483 = vmatmul.mubr.f32.gmra.mrb[102].mxu0 %v15290_v28  ;;  %6596 = vmatmul.mubr.f32.gmra.mrb[82].mxu1 %v15290_v28  ;;  %v14460_v28 = vpack.c.bf16 %v6757_v33, %v6753_v26  ;;  %v6780_v26 = vld [vmem:[#allocation25 + $0x20] sm:$0xff]  ;;  %v6778_v33 = vld [vmem:[#allocation25 + $0x10] sm:$0xff] }
 0xde7   :  { %10872 = vmatpush1.bf16.msra.mxu0 %v14436_v40  ;;  %10904 = vmatpush1.bf16.msra.mxu1 %v14438_v1 }
 0xde8   :  { %6488 = vmatprep.mubr.f32.mxu0 %v15101_v56  ;;  %6601 = vmatprep.mubr.f32.mxu1 %v15101_v56 }
 0xde9   :  { %10874 = vmatprep.subr.bf16.mxu0 %v14444_v34  ;;  %10906 = vmatprep.subr.bf16.mxu1 %v14446_v11 }
 0xdea   :  { %6489 = vmatmul.mubr.f32.gmra.mrb[104].mxu0 %v15291_v6  ;;  %6602 = vmatmul.mubr.f32.gmra.mrb[84].mxu1 %v15291_v6  ;;  %v14476_v6 = vpack.c.bf16 %v6765_v16, %v6761_v45  ;;  %v10923_v45 = vpack.c.bf16 %v6780_v26, %v6776_v27  ;;  %v10955_v16 = vpack.c.bf16 %v6782_v60, %v6778_v33  ;;  %v6805_v27 = vld [vmem:[#allocation25 + $0xe8] sm:$0xff]  ;;  %v6803_v26 = vld [vmem:[#allocation25 + $0xd8] sm:$0xff] }
 0xdeb   :  { %10876 = vmatpush1.bf16.msra.mxu0 %v14452_v53  ;;  %10908 = vmatpush1.bf16.msra.mxu1 %v14454_v58  ;;  %v6807_v33 = vld [vmem:[#allocation25 + $0xf8] sm:$0xff]  ;;  %v10931_v60 = vpack.c.bf16 %v6796_v17, %v6792_v48  ;;  %v6821_v48 = vld [vmem:[#allocation25 + $0x168] sm:$0xff] }
 0xdec   :  { %6494 = vmatprep.mubr.f32.mxu0 %v15101_v56  ;;  %6607 = vmatprep.mubr.f32.mxu1 %v15101_v56  ;;  %v10965_v61 = vpack.c.bf16 %v6807_v33, %v6803_v26  ;;  %v6819_v17 = vld [vmem:[#allocation25 + $0x158] sm:$0xff]  ;;  %v6818_v33 = vld [vmem:[#allocation25 + $0x150] sm:$0xff] }
 0xded   :  { %10878 = vmatprep.subr.bf16.mxu0 %v14460_v28  ;;  %10910 = vmatprep.subr.bf16.mxu1 %v14462_v52 }
 0xdee   :  { %6495 = vmatmul.mubr.f32.gmra.mrb[106].mxu0 %v14137_v14  ;;  %6608 = vmatmul.mubr.f32.gmra.mrb[86].mxu1 %v14137_v14  ;;  %v14492_v14 = vpack.c.bf16 %v6773_v55, %v6769_v49  ;;  %v6793_v49 = vld [vmem:[#allocation25 + $0x88] sm:$0xff]  ;;  %v6795_v55 = vld [vmem:[#allocation25 + $0x98] sm:$0xff] }
 0xdef   :  { %10880 = vmatpush1.bf16.msra.mxu0 %v14468_v22  ;;  %10912 = vmatpush1.bf16.msra.mxu1 %v14470_v29  ;;  %v10961_v63 = vpack.c.bf16 %v6799_v32, %v6795_v55  ;;  %v6810_v32 = vld [vmem:[#allocation25 + $0x110] sm:$0xff] }
 0xdf0   :  { %6500 = vmatprep.mubr.f32.mxu0 %v15101_v56  ;;  %6613 = vmatprep.mubr.f32.mxu1 %v15101_v56 }
 0xdf1   :  { %10882 = vmatprep.subr.bf16.mxu0 %v14476_v6  ;;  %10914 = vmatprep.subr.bf16.mxu1 %v14478_v31 }
 0xdf2   :  { %6501 = vmatmul.mubr.f32.gmra.mrb[108].mxu0 %v14229_v39  ;;  %6614 = vmatmul.mubr.f32.gmra.mrb[88].mxu1 %v14229_v39  ;;  %v6785_v39 = vld [vmem:[#allocation25 + $0x48] sm:$0xff] }
 0xdf3   :  { %10884 = vmatpush1.bf16.msra.mxu0 %v14484_v3  ;;  %10916 = vmatpush1.bf16.msra.mxu1 %v14486_v54  ;;  %v10925_v41 = vpack.c.bf16 %v6789_v46, %v6785_v39  ;;  %v10963_v39 = vpack.c.bf16 %v6798_v50, %v6794_v57  ;;  %v10933_v46 = vpack.c.bf16 %v6805_v27, %v6801_v20  ;;  %v6816_v50 = vld [vmem:[#allocation25 + $0x140] sm:$0xff] }
 0xdf4   :  { %6506 = vmatprep.mubr.f32.mxu0 %v15101_v56  ;;  %6619 = vmatprep.mubr.f32.mxu1 %v15101_v56  ;;  %v6820_v20 = vld [vmem:[#allocation25 + $0x160] sm:$0xff] }
 0xdf5   :  { %10886 = vmatprep.subr.bf16.mxu0 %v14492_v14  ;;  %10918 = vmatprep.subr.bf16.mxu1 %v14494_v13 }
 0xdf6   :  { %6507 = vmatmul.mubr.f32.gmra.mrb[94].mxu0 %v14285_v12  ;;  %6620 = vmatmul.mubr.f32.gmra.mrb[74].mxu1 %v14285_v12  ;;  %v6797_v12 = vld [vmem:[#allocation25 + $0xa8] sm:$0xff] }
 0xdf7   :  { %10888 = vmatpush1.bf16.msra.mxu0 %v14500_v21  ;;  %10920 = vmatpush1.bf16.msra.mxu1 %v14502_v10  ;;  %v10929_v36 = vpack.c.bf16 %v6797_v12, %v6793_v49  ;;  %v6812_v49 = vld [vmem:[#allocation25 + $0x120] sm:$0xff] }
 0xdf8   :  { %6908 = vmatprep.mubr.f32.mxu0 %v15101_v56  ;;  %6979 = vmatprep.mubr.f32.mxu1 %v15101_v56 }
 0xdf9   :  { %10922 = vmatprep.subr.bf16.mxu0 %v10921_v35  ;;  %10954 = vmatprep.subr.bf16.mxu1 %v10953_v5  ;;  %v6800_v35 = vld [vmem:[#allocation25 + $0xc0] sm:$0xff] }
 0xdfa   :  { %6909 = vmatmul.mubr.f32.vlgmr.msra.gmra.mrb[64].mxu0 %v15101_v56  ;;  %6980 = vmatmul.mubr.f32.vlgmr.msra.gmra.mrb[44].mxu1 %v15101_v56  ;;  %v6804_v5 = vld [vmem:[#allocation25 + $0xe0] sm:$0xff] }
 0xdfb   :  { %10924 = vmatpush1.bf16.msra.mxu0 %v10923_v45  ;;  %10956 = vmatpush1.bf16.msra.mxu1 %v10955_v16  ;;  %v6806_v45 = vld [vmem:[#allocation25 + $0xf0] sm:$0xff]  ;;  %v6809_v16 = vld [vmem:[#allocation25 + $0x108] sm:$0xff] }
 0xdfc   :  { %10926 = vmatprep.subr.bf16.mxu0 %v10925_v41  ;;  %10958 = vmatprep.subr.bf16.mxu1 %v10957_v59  ;;  %v6815_v41 = vld [vmem:[#allocation25 + $0x138] sm:$0xff]  ;;  %v10935_v59 = vpack.c.bf16 %v6804_v5, %v6800_v35  ;;  %v10967_v47 = vpack.c.bf16 %v6806_v45, %v6802_v30  ;;  %v10937_v12 = vpack.c.bf16 %v6813_v0, %v6809_v16  ;;  %v6829_v35 = vld [vmem:[#allocation25 + $0x1a8] sm:$0xff]  ;;  %v6824_v45 = vld [vmem:[#allocation25 + $0x180] sm:$0xff] }
 0xdfd   :  { %7058 = vmatprep.mubr.f32.mxu0 %v15101_v56  ;;  %7129 = vmatprep.mubr.f32.mxu1 %v15101_v56  ;;  %v10969_v55 = vpack.c.bf16 %v6815_v41, %v6811_v19  ;;  %v6827_v5 = vld [vmem:[#allocation25 + $0x198] sm:$0xff]  ;;  %v6828_v16 = vld [vmem:[#allocation25 + $0x1a0] sm:$0xff]  ;;  %v6826_v41 = vld [vmem:[#allocation25 + $0x190] sm:$0xff] }
 0xdff   :  { %10928 = vmatpush1.bf16.msra.mxu0 %v10927_v23  ;;  %10960 = vmatpush1.bf16.msra.mxu1 %v10959_v38  ;;  %v6814_v23 = vld [vmem:[#allocation25 + $0x130] sm:$0xff]  ;;  %v6817_v38 = vld [vmem:[#allocation25 + $0x148] sm:$0xff] }
 0xe00   :  { %10930 = vmatprep.subr.bf16.mxu0 %v10929_v36  ;;  %10962 = vmatprep.subr.bf16.mxu1 %v10961_v63  ;;  %v6823_v36 = vld [vmem:[#allocation25 + $0x178] sm:$0xff]  ;;  %v10939_v63 = vpack.c.bf16 %v6812_v49, %v6808_v15  ;;  %v10971_v57 = vpack.c.bf16 %v6814_v23, %v6810_v32  ;;  %v10941_v27 = vpack.c.bf16 %v6821_v48, %v6817_v38  ;;  %v6837_v15 = vld [vmem:[#allocation25 + $0x1e8] sm:$0xff]  ;;  %v6832_v23 = vld [vmem:[#allocation25 + $0x1c0] sm:$0xff] }
 0xe01   :  { %v10973_v26 = vpack.c.bf16 %v6823_v36, %v6819_v17  ;;  %v6835_v49 = vld [vmem:[#allocation25 + $0x1d8] sm:$0xff]  ;;  %v6836_v17 = vld [vmem:[#allocation25 + $0x1e0] sm:$0xff]  ;;  %v6834_v36 = vld [vmem:[#allocation25 + $0x1d0] sm:$0xff] }
 0xe03   :  { %10932 = vmatpush1.bf16.msra.mxu0 %v10931_v60  ;;  %10964 = vmatpush1.bf16.msra.mxu1 %v10963_v39  ;;  %v6822_v60 = vld [vmem:[#allocation25 + $0x170] sm:$0xff]  ;;  %v6825_v39 = vld [vmem:[#allocation25 + $0x188] sm:$0xff] }
 0xe04   :  { %10934 = vmatprep.subr.bf16.mxu0 %v10933_v46  ;;  %10966 = vmatprep.subr.bf16.mxu1 %v10965_v61  ;;  %v6831_v46 = vld [vmem:[#allocation25 + $0x1b8] sm:$0xff]  ;;  %v10943_v61 = vpack.c.bf16 %v6820_v20, %v6816_v50  ;;  %v10975_v30 = vpack.c.bf16 %v6822_v60, %v6818_v33  ;;  %v10945_v0 = vpack.c.bf16 %v6829_v35, %v6825_v39 }
 0xe05   :  { %v10977_v19 = vpack.c.bf16 %v6831_v46, %v6827_v5 }
 0xe07   :  { %10936 = vmatpush1.bf16.msra.mxu0 %v10935_v59  ;;  %10968 = vmatpush1.bf16.msra.mxu1 %v10967_v47  ;;  %v6830_v59 = vld [vmem:[#allocation25 + $0x1b0] sm:$0xff]  ;;  %v6833_v47 = vld [vmem:[#allocation25 + $0x1c8] sm:$0xff] }
 0xe08   :  { %10938 = vmatprep.subr.bf16.mxu0 %v10937_v12  ;;  %10970 = vmatprep.subr.bf16.mxu1 %v10969_v55  ;;  %v6839_v12 = vld [vmem:[#allocation25 + $0x1f8] sm:$0xff]  ;;  %v10947_v55 = vpack.c.bf16 %v6828_v16, %v6824_v45  ;;  %v10979_v32 = vpack.c.bf16 %v6830_v59, %v6826_v41  ;;  %v10949_v38 = vpack.c.bf16 %v6837_v15, %v6833_v47 }
 0xe09   :  { %v10981_v48 = vpack.c.bf16 %v6839_v12, %v6835_v49 }
 0xe0b   :  { %10940 = vmatpush1.bf16.msra.mxu0 %v10939_v63  ;;  %10972 = vmatpush1.bf16.msra.mxu1 %v10971_v57  ;;  %v6838_v63 = vld [vmem:[#allocation25 + $0x1f0] sm:$0xff]  ;;  %v10951_v57 = vpack.c.bf16 %v6836_v17, %v6832_v23 }
 0xe0c   :  { %10942 = vmatprep.subr.bf16.mxu0 %v10941_v27  ;;  %10974 = vmatprep.subr.bf16.mxu1 %v10973_v26  ;;  %v10983_v50 = vpack.c.bf16 %v6838_v63, %v6834_v36 }
 0xe0f   :  { %10944 = vmatpush1.bf16.msra.mxu0 %v10943_v61  ;;  %10976 = vmatpush1.bf16.msra.mxu1 %v10975_v30 }
 0xe10   :  { %10946 = vmatprep.subr.bf16.mxu0 %v10945_v0  ;;  %10978 = vmatprep.subr.bf16.mxu1 %v10977_v19 }
 0xe13   :  { %10948 = vmatpush1.bf16.msra.mxu0 %v10947_v55  ;;  %10980 = vmatpush1.bf16.msra.mxu1 %v10979_v32 }
 0xe14   :  { %10950 = vmatprep.subr.bf16.mxu0 %v10949_v38  ;;  %10982 = vmatprep.subr.bf16.mxu1 %v10981_v48 }
 0xe17   :  { %10952 = vmatpush1.bf16.msra.mxu0 %v10951_v57  ;;  %10984 = vmatpush1.bf16.msra.mxu1 %v10983_v50 }
 0xe18   :  { %10986 = vmatprep.subr.bf16.mxu0 %v14382_v8  ;;  %11018 = vmatprep.subr.bf16.mxu1 %v14384_v25 }
 0xe1a   :  { %7059 = vmatmul.mubr.f32.vlgmr.msra.gmra.mrb[94].mxu0 %v15101_v56  ;;  %7130 = vmatmul.mubr.f32.vlgmr.msra.gmra.mrb[74].mxu1 %v15101_v56 }
 0xe1b   :  { %10988 = vmatpush1.bf16.msra.mxu0 %v14388_v62  ;;  %11020 = vmatpush1.bf16.msra.mxu1 %v14390_v18 }
 0xe1c   :  { %10990 = vmatprep.subr.bf16.mxu0 %v14396_v2  ;;  %11022 = vmatprep.subr.bf16.mxu1 %v14398_v9 }
 0xe1d   :  { %7256 = vmatprep.mubr.f32.mxu0 %v15101_v56  ;;  %7327 = vmatprep.mubr.f32.mxu1 %v15101_v56 }
 0xe1f   :  { %10992 = vmatpush1.bf16.msra.mxu0 %v14404_v51  ;;  %11024 = vmatpush1.bf16.msra.mxu1 %v14406_v42 }
 0xe20   :  { %10994 = vmatprep.subr.bf16.mxu0 %v14412_v43  ;;  %11026 = vmatprep.subr.bf16.mxu1 %v14414_v24 }
 0xe23   :  { %10996 = vmatpush1.bf16.msra.mxu0 %v14420_v4  ;;  %11028 = vmatpush1.bf16.msra.mxu1 %v14422_v7 }
 0xe24   :  { %10998 = vmatprep.subr.bf16.mxu0 %v14428_v44  ;;  %11030 = vmatprep.subr.bf16.mxu1 %v14430_v37 }
 0xe27   :  { %11000 = vmatpush1.bf16.msra.mxu0 %v14436_v40  ;;  %11032 = vmatpush1.bf16.msra.mxu1 %v14438_v1 }
 0xe28   :  { %11002 = vmatprep.subr.bf16.mxu0 %v14444_v34  ;;  %11034 = vmatprep.subr.bf16.mxu1 %v14446_v11 }
 0xe2b   :  { %11004 = vmatpush1.bf16.msra.mxu0 %v14452_v53  ;;  %11036 = vmatpush1.bf16.msra.mxu1 %v14454_v58 }
 0xe2c   :  { %11006 = vmatprep.subr.bf16.mxu0 %v14460_v28  ;;  %11038 = vmatprep.subr.bf16.mxu1 %v14462_v52 }
 0xe2f   :  { %11008 = vmatpush1.bf16.msra.mxu0 %v14468_v22  ;;  %11040 = vmatpush1.bf16.msra.mxu1 %v14470_v29 }
 0xe30   :  { %11010 = vmatprep.subr.bf16.mxu0 %v14476_v6  ;;  %11042 = vmatprep.subr.bf16.mxu1 %v14478_v31 }
 0xe33   :  { %11012 = vmatpush1.bf16.msra.mxu0 %v14484_v3  ;;  %11044 = vmatpush1.bf16.msra.mxu1 %v14486_v54 }
 0xe34   :  { %11014 = vmatprep.subr.bf16.mxu0 %v14492_v14  ;;  %11046 = vmatprep.subr.bf16.mxu1 %v14494_v13 }
 0xe37   :  { %11016 = vmatpush1.bf16.msra.mxu0 %v14500_v21  ;;  %11048 = vmatpush1.bf16.msra.mxu1 %v14502_v10 }
 0xe38   :  { %11050 = vmatprep.subr.bf16.mxu0 %v14382_v8  ;;  %11082 = vmatprep.subr.bf16.mxu1 %v14384_v25 }
 0xe8d   :  { %v6240_v20 = vpop.f32.mrb[80].mxu0  ;;  %v6353_v27 = vpop.f32.mrb[60].mxu1 }
 0xe8e   :  { %v6242_v26 = vpop.f32.mrb[81].mxu0  ;;  %v6355_v33 = vpop.f32.mrb[61].mxu1 }
 0xe91   :  { %v6246_v60 = vpop.f32.mrb[82].mxu0  ;;  %v6359_v39 = vpop.f32.mrb[62].mxu1 }
 0xe92   :  { %v6248_v35 = vpop.f32.mrb[83].mxu0  ;;  %v6361_v5 = vpop.f32.mrb[63].mxu1 }
 0xe95   :  { %v6252_v46 = vpop.f32.mrb[84].mxu0  ;;  %v6365_v61 = vpop.f32.mrb[64].mxu1 }
 0xe96   :  { %v6254_v30 = vpop.f32.mrb[85].mxu0  ;;  %v6367_v45 = vpop.f32.mrb[65].mxu1 }
 0xe99   :  { %v6258_v16 = vpop.f32.mrb[86].mxu0  ;;  %v6371_v0 = vpop.f32.mrb[66].mxu1 }
 0xe9a   :  { %v6260_v19 = vpop.f32.mrb[87].mxu0  ;;  %v6373_v41 = vpop.f32.mrb[67].mxu1 }
 0xe9d   :  { %v6264_v59 = vpop.f32.mrb[88].mxu0  ;;  %v6377_v47 = vpop.f32.mrb[68].mxu1 }
 0xe9e   :  { %v6266_v15 = vpop.f32.mrb[89].mxu0  ;;  %v6379_v49 = vpop.f32.mrb[69].mxu1 }
 0xea1   :  { %v6270_v12 = vpop.f32.mrb[90].mxu0  ;;  %v6383_v55 = vpop.f32.mrb[70].mxu1 }
 0xea2   :  { %v6272_v32 = vpop.f32.mrb[91].mxu0  ;;  %v6385_v23 = vpop.f32.mrb[71].mxu1 }
 0xea5   :  { %v6276_v38 = vpop.f32.mrb[92].mxu0  ;;  %v6389_v48 = vpop.f32.mrb[72].mxu1 }
 0xea6   :  { %v6278_v17 = vpop.f32.mrb[93].mxu0  ;;  %v6391_v36 = vpop.f32.mrb[73].mxu1  ;;  %v5960_v48 = vld [vmem:[%s14901_s16] sm:$0xf] }
 0xea7   :  { %v15292_v17 = vld [vmem:[#allocation79_spill] sm:$0xff] }
 0xea8   :  { %v14560_v36 = vrot.slane %v5960_v48, %v15292_v17 }
 0xead   :  { %v6466_v63 = vpop.f32.mrb[96].mxu0  ;;  %v6579_v57 = vpop.f32.mrb[76].mxu1 }
 0xeae   :  { %v6468_v50 = vpop.f32.mrb[97].mxu0  ;;  %v6581_v20 = vpop.f32.mrb[77].mxu1  ;;  %v15293_v63 = vld [vmem:[#allocation80_spill] sm:$0xff] }
 0xeaf   :  { %v14563_v57 = vrot.slane %v5960_v48, %v15293_v63 }
 0xeb1   :  { %v6472_v27 = vpop.f32.mrb[98].mxu0  ;;  %v6585_v26 = vpop.f32.mrb[78].mxu1 }
 0xeb2   :  { %v6474_v33 = vpop.f32.mrb[99].mxu0  ;;  %v6587_v60 = vpop.f32.mrb[79].mxu1 }
 0xeb5   :  { %v6478_v39 = vpop.f32.mrb[100].mxu0  ;;  %v6591_v35 = vpop.f32.mrb[80].mxu1 }
 0xeb6   :  { %v6480_v5 = vpop.f32.mrb[101].mxu0  ;;  %v6593_v46 = vpop.f32.mrb[81].mxu1 }
 0xeb7   :  { %v15294_v5 = vld [vmem:[#allocation82_spill] sm:$0xff] }
 0xeb8   :  { %v14568_v46 = vrot.slane %v5960_v48, %v15294_v5 }
 0xeb9   :  { %v6484_v61 = vpop.f32.mrb[102].mxu0  ;;  %v6597_v30 = vpop.f32.mrb[82].mxu1 }
 0xeba   :  { %v6486_v45 = vpop.f32.mrb[103].mxu0  ;;  %v6599_v16 = vpop.f32.mrb[83].mxu1  ;;  %v15295_v30 = vld [vmem:[#allocation84_spill] sm:$0xff] }
 0xebb   :  { %v14572_v45 = vrot.slane %v5960_v48, %v15295_v30 }
 0xebd   :  { %v6490_v0 = vpop.f32.mrb[104].mxu0  ;;  %v6603_v19 = vpop.f32.mrb[84].mxu1 }
 0xebe   :  { %v6492_v41 = vpop.f32.mrb[105].mxu0  ;;  %v6605_v59 = vpop.f32.mrb[85].mxu1 }
 0xec1   :  { %v6496_v47 = vpop.f32.mrb[106].mxu0  ;;  %v6609_v15 = vpop.f32.mrb[86].mxu1 }
 0xec2   :  { %v6498_v49 = vpop.f32.mrb[107].mxu0  ;;  %v6611_v12 = vpop.f32.mrb[87].mxu1 }
 0xec3   :  { %v6626_v49 = vld [vmem:[#allocation27] sm:$0xf] }
 0xec4   :  { %v6631_v48 = vrot.slane %v6626_v49, %v15292_v17 }
 0xec5   :  { %v6502_v55 = vpop.f32.mrb[108].mxu0  ;;  %v6615_v32 = vpop.f32.mrb[88].mxu1 }
 0xec6   :  { %v6504_v23 = vpop.f32.mrb[109].mxu0  ;;  %v6617_v38 = vpop.f32.mrb[89].mxu1 }
 0xecd   :  { %v6910_v50 = vpop.f32.mrb[64].mxu0  ;;  %v6981_v20 = vpop.f32.mrb[44].mxu1 }
 0xece   :  { %v11609_v27 = vadd.f32 %v6910_v50, %v14560_v36  ;;  %v6912_v26 = vpop.f32.mrb[65].mxu0  ;;  %v6983_v33 = vpop.f32.mrb[45].mxu1  ;;  %v11625_v0 = vadd.f32 %v6981_v20, %v14572_v45  ;;  %v6635_v20 = vrot.slane %v6626_v49, %v15293_v63 }
 0xecf   :  { %v11610_v60 = vadd.f32 %v6912_v26, %v14563_v57  ;;  %v11626_v61 = vadd.f32 %v6983_v33, %v14568_v46 }
 0xed0   :  { %v8979_v39 = vmul.f32 -1.442695, %v11609_v27 }
 0xed1   :  { %v8980_v35 = vmul.f32 -1.442695, %v11610_v60  ;;  %v8981_v16 = vmul.f32 -1.442695, %v11626_v61 }
 0xed2   :  { %12078 = vpow2.f32 %v8979_v39 }
 0xed3   :  { %12080 = vpow2.f32 %v8980_v35 }
 0xed4   :  { %12082 = vpow2.f32 %v8981_v16 }
 0xed5   :  { %12084 = vtanh.f32 %v11625_v0 }
 0xedc   :  { %v12079_v19 = vpop.eup %12078 }
 0xedd   :  { %v12081_v41 = vpop.eup %12080  ;;  %v7143_v59 = vadd.f32 1.0, %v12079_v19  ;;  %v6643_v19 = vrot.slane %v6626_v49, %v15294_v5 }
 0xede   :  { %v7149_v47 = vadd.f32 1.0, %v12081_v41  ;;  %v12083_v15 = vpop.eup %12082 }
 0xedf   :  { %12086 = vrcp.f32 %v7143_v59  ;;  %v12085_v12 = vpop.eup %12084  ;;  %v7156_v38 = vadd.f32 1.0, %v12083_v15  ;;  %v6639_v59 = vrot.slane %v6626_v49, %v15295_v30 }
 0xee0   :  { %12088 = vrcp.f32 %v7149_v47 }
 0xee1   :  { %12090 = vrcp.f32 %v7156_v38 }
 0xee9   :  { %v12087_v55 = vpop.eup %12086 }
 0xeea   :  { %v12089_v32 = vpop.eup %12088  ;;  %v7160_v23 = vmul.f32 %v12087_v55, %v12085_v12 }
 0xeeb   :  { %v7159_v50 = vmul.f32 0.0, %v12089_v32  ;;  %v12091_v47 = vpop.eup %12090 }
 0xeed   :  { %v14577_v27 = vadd.f32 %v7160_v23, %v7159_v50  ;;  %v7060_v26 = vpop.f32.mrb[94].mxu0  ;;  %v7131_v33 = vpop.f32.mrb[74].mxu1 }
 0xeee   :  { %v11641_v60 = vadd.f32 %v7060_v26, %v6631_v48  ;;  %v7062_v39 = vpop.f32.mrb[95].mxu0  ;;  %v7133_v35 = vpop.f32.mrb[75].mxu1  ;;  %v11643_v55 = vadd.f32 %v7131_v33, %v6639_v59 }
 0xeef   :  { %12092 = vtanh.f32 %v14577_v27  ;;  %v11642_v61 = vadd.f32 %v7062_v39, %v6635_v20  ;;  %v11644_v41 = vadd.f32 %v7133_v35, %v6643_v19 }
 0xef0   :  { %v8982_v16 = vmul.f32 -1.442695, %v11641_v60 }
 0xef1   :  { %v8983_v0 = vmul.f32 -1.442695, %v11642_v61  ;;  %v8984_v12 = vmul.f32 -1.442695, %v11644_v41 }
 0xef2   :  { %12094 = vpow2.f32 %v8982_v16 }
 0xef3   :  { %12096 = vpow2.f32 %v8983_v0 }
 0xef4   :  { %12098 = vpow2.f32 %v8984_v12 }
 0xef5   :  { %12100 = vtanh.f32 %v11643_v55 }
 0xef9   :  { %v12093_v15 = vpop.eup %12092 }
 0xefa   :  { %v7163_v32 = vmul.f32 %v12093_v15, %v12091_v47 }
 0xefc   :  { %v12095_v23 = vpop.eup %12094  ;;  %7257 = vmatmul.mubr.f32.vlgmr.msra.gmra.mrb[66].mxu0 %v7163_v32  ;;  %7328 = vmatmul.mubr.f32.vlgmr.msra.gmra.mrb[46].mxu1 %v7163_v32 }
 0xefd   :  { %v12097_v38 = vpop.eup %12096  ;;  %v7167_v48 = vadd.f32 1.0, %v12095_v23  ;;  %11052 = vmatpush1.bf16.msra.mxu0 %v14388_v62  ;;  %11084 = vmatpush1.bf16.msra.mxu1 %v14390_v18 }
 0xefe   :  { %v7173_v50 = vadd.f32 1.0, %v12097_v38  ;;  %11054 = vmatprep.subr.bf16.mxu0 %v14396_v2  ;;  %11086 = vmatprep.subr.bf16.mxu1 %v14398_v9  ;;  %v12099_v49 = vpop.eup %12098 }
 0xeff   :  { %12102 = vrcp.f32 %v7167_v48  ;;  %7430 = vmatprep.mubr.f32.mxu0 %v15101_v56  ;;  %7501 = vmatprep.mubr.f32.mxu1 %v15101_v56  ;;  %v12101_v20 = vpop.eup %12100  ;;  %v7180_v39 = vadd.f32 1.0, %v12099_v49 }
 0xf00   :  { %12104 = vrcp.f32 %v7173_v50 }
 0xf01   :  { %11056 = vmatpush1.bf16.msra.mxu0 %v14404_v51  ;;  %11088 = vmatpush1.bf16.msra.mxu1 %v14406_v42  ;;  %12106 = vrcp.f32 %v7180_v39 }
 0xf02   :  { %11058 = vmatprep.subr.bf16.mxu0 %v14412_v43  ;;  %11090 = vmatprep.subr.bf16.mxu1 %v14414_v24 }
 0xf05   :  { %11060 = vmatpush1.bf16.msra.mxu0 %v14420_v4  ;;  %11092 = vmatpush1.bf16.msra.mxu1 %v14422_v7 }
 0xf06   :  { %11062 = vmatprep.subr.bf16.mxu0 %v14428_v44  ;;  %11094 = vmatprep.subr.bf16.mxu1 %v14430_v37 }
 0xf09   :  { %v12103_v26 = vpop.eup %12102  ;;  %11064 = vmatpush1.bf16.msra.mxu0 %v14436_v40  ;;  %11096 = vmatpush1.bf16.msra.mxu1 %v14438_v1 }
 0xf0a   :  { %v12105_v33 = vpop.eup %12104  ;;  %v7184_v60 = vmul.f32 %v12103_v26, %v12101_v20  ;;  %11066 = vmatprep.subr.bf16.mxu0 %v14444_v34  ;;  %11098 = vmatprep.subr.bf16.mxu1 %v14446_v11 }
 0xf0b   :  { %v7183_v35 = vmul.f32 0.0, %v12105_v33  ;;  %v12107_v16 = vpop.eup %12106 }
 0xf0d   :  { %v7185_v61 = vadd.f32 %v7184_v60, %v7183_v35  ;;  %11068 = vmatpush1.bf16.msra.mxu0 %v14452_v53  ;;  %11100 = vmatpush1.bf16.msra.mxu1 %v14454_v58 }
 0xf0e   :  { %11070 = vmatprep.subr.bf16.mxu0 %v14460_v28  ;;  %11102 = vmatprep.subr.bf16.mxu1 %v14462_v52 }
 0xf0f   :  { %12108 = vtanh.f32 %v7185_v61 }
 0xf11   :  { %11072 = vmatpush1.bf16.msra.mxu0 %v14468_v22  ;;  %11104 = vmatpush1.bf16.msra.mxu1 %v14470_v29 }
 0xf12   :  { %11074 = vmatprep.subr.bf16.mxu0 %v14476_v6  ;;  %11106 = vmatprep.subr.bf16.mxu1 %v14478_v31 }
 0xf15   :  { %11076 = vmatpush1.bf16.msra.mxu0 %v14484_v3  ;;  %11108 = vmatpush1.bf16.msra.mxu1 %v14486_v54 }
 0xf16   :  { %11078 = vmatprep.subr.bf16.mxu0 %v14492_v14  ;;  %11110 = vmatprep.subr.bf16.mxu1 %v14494_v13 }
 0xf19   :  { %v12109_v0 = vpop.eup %12108  ;;  %11080 = vmatpush1.bf16.msra.mxu0 %v14500_v21  ;;  %11112 = vmatpush1.bf16.msra.mxu1 %v14502_v10 }
 0xf1a   :  { %11114 = vmatprep.subr.bf16.mxu0 %v14382_v8  ;;  %11146 = vmatprep.subr.bf16.mxu1 %v14384_v25  ;;  %v14616_v19 = vmul.f32 %v12109_v0, %v12107_v16 }
 0xfcf   :  { %v7258_v41 = vpop.f32.mrb[66].mxu0  ;;  %v7329_v59 = vpop.f32.mrb[46].mxu1 }
 0xfd0   :  { %v11611_v47 = vadd.f32 %v7258_v41, %v14560_v36  ;;  %v7260_v15 = vpop.f32.mrb[67].mxu0  ;;  %v7331_v12 = vpop.f32.mrb[47].mxu1  ;;  %v11627_v50 = vadd.f32 %v7329_v59, %v14572_v45 }
 0xfd1   :  { %v11612_v55 = vadd.f32 %v7260_v15, %v14563_v57  ;;  %v11628_v38 = vadd.f32 %v7331_v12, %v14568_v46 }
 0xfd2   :  { %v8985_v32 = vmul.f32 -1.442695, %v11611_v47 }
 0xfd3   :  { %v8986_v23 = vmul.f32 -1.442695, %v11612_v55  ;;  %v8987_v48 = vmul.f32 -1.442695, %v11628_v38 }
 0xfd4   :  { %12110 = vpow2.f32 %v8985_v32 }
 0xfd5   :  { %12112 = vpow2.f32 %v8986_v23 }
 0xfd6   :  { %12114 = vpow2.f32 %v8987_v48 }
 0xfd7   :  { %12116 = vtanh.f32 %v11627_v50 }
 0xfde   :  { %v12111_v49 = vpop.eup %12110 }
 0xfdf   :  { %v12113_v20 = vpop.eup %12112  ;;  %v7341_v26 = vadd.f32 1.0, %v12111_v49 }
 0xfe0   :  { %v7347_v33 = vadd.f32 1.0, %v12113_v20  ;;  %v12115_v60 = vpop.eup %12114 }
 0xfe1   :  { %12118 = vrcp.f32 %v7341_v26  ;;  %v12117_v39 = vpop.eup %12116  ;;  %v7354_v0 = vadd.f32 1.0, %v12115_v60 }
 0xfe2   :  { %12120 = vrcp.f32 %v7347_v33 }
 0xfe3   :  { %12122 = vrcp.f32 %v7354_v0 }
 0xfeb   :  { %v12119_v35 = vpop.eup %12118 }
 0xfec   :  { %v12121_v61 = vpop.eup %12120  ;;  %v7358_v16 = vmul.f32 %v12119_v35, %v12117_v39 }
 0xfed   :  { %v7357_v41 = vmul.f32 %v12121_v61, %v14577_v27  ;;  %v12123_v59 = vpop.eup %12122 }
 0xfef   :  { %v14623_v47 = vadd.f32 %v7358_v16, %v7357_v41 }
 0xff1   :  { %12124 = vtanh.f32 %v14623_v47 }
 0xffb   :  { %v12125_v15 = vpop.eup %12124 }
 0xffc   :  { %v7361_v12 = vmul.f32 %v12125_v15, %v12123_v59 }
 0xffe   :  { %7431 = vmatmul.mubr.f32.vlgmr.msra.gmra.mrb[68].mxu0 %v7361_v12  ;;  %7502 = vmatmul.mubr.f32.vlgmr.msra.gmra.mrb[48].mxu1 %v7361_v12 }
 0xfff   :  { %11116 = vmatpush1.bf16.msra.mxu0 %v14388_v62  ;;  %11148 = vmatpush1.bf16.msra.mxu1 %v14390_v18 }
0x1000   :  { %11118 = vmatprep.subr.bf16.mxu0 %v14396_v2  ;;  %11150 = vmatprep.subr.bf16.mxu1 %v14398_v9 }
0x1001   :  { %7604 = vmatprep.mubr.f32.mxu0 %v15101_v56  ;;  %7675 = vmatprep.mubr.f32.mxu1 %v15101_v56 }
0x1003   :  { %11120 = vmatpush1.bf16.msra.mxu0 %v14404_v51  ;;  %11152 = vmatpush1.bf16.msra.mxu1 %v14406_v42 }
0x1004   :  { %11122 = vmatprep.subr.bf16.mxu0 %v14412_v43  ;;  %11154 = vmatprep.subr.bf16.mxu1 %v14414_v24 }
0x1007   :  { %11124 = vmatpush1.bf16.msra.mxu0 %v14420_v4  ;;  %11156 = vmatpush1.bf16.msra.mxu1 %v14422_v7 }
0x1008   :  { %11126 = vmatprep.subr.bf16.mxu0 %v14428_v44  ;;  %11158 = vmatprep.subr.bf16.mxu1 %v14430_v37 }
0x100b   :  { %11128 = vmatpush1.bf16.msra.mxu0 %v14436_v40  ;;  %11160 = vmatpush1.bf16.msra.mxu1 %v14438_v1 }
0x100c   :  { %11130 = vmatprep.subr.bf16.mxu0 %v14444_v34  ;;  %11162 = vmatprep.subr.bf16.mxu1 %v14446_v11 }
0x100f   :  { %11132 = vmatpush1.bf16.msra.mxu0 %v14452_v53  ;;  %11164 = vmatpush1.bf16.msra.mxu1 %v14454_v58 }
0x1010   :  { %11134 = vmatprep.subr.bf16.mxu0 %v14460_v28  ;;  %11166 = vmatprep.subr.bf16.mxu1 %v14462_v52 }
0x1013   :  { %11136 = vmatpush1.bf16.msra.mxu0 %v14468_v22  ;;  %11168 = vmatpush1.bf16.msra.mxu1 %v14470_v29 }
0x1014   :  { %11138 = vmatprep.subr.bf16.mxu0 %v14476_v6  ;;  %11170 = vmatprep.subr.bf16.mxu1 %v14478_v31 }
0x1017   :  { %11140 = vmatpush1.bf16.msra.mxu0 %v14484_v3  ;;  %11172 = vmatpush1.bf16.msra.mxu1 %v14486_v54 }
0x1018   :  { %11142 = vmatprep.subr.bf16.mxu0 %v14492_v14  ;;  %11174 = vmatprep.subr.bf16.mxu1 %v14494_v13 }
0x101b   :  { %11144 = vmatpush1.bf16.msra.mxu0 %v14500_v21  ;;  %11176 = vmatpush1.bf16.msra.mxu1 %v14502_v10 }
0x101c   :  { %11178 = vmatprep.subr.bf16.mxu0 %v14382_v8  ;;  %11210 = vmatprep.subr.bf16.mxu1 %v14384_v25 }
0x10d1   :  { %v7432_v27 = vpop.f32.mrb[68].mxu0  ;;  %v7503_v55 = vpop.f32.mrb[48].mxu1 }
0x10d2   :  { %v11613_v32 = vadd.f32 %v7432_v27, %v14560_v36  ;;  %v7434_v23 = vpop.f32.mrb[69].mxu0  ;;  %v7505_v38 = vpop.f32.mrb[49].mxu1  ;;  %v11629_v33 = vadd.f32 %v7503_v55, %v14572_v45 }
0x10d3   :  { %v11614_v48 = vadd.f32 %v7434_v23, %v14563_v57  ;;  %v11630_v20 = vadd.f32 %v7505_v38, %v14568_v46 }
0x10d4   :  { %v8988_v50 = vmul.f32 -1.442695, %v11613_v32 }
0x10d5   :  { %v8989_v49 = vmul.f32 -1.442695, %v11614_v48  ;;  %v8990_v26 = vmul.f32 -1.442695, %v11630_v20 }
0x10d6   :  { %12126 = vpow2.f32 %v8988_v50 }
0x10d7   :  { %12128 = vpow2.f32 %v8989_v49 }
0x10d8   :  { %12130 = vpow2.f32 %v8990_v26 }
0x10d9   :  { %12132 = vtanh.f32 %v11629_v33 }
0x10e0   :  { %v12127_v60 = vpop.eup %12126 }
0x10e1   :  { %v12129_v39 = vpop.eup %12128  ;;  %v7515_v35 = vadd.f32 1.0, %v12127_v60 }
0x10e2   :  { %v7521_v61 = vadd.f32 1.0, %v12129_v39  ;;  %v12131_v16 = vpop.eup %12130 }
0x10e3   :  { %12134 = vrcp.f32 %v7515_v35  ;;  %v12133_v0 = vpop.eup %12132  ;;  %v7528_v12 = vadd.f32 1.0, %v12131_v16 }
0x10e4   :  { %12136 = vrcp.f32 %v7521_v61 }
0x10e5   :  { %12138 = vrcp.f32 %v7528_v12 }
0x10ed   :  { %v12135_v41 = vpop.eup %12134 }
0x10ee   :  { %v12137_v59 = vpop.eup %12136  ;;  %v7532_v15 = vmul.f32 %v12135_v41, %v12133_v0 }
0x10ef   :  { %v7531_v27 = vmul.f32 %v12137_v59, %v14623_v47  ;;  %v12139_v55 = vpop.eup %12138 }
0x10f1   :  { %v14665_v32 = vadd.f32 %v7532_v15, %v7531_v27 }
0x10f3   :  { %12140 = vtanh.f32 %v14665_v32 }
0x10fd   :  { %v12141_v23 = vpop.eup %12140 }
0x10fe   :  { %v7535_v38 = vmul.f32 %v12141_v23, %v12139_v55 }
0x1100   :  { %7605 = vmatmul.mubr.f32.vlgmr.msra.gmra.mrb[70].mxu0 %v7535_v38  ;;  %7676 = vmatmul.mubr.f32.vlgmr.msra.gmra.mrb[50].mxu1 %v7535_v38 }
0x1101   :  { %11180 = vmatpush1.bf16.msra.mxu0 %v14388_v62  ;;  %11212 = vmatpush1.bf16.msra.mxu1 %v14390_v18 }
0x1102   :  { %11182 = vmatprep.subr.bf16.mxu0 %v14396_v2  ;;  %11214 = vmatprep.subr.bf16.mxu1 %v14398_v9 }
0x1103   :  { %7778 = vmatprep.mubr.f32.mxu0 %v15101_v56  ;;  %7849 = vmatprep.mubr.f32.mxu1 %v15101_v56 }
0x1105   :  { %11184 = vmatpush1.bf16.msra.mxu0 %v14404_v51  ;;  %11216 = vmatpush1.bf16.msra.mxu1 %v14406_v42 }
0x1106   :  { %11186 = vmatprep.subr.bf16.mxu0 %v14412_v43  ;;  %11218 = vmatprep.subr.bf16.mxu1 %v14414_v24 }
0x1109   :  { %11188 = vmatpush1.bf16.msra.mxu0 %v14420_v4  ;;  %11220 = vmatpush1.bf16.msra.mxu1 %v14422_v7 }
0x110a   :  { %11190 = vmatprep.subr.bf16.mxu0 %v14428_v44  ;;  %11222 = vmatprep.subr.bf16.mxu1 %v14430_v37 }
0x110d   :  { %11192 = vmatpush1.bf16.msra.mxu0 %v14436_v40  ;;  %11224 = vmatpush1.bf16.msra.mxu1 %v14438_v1 }
0x110e   :  { %11194 = vmatprep.subr.bf16.mxu0 %v14444_v34  ;;  %11226 = vmatprep.subr.bf16.mxu1 %v14446_v11 }
0x1111   :  { %11196 = vmatpush1.bf16.msra.mxu0 %v14452_v53  ;;  %11228 = vmatpush1.bf16.msra.mxu1 %v14454_v58 }
0x1112   :  { %11198 = vmatprep.subr.bf16.mxu0 %v14460_v28  ;;  %11230 = vmatprep.subr.bf16.mxu1 %v14462_v52 }
0x1115   :  { %11200 = vmatpush1.bf16.msra.mxu0 %v14468_v22  ;;  %11232 = vmatpush1.bf16.msra.mxu1 %v14470_v29 }
0x1116   :  { %11202 = vmatprep.subr.bf16.mxu0 %v14476_v6  ;;  %11234 = vmatprep.subr.bf16.mxu1 %v14478_v31 }
0x1119   :  { %11204 = vmatpush1.bf16.msra.mxu0 %v14484_v3  ;;  %11236 = vmatpush1.bf16.msra.mxu1 %v14486_v54 }
0x111a   :  { %11206 = vmatprep.subr.bf16.mxu0 %v14492_v14  ;;  %11238 = vmatprep.subr.bf16.mxu1 %v14494_v13 }
0x111d   :  { %11208 = vmatpush1.bf16.msra.mxu0 %v14500_v21  ;;  %11240 = vmatpush1.bf16.msra.mxu1 %v14502_v10 }
0x111e   :  { %11242 = vmatprep.subr.bf16.mxu0 %v14382_v8  ;;  %11274 = vmatprep.subr.bf16.mxu1 %v14384_v25 }
0x11d3   :  { %v7606_v47 = vpop.f32.mrb[70].mxu0  ;;  %v7677_v48 = vpop.f32.mrb[50].mxu1 }
0x11d4   :  { %v11615_v50 = vadd.f32 %v7606_v47, %v14560_v36  ;;  %v7608_v49 = vpop.f32.mrb[71].mxu0  ;;  %v7679_v20 = vpop.f32.mrb[51].mxu1  ;;  %v11631_v61 = vadd.f32 %v7677_v48, %v14572_v45 }
0x11d5   :  { %v11616_v26 = vadd.f32 %v7608_v49, %v14563_v57  ;;  %v11632_v39 = vadd.f32 %v7679_v20, %v14568_v46 }
0x11d6   :  { %v8991_v33 = vmul.f32 -1.442695, %v11615_v50 }
0x11d7   :  { %v8992_v60 = vmul.f32 -1.442695, %v11616_v26  ;;  %v8993_v35 = vmul.f32 -1.442695, %v11632_v39 }
0x11d8   :  { %12142 = vpow2.f32 %v8991_v33 }
0x11d9   :  { %12144 = vpow2.f32 %v8992_v60 }
0x11da   :  { %12146 = vpow2.f32 %v8993_v35 }
0x11db   :  { %12148 = vtanh.f32 %v11631_v61 }
0x11e2   :  { %v12143_v16 = vpop.eup %12142 }
0x11e3   :  { %v12145_v0 = vpop.eup %12144  ;;  %v7689_v41 = vadd.f32 1.0, %v12143_v16 }
0x11e4   :  { %v7695_v59 = vadd.f32 1.0, %v12145_v0  ;;  %v12147_v15 = vpop.eup %12146 }
0x11e5   :  { %12150 = vrcp.f32 %v7689_v41  ;;  %v12149_v12 = vpop.eup %12148  ;;  %v7702_v38 = vadd.f32 1.0, %v12147_v15 }
0x11e6   :  { %12152 = vrcp.f32 %v7695_v59 }
0x11e7   :  { %12154 = vrcp.f32 %v7702_v38 }
0x11ef   :  { %v12151_v27 = vpop.eup %12150 }
0x11f0   :  { %v12153_v55 = vpop.eup %12152  ;;  %v7706_v23 = vmul.f32 %v12151_v27, %v12149_v12 }
0x11f1   :  { %v7705_v47 = vmul.f32 %v12153_v55, %v14665_v32  ;;  %v12155_v48 = vpop.eup %12154 }
0x11f3   :  { %v14707_v50 = vadd.f32 %v7706_v23, %v7705_v47 }
0x11f5   :  { %12156 = vtanh.f32 %v14707_v50 }
0x11ff   :  { %v12157_v49 = vpop.eup %12156 }
0x1200   :  { %v7709_v20 = vmul.f32 %v12157_v49, %v12155_v48 }
0x1202   :  { %7779 = vmatmul.mubr.f32.vlgmr.msra.gmra.mrb[72].mxu0 %v7709_v20  ;;  %7850 = vmatmul.mubr.f32.vlgmr.msra.gmra.mrb[52].mxu1 %v7709_v20 }
0x1203   :  { %11244 = vmatpush1.bf16.msra.mxu0 %v14388_v62  ;;  %11276 = vmatpush1.bf16.msra.mxu1 %v14390_v18 }
0x1204   :  { %11246 = vmatprep.subr.bf16.mxu0 %v14396_v2  ;;  %11278 = vmatprep.subr.bf16.mxu1 %v14398_v9 }
0x1205   :  { %7952 = vmatprep.mubr.f32.mxu0 %v15101_v56  ;;  %8023 = vmatprep.mubr.f32.mxu1 %v15101_v56 }
0x1207   :  { %11248 = vmatpush1.bf16.msra.mxu0 %v14404_v51  ;;  %11280 = vmatpush1.bf16.msra.mxu1 %v14406_v42 }
0x1208   :  { %11250 = vmatprep.subr.bf16.mxu0 %v14412_v43  ;;  %11282 = vmatprep.subr.bf16.mxu1 %v14414_v24 }
0x120b   :  { %11252 = vmatpush1.bf16.msra.mxu0 %v14420_v4  ;;  %11284 = vmatpush1.bf16.msra.mxu1 %v14422_v7 }
0x120c   :  { %11254 = vmatprep.subr.bf16.mxu0 %v14428_v44  ;;  %11286 = vmatprep.subr.bf16.mxu1 %v14430_v37 }
0x120f   :  { %11256 = vmatpush1.bf16.msra.mxu0 %v14436_v40  ;;  %11288 = vmatpush1.bf16.msra.mxu1 %v14438_v1 }
0x1210   :  { %11258 = vmatprep.subr.bf16.mxu0 %v14444_v34  ;;  %11290 = vmatprep.subr.bf16.mxu1 %v14446_v11 }
0x1213   :  { %11260 = vmatpush1.bf16.msra.mxu0 %v14452_v53  ;;  %11292 = vmatpush1.bf16.msra.mxu1 %v14454_v58 }
0x1214   :  { %11262 = vmatprep.subr.bf16.mxu0 %v14460_v28  ;;  %11294 = vmatprep.subr.bf16.mxu1 %v14462_v52 }
0x1217   :  { %11264 = vmatpush1.bf16.msra.mxu0 %v14468_v22  ;;  %11296 = vmatpush1.bf16.msra.mxu1 %v14470_v29 }
0x1218   :  { %11266 = vmatprep.subr.bf16.mxu0 %v14476_v6  ;;  %11298 = vmatprep.subr.bf16.mxu1 %v14478_v31 }
0x121b   :  { %11268 = vmatpush1.bf16.msra.mxu0 %v14484_v3  ;;  %11300 = vmatpush1.bf16.msra.mxu1 %v14486_v54 }
0x121c   :  { %11270 = vmatprep.subr.bf16.mxu0 %v14492_v14  ;;  %11302 = vmatprep.subr.bf16.mxu1 %v14494_v13 }
0x121f   :  { %11272 = vmatpush1.bf16.msra.mxu0 %v14500_v21  ;;  %11304 = vmatpush1.bf16.msra.mxu1 %v14502_v10 }
0x1220   :  { %11306 = vmatprep.subr.bf16.mxu0 %v14382_v8  ;;  %11338 = vmatprep.subr.bf16.mxu1 %v14384_v25 }
0x12d5   :  { %v7780_v32 = vpop.f32.mrb[72].mxu0  ;;  %v7851_v26 = vpop.f32.mrb[52].mxu1 }
0x12d6   :  { %v11617_v33 = vadd.f32 %v7780_v32, %v14560_v36  ;;  %v7782_v60 = vpop.f32.mrb[73].mxu0  ;;  %v7853_v39 = vpop.f32.mrb[53].mxu1  ;;  %v11633_v59 = vadd.f32 %v7851_v26, %v14572_v45 }
0x12d7   :  { %v11618_v35 = vadd.f32 %v7782_v60, %v14563_v57  ;;  %v11634_v0 = vadd.f32 %v7853_v39, %v14568_v46 }
0x12d8   :  { %v8994_v61 = vmul.f32 -1.442695, %v11617_v33 }
0x12d9   :  { %v8995_v16 = vmul.f32 -1.442695, %v11618_v35  ;;  %v8996_v41 = vmul.f32 -1.442695, %v11634_v0 }
0x12da   :  { %12158 = vpow2.f32 %v8994_v61 }
0x12db   :  { %12160 = vpow2.f32 %v8995_v16 }
0x12dc   :  { %12162 = vpow2.f32 %v8996_v41 }
0x12dd   :  { %12164 = vtanh.f32 %v11633_v59 }
0x12e4   :  { %v12159_v15 = vpop.eup %12158 }
0x12e5   :  { %v12161_v12 = vpop.eup %12160  ;;  %v7863_v27 = vadd.f32 1.0, %v12159_v15 }
0x12e6   :  { %v7869_v55 = vadd.f32 1.0, %v12161_v12  ;;  %v12163_v23 = vpop.eup %12162 }
0x12e7   :  { %12166 = vrcp.f32 %v7863_v27  ;;  %v12165_v38 = vpop.eup %12164  ;;  %v7876_v20 = vadd.f32 1.0, %v12163_v23 }
0x12e8   :  { %12168 = vrcp.f32 %v7869_v55 }
0x12e9   :  { %12170 = vrcp.f32 %v7876_v20 }
0x12f1   :  { %v12167_v47 = vpop.eup %12166 }
0x12f2   :  { %v12169_v48 = vpop.eup %12168  ;;  %v7880_v49 = vmul.f32 %v12167_v47, %v12165_v38 }
0x12f3   :  { %v7879_v32 = vmul.f32 %v12169_v48, %v14707_v50  ;;  %v12171_v26 = vpop.eup %12170 }
0x12f5   :  { %v14749_v33 = vadd.f32 %v7880_v49, %v7879_v32 }
0x12f7   :  { %12172 = vtanh.f32 %v14749_v33 }
0x1301   :  { %v12173_v60 = vpop.eup %12172 }
0x1302   :  { %v7883_v39 = vmul.f32 %v12173_v60, %v12171_v26 }
0x1304   :  { %7953 = vmatmul.mubr.f32.vlgmr.msra.gmra.mrb[74].mxu0 %v7883_v39  ;;  %8024 = vmatmul.mubr.f32.vlgmr.msra.gmra.mrb[54].mxu1 %v7883_v39 }
0x1305   :  { %11308 = vmatpush1.bf16.msra.mxu0 %v14388_v62  ;;  %11340 = vmatpush1.bf16.msra.mxu1 %v14390_v18 }
0x1306   :  { %11310 = vmatprep.subr.bf16.mxu0 %v14396_v2  ;;  %11342 = vmatprep.subr.bf16.mxu1 %v14398_v9 }
0x1307   :  { %8126 = vmatprep.mubr.f32.mxu0 %v15101_v56  ;;  %8197 = vmatprep.mubr.f32.mxu1 %v15101_v56 }
0x1309   :  { %11312 = vmatpush1.bf16.msra.mxu0 %v14404_v51  ;;  %11344 = vmatpush1.bf16.msra.mxu1 %v14406_v42 }
0x130a   :  { %11314 = vmatprep.subr.bf16.mxu0 %v14412_v43  ;;  %11346 = vmatprep.subr.bf16.mxu1 %v14414_v24 }
0x130d   :  { %11316 = vmatpush1.bf16.msra.mxu0 %v14420_v4  ;;  %11348 = vmatpush1.bf16.msra.mxu1 %v14422_v7 }
0x130e   :  { %11318 = vmatprep.subr.bf16.mxu0 %v14428_v44  ;;  %11350 = vmatprep.subr.bf16.mxu1 %v14430_v37 }
0x1311   :  { %11320 = vmatpush1.bf16.msra.mxu0 %v14436_v40  ;;  %11352 = vmatpush1.bf16.msra.mxu1 %v14438_v1 }
0x1312   :  { %11322 = vmatprep.subr.bf16.mxu0 %v14444_v34  ;;  %11354 = vmatprep.subr.bf16.mxu1 %v14446_v11 }
0x1315   :  { %11324 = vmatpush1.bf16.msra.mxu0 %v14452_v53  ;;  %11356 = vmatpush1.bf16.msra.mxu1 %v14454_v58 }
0x1316   :  { %11326 = vmatprep.subr.bf16.mxu0 %v14460_v28  ;;  %11358 = vmatprep.subr.bf16.mxu1 %v14462_v52 }
0x1319   :  { %11328 = vmatpush1.bf16.msra.mxu0 %v14468_v22  ;;  %11360 = vmatpush1.bf16.msra.mxu1 %v14470_v29 }
0x131a   :  { %11330 = vmatprep.subr.bf16.mxu0 %v14476_v6  ;;  %11362 = vmatprep.subr.bf16.mxu1 %v14478_v31 }
0x131d   :  { %11332 = vmatpush1.bf16.msra.mxu0 %v14484_v3  ;;  %11364 = vmatpush1.bf16.msra.mxu1 %v14486_v54 }
0x131e   :  { %11334 = vmatprep.subr.bf16.mxu0 %v14492_v14  ;;  %11366 = vmatprep.subr.bf16.mxu1 %v14494_v13 }
0x1321   :  { %11336 = vmatpush1.bf16.msra.mxu0 %v14500_v21  ;;  %11368 = vmatpush1.bf16.msra.mxu1 %v14502_v10 }
0x1322   :  { %11370 = vmatprep.subr.bf16.mxu0 %v14382_v8  ;;  %11402 = vmatprep.subr.bf16.mxu1 %v14384_v25 }
0x13d7   :  { %v7954_v50 = vpop.f32.mrb[74].mxu0  ;;  %v8025_v35 = vpop.f32.mrb[54].mxu1 }
0x13d8   :  { %v11619_v61 = vadd.f32 %v7954_v50, %v14560_v36  ;;  %v7956_v16 = vpop.f32.mrb[75].mxu0  ;;  %v8027_v0 = vpop.f32.mrb[55].mxu1  ;;  %v11635_v55 = vadd.f32 %v8025_v35, %v14572_v45 }
0x13d9   :  { %v11620_v41 = vadd.f32 %v7956_v16, %v14563_v57  ;;  %v11636_v12 = vadd.f32 %v8027_v0, %v14568_v46  ;;  %v8425_v16 = vld [vmem:[#allocation30 + $0x18] sm:$0xff] }
0x13da   :  { %v8997_v59 = vmul.f32 -1.442695, %v11619_v61 }
0x13db   :  { %v8998_v15 = vmul.f32 -1.442695, %v11620_v41  ;;  %v8999_v27 = vmul.f32 -1.442695, %v11636_v12  ;;  %v8426_v41 = vld [vmem:[#allocation30 + $0x20] sm:$0xff]  ;;  %v8428_v12 = vld [vmem:[#allocation30 + $0x30] sm:$0xff] }
0x13dc   :  { %12174 = vpow2.f32 %v8997_v59  ;;  %v8427_v59 = vld [vmem:[#allocation30 + $0x28] sm:$0xff] }
0x13dd   :  { %12176 = vpow2.f32 %v8998_v15  ;;  %v11440_v15 = vpack.c.bf16 %v8427_v59, %v8426_v41  ;;  %v8595_v59 = vld [vmem:[#allocation31 + $0x40] sm:$0xff] }
0x13de   :  { %12178 = vpow2.f32 %v8999_v27  ;;  %v8429_v27 = vld [vmem:[#allocation30 + $0x38] sm:$0xff] }
0x13df   :  { %12180 = vtanh.f32 %v11635_v55  ;;  %v11443_v55 = vpack.c.bf16 %v8429_v27, %v8428_v12  ;;  %v8608_v27 = vld [vmem:[#allocation31 + $0xa8] sm:$0xff] }
0x13e6   :  { %v12175_v8 = vpop.eup %12174 }
0x13e7   :  { %v12177_v23 = vpop.eup %12176  ;;  %v8037_v25 = vadd.f32 1.0, %v12175_v8  ;;  %v8430_v8 = vld [vmem:[#allocation30 + $0x40] sm:$0xff] }
0x13e8   :  { %v8043_v38 = vadd.f32 1.0, %v12177_v23  ;;  %v12179_v47 = vpop.eup %12178  ;;  %v8431_v23 = vld [vmem:[#allocation30 + $0x48] sm:$0xff] }
0x13e9   :  { %12182 = vrcp.f32 %v8037_v25  ;;  %v12181_v48 = vpop.eup %12180  ;;  %v8050_v26 = vadd.f32 1.0, %v12179_v47  ;;  %v11446_v25 = vpack.c.bf16 %v8431_v23, %v8430_v8  ;;  %v8433_v47 = vld [vmem:[#allocation30 + $0x58] sm:$0xff]  ;;  %v8603_v8 = vld [vmem:[#allocation31 + $0x80] sm:$0xff] }
0x13ea   :  { %12184 = vrcp.f32 %v8043_v38  ;;  %v8432_v38 = vld [vmem:[#allocation30 + $0x50] sm:$0xff]  ;;  %v8607_v23 = vld [vmem:[#allocation31 + $0xa0] sm:$0xff] }
0x13eb   :  { %12186 = vrcp.f32 %v8050_v26  ;;  %v8436_v26 = vld [vmem:[#allocation30 + $0x70] sm:$0xff] }
0x13f3   :  { %v12183_v49 = vpop.eup %12182 }
0x13f4   :  { %v12185_v20 = vpop.eup %12184  ;;  %v8054_v32 = vmul.f32 %v12183_v49, %v12181_v48  ;;  %v11449_v48 = vpack.c.bf16 %v8433_v47, %v8432_v38  ;;  %v8434_v49 = vld [vmem:[#allocation30 + $0x60] sm:$0xff]  ;;  %v8612_v38 = vld [vmem:[#allocation31 + $0xc8] sm:$0xff] }
0x13f5   :  { %v8053_v60 = vmul.f32 %v12185_v20, %v14749_v33  ;;  %v12187_v50 = vpop.eup %12186  ;;  %v8424_v33 = vld [vmem:[#allocation30 + $0x10] sm:$0xff]  ;;  %v8435_v20 = vld [vmem:[#allocation30 + $0x68] sm:$0xff] }
0x13f6   :  { %v11437_v0 = vpack.c.bf16 %v8425_v16, %v8424_v33  ;;  %v8596_v16 = vld [vmem:[#allocation31 + $0x48] sm:$0xff] }
0x13f7   :  { %v14791_v39 = vadd.f32 %v8054_v32, %v8053_v60  ;;  %v11452_v32 = vpack.c.bf16 %v8435_v20, %v8434_v49  ;;  %v8437_v60 = vld [vmem:[#allocation30 + $0x78] sm:$0xff]  ;;  %v8616_v47 = vld [vmem:[#allocation31 + $0xe8] sm:$0xff]  ;;  %v8611_v49 = vld [vmem:[#allocation31 + $0xc0] sm:$0xff] }
0x13f8   :  { %v8615_v20 = vld [vmem:[#allocation31 + $0xe0] sm:$0xff] }
0x13f9   :  { %12188 = vtanh.f32 %v14791_v39 }
0x1403   :  { %v12189_v35 = vpop.eup %12188 }
0x1404   :  { %v8057_v61 = vmul.f32 %v12189_v35, %v12187_v50  ;;  %v8406_v50 = vld [vmem:[#allocation28] sm:$0xff]  ;;  %v8407_v35 = vld [vmem:[#allocation28 + $0x8] sm:$0xff] }
0x1406   :  { %8127 = vmatmul.mubr.f32.vlgmr.msra.gmra.mrb[76].mxu0 %v8057_v61  ;;  %8198 = vmatmul.mubr.f32.vlgmr.msra.gmra.mrb[56].mxu1 %v8057_v61  ;;  %v11458_v61 = vpack.c.bf16 %v8407_v35, %v8406_v50  ;;  %v8619_v50 = vld [vmem:[#allocation31 + $0x100] sm:$0xff] }
0x1407   :  { %11372 = vmatpush1.bf16.msra.mxu0 %v14388_v62  ;;  %11404 = vmatpush1.bf16.msra.mxu1 %v14390_v18  ;;  %v12637_v62 = vmov 0.0|0.0   ;;  %v8623_v35 = vld [vmem:[#allocation31 + $0x120] sm:$0xff] }
0x1408   :  { %11374 = vmatprep.subr.bf16.mxu0 %v14396_v2  ;;  %11406 = vmatprep.subr.bf16.mxu1 %v14398_v9 }
0x1409   :  { %8300 = vmatprep.mubr.f32.mxu0 %v15101_v56  ;;  %8371 = vmatprep.mubr.f32.mxu1 %v15101_v56 }
0x140b   :  { %11376 = vmatpush1.bf16.msra.mxu0 %v14404_v51  ;;  %11408 = vmatpush1.bf16.msra.mxu1 %v14406_v42 }
0x140c   :  { %11378 = vmatprep.subr.bf16.mxu0 %v14412_v43  ;;  %11410 = vmatprep.subr.bf16.mxu1 %v14414_v24 }
0x140f   :  { %11380 = vmatpush1.bf16.msra.mxu0 %v14420_v4  ;;  %11412 = vmatpush1.bf16.msra.mxu1 %v14422_v7 }
0x1410   :  { %11382 = vmatprep.subr.bf16.mxu0 %v14428_v44  ;;  %11414 = vmatprep.subr.bf16.mxu1 %v14430_v37 }
0x1413   :  { %11384 = vmatpush1.bf16.msra.mxu0 %v14436_v40  ;;  %11416 = vmatpush1.bf16.msra.mxu1 %v14438_v1 }
0x1414   :  { %11386 = vmatprep.subr.bf16.mxu0 %v14444_v34  ;;  %11418 = vmatprep.subr.bf16.mxu1 %v14446_v11 }
0x1417   :  { %11388 = vmatpush1.bf16.msra.mxu0 %v14452_v53  ;;  %11420 = vmatpush1.bf16.msra.mxu1 %v14454_v58 }
0x1418   :  { %11390 = vmatprep.subr.bf16.mxu0 %v14460_v28  ;;  %11422 = vmatprep.subr.bf16.mxu1 %v14462_v52 }
0x141b   :  { %11392 = vmatpush1.bf16.msra.mxu0 %v14468_v22  ;;  %11424 = vmatpush1.bf16.msra.mxu1 %v14470_v29 }
0x141c   :  { %11394 = vmatprep.subr.bf16.mxu0 %v14476_v6  ;;  %11426 = vmatprep.subr.bf16.mxu1 %v14478_v31 }
0x141f   :  { %11396 = vmatpush1.bf16.msra.mxu0 %v14484_v3  ;;  %11428 = vmatpush1.bf16.msra.mxu1 %v14486_v54  ;;  %v8422_v3 = vld [vmem:[#allocation30] sm:$0xff]  ;;  %v8423_v54 = vld [vmem:[#allocation30 + $0x8] sm:$0xff] }
0x1420   :  { %11398 = vmatprep.subr.bf16.mxu0 %v14492_v14  ;;  %11430 = vmatprep.subr.bf16.mxu1 %v14494_v13 }
0x1423   :  { %11400 = vmatpush1.bf16.msra.mxu0 %v14500_v21  ;;  %11432 = vmatpush1.bf16.msra.mxu1 %v14502_v10  ;;  %v11434_v21 = vpack.c.bf16 %v8423_v54, %v8422_v3  ;;  %v8590_v3 = vld [vmem:[#allocation31 + $0x18] sm:$0xff] }
0x1424   :  { %11433 = vmatprep.subr.bf16.mxu0 %v12637_v62  ;;  %11457 = vmatprep.subr.bf16.mxu1 %v12637_v62 }
0x14d9   :  { %v8128_v18 = vpop.f32.mrb[76].mxu0  ;;  %v8199_v2 = vpop.f32.mrb[56].mxu1 }
0x14da   :  { %v11621_v9 = vadd.f32 %v8128_v18, %v14560_v36  ;;  %v8130_v51 = vpop.f32.mrb[77].mxu0  ;;  %v8201_v42 = vpop.f32.mrb[57].mxu1  ;;  %v11637_v37 = vadd.f32 %v8199_v2, %v14572_v45  ;;  %v8408_v18 = vld [vmem:[#allocation28 + $0x10] sm:$0xff]  ;;  %v8409_v2 = vld [vmem:[#allocation28 + $0x18] sm:$0xff] }
0x14db   :  { %v11622_v43 = vadd.f32 %v8130_v51, %v14563_v57  ;;  %v11638_v7 = vadd.f32 %v8201_v42, %v14568_v46  ;;  %v8410_v51 = vld [vmem:[#allocation28 + $0x20] sm:$0xff]  ;;  %v8411_v42 = vld [vmem:[#allocation28 + $0x28] sm:$0xff] }
0x14dc   :  { %v9000_v24 = vmul.f32 -1.442695, %v11621_v9  ;;  %v11461_v9 = vpack.c.bf16 %v8409_v2, %v8408_v18  ;;  %v8628_v18 = vld [vmem:[#allocation31 + $0x148] sm:$0xff] }
0x14dd   :  { %v9001_v4 = vmul.f32 -1.442695, %v11622_v43  ;;  %v9002_v44 = vmul.f32 -1.442695, %v11638_v7  ;;  %v11464_v43 = vpack.c.bf16 %v8411_v42, %v8410_v51  ;;  %v8414_v7 = vld [vmem:[#allocation28 + $0x40] sm:$0xff]  ;;  %v8632_v2 = vld [vmem:[#allocation31 + $0x168] sm:$0xff] }
0x14de   :  { %12190 = vpow2.f32 %v9000_v24  ;;  %v8413_v24 = vld [vmem:[#allocation28 + $0x38] sm:$0xff]  ;;  %v8627_v51 = vld [vmem:[#allocation31 + $0x140] sm:$0xff] }
0x14df   :  { %12192 = vpow2.f32 %v9001_v4  ;;  %v8631_v42 = vld [vmem:[#allocation31 + $0x160] sm:$0xff] }
0x14e0   :  { %12194 = vpow2.f32 %v9002_v44  ;;  %v8415_v44 = vld [vmem:[#allocation28 + $0x48] sm:$0xff] }
0x14e1   :  { %12196 = vtanh.f32 %v11637_v37  ;;  %v11470_v37 = vpack.c.bf16 %v8415_v44, %v8414_v7  ;;  %v8635_v7 = vld [vmem:[#allocation31 + $0x180] sm:$0xff] }
0x14e2   :  { %v8639_v44 = vld [vmem:[#allocation31 + $0x1a0] sm:$0xff] }
0x14e8   :  { %v12191_v40 = vpop.eup %12190 }
0x14e9   :  { %v12193_v1 = vpop.eup %12192  ;;  %v8211_v34 = vadd.f32 1.0, %v12191_v40  ;;  %v8416_v40 = vld [vmem:[#allocation28 + $0x50] sm:$0xff] }
0x14ea   :  { %v8217_v11 = vadd.f32 1.0, %v12193_v1  ;;  %v12195_v53 = vpop.eup %12194  ;;  %v8417_v1 = vld [vmem:[#allocation28 + $0x58] sm:$0xff] }
0x14eb   :  { %12198 = vrcp.f32 %v8211_v34  ;;  %v12197_v58 = vpop.eup %12196  ;;  %v8224_v29 = vadd.f32 1.0, %v12195_v53  ;;  %v11473_v34 = vpack.c.bf16 %v8417_v1, %v8416_v40  ;;  %v8419_v53 = vld [vmem:[#allocation28 + $0x68] sm:$0xff] }
0x14ec   :  { %12200 = vrcp.f32 %v8217_v11  ;;  %v8418_v11 = vld [vmem:[#allocation28 + $0x60] sm:$0xff] }
0x14ed   :  { %12202 = vrcp.f32 %v8224_v29  ;;  %v8588_v29 = vld [vmem:[#allocation31 + $0x8] sm:$0xff] }
0x14f5   :  { %v12199_v28 = vpop.eup %12198 }
0x14f6   :  { %v12201_v52 = vpop.eup %12200  ;;  %v8228_v22 = vmul.f32 %v12199_v28, %v12197_v58  ;;  %v11476_v58 = vpack.c.bf16 %v8419_v53, %v8418_v11  ;;  %v8420_v28 = vld [vmem:[#allocation28 + $0x70] sm:$0xff] }
0x14f7   :  { %v8227_v6 = vmul.f32 %v12201_v52, %v14791_v39  ;;  %v12203_v14 = vpop.eup %12202  ;;  %v11455_v39 = vpack.c.bf16 %v8437_v60, %v8436_v26  ;;  %v8421_v52 = vld [vmem:[#allocation28 + $0x78] sm:$0xff]  ;;  %v8620_v26 = vld [vmem:[#allocation31 + $0x108] sm:$0xff] }
0x14f8   :  { %v8624_v60 = vld [vmem:[#allocation31 + $0x128] sm:$0xff] }
0x14f9   :  { %v14833_v31 = vadd.f32 %v8228_v22, %v8227_v6  ;;  %v11479_v22 = vpack.c.bf16 %v8421_v52, %v8420_v28  ;;  %v8592_v6 = vld [vmem:[#allocation31 + $0x28] sm:$0xff] }
0x14fa   :  { %v11481_v54 = vpack.c.bf16 %v8592_v6, %v8588_v29 }
0x14fb   :  { %12204 = vtanh.f32 %v14833_v31 }
0x1505   :  { %v12205_v13 = vpop.eup %12204 }
0x1506   :  { %v8231_v10 = vmul.f32 %v12205_v13, %v12203_v14  ;;  %v8594_v14 = vld [vmem:[#allocation31 + $0x38] sm:$0xff]  ;;  %v8587_v13 = vld [vmem:[#allocation31] sm:$0xff] }
0x1508   :  { %8301 = vmatmul.mubr.f32.vlgmr.msra.gmra.mrb[78].mxu0 %v8231_v10  ;;  %8372 = vmatmul.mubr.f32.vlgmr.msra.gmra.mrb[58].mxu1 %v8231_v10  ;;  %v11513_v10 = vpack.c.bf16 %v8594_v14, %v8590_v3 }
0x1509   :  { %11435 = vmatpush3.bf16.msra.mxu0 %v11434_v21  ;;  %9373 = vmatprep.mubr.msk.f32.mxu0 %vm12638_vm2, %v15101_v56  ;;  %v8591_v21 = vld [vmem:[#allocation31 + $0x20] sm:$0xff] }
0x150a   :  { %11436 = vmatprep.subr.bf16.mxu0 %v12637_v62  ;;  %9408 = vmatprep.mubr.msk.f32.mxu1 %vm12638_vm2, %v15101_v56  ;;  %v11483_v33 = vpack.c.bf16 %v8591_v21, %v8587_v13 }
0x150b   :  { %11459 = vmatpush3.bf16.msra.mxu1 %v11458_v61  ;;  %v11499_v61 = vpack.c.bf16 %v8623_v35, %v8619_v50 }
0x150c   :  { %11460 = vmatprep.subr.bf16.mxu1 %v12637_v62 }
0x150d   :  { %11438 = vmatpush3.bf16.msra.mxu0 %v11437_v0  ;;  %v8600_v0 = vld [vmem:[#allocation31 + $0x68] sm:$0xff] }
0x150e   :  { %11439 = vmatprep.subr.bf16.mxu0 %v12637_v62  ;;  %v11485_v41 = vpack.c.bf16 %v8600_v0, %v8596_v16 }
0x150f   :  { %11462 = vmatpush3.bf16.msra.mxu1 %v11461_v9  ;;  %v11501_v9 = vpack.c.bf16 %v8632_v2, %v8628_v18  ;;  %v8617_v18 = vld [vmem:[#allocation31 + $0xf0] sm:$0xff]  ;;  %v8622_v2 = vld [vmem:[#allocation31 + $0x118] sm:$0xff] }
0x1510   :  { %11463 = vmatprep.subr.bf16.mxu1 %v12637_v62 }
0x1511   :  { %11441 = vmatpush3.bf16.msra.mxu0 %v11440_v15  ;;  %v8599_v15 = vld [vmem:[#allocation31 + $0x60] sm:$0xff] }
0x1512   :  { %11442 = vmatprep.subr.bf16.mxu0 %v12637_v62  ;;  %v11487_v12 = vpack.c.bf16 %v8599_v15, %v8595_v59  ;;  %v8589_v59 = vld [vmem:[#allocation31 + $0x10] sm:$0xff] }
0x1513   :  { %11465 = vmatpush3.bf16.msra.mxu1 %v11464_v43  ;;  %v11503_v43 = vpack.c.bf16 %v8631_v42, %v8627_v51  ;;  %v8593_v15 = vld [vmem:[#allocation31 + $0x30] sm:$0xff] }
0x1514   :  { %11466 = vmatprep.subr.bf16.mxu1 %v12637_v62 }
0x1515   :  { %11444 = vmatpush3.bf16.msra.mxu0 %v11443_v55 }
0x1516   :  { %11445 = vmatprep.subr.bf16.mxu0 %v12637_v62 }
0x1519   :  { %11447 = vmatpush3.bf16.msra.mxu0 %v11446_v25  ;;  %v11491_v25 = vpack.c.bf16 %v8607_v23, %v8603_v8  ;;  %v11515_v8 = vpack.c.bf16 %v8593_v15, %v8589_v59  ;;  %v8651_v59 = vld [vmem:[#allocation33] sm:$0xf] }
0x151a   :  { %11448 = vmatprep.subr.bf16.mxu0 %v12637_v62  ;;  %v8656_v15 = vrot.slane %v8651_v59, %v15292_v17 }
0x151d   :  { %11450 = vmatpush3.bf16.msra.mxu0 %v11449_v48  ;;  %v11493_v48 = vpack.c.bf16 %v8616_v47, %v8612_v38  ;;  %v8597_v38 = vld [vmem:[#allocation31 + $0x50] sm:$0xff] }
0x151e   :  { %11451 = vmatprep.subr.bf16.mxu0 %v12637_v62  ;;  %v8601_v47 = vld [vmem:[#allocation31 + $0x70] sm:$0xff] }
0x1521   :  { %11453 = vmatpush3.bf16.msra.mxu0 %v11452_v32  ;;  %v11495_v32 = vpack.c.bf16 %v8615_v20, %v8611_v49  ;;  %v8610_v49 = vld [vmem:[#allocation31 + $0xb8] sm:$0xff] }
0x1522   :  { %11454 = vmatprep.subr.bf16.mxu0 %v12637_v62 }
0x1525   :  { %11456 = vmatpush3.bf16.msra.mxu0 %v11455_v39  ;;  %v11497_v39 = vpack.c.bf16 %v8624_v60, %v8620_v26  ;;  %v8609_v26 = vld [vmem:[#allocation31 + $0xb0] sm:$0xff]  ;;  %v8614_v60 = vld [vmem:[#allocation31 + $0xd8] sm:$0xff] }
0x1526   :  { %11482 = vmatprep.subr.bf16.mxu0 %v11481_v54 }
0x1528   :  { %9374 = vmatmul.mubr.f32.vlgmr.msra.gmra.mrb[110].mxu0 %v14616_v19  ;;  %v8412_v19 = vld [vmem:[#allocation28 + $0x30] sm:$0xff] }
0x1529   :  { %8737 = vmatprep.mubr.f32.mxu0 %v15101_v56  ;;  %v11467_v4 = vpack.c.bf16 %v8413_v24, %v8412_v19  ;;  %11484 = vmatpush1.bf16.msra.mxu0 %v11483_v33  ;;  %v8636_v19 = vld [vmem:[#allocation31 + $0x188] sm:$0xff] }
0x152a   :  { %11486 = vmatprep.subr.bf16.mxu0 %v11485_v41  ;;  %v8640_v24 = vld [vmem:[#allocation31 + $0x1a8] sm:$0xff] }
0x152b   :  { %11468 = vmatpush3.bf16.msra.mxu1 %v11467_v4  ;;  %v11505_v4 = vpack.c.bf16 %v8640_v24, %v8636_v19  ;;  %v8630_v19 = vld [vmem:[#allocation31 + $0x158] sm:$0xff] }
0x152c   :  { %11469 = vmatprep.subr.bf16.mxu1 %v12637_v62  ;;  %v8634_v24 = vld [vmem:[#allocation31 + $0x178] sm:$0xff] }
0x152d   :  { %11488 = vmatpush1.bf16.msra.mxu0 %v11487_v12  ;;  %v8598_v12 = vld [vmem:[#allocation31 + $0x58] sm:$0xff] }
0x152f   :  { %11471 = vmatpush3.bf16.msra.mxu1 %v11470_v37  ;;  %v11507_v37 = vpack.c.bf16 %v8639_v44, %v8635_v7  ;;  %v11533_v7 = vpack.c.bf16 %v8634_v24, %v8630_v19  ;;  %v8629_v44 = vld [vmem:[#allocation31 + $0x150] sm:$0xff] }
0x1530   :  { %11472 = vmatprep.subr.bf16.mxu1 %v12637_v62 }
0x1533   :  { %11474 = vmatpush3.bf16.msra.mxu1 %v11473_v34 }
0x1534   :  { %11475 = vmatprep.subr.bf16.mxu1 %v12637_v62 }
0x1537   :  { %11477 = vmatpush3.bf16.msra.mxu1 %v11476_v58 }
0x1538   :  { %11478 = vmatprep.subr.bf16.mxu1 %v12637_v62  ;;  %v8604_v62 = vld [vmem:[#allocation31 + $0x88] sm:$0xff] }
0x1539   :  { %v11489_v55 = vpack.c.bf16 %v8608_v27, %v8604_v62  ;;  %v8602_v62 = vld [vmem:[#allocation31 + $0x78] sm:$0xff] }
0x153b   :  { %11480 = vmatpush3.bf16.msra.mxu1 %v11479_v22  ;;  %11490 = vmatprep.subr.bf16.mxu0 %v11489_v55 }
0x153c   :  { %11514 = vmatprep.subr.bf16.mxu1 %v11513_v10  ;;  %11492 = vmatpush1.bf16.msra.mxu0 %v11491_v25  ;;  %v11517_v25 = vpack.c.bf16 %v8602_v62, %v8598_v12  ;;  %v8664_v12 = vrot.slane %v8651_v59, %v15295_v30  ;;  %v8660_v62 = vrot.slane %v8651_v59, %v15293_v63 }
0x153d   :  { %11494 = vmatprep.subr.bf16.mxu0 %v11493_v48  ;;  %v8606_v48 = vld [vmem:[#allocation31 + $0x98] sm:$0xff] }
0x153e   :  { %v11521_v20 = vpack.c.bf16 %v8610_v49, %v8606_v48 }
0x1540   :  { %11496 = vmatpush1.bf16.msra.mxu0 %v11495_v32  ;;  %v8605_v32 = vld [vmem:[#allocation31 + $0x90] sm:$0xff] }
0x1541   :  { %11498 = vmatprep.subr.bf16.mxu0 %v11497_v39  ;;  %v8618_v39 = vld [vmem:[#allocation31 + $0xf8] sm:$0xff]  ;;  %v11523_v50 = vpack.c.bf16 %v8609_v26, %v8605_v32 }
0x1542   :  { %v11525_v35 = vpack.c.bf16 %v8618_v39, %v8614_v60 }
0x1544   :  { %11500 = vmatpush1.bf16.msra.mxu0 %v11499_v61  ;;  %v8613_v61 = vld [vmem:[#allocation31 + $0xd0] sm:$0xff] }
0x1545   :  { %11502 = vmatprep.subr.bf16.mxu0 %v11501_v9  ;;  %v8626_v9 = vld [vmem:[#allocation31 + $0x138] sm:$0xff]  ;;  %v11527_v51 = vpack.c.bf16 %v8617_v18, %v8613_v61 }
0x1546   :  { %v11529_v42 = vpack.c.bf16 %v8626_v9, %v8622_v2 }
0x1548   :  { %11504 = vmatpush1.bf16.msra.mxu0 %v11503_v43  ;;  %v8621_v43 = vld [vmem:[#allocation31 + $0x110] sm:$0xff] }
0x1549   :  { %11506 = vmatprep.subr.bf16.mxu0 %v11505_v4 }
0x154c   :  { %11508 = vmatpush1.bf16.msra.mxu0 %v11507_v37  ;;  %v8633_v37 = vld [vmem:[#allocation31 + $0x170] sm:$0xff] }
0x15db   :  { %v8302_v40 = vpop.f32.mrb[78].mxu0  ;;  %v8373_v1 = vpop.f32.mrb[58].mxu1 }
0x15dc   :  { %v11623_v34 = vadd.f32 %v8302_v40, %v14560_v36  ;;  %v8304_v11 = vpop.f32.mrb[79].mxu0  ;;  %v8375_v53 = vpop.f32.mrb[59].mxu1  ;;  %v11639_v6 = vadd.f32 %v8373_v1, %v14572_v45  ;;  %v8638_v40 = vld [vmem:[#allocation31 + $0x198] sm:$0xff] }
0x15dd   :  { %v11624_v58 = vadd.f32 %v8304_v11, %v14563_v57  ;;  %v11640_v22 = vadd.f32 %v8375_v53, %v14568_v46  ;;  %v8642_v1 = vld [vmem:[#allocation31 + $0x1b8] sm:$0xff]  ;;  %v8637_v53 = vld [vmem:[#allocation31 + $0x190] sm:$0xff] }
0x15de   :  { %v9003_v28 = vmul.f32 -1.442695, %v11623_v34  ;;  %v11535_v34 = vpack.c.bf16 %v8633_v37, %v8629_v44  ;;  %v11537_v11 = vpack.c.bf16 %v8642_v1, %v8638_v40 }
0x15df   :  { %v9004_v52 = vmul.f32 -1.442695, %v11624_v58  ;;  %v9005_v29 = vmul.f32 -1.442695, %v11640_v22  ;;  %v8641_v58 = vld [vmem:[#allocation31 + $0x1b0] sm:$0xff]  ;;  %v8648_v22 = vld [vmem:[#allocation31 + $0x1e8] sm:$0xff] }
0x15e0   :  { %12206 = vpow2.f32 %v9003_v28  ;;  %v11539_v28 = vpack.c.bf16 %v8641_v58, %v8637_v53 }
0x15e1   :  { %12208 = vpow2.f32 %v9004_v52  ;;  %v8644_v52 = vld [vmem:[#allocation31 + $0x1c8] sm:$0xff] }
0x15e2   :  { %12210 = vpow2.f32 %v9005_v29  ;;  %v8646_v29 = vld [vmem:[#allocation31 + $0x1d8] sm:$0xff] }
0x15e3   :  { %12212 = vtanh.f32 %v11639_v6  ;;  %v11509_v6 = vpack.c.bf16 %v8648_v22, %v8644_v52 }
0x15e5   :  { %11510 = vmatprep.subr.bf16.mxu0 %v11509_v6 }
0x15ea   :  { %v12207_v3 = vpop.eup %12206 }
0x15eb   :  { %v12209_v54 = vpop.eup %12208  ;;  %v8385_v14 = vadd.f32 1.0, %v12207_v3  ;;  %v8650_v3 = vld [vmem:[#allocation31 + $0x1f8] sm:$0xff] }
0x15ec   :  { %v8391_v13 = vadd.f32 1.0, %v12209_v54  ;;  %v12211_v36 = vpop.eup %12210  ;;  %v8643_v54 = vld [vmem:[#allocation31 + $0x1c0] sm:$0xff] }
0x15ed   :  { %12214 = vrcp.f32 %v8385_v14  ;;  %v12213_v21 = vpop.eup %12212  ;;  %v8398_v16 = vadd.f32 1.0, %v12211_v36  ;;  %v11541_v14 = vpack.c.bf16 %v8650_v3, %v8646_v29  ;;  %v8645_v36 = vld [vmem:[#allocation31 + $0x1d0] sm:$0xff] }
0x15ee   :  { %12216 = vrcp.f32 %v8391_v13  ;;  %v8647_v13 = vld [vmem:[#allocation31 + $0x1e0] sm:$0xff] }
0x15ef   :  { %12218 = vrcp.f32 %v8398_v16  ;;  %v9006_v16 = vld [vmem:[%s15296_s28] ss:$0 sm:$0xff] }
0x15f7   :  { %v12215_v57 = vpop.eup %12214 }
0x15f8   :  { %v12217_v10 = vpop.eup %12216  ;;  %v8402_v33 = vmul.f32 %v12215_v57, %v12213_v21  ;;  %v8649_v21 = vld [vmem:[#allocation31 + $0x1f0] sm:$0xff]  ;;  %v11511_v57 = vpack.c.bf16 %v8647_v13, %v8643_v54 }
0x15f9   :  { %v8401_v0 = vmul.f32 %v12217_v10, %v14833_v31  ;;  %v12219_v27 = vpop.eup %12218  ;;  %v11519_v31 = vpack.c.bf16 %v8601_v47, %v8597_v38  ;;  %v11543_v10 = vpack.c.bf16 %v8649_v21, %v8645_v36 }
0x15fa   :  { %11512 = vmatpush1.bf16.msra.mxu0 %v11511_v57 }
0x15fb   :  { %v8403_v46 = vadd.f32 %v8402_v33, %v8401_v0  ;;  %v14859_v41 = vpop.f32.mrb[110].mxu0 }
0x15fc   :  { %v9375_v45 = vpop.f32.mrb[111].mxu0 }
0x15fd   :  { %12220 = vtanh.f32 %v8403_v46 }
0x1607   :  { %v12221_v55 = vpop.eup %12220 }
0x1608   :  { %v8405_v23 = vmul.f32 %v12221_v55, %v12219_v27  ;;  %v8668_v27 = vrot.slane %v8651_v59, %v15294_v5 }
0x160a   :  { %9409 = vmatmul.mubr.f32.vlgmr.msra.gmra.mrb[90].mxu1 %v8405_v23 }
0x160b   :  { %11516 = vmatpush1.bf16.msra.mxu1 %v11515_v8  ;;  %8808 = vmatprep.mubr.f32.mxu1 %v15101_v56  ;;  %v8625_v56 = vld [vmem:[#allocation31 + $0x130] sm:$0xff] }
0x160c   :  { %11518 = vmatprep.subr.bf16.mxu1 %v11517_v25  ;;  %v11531_v4 = vpack.c.bf16 %v8625_v56, %v8621_v43 }
0x160f   :  { %11520 = vmatpush1.bf16.msra.mxu1 %v11519_v31 }
0x1610   :  { %11522 = vmatprep.subr.bf16.mxu1 %v11521_v20 }
0x1613   :  { %11524 = vmatpush1.bf16.msra.mxu1 %v11523_v50 }
0x1614   :  { %11526 = vmatprep.subr.bf16.mxu1 %v11525_v35 }
0x1617   :  { %11528 = vmatpush1.bf16.msra.mxu1 %v11527_v51 }
0x1618   :  { %11530 = vmatprep.subr.bf16.mxu1 %v11529_v42 }
0x161b   :  { %11532 = vmatpush1.bf16.msra.mxu1 %v11531_v4 }
0x161c   :  { %11534 = vmatprep.subr.bf16.mxu1 %v11533_v7 }
0x161f   :  { %11536 = vmatpush1.bf16.msra.mxu1 %v11535_v34 }
0x1620   :  { %11538 = vmatprep.subr.bf16.mxu1 %v11537_v11 }
0x1623   :  { %11540 = vmatpush1.bf16.msra.mxu1 %v11539_v28 }
0x1624   :  { %11542 = vmatprep.subr.bf16.mxu1 %v11541_v14 }
0x1627   :  { %11544 = vmatpush1.bf16.msra.mxu1 %v11543_v10 }
0x16dd   :  { %v8574_v33 = vpop.f32.mrb[90].mxu1 }
0x16de   :  { %v8575_v0 = vadd.f32 %v8574_v33, %v14859_v41  ;;  %v9410_v46 = vpop.f32.mrb[91].mxu1 }
0x16e0   :  { %v8585_v45 = vadd.f32 %v9006_v16, %v8575_v0 }
0x16e2   :  { %8586 = vst [vmem:[%s15297_s24] sm:$0xff] %v8585_v45  ;;  %8738 = vmatmul.mubr.f32.vlgmr.msra.gmra.mrb[112].mxu0 %v8585_v45  ;;  %8809 = vmatmul.mubr.f32.vlgmr.msra.gmra.mrb[92].mxu1 %v8585_v45 }
0x17b5   :  { %v8739_v55 = vpop.f32.mrb[112].mxu0  ;;  %v8810_v8 = vpop.f32.mrb[92].mxu1 }
0x17b6   :  { %v8740_v41 = vadd.f32 %v8739_v55, %v8656_v15  ;;  %v8811_v23 = vadd.f32 %v8810_v8, %v8664_v12  ;;  %v8741_v25 = vpop.f32.mrb[113].mxu0  ;;  %v8812_v38 = vpop.f32.mrb[93].mxu1 }
0x17b7   :  { %v8742_v47 = vadd.f32 %v8741_v25, %v8660_v62  ;;  %v8813_v48 = vadd.f32 %v8812_v38, %v8668_v27 }
0x17b8   :  { %8815 = vst [vmem:[%s15298_s14] sm:$0xff] %v8740_v41  ;;  %8817 = vst [vmem:[%s15298_s14 + $0x10] sm:$0xff] %v8811_v23 }
0x17b9   :  { %8816 = vst [vmem:[%s15298_s14 + $0x8] sm:$0xff] %v8742_v47  ;;  %8818 = vst [vmem:[%s15298_s14 + $0x18] sm:$0xff] %v8813_v48 }
0x17ba   :  { %8827 = vsyncpa [#allocation9], 1 }
0x17bb   :  { %8828 = vsyncpa [#allocation11], 1 }
0x17bc   :  { %8829 = vsyncpa [#allocation14], 1 }
0x17bd   :  { %8830 = vsyncpa [#allocation17], 1 }
0x17be   :  { %8831 = vsyncpa [#allocation20], 1 }
0x17bf   :  { %8832 = vsyncpa [#allocation23], 1 }
0x17c0   :  { %8833 = vsyncpa [#allocation26], 1 }
0x17c1   :  { %8834 = vsyncpa [#allocation29], 1 }
0x17c2   :  { %8835 = vsyncpa [#allocation32], 1 }

</bundles_post_ra>
